<compile_context>
chip_gen: v5e
topology: v5e:2x2
jax: 0.10.0
libtpu: 0.0.40
codegen_flags: <defaults>
</compile_context>

<pallas_src>
import functools

import jax
import jax.numpy as jnp
from jax.experimental import pallas as pl
from jax.experimental.pallas import tpu as pltpu

_BN_EPS = 1e-5
_BN_TILE_ELEMS = 1 << 20           # ~2 MiB bf16 moved per BN-apply grid step


def _round_up(x, m):
    return (x + m - 1) // m * m


def _tpu_config():
    """Per-generation tiling / VMEM policy.

    v5e / v6e: 128 MiB VMEM, 1 TensorCore.  v7x: 64 MiB VMEM, 2 TensorCores."""
    vmem = None
    cores = None
    try:
        info = pltpu.get_tpu_info()
        vmem = getattr(info, "vmem_capacity_bytes", None)
        for name in ("num_cores", "core_count", "tensorcore_count",
                     "num_tensorcores"):
            v = getattr(info, name, None)
            if isinstance(v, int) and v > 0:
                cores = v
                break
    except Exception:
        pass
    if not vmem:
        vmem = 64 * 1024 * 1024
    if vmem >= 128 * 1024 * 1024:                          # v5e / v6e
        return {"vmem_limit": 96 << 20, "tm_cap": 1024,
                "k_untiled_cap": 4096, "k_tile": 2048,
                "w_resident_budget": 32 << 20, "min_m_tiles": cores or 1}
    return {"vmem_limit": 56 << 20, "tm_cap": 1024,        # v7x (or unknown)
            "k_untiled_cap": 2048, "k_tile": 2048,
            "w_resident_budget": 14 << 20, "min_m_tiles": cores or 2}


_CFG = _tpu_config()


def _largest_div_mult8(m, cap):
    """Largest divisor of m that is a multiple of 8 and <= cap (None if none)."""
    t = min(cap, m)
    t -= t % 8
    while t >= 8:
        if m % t == 0:
            return t
        t -= 8
    return None


def _choose_tm(m_pad, cap, min_tiles):
    tm = _largest_div_mult8(m_pad, cap) or m_pad
    if min_tiles > 1 and m_pad // tm < min_tiles:
        smaller = _largest_div_mult8(m_pad, max(8, m_pad // min_tiles))
        if smaller:
            tm = smaller
    return tm


def _choose_tk(k, cap):
    """Largest multiple-of-128 divisor of K that is <= cap (tap-aligned because
    K = taps * C with C a multiple of 128 whenever tiling engages)."""
    t = (min(cap, k) // 128) * 128
    while t >= 128:
        if k % t == 0:
            return t
        t -= 128
    return None


# ----------------------------------------------------------------------------
# Pallas kernels
# ----------------------------------------------------------------------------
def _conv_matmul_stats_kernel(a_ref, w_ref, b_ref, y_ref, s_ref, acc_ref=None,
                              *, n_k, tk, w_resident):
    """One (M-tile, K-tile) step of Y = A @ W + bias (bf16 MXU inputs, f32
    accumulation), plus per-M-tile partial sum / sum-of-squares for BatchNorm.

    When K is tiled, the f32 accumulator scratch is kept (y_ref may be bf16, so
    accumulating directly into it would lose precision across K tiles)."""
    if w_resident:
        off = pl.multiple_of(pl.program_id(1) * tk, 128)
        w = w_ref[pl.ds(off, tk), :]          # full (K, N) weight stays resident
    else:
        w = w_ref[...]
    part = jnp.dot(a_ref[...], w, preferred_element_type=jnp.float32)

    def finalize(y32):
        y32 = y32 + b_ref[...]                               # (tm, N) f32
        y_ref[...] = y32.astype(y_ref.dtype)
        s_ref[0, 0:1, :] = jnp.sum(y32, axis=0, keepdims=True)
        s_ref[0, 1:2, :] = jnp.sum(y32 * y32, axis=0, keepdims=True)

    if n_k == 1:
        finalize(part)
    else:
        k = pl.program_id(1)

        @pl.when(k == 0)
        def _():
            acc_ref[...] = jnp.zeros_like(acc_ref)

        acc_ref[...] += part

        @pl.when(k == n_k - 1)
        def _():
            finalize(acc_ref[...])


def _scale_shift_relu_kernel(y_ref, sc_ref, sh_ref, o_ref):
    """Elementwise BatchNorm apply + ReLU on one lane-dense row tile."""
    y = y_ref[...].astype(jnp.float32)
    o_ref[...] = jnp.maximum(y * sc_ref[...] + sh_ref[...], 0.0).astype(o_ref.dtype)


# ----------------------------------------------------------------------------
# Kernel wrappers
# ----------------------------------------------------------------------------
def _matmul_bias_stats(patches, w_mat, bias, out_dtype=jnp.bfloat16):
    """patches (M, K) bf16 @ w_mat (K, N) bf16 + bias (1, N) f32.

    Returns (y_pad (M_pad, N) out_dtype, stats (2, N) f32, M)."""
    cfg = _CFG
    m, k = patches.shape
    n = w_mat.shape[1]

    # --- M tiling: divisor-based, no full-matrix pad copy --------------------
    m_pad = _round_up(m, 8)
    if m_pad != m:                     # rare (<8 rows); stats fixed up below
        patches = jnp.pad(patches, ((0, m_pad - m), (0, 0)))
    tm = _choose_tm(m_pad, cfg["tm_cap"], cfg["min_m_tiles"])
    grid_m = m_pad // tm

    # --- K tiling: tap-aligned multiple-of-128 divisor ------------------------
    if k <= cfg["k_untiled_cap"]:
        tk, grid_k = k, 1
    else:
        tk = _choose_tk(k, cfg["k_tile"])
        if tk is None:                 # no aligned divisor: fall back untiled
            tk, grid_k = k, 1
        else:
            grid_k = k // tk

    w_resident = (grid_k > 1 and
                  2 * k * n * w_mat.dtype.itemsize <= cfg["w_resident_budget"])

    if grid_k == 1 or w_resident:
        w_spec = pl.BlockSpec((k, n), lambda i, kk: (0, 0))      # stays in VMEM
    else:
        w_spec = pl.BlockSpec((tk, n), lambda i, kk: (kk, 0))

    kernel = functools.partial(_conv_matmul_stats_kernel,
                               n_k=grid_k, tk=tk, w_resident=w_resident)
    scratch = [pltpu.VMEM((tm, n), jnp.float32)] if grid_k > 1 else []

    y_pad, stats_t = pl.pallas_call(
        kernel,
        out_shape=(jax.ShapeDtypeStruct((m_pad, n), out_dtype),
                   jax.ShapeDtypeStruct((grid_m, 2, n), jnp.float32)),
        grid_spec=pltpu.PrefetchScalarGridSpec(
            num_scalar_prefetch=0,
            grid=(grid_m, grid_k),
            in_specs=[
                pl.BlockSpec((tm, tk), lambda i, kk: (i, kk)),
                w_spec,
                pl.BlockSpec((1, n), lambda i, kk: (0, 0)),
            ],
            out_specs=(
                pl.BlockSpec((tm, n), lambda i, kk: (i, 0)),
                pl.BlockSpec((1, 2, n), lambda i, kk: (i, 0, 0)),
            ),
            scratch_shapes=scratch,
        ),
        compiler_params=pltpu.CompilerParams(
            dimension_semantics=("parallel", "arbitrary"),
            vmem_limit_bytes=cfg["vmem_limit"]),
    )(patches, w_mat, bias)

    stats = jnp.sum(stats_t, axis=0)                             # (2, N)
    if m_pad != m:
        # padded A rows are zero, so their y is exactly the bias; subtract the
        # known contribution host-side instead of masking inside the kernel.
        npad = float(m_pad - m)
        bvec = bias[0].astype(jnp.float32)
        stats = stats - jnp.stack([npad * bvec, npad * bvec * bvec])
    return y_pad, stats, m


def _bn_row_tile(rows, lanes):
    cap = max(8, (_BN_TILE_ELEMS // max(lanes, 1)) // 8 * 8)
    if rows <= cap:
        return rows
    t = cap
    while t >= 8:
        if rows % t == 0:
            return t
        t -= 8
    return rows                       # fallback: single (full-dim) block


def _bn_relu_apply(y_pad, scale, shift):
    """relu(y * scale + shift) -> bf16; lane-dense when channel count < 128
    (the (M, C) buffer is viewed row-major as (M*C/128, 128))."""
    m_pad, n = y_pad.shape
    use_dense = (n % 128 != 0) and (128 % n == 0) and ((m_pad * n) % 128 == 0)
    if use_dense:
        rows = m_pad * n // 128
        if rows > 8 and rows % 8 != 0:
            use_dense = False
    if n % 128 == 0:
        y2, sc, sh = y_pad, scale, shift
    elif use_dense:
        rep = 128 // n
        y2 = y_pad.reshape(m_pad * n // 128, 128)    # contiguous view reshape
        sc, sh = jnp.tile(scale, rep), jnp.tile(shift, rep)
    else:
        y2, sc, sh = y_pad, scale, shift             # lane-sparse fallback
    rows, lanes = y2.shape
    tr = _bn_row_tile(rows, lanes)

    out2 = pl.pallas_call(
        _scale_shift_relu_kernel,
        out_shape=jax.ShapeDtypeStruct((rows, lanes), jnp.bfloat16),
        grid_spec=pltpu.PrefetchScalarGridSpec(
            num_scalar_prefetch=0,
            grid=(rows // tr,),
            in_specs=[
                pl.BlockSpec((tr, lanes), lambda i: (i, 0)),
                pl.BlockSpec((1, lanes), lambda i: (0, 0)),
                pl.BlockSpec((1, lanes), lambda i: (0, 0)),
            ],
            out_specs=pl.BlockSpec((tr, lanes), lambda i: (i, 0)),
        ),
        compiler_params=pltpu.CompilerParams(
            dimension_semantics=("parallel",),
            vmem_limit_bytes=_CFG["vmem_limit"]),
    )(y2, sc.reshape(1, lanes).astype(jnp.float32),
      sh.reshape(1, lanes).astype(jnp.float32))
    return out2.reshape(m_pad, n)


# ----------------------------------------------------------------------------
# Conv / BN building blocks (im2col glue in XLA, matmul/stats/BN in Pallas)
# ----------------------------------------------------------------------------
def _bn_scale_shift(stats, count, bn_p):
    # Training-mode batch statistics (biased variance), computed in f32.
    # NOTE: E[y^2] - E[y]^2 can cancel for very large activations; clamped >= 0.
    mean = stats[0] / count
    var = jnp.maximum(stats[1] / count - mean * mean, 0.0)
    scale = bn_p["gamma"] * jax.lax.rsqrt(var + _BN_EPS)
    shift = bn_p["beta"] - mean * scale
    return scale, shift


def _im2col_3x3(xs, dilation):
    # TODO(synk): stream the 27 taps through VMEM with a halo-tiled grid
    #             instead of materializing the 27x im2col matrix in HBM.
    # `xs` is a list of channels-last tensors sharing spatial dims; their
    # channels are interleaved per tap, which fuses the decoder skip-concat.
    b, d, h, w = xs[0].shape[:4]
    p = dilation
    xps = [jnp.pad(x, ((0, 0), (p, p), (p, p), (p, p), (0, 0))) for x in xs]
    cols = []
    for kd in range(3):
        for kh in range(3):
            for kw in range(3):
                for x, xp in zip(xs, xps):
                    c = x.shape[-1]
                    cols.append(
                        xp[:, kd * dilation:kd * dilation + d,
                           kh * dilation:kh * dilation + h,
                           kw * dilation:kw * dilation + w, :]
                        .reshape(b * d * h * w, c))
    return jnp.concatenate(cols, axis=1)             # (M, 27*C_total) bf16


def _as_list(x):
    return list(x) if isinstance(x, (tuple, list)) else [x]


def conv3_bn_relu(x, conv_p, bn_p, dilation=1):
    xs = _as_list(x)
    b, d, h, w = xs[0].shape[:4]
    patches = _im2col_3x3(xs, dilation)
    y_pad, stats, m = _matmul_bias_stats(patches, conv_p["w_mat"], conv_p["b"])
    scale, shift = _bn_scale_shift(stats, float(m), bn_p)
    out = _bn_relu_apply(y_pad, scale, shift)[:m]
    return out.reshape(b, d, h, w, -1)


def conv_down_bn_relu(x, conv_p, bn_p):
    """Conv3d(kernel=2, stride=2) + BN + ReLU."""
    b, d, h, w, c = x.shape
    d2, h2, w2 = d // 2, h // 2, w // 2
    xr = x.reshape(b, d2, 2, h2, 2, w2, 2, c)
    patches = jnp.transpose(xr, (0, 1, 3, 5, 2, 4, 6, 7)).reshape(
        b * d2 * h2 * w2, 8 * c)
    y_pad, stats, m = _matmul_bias_stats(patches, conv_p["w_mat"], conv_p["b"])
    scale, shift = _bn_scale_shift(stats, float(m), bn_p)
    out = _bn_relu_apply(y_pad, scale, shift)[:m]
    return out.reshape(b, d2, h2, w2, -1)


def convt_bn_relu(x, conv_p, bn_p):
    """ConvTranspose3d(kernel=2, stride=2) + BN + ReLU."""
    b, d, h, w, c = x.shape
    y_pad, stats8, m = _matmul_bias_stats(
        x.reshape(b * d * h * w, c), conv_p["w_mat"], conv_p["b"])
    c_out = conv_p["w_mat"].shape[1] // 8
    stats = stats8.reshape(2, 8, c_out).sum(axis=1)
    scale, shift = _bn_scale_shift(stats, float(m * 8), bn_p)
    out = _bn_relu_apply(y_pad, jnp.tile(scale, 8), jnp.tile(shift, 8))[:m]
    out = out.reshape(b, d, h, w, 2, 2, 2, c_out)
    out = jnp.transpose(out, (0, 1, 4, 2, 5, 3, 6, 7)).reshape(
        b, 2 * d, 2 * h, 2 * w, c_out)
    return out


def conv3_plain(x, conv_p):
    """Final Conv3d(kernel=3, padding=1) without BN / ReLU (f32 output)."""
    xs = _as_list(x)
    b, d, h, w = xs[0].shape[:4]
    patches = _im2col_3x3(xs, 1)
    y_pad, _, m = _matmul_bias_stats(patches, conv_p["w_mat"], conv_p["b"],
                                     out_dtype=jnp.float32)
    return y_pad[:m].reshape(b, d, h, w, -1)


# ----------------------------------------------------------------------------
# Network structure (mirrors the PyTorch module tree)
# ----------------------------------------------------------------------------
def subnet2conv_fwd(p, x):
    x = conv3_bn_relu(x, p["conv1"], p["bn1"])
    x = conv3_bn_relu(x, p["conv2"], p["bn2"])
    return x


def dilated_bottleneck_fwd(p, x):
    # TODO(synk): fuse the residual accumulation into the BN-apply kernel.
    out = x
    acc = None
    for i, layer in enumerate(p):
        out = conv3_bn_relu(out, layer["conv"], layer["bn"], dilation=2 ** i)
        acc = out if acc is None else acc + out
    return acc


def net_recurse_fwd(p, x):
    if "bottleneck" in p:                                 # depth == 0
        return dilated_bottleneck_fwd(p["bottleneck"], x)
    x_more = subnet2conv_fwd(p["sub_2conv_more"], x)
    x_down = conv_down_bn_relu(x_more, p["conv_down"], p["bn0"])
    x_sub = net_recurse_fwd(p["sub_u"], x_down)
    x_up = convt_bn_relu(x_sub, p["convt"], p["bn1"])
    # skip-concat fused into the next conv's im2col (no jnp.concatenate pass)
    return subnet2conv_fwd(p["sub_2conv_less"], (x_more, x_up))


def net_forward(params, x):
    """x: (B, C_in, D, H, W) NCDHW f32 -> (B, C_out, D, H, W) f32."""
    xl = jnp.transpose(x, (0, 2, 3, 4, 1)).astype(jnp.bfloat16)
    y = net_recurse_fwd(params["net_recurse"], xl)
    y = conv3_plain(y, params["conv_out"])                # no BN / ReLU
    return jnp.transpose(y, (0, 4, 1, 2, 3))


# ----------------------------------------------------------------------------
# One-time weight packing: PyTorch layout -> bf16 (K, C_out) matmul layout
# ----------------------------------------------------------------------------
def _prep_conv3(p):
    c_out, c_in = p["w"].shape[0], p["w"].shape[1]
    w_mat = jnp.transpose(p["w"], (2, 3, 4, 1, 0)).reshape(27 * c_in, c_out)
    return {"w_mat": w_mat.astype(jnp.bfloat16),
            "b": p["b"].reshape(1, c_out).astype(jnp.float32)}


def _prep_conv_down(p):
    c_out, c_in = p["w"].shape[0], p["w"].shape[1]
    w_mat = jnp.transpose(p["w"], (2, 3, 4, 1, 0)).reshape(8 * c_in, c_out)
    return {"w_mat": w_mat.astype(jnp.bfloat16),
            "b": p["b"].reshape(1, c_out).astype(jnp.float32)}


def _prep_convt(p):
    c_in, c_out = p["w"].shape[0], p["w"].shape[1]
    w_mat = jnp.transpose(p["w"], (0, 2, 3, 4, 1)).reshape(c_in, 8 * c_out)
    return {"w_mat": w_mat.astype(jnp.bfloat16),
            "b": jnp.tile(p["b"], 8).reshape(1, 8 * c_out).astype(jnp.float32)}


def _prep_bn(p):
    return {"gamma": p["gamma"].astype(jnp.float32),
            "beta": p["beta"].astype(jnp.float32)}


def _prep_subnet2conv(p):
    return {"conv1": _prep_conv3(p["conv1"]), "bn1": _prep_bn(p["bn1"]),
            "conv2": _prep_conv3(p["conv2"]), "bn2": _prep_bn(p["bn2"])}


def _prep_recurse(p):
    if "bottleneck" in p:
        return {"bottleneck": [{"conv": _prep_conv3(l["conv"]),
                                "bn": _prep_bn(l["bn"])}
                               for l in p["bottleneck"]]}
    return {"sub_2conv_more": _prep_subnet2conv(p["sub_2conv_more"]),
            "sub_2conv_less": _prep_subnet2conv(p["sub_2conv_less"]),
            "conv_down": _prep_conv_down(p["conv_down"]),
            "bn0": _prep_bn(p["bn0"]),
            "convt": _prep_convt(p["convt"]),
            "bn1": _prep_bn(p["bn1"]),
            "sub_u": _prep_recurse(p["sub_u"])}


def prepare_net_params(p):
    return {"net_recurse": _prep_recurse(p["net_recurse"]),
            "conv_out": _prep_conv3(p["conv_out"])}


# ----------------------------------------------------------------------------
# Deterministic parameter initialization (synthetic weights, PyTorch layout)
# ----------------------------------------------------------------------------
def _init_conv(key, c_out, c_in, k):
    kw, kb = jax.random.split(key)
    fan_in = c_in * k ** 3
    w = jax.random.normal(kw, (c_out, c_in, k, k, k), jnp.float32) / jnp.sqrt(float(fan_in))
    b = 0.01 * jax.random.normal(kb, (c_out,), jnp.float32)
    return {"w": w, "b": b}


def _init_convt(key, c_in, c_out, k):
    kw, kb = jax.random.split(key)
    fan_in = c_in * k ** 3
    w = jax.random.normal(kw, (c_in, c_out, k, k, k), jnp.float32) / jnp.sqrt(float(fan_in))
    b = 0.01 * jax.random.normal(kb, (c_out,), jnp.float32)
    return {"w": w, "b": b}


def _init_bn(key, c):
    kg, kb = jax.random.split(key)
    return {"gamma": 1.0 + 0.1 * jax.random.normal(kg, (c,), jnp.float32),
            "beta": 0.1 * jax.random.normal(kb, (c,), jnp.float32)}


def init_subnet2conv(key, n_in, n_out):
    k1, k2, k3, k4 = jax.random.split(key, 4)
    return {"conv1": _init_conv(k1, n_out, n_in, 3), "bn1": _init_bn(k2, n_out),
            "conv2": _init_conv(k3, n_out, n_out, 3), "bn2": _init_bn(k4, n_out)}


def init_dilated_bottleneck(key, n_in, n_out, depth):
    layers = []
    keys = jax.random.split(key, depth)
    for i in range(depth):
        k1, k2 = jax.random.split(keys[i])
        layers.append({"conv": _init_conv(k1, n_out, n_in, 3), "bn": _init_bn(k2, n_out)})
        if i == 0:
            n_in = n_out
    return layers


def init_net_recurse(key, n_in, mult_chan, depth_parent, depth, dilate):
    n_out = mult_chan if depth == depth_parent else n_in * mult_chan
    keys = jax.random.split(key, 7)
    if depth == 0:
        return {"bottleneck": init_dilated_bottleneck(keys[0], n_in, n_out, dilate)}
    return {
        "sub_2conv_more": init_subnet2conv(keys[0], n_in, n_out),
        "sub_2conv_less": init_subnet2conv(keys[1], 2 * n_out, n_out),
        "conv_down": _init_conv(keys[2], n_out, n_out, 2),
        "bn0": _init_bn(keys[3], n_out),
        "convt": _init_convt(keys[4], 2 * n_out, n_out, 2),
        "bn1": _init_bn(keys[5], n_out),
        # sub-levels of the torch module use the default dilate=1
        "sub_u": init_net_recurse(keys[6], n_out, 2, depth_parent, depth - 1, 1),
    }


def init_net(key, depth, mult_chan, dilate, in_channels, out_channels):
    k1, k2 = jax.random.split(key)
    return {
        "net_recurse": init_net_recurse(k1, in_channels, mult_chan, depth, depth, dilate),
        "conv_out": _init_conv(k2, out_channels, mult_chan, 3),
    }


# ----------------------------------------------------------------------------
if __name__ == "__main__":
    # Small, semantics-preserving configuration of Net(depth, mult_chan, dilate,
    # in_channels, out_channels).  Spatial size must be divisible by 2**depth.
    depth, mult_chan, dilate, in_ch, out_ch = 2, 8, 1, 1, 1
    B, D, H, W = 2, 8, 8, 8

    key = jax.random.PRNGKey(0)
    k_param, k_x = jax.random.split(key)
    raw_params = init_net(k_param, depth, mult_chan, dilate, in_ch, out_ch)
    params = prepare_net_params(raw_params)       # one-time bf16 weight packing
    x = jax.random.normal(k_x, (B, in_ch, D, H, W), jnp.float32)

    fwd = jax.jit(net_forward)
    y = jax.block_until_ready(fwd(params, x))

    assert y.shape == (B, out_ch, D, H, W), y.shape
    assert bool(jnp.all(jnp.isfinite(y)))

    # Exercise the K-tiled / resident-weight matmul path (K is too small in the
    # demo net to trigger it) and check it against a plain XLA matmul.
    km, kk, kn = 256, 27 * 256, 128
    ka, kb = jax.random.split(jax.random.PRNGKey(1))
    a_chk = jax.random.normal(ka, (km, kk), jnp.float32).astype(jnp.bfloat16)
    w_chk = (jax.random.normal(kb, (kk, kn), jnp.float32)
             / jnp.sqrt(float(kk))).astype(jnp.bfloat16)
    b_chk = jnp.zeros((1, kn), jnp.float32)
    y_chk, _, _ = _matmul_bias_stats(a_chk, w_chk, b_chk)
    y_ref = jnp.dot(a_chk.astype(jnp.float32), w_chk.astype(jnp.float32))
    y_chk = jax.block_until_ready(y_chk)
    assert bool(jnp.allclose(y_chk.astype(jnp.float32), y_ref,
                             atol=0.05, rtol=0.05))

    print("KERNEL_OK")
</pallas_src>

<mosaic_0001>
module attributes {stable_mosaic.version = 11 : i64} {
  func.func @_conv_matmul_stats_kernel(%arg0: i32, %arg1: i32, %arg2: memref<512x27xbf16, #tpu.memory_space<vmem>>, %arg3: memref<27x8xbf16, #tpu.memory_space<vmem>>, %arg4: memref<1x8xf32, #tpu.memory_space<vmem>>, %arg5: memref<512x8xbf16, #tpu.memory_space<vmem>>, %arg6: memref<1x2x8xf32, #tpu.memory_space<vmem>>) attributes {dimension_semantics = [#tpu.dimension_semantics<parallel>, #tpu.dimension_semantics<arbitrary>], iteration_bounds = array<i64: 2, 1>, scalar_prefetch = 0 : i64, scratch_operands = 0 : i64, tpu.core_type = #tpu.core_type<tc>, window_params = [{transform_indices = @transform_0, window_bounds = array<i64: 512, 27>}, {pipeline_mode = #tpu.pipeline_mode<synchronous>, transform_indices = @transform_1, window_bounds = array<i64: 27, 8>}, {pipeline_mode = #tpu.pipeline_mode<synchronous>, transform_indices = @transform_2, window_bounds = array<i64: 1, 8>}, {transform_indices = @transform_3, window_bounds = array<i64: 512, 8>}, {transform_indices = @transform_4, window_bounds = array<i64: 1, 2, 8>}]} {
    %c0 = arith.constant 0 : index
    %c0_0 = arith.constant 0 : index
    %0 = vector.load %arg3[%c0, %c0_0] : memref<27x8xbf16, #tpu.memory_space<vmem>>, vector<27x8xbf16>
    %c0_1 = arith.constant 0 : index
    %c0_2 = arith.constant 0 : index
    %1 = vector.load %arg2[%c0_1, %c0_2] : memref<512x27xbf16, #tpu.memory_space<vmem>>, vector<512x27xbf16>
    %cst = arith.constant dense<0.000000e+00> : vector<512x8xf32>
    %2 = tpu.matmul %1, %0, %cst {dimension_numbers = #tpu.dot_dimension_numbers<[1], [0], [0], [1], [0, 0, 1, 1], [], []>} : vector<512x27xbf16>, vector<27x8xbf16>, vector<512x8xf32> -> vector<512x8xf32>
    %c0_3 = arith.constant 0 : index
    %c0_4 = arith.constant 0 : index
    %3 = vector.load %arg4[%c0_3, %c0_4] : memref<1x8xf32, #tpu.memory_space<vmem>>, vector<1x8xf32>
    %4 = vector.broadcast %3 : vector<1x8xf32> to vector<512x8xf32>
    %5 = arith.addf %2, %4 : vector<512x8xf32>
    %6 = arith.truncf %5 : vector<512x8xf32> to vector<512x8xbf16>
    %c0_5 = arith.constant 0 : index
    %c0_6 = arith.constant 0 : index
    %7 = vector.load %arg5[%c0_5, %c0_6] : memref<512x8xbf16, #tpu.memory_space<vmem>>, vector<512x8xbf16>
    tpu.vector_store %arg5[%c0_5, %c0_6], %6 {strides = array<i32>} : memref<512x8xbf16, #tpu.memory_space<vmem>>, vector<512x8xbf16>,
    %cst_7 = arith.constant dense<0.000000e+00> : vector<8xf32>
    %8 = vector.multi_reduction <add>, %5, %cst_7 [0] : vector<512x8xf32> to vector<8xf32>
    %9 = vector.shape_cast %8 : vector<8xf32> to vector<1x8xf32>
    %c0_8 = arith.constant 0 : index
    %c0_9 = arith.constant 0 : index
    %c0_10 = arith.constant 0 : index
    %10 = vector.load %arg6[%c0_8, %c0_9, %c0_10] : memref<1x2x8xf32, #tpu.memory_space<vmem>>, vector<1x1x8xf32>
    %11 = vector.shape_cast %10 : vector<1x1x8xf32> to vector<1x8xf32>
    %12 = vector.shape_cast %9 : vector<1x8xf32> to vector<1x1x8xf32>
    tpu.vector_store %arg6[%c0_8, %c0_9, %c0_10], %12 {strides = array<i32>} : memref<1x2x8xf32, #tpu.memory_space<vmem>>, vector<1x1x8xf32>,
    %13 = arith.mulf %5, %5 : vector<512x8xf32>
    %cst_11 = arith.constant dense<0.000000e+00> : vector<8xf32>
    %14 = vector.multi_reduction <add>, %13, %cst_11 [0] : vector<512x8xf32> to vector<8xf32>
    %15 = vector.shape_cast %14 : vector<8xf32> to vector<1x8xf32>
    %c0_12 = arith.constant 0 : index
    %c1 = arith.constant 1 : index
    %c0_13 = arith.constant 0 : index
    %16 = vector.load %arg6[%c0_12, %c1, %c0_13] : memref<1x2x8xf32, #tpu.memory_space<vmem>>, vector<1x1x8xf32>
    %17 = vector.shape_cast %16 : vector<1x1x8xf32> to vector<1x8xf32>
    %18 = vector.shape_cast %15 : vector<1x8xf32> to vector<1x1x8xf32>
    tpu.vector_store %arg6[%c0_12, %c1, %c0_13], %18 {strides = array<i32>} : memref<1x2x8xf32, #tpu.memory_space<vmem>>, vector<1x1x8xf32>,
    return
  }
  func.func @transform_0(%arg0: i32, %arg1: i32) -> (i32, i32) {
    %c0_i32 = arith.constant 0 : i32
    return %arg0, %arg1 : i32, i32
  }
  func.func @transform_1(%arg0: i32, %arg1: i32) -> (i32, i32) {
    %c0_i32 = arith.constant 0 : i32
    %c0_i32_0 = arith.constant 0 : i32
    %c0_i32_1 = arith.constant 0 : i32
    return %c0_i32, %c0_i32_0 : i32, i32
  }
  func.func @transform_2(%arg0: i32, %arg1: i32) -> (i32, i32) {
    %c0_i32 = arith.constant 0 : i32
    %c0_i32_0 = arith.constant 0 : i32
    %c0_i32_1 = arith.constant 0 : i32
    return %c0_i32, %c0_i32_0 : i32, i32
  }
  func.func @transform_3(%arg0: i32, %arg1: i32) -> (i32, i32) {
    %c0_i32 = arith.constant 0 : i32
    %c0_i32_0 = arith.constant 0 : i32
    return %arg0, %c0_i32 : i32, i32
  }
  func.func @transform_4(%arg0: i32, %arg1: i32) -> (i32, i32, i32) {
    %c0_i32 = arith.constant 0 : i32
    %c0_i32_0 = arith.constant 0 : i32
    %c0_i32_1 = arith.constant 0 : i32
    return %arg0, %c0_i32, %c0_i32_0 : i32, i32, i32
  }
}

module attributes {stable_mosaic.version = 11 : i64} {
  func.func @_scale_shift_relu_kernel(%arg0: i32, %arg1: memref<64x128xbf16, #tpu.memory_space<vmem>>, %arg2: memref<1x128xf32, #tpu.memory_space<vmem>>, %arg3: memref<1x128xf32, #tpu.memory_space<vmem>>, %arg4: memref<64x128xbf16, #tpu.memory_space<vmem>>) attributes {dimension_semantics = [#tpu.dimension_semantics<parallel>], iteration_bounds = array<i64: 1>, scalar_prefetch = 0 : i64, scratch_operands = 0 : i64, tpu.core_type = #tpu.core_type<tc>, window_params = [{transform_indices = @transform_0, window_bounds = array<i64: 64, 128>}, {pipeline_mode = #tpu.pipeline_mode<synchronous>, transform_indices = @transform_1, window_bounds = array<i64: 1, 128>}, {pipeline_mode = #tpu.pipeline_mode<synchronous>, transform_indices = @transform_2, window_bounds = array<i64: 1, 128>}, {transform_indices = @transform_3, window_bounds = array<i64: 64, 128>}]} {
    %c0 = arith.constant 0 : index
    %c0_0 = arith.constant 0 : index
    %0 = vector.load %arg1[%c0, %c0_0] : memref<64x128xbf16, #tpu.memory_space<vmem>>, vector<64x128xbf16>
    %1 = arith.extf %0 : vector<64x128xbf16> to vector<64x128xf32>
    %c0_1 = arith.constant 0 : index
    %c0_2 = arith.constant 0 : index
    %2 = vector.load %arg2[%c0_1, %c0_2] : memref<1x128xf32, #tpu.memory_space<vmem>>, vector<1x128xf32>
    %3 = vector.broadcast %2 : vector<1x128xf32> to vector<64x128xf32>
    %4 = arith.mulf %1, %3 : vector<64x128xf32>
    %c0_3 = arith.constant 0 : index
    %c0_4 = arith.constant 0 : index
    %5 = vector.load %arg3[%c0_3, %c0_4] : memref<1x128xf32, #tpu.memory_space<vmem>>, vector<1x128xf32>
    %6 = vector.broadcast %5 : vector<1x128xf32> to vector<64x128xf32>
    %7 = arith.addf %4, %6 : vector<64x128xf32>
    %cst = arith.constant 0.000000e+00 : f32
    %8 = vector.broadcast %cst : f32 to vector<64x128xf32>
    %9 = arith.maximumf %7, %8 : vector<64x128xf32>
    %10 = arith.truncf %9 : vector<64x128xf32> to vector<64x128xbf16>
    %c0_5 = arith.constant 0 : index
    %c0_6 = arith.constant 0 : index
    %11 = vector.load %arg4[%c0_5, %c0_6] : memref<64x128xbf16, #tpu.memory_space<vmem>>, vector<64x128xbf16>
    tpu.vector_store %arg4[%c0_5, %c0_6], %10 {strides = array<i32>} : memref<64x128xbf16, #tpu.memory_space<vmem>>, vector<64x128xbf16>,
    return
  }
  func.func @transform_0(%arg0: i32) -> (i32, i32) {
    %c0_i32 = arith.constant 0 : i32
    %c0_i32_0 = arith.constant 0 : i32
    return %arg0, %c0_i32 : i32, i32
  }
  func.func @transform_1(%arg0: i32) -> (i32, i32) {
    %c0_i32 = arith.constant 0 : i32
    %c0_i32_0 = arith.constant 0 : i32
    %c0_i32_1 = arith.constant 0 : i32
    return %c0_i32, %c0_i32_0 : i32, i32
  }
  func.func @transform_2(%arg0: i32) -> (i32, i32) {
    %c0_i32 = arith.constant 0 : i32
    %c0_i32_0 = arith.constant 0 : i32
    %c0_i32_1 = arith.constant 0 : i32
    return %c0_i32, %c0_i32_0 : i32, i32
  }
  func.func @transform_3(%arg0: i32) -> (i32, i32) {
    %c0_i32 = arith.constant 0 : i32
    %c0_i32_0 = arith.constant 0 : i32
    return %arg0, %c0_i32 : i32, i32
  }
}

module attributes {stable_mosaic.version = 11 : i64} {
  func.func @_conv_matmul_stats_kernel(%arg0: i32, %arg1: i32, %arg2: memref<512x216xbf16, #tpu.memory_space<vmem>>, %arg3: memref<216x8xbf16, #tpu.memory_space<vmem>>, %arg4: memref<1x8xf32, #tpu.memory_space<vmem>>, %arg5: memref<512x8xbf16, #tpu.memory_space<vmem>>, %arg6: memref<1x2x8xf32, #tpu.memory_space<vmem>>) attributes {dimension_semantics = [#tpu.dimension_semantics<parallel>, #tpu.dimension_semantics<arbitrary>], iteration_bounds = array<i64: 2, 1>, scalar_prefetch = 0 : i64, scratch_operands = 0 : i64, tpu.core_type = #tpu.core_type<tc>, window_params = [{transform_indices = @transform_0, window_bounds = array<i64: 512, 216>}, {pipeline_mode = #tpu.pipeline_mode<synchronous>, transform_indices = @transform_1, window_bounds = array<i64: 216, 8>}, {pipeline_mode = #tpu.pipeline_mode<synchronous>, transform_indices = @transform_2, window_bounds = array<i64: 1, 8>}, {transform_indices = @transform_3, window_bounds = array<i64: 512, 8>}, {transform_indices = @transform_4, window_bounds = array<i64: 1, 2, 8>}]} {
    %c0 = arith.constant 0 : index
    %c0_0 = arith.constant 0 : index
    %0 = vector.load %arg3[%c0, %c0_0] : memref<216x8xbf16, #tpu.memory_space<vmem>>, vector<216x8xbf16>
    %c0_1 = arith.constant 0 : index
    %c0_2 = arith.constant 0 : index
    %1 = vector.load %arg2[%c0_1, %c0_2] : memref<512x216xbf16, #tpu.memory_space<vmem>>, vector<512x216xbf16>
    %cst = arith.constant dense<0.000000e+00> : vector<512x8xf32>
    %2 = tpu.matmul %1, %0, %cst {dimension_numbers = #tpu.dot_dimension_numbers<[1], [0], [0], [1], [0, 0, 1, 1], [], []>} : vector<512x216xbf16>, vector<216x8xbf16>, vector<512x8xf32> -> vector<512x8xf32>
    %c0_3 = arith.constant 0 : index
    %c0_4 = arith.constant 0 : index
    %3 = vector.load %arg4[%c0_3, %c0_4] : memref<1x8xf32, #tpu.memory_space<vmem>>, vector<1x8xf32>
    %4 = vector.broadcast %3 : vector<1x8xf32> to vector<512x8xf32>
    %5 = arith.addf %2, %4 : vector<512x8xf32>
    %6 = arith.truncf %5 : vector<512x8xf32> to vector<512x8xbf16>
    %c0_5 = arith.constant 0 : index
    %c0_6 = arith.constant 0 : index
    %7 = vector.load %arg5[%c0_5, %c0_6] : memref<512x8xbf16, #tpu.memory_space<vmem>>, vector<512x8xbf16>
    tpu.vector_store %arg5[%c0_5, %c0_6], %6 {strides = array<i32>} : memref<512x8xbf16, #tpu.memory_space<vmem>>, vector<512x8xbf16>,
    %cst_7 = arith.constant dense<0.000000e+00> : vector<8xf32>
    %8 = vector.multi_reduction <add>, %5, %cst_7 [0] : vector<512x8xf32> to vector<8xf32>
    %9 = vector.shape_cast %8 : vector<8xf32> to vector<1x8xf32>
    %c0_8 = arith.constant 0 : index
    %c0_9 = arith.constant 0 : index
    %c0_10 = arith.constant 0 : index
    %10 = vector.load %arg6[%c0_8, %c0_9, %c0_10] : memref<1x2x8xf32, #tpu.memory_space<vmem>>, vector<1x1x8xf32>
    %11 = vector.shape_cast %10 : vector<1x1x8xf32> to vector<1x8xf32>
    %12 = vector.shape_cast %9 : vector<1x8xf32> to vector<1x1x8xf32>
    tpu.vector_store %arg6[%c0_8, %c0_9, %c0_10], %12 {strides = array<i32>} : memref<1x2x8xf32, #tpu.memory_space<vmem>>, vector<1x1x8xf32>,
    %13 = arith.mulf %5, %5 : vector<512x8xf32>
    %cst_11 = arith.constant dense<0.000000e+00> : vector<8xf32>
    %14 = vector.multi_reduction <add>, %13, %cst_11 [0] : vector<512x8xf32> to vector<8xf32>
    %15 = vector.shape_cast %14 : vector<8xf32> to vector<1x8xf32>
    %c0_12 = arith.constant 0 : index
    %c1 = arith.constant 1 : index
    %c0_13 = arith.constant 0 : index
    %16 = vector.load %arg6[%c0_12, %c1, %c0_13] : memref<1x2x8xf32, #tpu.memory_space<vmem>>, vector<1x1x8xf32>
    %17 = vector.shape_cast %16 : vector<1x1x8xf32> to vector<1x8xf32>
    %18 = vector.shape_cast %15 : vector<1x8xf32> to vector<1x1x8xf32>
    tpu.vector_store %arg6[%c0_12, %c1, %c0_13], %18 {strides = array<i32>} : memref<1x2x8xf32, #tpu.memory_space<vmem>>, vector<1x1x8xf32>,
    return
  }
  func.func @transform_0(%arg0: i32, %arg1: i32) -> (i32, i32) {
    %c0_i32 = arith.constant 0 : i32
    return %arg0, %arg1 : i32, i32
  }
  func.func @transform_1(%arg0: i32, %arg1: i32) -> (i32, i32) {
    %c0_i32 = arith.constant 0 : i32
    %c0_i32_0 = arith.constant 0 : i32
    %c0_i32_1 = arith.constant 0 : i32
    return %c0_i32, %c0_i32_0 : i32, i32
  }
  func.func @transform_2(%arg0: i32, %arg1: i32) -> (i32, i32) {
    %c0_i32 = arith.constant 0 : i32
    %c0_i32_0 = arith.constant 0 : i32
    %c0_i32_1 = arith.constant 0 : i32
    return %c0_i32, %c0_i32_0 : i32, i32
  }
  func.func @transform_3(%arg0: i32, %arg1: i32) -> (i32, i32) {
    %c0_i32 = arith.constant 0 : i32
    %c0_i32_0 = arith.constant 0 : i32
    return %arg0, %c0_i32 : i32, i32
  }
  func.func @transform_4(%arg0: i32, %arg1: i32) -> (i32, i32, i32) {
    %c0_i32 = arith.constant 0 : i32
    %c0_i32_0 = arith.constant 0 : i32
    %c0_i32_1 = arith.constant 0 : i32
    return %arg0, %c0_i32, %c0_i32_0 : i32, i32, i32
  }
}

module attributes {stable_mosaic.version = 11 : i64} {
  func.func @_conv_matmul_stats_kernel(%arg0: i32, %arg1: i32, %arg2: memref<64x64xbf16, #tpu.memory_space<vmem>>, %arg3: memref<64x8xbf16, #tpu.memory_space<vmem>>, %arg4: memref<1x8xf32, #tpu.memory_space<vmem>>, %arg5: memref<64x8xbf16, #tpu.memory_space<vmem>>, %arg6: memref<1x2x8xf32, #tpu.memory_space<vmem>>) attributes {dimension_semantics = [#tpu.dimension_semantics<parallel>, #tpu.dimension_semantics<arbitrary>], iteration_bounds = array<i64: 2, 1>, scalar_prefetch = 0 : i64, scratch_operands = 0 : i64, tpu.core_type = #tpu.core_type<tc>, window_params = [{transform_indices = @transform_0, window_bounds = array<i64: 64, 64>}, {pipeline_mode = #tpu.pipeline_mode<synchronous>, transform_indices = @transform_1, window_bounds = array<i64: 64, 8>}, {pipeline_mode = #tpu.pipeline_mode<synchronous>, transform_indices = @transform_2, window_bounds = array<i64: 1, 8>}, {transform_indices = @transform_3, window_bounds = array<i64: 64, 8>}, {transform_indices = @transform_4, window_bounds = array<i64: 1, 2, 8>}]} {
    %c0 = arith.constant 0 : index
    %c0_0 = arith.constant 0 : index
    %0 = vector.load %arg3[%c0, %c0_0] : memref<64x8xbf16, #tpu.memory_space<vmem>>, vector<64x8xbf16>
    %c0_1 = arith.constant 0 : index
    %c0_2 = arith.constant 0 : index
    %1 = vector.load %arg2[%c0_1, %c0_2] : memref<64x64xbf16, #tpu.memory_space<vmem>>, vector<64x64xbf16>
    %cst = arith.constant dense<0.000000e+00> : vector<64x8xf32>
    %2 = tpu.matmul %1, %0, %cst {dimension_numbers = #tpu.dot_dimension_numbers<[1], [0], [0], [1], [0, 0, 1, 1], [], []>} : vector<64x64xbf16>, vector<64x8xbf16>, vector<64x8xf32> -> vector<64x8xf32>
    %c0_3 = arith.constant 0 : index
    %c0_4 = arith.constant 0 : index
    %3 = vector.load %arg4[%c0_3, %c0_4] : memref<1x8xf32, #tpu.memory_space<vmem>>, vector<1x8xf32>
    %4 = vector.broadcast %3 : vector<1x8xf32> to vector<64x8xf32>
    %5 = arith.addf %2, %4 : vector<64x8xf32>
    %6 = arith.truncf %5 : vector<64x8xf32> to vector<64x8xbf16>
    %c0_5 = arith.constant 0 : index
    %c0_6 = arith.constant 0 : index
    %7 = vector.load %arg5[%c0_5, %c0_6] : memref<64x8xbf16, #tpu.memory_space<vmem>>, vector<64x8xbf16>
    tpu.vector_store %arg5[%c0_5, %c0_6], %6 {strides = array<i32>} : memref<64x8xbf16, #tpu.memory_space<vmem>>, vector<64x8xbf16>,
    %cst_7 = arith.constant dense<0.000000e+00> : vector<8xf32>
    %8 = vector.multi_reduction <add>, %5, %cst_7 [0] : vector<64x8xf32> to vector<8xf32>
    %9 = vector.shape_cast %8 : vector<8xf32> to vector<1x8xf32>
    %c0_8 = arith.constant 0 : index
    %c0_9 = arith.constant 0 : index
    %c0_10 = arith.constant 0 : index
    %10 = vector.load %arg6[%c0_8, %c0_9, %c0_10] : memref<1x2x8xf32, #tpu.memory_space<vmem>>, vector<1x1x8xf32>
    %11 = vector.shape_cast %10 : vector<1x1x8xf32> to vector<1x8xf32>
    %12 = vector.shape_cast %9 : vector<1x8xf32> to vector<1x1x8xf32>
    tpu.vector_store %arg6[%c0_8, %c0_9, %c0_10], %12 {strides = array<i32>} : memref<1x2x8xf32, #tpu.memory_space<vmem>>, vector<1x1x8xf32>,
    %13 = arith.mulf %5, %5 : vector<64x8xf32>
    %cst_11 = arith.constant dense<0.000000e+00> : vector<8xf32>
    %14 = vector.multi_reduction <add>, %13, %cst_11 [0] : vector<64x8xf32> to vector<8xf32>
    %15 = vector.shape_cast %14 : vector<8xf32> to vector<1x8xf32>
    %c0_12 = arith.constant 0 : index
    %c1 = arith.constant 1 : index
    %c0_13 = arith.constant 0 : index
    %16 = vector.load %arg6[%c0_12, %c1, %c0_13] : memref<1x2x8xf32, #tpu.memory_space<vmem>>, vector<1x1x8xf32>
    %17 = vector.shape_cast %16 : vector<1x1x8xf32> to vector<1x8xf32>
    %18 = vector.shape_cast %15 : vector<1x8xf32> to vector<1x1x8xf32>
    tpu.vector_store %arg6[%c0_12, %c1, %c0_13], %18 {strides = array<i32>} : memref<1x2x8xf32, #tpu.memory_space<vmem>>, vector<1x1x8xf32>,
    return
  }
  func.func @transform_0(%arg0: i32, %arg1: i32) -> (i32, i32) {
    %c0_i32 = arith.constant 0 : i32
    return %arg0, %arg1 : i32, i32
  }
  func.func @transform_1(%arg0: i32, %arg1: i32) -> (i32, i32) {
    %c0_i32 = arith.constant 0 : i32
    %c0_i32_0 = arith.constant 0 : i32
    %c0_i32_1 = arith.constant 0 : i32
    return %c0_i32, %c0_i32_0 : i32, i32
  }
  func.func @transform_2(%arg0: i32, %arg1: i32) -> (i32, i32) {
    %c0_i32 = arith.constant 0 : i32
    %c0_i32_0 = arith.constant 0 : i32
    %c0_i32_1 = arith.constant 0 : i32
    return %c0_i32, %c0_i32_0 : i32, i32
  }
  func.func @transform_3(%arg0: i32, %arg1: i32) -> (i32, i32) {
    %c0_i32 = arith.constant 0 : i32
    %c0_i32_0 = arith.constant 0 : i32
    return %arg0, %c0_i32 : i32, i32
  }
  func.func @transform_4(%arg0: i32, %arg1: i32) -> (i32, i32, i32) {
    %c0_i32 = arith.constant 0 : i32
    %c0_i32_0 = arith.constant 0 : i32
    %c0_i32_1 = arith.constant 0 : i32
    return %arg0, %c0_i32, %c0_i32_0 : i32, i32, i32
  }
}

module attributes {stable_mosaic.version = 11 : i64} {
  func.func @_scale_shift_relu_kernel(%arg0: i32, %arg1: memref<8x128xbf16, #tpu.memory_space<vmem>>, %arg2: memref<1x128xf32, #tpu.memory_space<vmem>>, %arg3: memref<1x128xf32, #tpu.memory_space<vmem>>, %arg4: memref<8x128xbf16, #tpu.memory_space<vmem>>) attributes {dimension_semantics = [#tpu.dimension_semantics<parallel>], iteration_bounds = array<i64: 1>, scalar_prefetch = 0 : i64, scratch_operands = 0 : i64, tpu.core_type = #tpu.core_type<tc>, window_params = [{transform_indices = @transform_0, window_bounds = array<i64: 8, 128>}, {pipeline_mode = #tpu.pipeline_mode<synchronous>, transform_indices = @transform_1, window_bounds = array<i64: 1, 128>}, {pipeline_mode = #tpu.pipeline_mode<synchronous>, transform_indices = @transform_2, window_bounds = array<i64: 1, 128>}, {transform_indices = @transform_3, window_bounds = array<i64: 8, 128>}]} {
    %c0 = arith.constant 0 : index
    %c0_0 = arith.constant 0 : index
    %0 = vector.load %arg1[%c0, %c0_0] : memref<8x128xbf16, #tpu.memory_space<vmem>>, vector<8x128xbf16>
    %1 = arith.extf %0 : vector<8x128xbf16> to vector<8x128xf32>
    %c0_1 = arith.constant 0 : index
    %c0_2 = arith.constant 0 : index
    %2 = vector.load %arg2[%c0_1, %c0_2] : memref<1x128xf32, #tpu.memory_space<vmem>>, vector<1x128xf32>
    %3 = vector.broadcast %2 : vector<1x128xf32> to vector<8x128xf32>
    %4 = arith.mulf %1, %3 : vector<8x128xf32>
    %c0_3 = arith.constant 0 : index
    %c0_4 = arith.constant 0 : index
    %5 = vector.load %arg3[%c0_3, %c0_4] : memref<1x128xf32, #tpu.memory_space<vmem>>, vector<1x128xf32>
    %6 = vector.broadcast %5 : vector<1x128xf32> to vector<8x128xf32>
    %7 = arith.addf %4, %6 : vector<8x128xf32>
    %cst = arith.constant 0.000000e+00 : f32
    %8 = vector.broadcast %cst : f32 to vector<8x128xf32>
    %9 = arith.maximumf %7, %8 : vector<8x128xf32>
    %10 = arith.truncf %9 : vector<8x128xf32> to vector<8x128xbf16>
    %c0_5 = arith.constant 0 : index
    %c0_6 = arith.constant 0 : index
    %11 = vector.load %arg4[%c0_5, %c0_6] : memref<8x128xbf16, #tpu.memory_space<vmem>>, vector<8x128xbf16>
    tpu.vector_store %arg4[%c0_5, %c0_6], %10 {strides = array<i32>} : memref<8x128xbf16, #tpu.memory_space<vmem>>, vector<8x128xbf16>,
    return
  }
  func.func @transform_0(%arg0: i32) -> (i32, i32) {
    %c0_i32 = arith.constant 0 : i32
    %c0_i32_0 = arith.constant 0 : i32
    return %arg0, %c0_i32 : i32, i32
  }
  func.func @transform_1(%arg0: i32) -> (i32, i32) {
    %c0_i32 = arith.constant 0 : i32
    %c0_i32_0 = arith.constant 0 : i32
    %c0_i32_1 = arith.constant 0 : i32
    return %c0_i32, %c0_i32_0 : i32, i32
  }
  func.func @transform_2(%arg0: i32) -> (i32, i32) {
    %c0_i32 = arith.constant 0 : i32
    %c0_i32_0 = arith.constant 0 : i32
    %c0_i32_1 = arith.constant 0 : i32
    return %c0_i32, %c0_i32_0 : i32, i32
  }
  func.func @transform_3(%arg0: i32) -> (i32, i32) {
    %c0_i32 = arith.constant 0 : i32
    %c0_i32_0 = arith.constant 0 : i32
    return %arg0, %c0_i32 : i32, i32
  }
}

module attributes {stable_mosaic.version = 11 : i64} {
  func.func @_conv_matmul_stats_kernel(%arg0: i32, %arg1: i32, %arg2: memref<64x216xbf16, #tpu.memory_space<vmem>>, %arg3: memref<216x16xbf16, #tpu.memory_space<vmem>>, %arg4: memref<1x16xf32, #tpu.memory_space<vmem>>, %arg5: memref<64x16xbf16, #tpu.memory_space<vmem>>, %arg6: memref<1x2x16xf32, #tpu.memory_space<vmem>>) attributes {dimension_semantics = [#tpu.dimension_semantics<parallel>, #tpu.dimension_semantics<arbitrary>], iteration_bounds = array<i64: 2, 1>, scalar_prefetch = 0 : i64, scratch_operands = 0 : i64, tpu.core_type = #tpu.core_type<tc>, window_params = [{transform_indices = @transform_0, window_bounds = array<i64: 64, 216>}, {pipeline_mode = #tpu.pipeline_mode<synchronous>, transform_indices = @transform_1, window_bounds = array<i64: 216, 16>}, {pipeline_mode = #tpu.pipeline_mode<synchronous>, transform_indices = @transform_2, window_bounds = array<i64: 1, 16>}, {transform_indices = @transform_3, window_bounds = array<i64: 64, 16>}, {transform_indices = @transform_4, window_bounds = array<i64: 1, 2, 16>}]} {
    %c0 = arith.constant 0 : index
    %c0_0 = arith.constant 0 : index
    %0 = vector.load %arg3[%c0, %c0_0] : memref<216x16xbf16, #tpu.memory_space<vmem>>, vector<216x16xbf16>
    %c0_1 = arith.constant 0 : index
    %c0_2 = arith.constant 0 : index
    %1 = vector.load %arg2[%c0_1, %c0_2] : memref<64x216xbf16, #tpu.memory_space<vmem>>, vector<64x216xbf16>
    %cst = arith.constant dense<0.000000e+00> : vector<64x16xf32>
    %2 = tpu.matmul %1, %0, %cst {dimension_numbers = #tpu.dot_dimension_numbers<[1], [0], [0], [1], [0, 0, 1, 1], [], []>} : vector<64x216xbf16>, vector<216x16xbf16>, vector<64x16xf32> -> vector<64x16xf32>
    %c0_3 = arith.constant 0 : index
    %c0_4 = arith.constant 0 : index
    %3 = vector.load %arg4[%c0_3, %c0_4] : memref<1x16xf32, #tpu.memory_space<vmem>>, vector<1x16xf32>
    %4 = vector.broadcast %3 : vector<1x16xf32> to vector<64x16xf32>
    %5 = arith.addf %2, %4 : vector<64x16xf32>
    %6 = arith.truncf %5 : vector<64x16xf32> to vector<64x16xbf16>
    %c0_5 = arith.constant 0 : index
    %c0_6 = arith.constant 0 : index
    %7 = vector.load %arg5[%c0_5, %c0_6] : memref<64x16xbf16, #tpu.memory_space<vmem>>, vector<64x16xbf16>
    tpu.vector_store %arg5[%c0_5, %c0_6], %6 {strides = array<i32>} : memref<64x16xbf16, #tpu.memory_space<vmem>>, vector<64x16xbf16>,
    %cst_7 = arith.constant dense<0.000000e+00> : vector<16xf32>
    %8 = vector.multi_reduction <add>, %5, %cst_7 [0] : vector<64x16xf32> to vector<16xf32>
    %9 = vector.shape_cast %8 : vector<16xf32> to vector<1x16xf32>
    %c0_8 = arith.constant 0 : index
    %c0_9 = arith.constant 0 : index
    %c0_10 = arith.constant 0 : index
    %10 = vector.load %arg6[%c0_8, %c0_9, %c0_10] : memref<1x2x16xf32, #tpu.memory_space<vmem>>, vector<1x1x16xf32>
    %11 = vector.shape_cast %10 : vector<1x1x16xf32> to vector<1x16xf32>
    %12 = vector.shape_cast %9 : vector<1x16xf32> to vector<1x1x16xf32>
    tpu.vector_store %arg6[%c0_8, %c0_9, %c0_10], %12 {strides = array<i32>} : memref<1x2x16xf32, #tpu.memory_space<vmem>>, vector<1x1x16xf32>,
    %13 = arith.mulf %5, %5 : vector<64x16xf32>
    %cst_11 = arith.constant dense<0.000000e+00> : vector<16xf32>
    %14 = vector.multi_reduction <add>, %13, %cst_11 [0] : vector<64x16xf32> to vector<16xf32>
    %15 = vector.shape_cast %14 : vector<16xf32> to vector<1x16xf32>
    %c0_12 = arith.constant 0 : index
    %c1 = arith.constant 1 : index
    %c0_13 = arith.constant 0 : index
    %16 = vector.load %arg6[%c0_12, %c1, %c0_13] : memref<1x2x16xf32, #tpu.memory_space<vmem>>, vector<1x1x16xf32>
    %17 = vector.shape_cast %16 : vector<1x1x16xf32> to vector<1x16xf32>
    %18 = vector.shape_cast %15 : vector<1x16xf32> to vector<1x1x16xf32>
    tpu.vector_store %arg6[%c0_12, %c1, %c0_13], %18 {strides = array<i32>} : memref<1x2x16xf32, #tpu.memory_space<vmem>>, vector<1x1x16xf32>,
    return
  }
  func.func @transform_0(%arg0: i32, %arg1: i32) -> (i32, i32) {
    %c0_i32 = arith.constant 0 : i32
    return %arg0, %arg1 : i32, i32
  }
  func.func @transform_1(%arg0: i32, %arg1: i32) -> (i32, i32) {
    %c0_i32 = arith.constant 0 : i32
    %c0_i32_0 = arith.constant 0 : i32
    %c0_i32_1 = arith.constant 0 : i32
    return %c0_i32, %c0_i32_0 : i32, i32
  }
  func.func @transform_2(%arg0: i32, %arg1: i32) -> (i32, i32) {
    %c0_i32 = arith.constant 0 : i32
    %c0_i32_0 = arith.constant 0 : i32
    %c0_i32_1 = arith.constant 0 : i32
    return %c0_i32, %c0_i32_0 : i32, i32
  }
  func.func @transform_3(%arg0: i32, %arg1: i32) -> (i32, i32) {
    %c0_i32 = arith.constant 0 : i32
    %c0_i32_0 = arith.constant 0 : i32
    return %arg0, %c0_i32 : i32, i32
  }
  func.func @transform_4(%arg0: i32, %arg1: i32) -> (i32, i32, i32) {
    %c0_i32 = arith.constant 0 : i32
    %c0_i32_0 = arith.constant 0 : i32
    %c0_i32_1 = arith.constant 0 : i32
    return %arg0, %c0_i32, %c0_i32_0 : i32, i32, i32
  }
}

module attributes {stable_mosaic.version = 11 : i64} {
  func.func @_scale_shift_relu_kernel(%arg0: i32, %arg1: memref<16x128xbf16, #tpu.memory_space<vmem>>, %arg2: memref<1x128xf32, #tpu.memory_space<vmem>>, %arg3: memref<1x128xf32, #tpu.memory_space<vmem>>, %arg4: memref<16x128xbf16, #tpu.memory_space<vmem>>) attributes {dimension_semantics = [#tpu.dimension_semantics<parallel>], iteration_bounds = array<i64: 1>, scalar_prefetch = 0 : i64, scratch_operands = 0 : i64, tpu.core_type = #tpu.core_type<tc>, window_params = [{transform_indices = @transform_0, window_bounds = array<i64: 16, 128>}, {pipeline_mode = #tpu.pipeline_mode<synchronous>, transform_indices = @transform_1, window_bounds = array<i64: 1, 128>}, {pipeline_mode = #tpu.pipeline_mode<synchronous>, transform_indices = @transform_2, window_bounds = array<i64: 1, 128>}, {transform_indices = @transform_3, window_bounds = array<i64: 16, 128>}]} {
    %c0 = arith.constant 0 : index
    %c0_0 = arith.constant 0 : index
    %0 = vector.load %arg1[%c0, %c0_0] : memref<16x128xbf16, #tpu.memory_space<vmem>>, vector<16x128xbf16>
    %1 = arith.extf %0 : vector<16x128xbf16> to vector<16x128xf32>
    %c0_1 = arith.constant 0 : index
    %c0_2 = arith.constant 0 : index
    %2 = vector.load %arg2[%c0_1, %c0_2] : memref<1x128xf32, #tpu.memory_space<vmem>>, vector<1x128xf32>
    %3 = vector.broadcast %2 : vector<1x128xf32> to vector<16x128xf32>
    %4 = arith.mulf %1, %3 : vector<16x128xf32>
    %c0_3 = arith.constant 0 : index
    %c0_4 = arith.constant 0 : index
    %5 = vector.load %arg3[%c0_3, %c0_4] : memref<1x128xf32, #tpu.memory_space<vmem>>, vector<1x128xf32>
    %6 = vector.broadcast %5 : vector<1x128xf32> to vector<16x128xf32>
    %7 = arith.addf %4, %6 : vector<16x128xf32>
    %cst = arith.constant 0.000000e+00 : f32
    %8 = vector.broadcast %cst : f32 to vector<16x128xf32>
    %9 = arith.maximumf %7, %8 : vector<16x128xf32>
    %10 = arith.truncf %9 : vector<16x128xf32> to vector<16x128xbf16>
    %c0_5 = arith.constant 0 : index
    %c0_6 = arith.constant 0 : index
    %11 = vector.load %arg4[%c0_5, %c0_6] : memref<16x128xbf16, #tpu.memory_space<vmem>>, vector<16x128xbf16>
    tpu.vector_store %arg4[%c0_5, %c0_6], %10 {strides = array<i32>} : memref<16x128xbf16, #tpu.memory_space<vmem>>, vector<16x128xbf16>,
    return
  }
  func.func @transform_0(%arg0: i32) -> (i32, i32) {
    %c0_i32 = arith.constant 0 : i32
    %c0_i32_0 = arith.constant 0 : i32
    return %arg0, %c0_i32 : i32, i32
  }
  func.func @transform_1(%arg0: i32) -> (i32, i32) {
    %c0_i32 = arith.constant 0 : i32
    %c0_i32_0 = arith.constant 0 : i32
    %c0_i32_1 = arith.constant 0 : i32
    return %c0_i32, %c0_i32_0 : i32, i32
  }
  func.func @transform_2(%arg0: i32) -> (i32, i32) {
    %c0_i32 = arith.constant 0 : i32
    %c0_i32_0 = arith.constant 0 : i32
    %c0_i32_1 = arith.constant 0 : i32
    return %c0_i32, %c0_i32_0 : i32, i32
  }
  func.func @transform_3(%arg0: i32) -> (i32, i32) {
    %c0_i32 = arith.constant 0 : i32
    %c0_i32_0 = arith.constant 0 : i32
    return %arg0, %c0_i32 : i32, i32
  }
}

module attributes {stable_mosaic.version = 11 : i64} {
  func.func @_conv_matmul_stats_kernel(%arg0: i32, %arg1: i32, %arg2: memref<64x432xbf16, #tpu.memory_space<vmem>>, %arg3: memref<432x16xbf16, #tpu.memory_space<vmem>>, %arg4: memref<1x16xf32, #tpu.memory_space<vmem>>, %arg5: memref<64x16xbf16, #tpu.memory_space<vmem>>, %arg6: memref<1x2x16xf32, #tpu.memory_space<vmem>>) attributes {dimension_semantics = [#tpu.dimension_semantics<parallel>, #tpu.dimension_semantics<arbitrary>], iteration_bounds = array<i64: 2, 1>, scalar_prefetch = 0 : i64, scratch_operands = 0 : i64, tpu.core_type = #tpu.core_type<tc>, window_params = [{transform_indices = @transform_0, window_bounds = array<i64: 64, 432>}, {pipeline_mode = #tpu.pipeline_mode<synchronous>, transform_indices = @transform_1, window_bounds = array<i64: 432, 16>}, {pipeline_mode = #tpu.pipeline_mode<synchronous>, transform_indices = @transform_2, window_bounds = array<i64: 1, 16>}, {transform_indices = @transform_3, window_bounds = array<i64: 64, 16>}, {transform_indices = @transform_4, window_bounds = array<i64: 1, 2, 16>}]} {
    %c0 = arith.constant 0 : index
    %c0_0 = arith.constant 0 : index
    %0 = vector.load %arg3[%c0, %c0_0] : memref<432x16xbf16, #tpu.memory_space<vmem>>, vector<432x16xbf16>
    %c0_1 = arith.constant 0 : index
    %c0_2 = arith.constant 0 : index
    %1 = vector.load %arg2[%c0_1, %c0_2] : memref<64x432xbf16, #tpu.memory_space<vmem>>, vector<64x432xbf16>
    %cst = arith.constant dense<0.000000e+00> : vector<64x16xf32>
    %2 = tpu.matmul %1, %0, %cst {dimension_numbers = #tpu.dot_dimension_numbers<[1], [0], [0], [1], [0, 0, 1, 1], [], []>} : vector<64x432xbf16>, vector<432x16xbf16>, vector<64x16xf32> -> vector<64x16xf32>
    %c0_3 = arith.constant 0 : index
    %c0_4 = arith.constant 0 : index
    %3 = vector.load %arg4[%c0_3, %c0_4] : memref<1x16xf32, #tpu.memory_space<vmem>>, vector<1x16xf32>
    %4 = vector.broadcast %3 : vector<1x16xf32> to vector<64x16xf32>
    %5 = arith.addf %2, %4 : vector<64x16xf32>
    %6 = arith.truncf %5 : vector<64x16xf32> to vector<64x16xbf16>
    %c0_5 = arith.constant 0 : index
    %c0_6 = arith.constant 0 : index
    %7 = vector.load %arg5[%c0_5, %c0_6] : memref<64x16xbf16, #tpu.memory_space<vmem>>, vector<64x16xbf16>
    tpu.vector_store %arg5[%c0_5, %c0_6], %6 {strides = array<i32>} : memref<64x16xbf16, #tpu.memory_space<vmem>>, vector<64x16xbf16>,
    %cst_7 = arith.constant dense<0.000000e+00> : vector<16xf32>
    %8 = vector.multi_reduction <add>, %5, %cst_7 [0] : vector<64x16xf32> to vector<16xf32>
    %9 = vector.shape_cast %8 : vector<16xf32> to vector<1x16xf32>
    %c0_8 = arith.constant 0 : index
    %c0_9 = arith.constant 0 : index
    %c0_10 = arith.constant 0 : index
    %10 = vector.load %arg6[%c0_8, %c0_9, %c0_10] : memref<1x2x16xf32, #tpu.memory_space<vmem>>, vector<1x1x16xf32>
    %11 = vector.shape_cast %10 : vector<1x1x16xf32> to vector<1x16xf32>
    %12 = vector.shape_cast %9 : vector<1x16xf32> to vector<1x1x16xf32>
    tpu.vector_store %arg6[%c0_8, %c0_9, %c0_10], %12 {strides = array<i32>} : memref<1x2x16xf32, #tpu.memory_space<vmem>>, vector<1x1x16xf32>,
    %13 = arith.mulf %5, %5 : vector<64x16xf32>
    %cst_11 = arith.constant dense<0.000000e+00> : vector<16xf32>
    %14 = vector.multi_reduction <add>, %13, %cst_11 [0] : vector<64x16xf32> to vector<16xf32>
    %15 = vector.shape_cast %14 : vector<16xf32> to vector<1x16xf32>
    %c0_12 = arith.constant 0 : index
    %c1 = arith.constant 1 : index
    %c0_13 = arith.constant 0 : index
    %16 = vector.load %arg6[%c0_12, %c1, %c0_13] : memref<1x2x16xf32, #tpu.memory_space<vmem>>, vector<1x1x16xf32>
    %17 = vector.shape_cast %16 : vector<1x1x16xf32> to vector<1x16xf32>
    %18 = vector.shape_cast %15 : vector<1x16xf32> to vector<1x1x16xf32>
    tpu.vector_store %arg6[%c0_12, %c1, %c0_13], %18 {strides = array<i32>} : memref<1x2x16xf32, #tpu.memory_space<vmem>>, vector<1x1x16xf32>,
    return
  }
  func.func @transform_0(%arg0: i32, %arg1: i32) -> (i32, i32) {
    %c0_i32 = arith.constant 0 : i32
    return %arg0, %arg1 : i32, i32
  }
  func.func @transform_1(%arg0: i32, %arg1: i32) -> (i32, i32) {
    %c0_i32 = arith.constant 0 : i32
    %c0_i32_0 = arith.constant 0 : i32
    %c0_i32_1 = arith.constant 0 : i32
    return %c0_i32, %c0_i32_0 : i32, i32
  }
  func.func @transform_2(%arg0: i32, %arg1: i32) -> (i32, i32) {
    %c0_i32 = arith.constant 0 : i32
    %c0_i32_0 = arith.constant 0 : i32
    %c0_i32_1 = arith.constant 0 : i32
    return %c0_i32, %c0_i32_0 : i32, i32
  }
  func.func @transform_3(%arg0: i32, %arg1: i32) -> (i32, i32) {
    %c0_i32 = arith.constant 0 : i32
    %c0_i32_0 = arith.constant 0 : i32
    return %arg0, %c0_i32 : i32, i32
  }
  func.func @transform_4(%arg0: i32, %arg1: i32) -> (i32, i32, i32) {
    %c0_i32 = arith.constant 0 : i32
    %c0_i32_0 = arith.constant 0 : i32
    %c0_i32_1 = arith.constant 0 : i32
    return %arg0, %c0_i32, %c0_i32_0 : i32, i32, i32
  }
}

module attributes {stable_mosaic.version = 11 : i64} {
  func.func @_conv_matmul_stats_kernel(%arg0: i32, %arg1: i32, %arg2: memref<8x128xbf16, #tpu.memory_space<vmem>>, %arg3: memref<128x16xbf16, #tpu.memory_space<vmem>>, %arg4: memref<1x16xf32, #tpu.memory_space<vmem>>, %arg5: memref<8x16xbf16, #tpu.memory_space<vmem>>, %arg6: memref<1x2x16xf32, #tpu.memory_space<vmem>>) attributes {dimension_semantics = [#tpu.dimension_semantics<parallel>, #tpu.dimension_semantics<arbitrary>], iteration_bounds = array<i64: 2, 1>, scalar_prefetch = 0 : i64, scratch_operands = 0 : i64, tpu.core_type = #tpu.core_type<tc>, window_params = [{transform_indices = @transform_0, window_bounds = array<i64: 8, 128>}, {pipeline_mode = #tpu.pipeline_mode<synchronous>, transform_indices = @transform_1, window_bounds = array<i64: 128, 16>}, {pipeline_mode = #tpu.pipeline_mode<synchronous>, transform_indices = @transform_2, window_bounds = array<i64: 1, 16>}, {transform_indices = @transform_3, window_bounds = array<i64: 8, 16>}, {transform_indices = @transform_4, window_bounds = array<i64: 1, 2, 16>}]} {
    %c0 = arith.constant 0 : index
    %c0_0 = arith.constant 0 : index
    %0 = vector.load %arg3[%c0, %c0_0] : memref<128x16xbf16, #tpu.memory_space<vmem>>, vector<128x16xbf16>
    %c0_1 = arith.constant 0 : index
    %c0_2 = arith.constant 0 : index
    %1 = vector.load %arg2[%c0_1, %c0_2] : memref<8x128xbf16, #tpu.memory_space<vmem>>, vector<8x128xbf16>
    %cst = arith.constant dense<0.000000e+00> : vector<8x16xf32>
    %2 = tpu.matmul %1, %0, %cst {dimension_numbers = #tpu.dot_dimension_numbers<[1], [0], [0], [1], [0, 0, 1, 1], [], []>} : vector<8x128xbf16>, vector<128x16xbf16>, vector<8x16xf32> -> vector<8x16xf32>
    %c0_3 = arith.constant 0 : index
    %c0_4 = arith.constant 0 : index
    %3 = vector.load %arg4[%c0_3, %c0_4] : memref<1x16xf32, #tpu.memory_space<vmem>>, vector<1x16xf32>
    %4 = vector.broadcast %3 : vector<1x16xf32> to vector<8x16xf32>
    %5 = arith.addf %2, %4 : vector<8x16xf32>
    %6 = arith.truncf %5 : vector<8x16xf32> to vector<8x16xbf16>
    %c0_5 = arith.constant 0 : index
    %c0_6 = arith.constant 0 : index
    %7 = vector.load %arg5[%c0_5, %c0_6] : memref<8x16xbf16, #tpu.memory_space<vmem>>, vector<8x16xbf16>
    tpu.vector_store %arg5[%c0_5, %c0_6], %6 {strides = array<i32>} : memref<8x16xbf16, #tpu.memory_space<vmem>>, vector<8x16xbf16>,
    %cst_7 = arith.constant dense<0.000000e+00> : vector<16xf32>
    %8 = vector.multi_reduction <add>, %5, %cst_7 [0] : vector<8x16xf32> to vector<16xf32>
    %9 = vector.shape_cast %8 : vector<16xf32> to vector<1x16xf32>
    %c0_8 = arith.constant 0 : index
    %c0_9 = arith.constant 0 : index
    %c0_10 = arith.constant 0 : index
    %10 = vector.load %arg6[%c0_8, %c0_9, %c0_10] : memref<1x2x16xf32, #tpu.memory_space<vmem>>, vector<1x1x16xf32>
    %11 = vector.shape_cast %10 : vector<1x1x16xf32> to vector<1x16xf32>
    %12 = vector.shape_cast %9 : vector<1x16xf32> to vector<1x1x16xf32>
    tpu.vector_store %arg6[%c0_8, %c0_9, %c0_10], %12 {strides = array<i32>} : memref<1x2x16xf32, #tpu.memory_space<vmem>>, vector<1x1x16xf32>,
    %13 = arith.mulf %5, %5 : vector<8x16xf32>
    %cst_11 = arith.constant dense<0.000000e+00> : vector<16xf32>
    %14 = vector.multi_reduction <add>, %13, %cst_11 [0] : vector<8x16xf32> to vector<16xf32>
    %15 = vector.shape_cast %14 : vector<16xf32> to vector<1x16xf32>
    %c0_12 = arith.constant 0 : index
    %c1 = arith.constant 1 : index
    %c0_13 = arith.constant 0 : index
    %16 = vector.load %arg6[%c0_12, %c1, %c0_13] : memref<1x2x16xf32, #tpu.memory_space<vmem>>, vector<1x1x16xf32>
    %17 = vector.shape_cast %16 : vector<1x1x16xf32> to vector<1x16xf32>
    %18 = vector.shape_cast %15 : vector<1x16xf32> to vector<1x1x16xf32>
    tpu.vector_store %arg6[%c0_12, %c1, %c0_13], %18 {strides = array<i32>} : memref<1x2x16xf32, #tpu.memory_space<vmem>>, vector<1x1x16xf32>,
    return
  }
  func.func @transform_0(%arg0: i32, %arg1: i32) -> (i32, i32) {
    %c0_i32 = arith.constant 0 : i32
    return %arg0, %arg1 : i32, i32
  }
  func.func @transform_1(%arg0: i32, %arg1: i32) -> (i32, i32) {
    %c0_i32 = arith.constant 0 : i32
    %c0_i32_0 = arith.constant 0 : i32
    %c0_i32_1 = arith.constant 0 : i32
    return %c0_i32, %c0_i32_0 : i32, i32
  }
  func.func @transform_2(%arg0: i32, %arg1: i32) -> (i32, i32) {
    %c0_i32 = arith.constant 0 : i32
    %c0_i32_0 = arith.constant 0 : i32
    %c0_i32_1 = arith.constant 0 : i32
    return %c0_i32, %c0_i32_0 : i32, i32
  }
  func.func @transform_3(%arg0: i32, %arg1: i32) -> (i32, i32) {
    %c0_i32 = arith.constant 0 : i32
    %c0_i32_0 = arith.constant 0 : i32
    return %arg0, %c0_i32 : i32, i32
  }
  func.func @transform_4(%arg0: i32, %arg1: i32) -> (i32, i32, i32) {
    %c0_i32 = arith.constant 0 : i32
    %c0_i32_0 = arith.constant 0 : i32
    %c0_i32_1 = arith.constant 0 : i32
    return %arg0, %c0_i32, %c0_i32_0 : i32, i32, i32
  }
}

module attributes {stable_mosaic.version = 11 : i64} {
  func.func @_scale_shift_relu_kernel(%arg0: i32, %arg1: memref<2x128xbf16, #tpu.memory_space<vmem>>, %arg2: memref<1x128xf32, #tpu.memory_space<vmem>>, %arg3: memref<1x128xf32, #tpu.memory_space<vmem>>, %arg4: memref<2x128xbf16, #tpu.memory_space<vmem>>) attributes {dimension_semantics = [#tpu.dimension_semantics<parallel>], iteration_bounds = array<i64: 1>, scalar_prefetch = 0 : i64, scratch_operands = 0 : i64, tpu.core_type = #tpu.core_type<tc>, window_params = [{transform_indices = @transform_0, window_bounds = array<i64: 2, 128>}, {pipeline_mode = #tpu.pipeline_mode<synchronous>, transform_indices = @transform_1, window_bounds = array<i64: 1, 128>}, {pipeline_mode = #tpu.pipeline_mode<synchronous>, transform_indices = @transform_2, window_bounds = array<i64: 1, 128>}, {transform_indices = @transform_3, window_bounds = array<i64: 2, 128>}]} {
    %c0 = arith.constant 0 : index
    %c0_0 = arith.constant 0 : index
    %0 = vector.load %arg1[%c0, %c0_0] : memref<2x128xbf16, #tpu.memory_space<vmem>>, vector<2x128xbf16>
    %1 = arith.extf %0 : vector<2x128xbf16> to vector<2x128xf32>
    %c0_1 = arith.constant 0 : index
    %c0_2 = arith.constant 0 : index
    %2 = vector.load %arg2[%c0_1, %c0_2] : memref<1x128xf32, #tpu.memory_space<vmem>>, vector<1x128xf32>
    %3 = vector.broadcast %2 : vector<1x128xf32> to vector<2x128xf32>
    %4 = arith.mulf %1, %3 : vector<2x128xf32>
    %c0_3 = arith.constant 0 : index
    %c0_4 = arith.constant 0 : index
    %5 = vector.load %arg3[%c0_3, %c0_4] : memref<1x128xf32, #tpu.memory_space<vmem>>, vector<1x128xf32>
    %6 = vector.broadcast %5 : vector<1x128xf32> to vector<2x128xf32>
    %7 = arith.addf %4, %6 : vector<2x128xf32>
    %cst = arith.constant 0.000000e+00 : f32
    %8 = vector.broadcast %cst : f32 to vector<2x128xf32>
    %9 = arith.maximumf %7, %8 : vector<2x128xf32>
    %10 = arith.truncf %9 : vector<2x128xf32> to vector<2x128xbf16>
    %c0_5 = arith.constant 0 : index
    %c0_6 = arith.constant 0 : index
    %11 = vector.load %arg4[%c0_5, %c0_6] : memref<2x128xbf16, #tpu.memory_space<vmem>>, vector<2x128xbf16>
    tpu.vector_store %arg4[%c0_5, %c0_6], %10 {strides = array<i32>} : memref<2x128xbf16, #tpu.memory_space<vmem>>, vector<2x128xbf16>,
    return
  }
  func.func @transform_0(%arg0: i32) -> (i32, i32) {
    %c0_i32 = arith.constant 0 : i32
    %c0_i32_0 = arith.constant 0 : i32
    return %arg0, %c0_i32 : i32, i32
  }
  func.func @transform_1(%arg0: i32) -> (i32, i32) {
    %c0_i32 = arith.constant 0 : i32
    %c0_i32_0 = arith.constant 0 : i32
    %c0_i32_1 = arith.constant 0 : i32
    return %c0_i32, %c0_i32_0 : i32, i32
  }
  func.func @transform_2(%arg0: i32) -> (i32, i32) {
    %c0_i32 = arith.constant 0 : i32
    %c0_i32_0 = arith.constant 0 : i32
    %c0_i32_1 = arith.constant 0 : i32
    return %c0_i32, %c0_i32_0 : i32, i32
  }
  func.func @transform_3(%arg0: i32) -> (i32, i32) {
    %c0_i32 = arith.constant 0 : i32
    %c0_i32_0 = arith.constant 0 : i32
    return %arg0, %c0_i32 : i32, i32
  }
}

module attributes {stable_mosaic.version = 11 : i64} {
  func.func @_conv_matmul_stats_kernel(%arg0: i32, %arg1: i32, %arg2: memref<8x432xbf16, #tpu.memory_space<vmem>>, %arg3: memref<432x32xbf16, #tpu.memory_space<vmem>>, %arg4: memref<1x32xf32, #tpu.memory_space<vmem>>, %arg5: memref<8x32xbf16, #tpu.memory_space<vmem>>, %arg6: memref<1x2x32xf32, #tpu.memory_space<vmem>>) attributes {dimension_semantics = [#tpu.dimension_semantics<parallel>, #tpu.dimension_semantics<arbitrary>], iteration_bounds = array<i64: 2, 1>, scalar_prefetch = 0 : i64, scratch_operands = 0 : i64, tpu.core_type = #tpu.core_type<tc>, window_params = [{transform_indices = @transform_0, window_bounds = array<i64: 8, 432>}, {pipeline_mode = #tpu.pipeline_mode<synchronous>, transform_indices = @transform_1, window_bounds = array<i64: 432, 32>}, {pipeline_mode = #tpu.pipeline_mode<synchronous>, transform_indices = @transform_2, window_bounds = array<i64: 1, 32>}, {transform_indices = @transform_3, window_bounds = array<i64: 8, 32>}, {transform_indices = @transform_4, window_bounds = array<i64: 1, 2, 32>}]} {
    %c0 = arith.constant 0 : index
    %c0_0 = arith.constant 0 : index
    %0 = vector.load %arg3[%c0, %c0_0] : memref<432x32xbf16, #tpu.memory_space<vmem>>, vector<432x32xbf16>
    %c0_1 = arith.constant 0 : index
    %c0_2 = arith.constant 0 : index
    %1 = vector.load %arg2[%c0_1, %c0_2] : memref<8x432xbf16, #tpu.memory_space<vmem>>, vector<8x432xbf16>
    %cst = arith.constant dense<0.000000e+00> : vector<8x32xf32>
    %2 = tpu.matmul %1, %0, %cst {dimension_numbers = #tpu.dot_dimension_numbers<[1], [0], [0], [1], [0, 0, 1, 1], [], []>} : vector<8x432xbf16>, vector<432x32xbf16>, vector<8x32xf32> -> vector<8x32xf32>
    %c0_3 = arith.constant 0 : index
    %c0_4 = arith.constant 0 : index
    %3 = vector.load %arg4[%c0_3, %c0_4] : memref<1x32xf32, #tpu.memory_space<vmem>>, vector<1x32xf32>
    %4 = vector.broadcast %3 : vector<1x32xf32> to vector<8x32xf32>
    %5 = arith.addf %2, %4 : vector<8x32xf32>
    %6 = arith.truncf %5 : vector<8x32xf32> to vector<8x32xbf16>
    %c0_5 = arith.constant 0 : index
    %c0_6 = arith.constant 0 : index
    %7 = vector.load %arg5[%c0_5, %c0_6] : memref<8x32xbf16, #tpu.memory_space<vmem>>, vector<8x32xbf16>
    tpu.vector_store %arg5[%c0_5, %c0_6], %6 {strides = array<i32>} : memref<8x32xbf16, #tpu.memory_space<vmem>>, vector<8x32xbf16>,
    %cst_7 = arith.constant dense<0.000000e+00> : vector<32xf32>
    %8 = vector.multi_reduction <add>, %5, %cst_7 [0] : vector<8x32xf32> to vector<32xf32>
    %9 = vector.shape_cast %8 : vector<32xf32> to vector<1x32xf32>
    %c0_8 = arith.constant 0 : index
    %c0_9 = arith.constant 0 : index
    %c0_10 = arith.constant 0 : index
    %10 = vector.load %arg6[%c0_8, %c0_9, %c0_10] : memref<1x2x32xf32, #tpu.memory_space<vmem>>, vector<1x1x32xf32>
    %11 = vector.shape_cast %10 : vector<1x1x32xf32> to vector<1x32xf32>
    %12 = vector.shape_cast %9 : vector<1x32xf32> to vector<1x1x32xf32>
    tpu.vector_store %arg6[%c0_8, %c0_9, %c0_10], %12 {strides = array<i32>} : memref<1x2x32xf32, #tpu.memory_space<vmem>>, vector<1x1x32xf32>,
    %13 = arith.mulf %5, %5 : vector<8x32xf32>
    %cst_11 = arith.constant dense<0.000000e+00> : vector<32xf32>
    %14 = vector.multi_reduction <add>, %13, %cst_11 [0] : vector<8x32xf32> to vector<32xf32>
    %15 = vector.shape_cast %14 : vector<32xf32> to vector<1x32xf32>
    %c0_12 = arith.constant 0 : index
    %c1 = arith.constant 1 : index
    %c0_13 = arith.constant 0 : index
    %16 = vector.load %arg6[%c0_12, %c1, %c0_13] : memref<1x2x32xf32, #tpu.memory_space<vmem>>, vector<1x1x32xf32>
    %17 = vector.shape_cast %16 : vector<1x1x32xf32> to vector<1x32xf32>
    %18 = vector.shape_cast %15 : vector<1x32xf32> to vector<1x1x32xf32>
    tpu.vector_store %arg6[%c0_12, %c1, %c0_13], %18 {strides = array<i32>} : memref<1x2x32xf32, #tpu.memory_space<vmem>>, vector<1x1x32xf32>,
    return
  }
  func.func @transform_0(%arg0: i32, %arg1: i32) -> (i32, i32) {
    %c0_i32 = arith.constant 0 : i32
    return %arg0, %arg1 : i32, i32
  }
  func.func @transform_1(%arg0: i32, %arg1: i32) -> (i32, i32) {
    %c0_i32 = arith.constant 0 : i32
    %c0_i32_0 = arith.constant 0 : i32
    %c0_i32_1 = arith.constant 0 : i32
    return %c0_i32, %c0_i32_0 : i32, i32
  }
  func.func @transform_2(%arg0: i32, %arg1: i32) -> (i32, i32) {
    %c0_i32 = arith.constant 0 : i32
    %c0_i32_0 = arith.constant 0 : i32
    %c0_i32_1 = arith.constant 0 : i32
    return %c0_i32, %c0_i32_0 : i32, i32
  }
  func.func @transform_3(%arg0: i32, %arg1: i32) -> (i32, i32) {
    %c0_i32 = arith.constant 0 : i32
    %c0_i32_0 = arith.constant 0 : i32
    return %arg0, %c0_i32 : i32, i32
  }
  func.func @transform_4(%arg0: i32, %arg1: i32) -> (i32, i32, i32) {
    %c0_i32 = arith.constant 0 : i32
    %c0_i32_0 = arith.constant 0 : i32
    %c0_i32_1 = arith.constant 0 : i32
    return %arg0, %c0_i32, %c0_i32_0 : i32, i32, i32
  }
}

module attributes {stable_mosaic.version = 11 : i64} {
  func.func @_scale_shift_relu_kernel(%arg0: i32, %arg1: memref<4x128xbf16, #tpu.memory_space<vmem>>, %arg2: memref<1x128xf32, #tpu.memory_space<vmem>>, %arg3: memref<1x128xf32, #tpu.memory_space<vmem>>, %arg4: memref<4x128xbf16, #tpu.memory_space<vmem>>) attributes {dimension_semantics = [#tpu.dimension_semantics<parallel>], iteration_bounds = array<i64: 1>, scalar_prefetch = 0 : i64, scratch_operands = 0 : i64, tpu.core_type = #tpu.core_type<tc>, window_params = [{transform_indices = @transform_0, window_bounds = array<i64: 4, 128>}, {pipeline_mode = #tpu.pipeline_mode<synchronous>, transform_indices = @transform_1, window_bounds = array<i64: 1, 128>}, {pipeline_mode = #tpu.pipeline_mode<synchronous>, transform_indices = @transform_2, window_bounds = array<i64: 1, 128>}, {transform_indices = @transform_3, window_bounds = array<i64: 4, 128>}]} {
    %c0 = arith.constant 0 : index
    %c0_0 = arith.constant 0 : index
    %0 = vector.load %arg1[%c0, %c0_0] : memref<4x128xbf16, #tpu.memory_space<vmem>>, vector<4x128xbf16>
    %1 = arith.extf %0 : vector<4x128xbf16> to vector<4x128xf32>
    %c0_1 = arith.constant 0 : index
    %c0_2 = arith.constant 0 : index
    %2 = vector.load %arg2[%c0_1, %c0_2] : memref<1x128xf32, #tpu.memory_space<vmem>>, vector<1x128xf32>
    %3 = vector.broadcast %2 : vector<1x128xf32> to vector<4x128xf32>
    %4 = arith.mulf %1, %3 : vector<4x128xf32>
    %c0_3 = arith.constant 0 : index
    %c0_4 = arith.constant 0 : index
    %5 = vector.load %arg3[%c0_3, %c0_4] : memref<1x128xf32, #tpu.memory_space<vmem>>, vector<1x128xf32>
    %6 = vector.broadcast %5 : vector<1x128xf32> to vector<4x128xf32>
    %7 = arith.addf %4, %6 : vector<4x128xf32>
    %cst = arith.constant 0.000000e+00 : f32
    %8 = vector.broadcast %cst : f32 to vector<4x128xf32>
    %9 = arith.maximumf %7, %8 : vector<4x128xf32>
    %10 = arith.truncf %9 : vector<4x128xf32> to vector<4x128xbf16>
    %c0_5 = arith.constant 0 : index
    %c0_6 = arith.constant 0 : index
    %11 = vector.load %arg4[%c0_5, %c0_6] : memref<4x128xbf16, #tpu.memory_space<vmem>>, vector<4x128xbf16>
    tpu.vector_store %arg4[%c0_5, %c0_6], %10 {strides = array<i32>} : memref<4x128xbf16, #tpu.memory_space<vmem>>, vector<4x128xbf16>,
    return
  }
  func.func @transform_0(%arg0: i32) -> (i32, i32) {
    %c0_i32 = arith.constant 0 : i32
    %c0_i32_0 = arith.constant 0 : i32
    return %arg0, %c0_i32 : i32, i32
  }
  func.func @transform_1(%arg0: i32) -> (i32, i32) {
    %c0_i32 = arith.constant 0 : i32
    %c0_i32_0 = arith.constant 0 : i32
    %c0_i32_1 = arith.constant 0 : i32
    return %c0_i32, %c0_i32_0 : i32, i32
  }
  func.func @transform_2(%arg0: i32) -> (i32, i32) {
    %c0_i32 = arith.constant 0 : i32
    %c0_i32_0 = arith.constant 0 : i32
    %c0_i32_1 = arith.constant 0 : i32
    return %c0_i32, %c0_i32_0 : i32, i32
  }
  func.func @transform_3(%arg0: i32) -> (i32, i32) {
    %c0_i32 = arith.constant 0 : i32
    %c0_i32_0 = arith.constant 0 : i32
    return %arg0, %c0_i32 : i32, i32
  }
}

module attributes {stable_mosaic.version = 11 : i64} {
  func.func @_conv_matmul_stats_kernel(%arg0: i32, %arg1: i32, %arg2: memref<8x32xbf16, #tpu.memory_space<vmem>>, %arg3: memref<32x128xbf16, #tpu.memory_space<vmem>>, %arg4: memref<1x128xf32, #tpu.memory_space<vmem>>, %arg5: memref<8x128xbf16, #tpu.memory_space<vmem>>, %arg6: memref<1x2x128xf32, #tpu.memory_space<vmem>>) attributes {dimension_semantics = [#tpu.dimension_semantics<parallel>, #tpu.dimension_semantics<arbitrary>], iteration_bounds = array<i64: 2, 1>, scalar_prefetch = 0 : i64, scratch_operands = 0 : i64, tpu.core_type = #tpu.core_type<tc>, window_params = [{transform_indices = @transform_0, window_bounds = array<i64: 8, 32>}, {pipeline_mode = #tpu.pipeline_mode<synchronous>, transform_indices = @transform_1, window_bounds = array<i64: 32, 128>}, {pipeline_mode = #tpu.pipeline_mode<synchronous>, transform_indices = @transform_2, window_bounds = array<i64: 1, 128>}, {transform_indices = @transform_3, window_bounds = array<i64: 8, 128>}, {transform_indices = @transform_4, window_bounds = array<i64: 1, 2, 128>}]} {
    %c0 = arith.constant 0 : index
    %c0_0 = arith.constant 0 : index
    %0 = vector.load %arg3[%c0, %c0_0] : memref<32x128xbf16, #tpu.memory_space<vmem>>, vector<32x128xbf16>
    %c0_1 = arith.constant 0 : index
    %c0_2 = arith.constant 0 : index
    %1 = vector.load %arg2[%c0_1, %c0_2] : memref<8x32xbf16, #tpu.memory_space<vmem>>, vector<8x32xbf16>
    %cst = arith.constant dense<0.000000e+00> : vector<8x128xf32>
    %2 = tpu.matmul %1, %0, %cst {dimension_numbers = #tpu.dot_dimension_numbers<[1], [0], [0], [1], [0, 0, 1, 1], [], []>} : vector<8x32xbf16>, vector<32x128xbf16>, vector<8x128xf32> -> vector<8x128xf32>
    %c0_3 = arith.constant 0 : index
    %c0_4 = arith.constant 0 : index
    %3 = vector.load %arg4[%c0_3, %c0_4] : memref<1x128xf32, #tpu.memory_space<vmem>>, vector<1x128xf32>
    %4 = vector.broadcast %3 : vector<1x128xf32> to vector<8x128xf32>
    %5 = arith.addf %2, %4 : vector<8x128xf32>
    %6 = arith.truncf %5 : vector<8x128xf32> to vector<8x128xbf16>
    %c0_5 = arith.constant 0 : index
    %c0_6 = arith.constant 0 : index
    %7 = vector.load %arg5[%c0_5, %c0_6] : memref<8x128xbf16, #tpu.memory_space<vmem>>, vector<8x128xbf16>
    tpu.vector_store %arg5[%c0_5, %c0_6], %6 {strides = array<i32>} : memref<8x128xbf16, #tpu.memory_space<vmem>>, vector<8x128xbf16>,
    %cst_7 = arith.constant dense<0.000000e+00> : vector<128xf32>
    %8 = vector.multi_reduction <add>, %5, %cst_7 [0] : vector<8x128xf32> to vector<128xf32>
    %9 = vector.shape_cast %8 : vector<128xf32> to vector<1x128xf32>
    %c0_8 = arith.constant 0 : index
    %c0_9 = arith.constant 0 : index
    %c0_10 = arith.constant 0 : index
    %10 = vector.load %arg6[%c0_8, %c0_9, %c0_10] : memref<1x2x128xf32, #tpu.memory_space<vmem>>, vector<1x1x128xf32>
    %11 = vector.shape_cast %10 : vector<1x1x128xf32> to vector<1x128xf32>
    %12 = vector.shape_cast %9 : vector<1x128xf32> to vector<1x1x128xf32>
    tpu.vector_store %arg6[%c0_8, %c0_9, %c0_10], %12 {strides = array<i32>} : memref<1x2x128xf32, #tpu.memory_space<vmem>>, vector<1x1x128xf32>,
    %13 = arith.mulf %5, %5 : vector<8x128xf32>
    %cst_11 = arith.constant dense<0.000000e+00> : vector<128xf32>
    %14 = vector.multi_reduction <add>, %13, %cst_11 [0] : vector<8x128xf32> to vector<128xf32>
    %15 = vector.shape_cast %14 : vector<128xf32> to vector<1x128xf32>
    %c0_12 = arith.constant 0 : index
    %c1 = arith.constant 1 : index
    %c0_13 = arith.constant 0 : index
    %16 = vector.load %arg6[%c0_12, %c1, %c0_13] : memref<1x2x128xf32, #tpu.memory_space<vmem>>, vector<1x1x128xf32>
    %17 = vector.shape_cast %16 : vector<1x1x128xf32> to vector<1x128xf32>
    %18 = vector.shape_cast %15 : vector<1x128xf32> to vector<1x1x128xf32>
    tpu.vector_store %arg6[%c0_12, %c1, %c0_13], %18 {strides = array<i32>} : memref<1x2x128xf32, #tpu.memory_space<vmem>>, vector<1x1x128xf32>,
    return
  }
  func.func @transform_0(%arg0: i32, %arg1: i32) -> (i32, i32) {
    %c0_i32 = arith.constant 0 : i32
    return %arg0, %arg1 : i32, i32
  }
  func.func @transform_1(%arg0: i32, %arg1: i32) -> (i32, i32) {
    %c0_i32 = arith.constant 0 : i32
    %c0_i32_0 = arith.constant 0 : i32
    %c0_i32_1 = arith.constant 0 : i32
    return %c0_i32, %c0_i32_0 : i32, i32
  }
  func.func @transform_2(%arg0: i32, %arg1: i32) -> (i32, i32) {
    %c0_i32 = arith.constant 0 : i32
    %c0_i32_0 = arith.constant 0 : i32
    %c0_i32_1 = arith.constant 0 : i32
    return %c0_i32, %c0_i32_0 : i32, i32
  }
  func.func @transform_3(%arg0: i32, %arg1: i32) -> (i32, i32) {
    %c0_i32 = arith.constant 0 : i32
    %c0_i32_0 = arith.constant 0 : i32
    return %arg0, %c0_i32 : i32, i32
  }
  func.func @transform_4(%arg0: i32, %arg1: i32) -> (i32, i32, i32) {
    %c0_i32 = arith.constant 0 : i32
    %c0_i32_0 = arith.constant 0 : i32
    %c0_i32_1 = arith.constant 0 : i32
    return %arg0, %c0_i32, %c0_i32_0 : i32, i32, i32
  }
}

module attributes {stable_mosaic.version = 11 : i64} {
  func.func @_conv_matmul_stats_kernel(%arg0: i32, %arg1: i32, %arg2: memref<64x16xbf16, #tpu.memory_space<vmem>>, %arg3: memref<16x64xbf16, #tpu.memory_space<vmem>>, %arg4: memref<1x64xf32, #tpu.memory_space<vmem>>, %arg5: memref<64x64xbf16, #tpu.memory_space<vmem>>, %arg6: memref<1x2x64xf32, #tpu.memory_space<vmem>>) attributes {dimension_semantics = [#tpu.dimension_semantics<parallel>, #tpu.dimension_semantics<arbitrary>], iteration_bounds = array<i64: 2, 1>, scalar_prefetch = 0 : i64, scratch_operands = 0 : i64, tpu.core_type = #tpu.core_type<tc>, window_params = [{transform_indices = @transform_0, window_bounds = array<i64: 64, 16>}, {pipeline_mode = #tpu.pipeline_mode<synchronous>, transform_indices = @transform_1, window_bounds = array<i64: 16, 64>}, {pipeline_mode = #tpu.pipeline_mode<synchronous>, transform_indices = @transform_2, window_bounds = array<i64: 1, 64>}, {transform_indices = @transform_3, window_bounds = array<i64: 64, 64>}, {transform_indices = @transform_4, window_bounds = array<i64: 1, 2, 64>}]} {
    %c0 = arith.constant 0 : index
    %c0_0 = arith.constant 0 : index
    %0 = vector.load %arg3[%c0, %c0_0] : memref<16x64xbf16, #tpu.memory_space<vmem>>, vector<16x64xbf16>
    %c0_1 = arith.constant 0 : index
    %c0_2 = arith.constant 0 : index
    %1 = vector.load %arg2[%c0_1, %c0_2] : memref<64x16xbf16, #tpu.memory_space<vmem>>, vector<64x16xbf16>
    %cst = arith.constant dense<0.000000e+00> : vector<64x64xf32>
    %2 = tpu.matmul %1, %0, %cst {dimension_numbers = #tpu.dot_dimension_numbers<[1], [0], [0], [1], [0, 0, 1, 1], [], []>} : vector<64x16xbf16>, vector<16x64xbf16>, vector<64x64xf32> -> vector<64x64xf32>
    %c0_3 = arith.constant 0 : index
    %c0_4 = arith.constant 0 : index
    %3 = vector.load %arg4[%c0_3, %c0_4] : memref<1x64xf32, #tpu.memory_space<vmem>>, vector<1x64xf32>
    %4 = vector.broadcast %3 : vector<1x64xf32> to vector<64x64xf32>
    %5 = arith.addf %2, %4 : vector<64x64xf32>
    %6 = arith.truncf %5 : vector<64x64xf32> to vector<64x64xbf16>
    %c0_5 = arith.constant 0 : index
    %c0_6 = arith.constant 0 : index
    %7 = vector.load %arg5[%c0_5, %c0_6] : memref<64x64xbf16, #tpu.memory_space<vmem>>, vector<64x64xbf16>
    tpu.vector_store %arg5[%c0_5, %c0_6], %6 {strides = array<i32>} : memref<64x64xbf16, #tpu.memory_space<vmem>>, vector<64x64xbf16>,
    %cst_7 = arith.constant dense<0.000000e+00> : vector<64xf32>
    %8 = vector.multi_reduction <add>, %5, %cst_7 [0] : vector<64x64xf32> to vector<64xf32>
    %9 = vector.shape_cast %8 : vector<64xf32> to vector<1x64xf32>
    %c0_8 = arith.constant 0 : index
    %c0_9 = arith.constant 0 : index
    %c0_10 = arith.constant 0 : index
    %10 = vector.load %arg6[%c0_8, %c0_9, %c0_10] : memref<1x2x64xf32, #tpu.memory_space<vmem>>, vector<1x1x64xf32>
    %11 = vector.shape_cast %10 : vector<1x1x64xf32> to vector<1x64xf32>
    %12 = vector.shape_cast %9 : vector<1x64xf32> to vector<1x1x64xf32>
    tpu.vector_store %arg6[%c0_8, %c0_9, %c0_10], %12 {strides = array<i32>} : memref<1x2x64xf32, #tpu.memory_space<vmem>>, vector<1x1x64xf32>,
    %13 = arith.mulf %5, %5 : vector<64x64xf32>
    %cst_11 = arith.constant dense<0.000000e+00> : vector<64xf32>
    %14 = vector.multi_reduction <add>, %13, %cst_11 [0] : vector<64x64xf32> to vector<64xf32>
    %15 = vector.shape_cast %14 : vector<64xf32> to vector<1x64xf32>
    %c0_12 = arith.constant 0 : index
    %c1 = arith.constant 1 : index
    %c0_13 = arith.constant 0 : index
    %16 = vector.load %arg6[%c0_12, %c1, %c0_13] : memref<1x2x64xf32, #tpu.memory_space<vmem>>, vector<1x1x64xf32>
    %17 = vector.shape_cast %16 : vector<1x1x64xf32> to vector<1x64xf32>
    %18 = vector.shape_cast %15 : vector<1x64xf32> to vector<1x1x64xf32>
    tpu.vector_store %arg6[%c0_12, %c1, %c0_13], %18 {strides = array<i32>} : memref<1x2x64xf32, #tpu.memory_space<vmem>>, vector<1x1x64xf32>,
    return
  }
  func.func @transform_0(%arg0: i32, %arg1: i32) -> (i32, i32) {
    %c0_i32 = arith.constant 0 : i32
    return %arg0, %arg1 : i32, i32
  }
  func.func @transform_1(%arg0: i32, %arg1: i32) -> (i32, i32) {
    %c0_i32 = arith.constant 0 : i32
    %c0_i32_0 = arith.constant 0 : i32
    %c0_i32_1 = arith.constant 0 : i32
    return %c0_i32, %c0_i32_0 : i32, i32
  }
  func.func @transform_2(%arg0: i32, %arg1: i32) -> (i32, i32) {
    %c0_i32 = arith.constant 0 : i32
    %c0_i32_0 = arith.constant 0 : i32
    %c0_i32_1 = arith.constant 0 : i32
    return %c0_i32, %c0_i32_0 : i32, i32
  }
  func.func @transform_3(%arg0: i32, %arg1: i32) -> (i32, i32) {
    %c0_i32 = arith.constant 0 : i32
    %c0_i32_0 = arith.constant 0 : i32
    return %arg0, %c0_i32 : i32, i32
  }
  func.func @transform_4(%arg0: i32, %arg1: i32) -> (i32, i32, i32) {
    %c0_i32 = arith.constant 0 : i32
    %c0_i32_0 = arith.constant 0 : i32
    %c0_i32_1 = arith.constant 0 : i32
    return %arg0, %c0_i32, %c0_i32_0 : i32, i32, i32
  }
}

module attributes {stable_mosaic.version = 11 : i64} {
  func.func @_conv_matmul_stats_kernel(%arg0: i32, %arg1: i32, %arg2: memref<64x864xbf16, #tpu.memory_space<vmem>>, %arg3: memref<864x16xbf16, #tpu.memory_space<vmem>>, %arg4: memref<1x16xf32, #tpu.memory_space<vmem>>, %arg5: memref<64x16xbf16, #tpu.memory_space<vmem>>, %arg6: memref<1x2x16xf32, #tpu.memory_space<vmem>>) attributes {dimension_semantics = [#tpu.dimension_semantics<parallel>, #tpu.dimension_semantics<arbitrary>], iteration_bounds = array<i64: 2, 1>, scalar_prefetch = 0 : i64, scratch_operands = 0 : i64, tpu.core_type = #tpu.core_type<tc>, window_params = [{transform_indices = @transform_0, window_bounds = array<i64: 64, 864>}, {pipeline_mode = #tpu.pipeline_mode<synchronous>, transform_indices = @transform_1, window_bounds = array<i64: 864, 16>}, {pipeline_mode = #tpu.pipeline_mode<synchronous>, transform_indices = @transform_2, window_bounds = array<i64: 1, 16>}, {transform_indices = @transform_3, window_bounds = array<i64: 64, 16>}, {transform_indices = @transform_4, window_bounds = array<i64: 1, 2, 16>}]} {
    %c0 = arith.constant 0 : index
    %c0_0 = arith.constant 0 : index
    %0 = vector.load %arg3[%c0, %c0_0] : memref<864x16xbf16, #tpu.memory_space<vmem>>, vector<864x16xbf16>
    %c0_1 = arith.constant 0 : index
    %c0_2 = arith.constant 0 : index
    %1 = vector.load %arg2[%c0_1, %c0_2] : memref<64x864xbf16, #tpu.memory_space<vmem>>, vector<64x864xbf16>
    %cst = arith.constant dense<0.000000e+00> : vector<64x16xf32>
    %2 = tpu.matmul %1, %0, %cst {dimension_numbers = #tpu.dot_dimension_numbers<[1], [0], [0], [1], [0, 0, 1, 1], [], []>} : vector<64x864xbf16>, vector<864x16xbf16>, vector<64x16xf32> -> vector<64x16xf32>
    %c0_3 = arith.constant 0 : index
    %c0_4 = arith.constant 0 : index
    %3 = vector.load %arg4[%c0_3, %c0_4] : memref<1x16xf32, #tpu.memory_space<vmem>>, vector<1x16xf32>
    %4 = vector.broadcast %3 : vector<1x16xf32> to vector<64x16xf32>
    %5 = arith.addf %2, %4 : vector<64x16xf32>
    %6 = arith.truncf %5 : vector<64x16xf32> to vector<64x16xbf16>
    %c0_5 = arith.constant 0 : index
    %c0_6 = arith.constant 0 : index
    %7 = vector.load %arg5[%c0_5, %c0_6] : memref<64x16xbf16, #tpu.memory_space<vmem>>, vector<64x16xbf16>
    tpu.vector_store %arg5[%c0_5, %c0_6], %6 {strides = array<i32>} : memref<64x16xbf16, #tpu.memory_space<vmem>>, vector<64x16xbf16>,
    %cst_7 = arith.constant dense<0.000000e+00> : vector<16xf32>
    %8 = vector.multi_reduction <add>, %5, %cst_7 [0] : vector<64x16xf32> to vector<16xf32>
    %9 = vector.shape_cast %8 : vector<16xf32> to vector<1x16xf32>
    %c0_8 = arith.constant 0 : index
    %c0_9 = arith.constant 0 : index
    %c0_10 = arith.constant 0 : index
    %10 = vector.load %arg6[%c0_8, %c0_9, %c0_10] : memref<1x2x16xf32, #tpu.memory_space<vmem>>, vector<1x1x16xf32>
    %11 = vector.shape_cast %10 : vector<1x1x16xf32> to vector<1x16xf32>
    %12 = vector.shape_cast %9 : vector<1x16xf32> to vector<1x1x16xf32>
    tpu.vector_store %arg6[%c0_8, %c0_9, %c0_10], %12 {strides = array<i32>} : memref<1x2x16xf32, #tpu.memory_space<vmem>>, vector<1x1x16xf32>,
    %13 = arith.mulf %5, %5 : vector<64x16xf32>
    %cst_11 = arith.constant dense<0.000000e+00> : vector<16xf32>
    %14 = vector.multi_reduction <add>, %13, %cst_11 [0] : vector<64x16xf32> to vector<16xf32>
    %15 = vector.shape_cast %14 : vector<16xf32> to vector<1x16xf32>
    %c0_12 = arith.constant 0 : index
    %c1 = arith.constant 1 : index
    %c0_13 = arith.constant 0 : index
    %16 = vector.load %arg6[%c0_12, %c1, %c0_13] : memref<1x2x16xf32, #tpu.memory_space<vmem>>, vector<1x1x16xf32>
    %17 = vector.shape_cast %16 : vector<1x1x16xf32> to vector<1x16xf32>
    %18 = vector.shape_cast %15 : vector<1x16xf32> to vector<1x1x16xf32>
    tpu.vector_store %arg6[%c0_12, %c1, %c0_13], %18 {strides = array<i32>} : memref<1x2x16xf32, #tpu.memory_space<vmem>>, vector<1x1x16xf32>,
    return
  }
  func.func @transform_0(%arg0: i32, %arg1: i32) -> (i32, i32) {
    %c0_i32 = arith.constant 0 : i32
    return %arg0, %arg1 : i32, i32
  }
  func.func @transform_1(%arg0: i32, %arg1: i32) -> (i32, i32) {
    %c0_i32 = arith.constant 0 : i32
    %c0_i32_0 = arith.constant 0 : i32
    %c0_i32_1 = arith.constant 0 : i32
    return %c0_i32, %c0_i32_0 : i32, i32
  }
  func.func @transform_2(%arg0: i32, %arg1: i32) -> (i32, i32) {
    %c0_i32 = arith.constant 0 : i32
    %c0_i32_0 = arith.constant 0 : i32
    %c0_i32_1 = arith.constant 0 : i32
    return %c0_i32, %c0_i32_0 : i32, i32
  }
  func.func @transform_3(%arg0: i32, %arg1: i32) -> (i32, i32) {
    %c0_i32 = arith.constant 0 : i32
    %c0_i32_0 = arith.constant 0 : i32
    return %arg0, %c0_i32 : i32, i32
  }
  func.func @transform_4(%arg0: i32, %arg1: i32) -> (i32, i32, i32) {
    %c0_i32 = arith.constant 0 : i32
    %c0_i32_0 = arith.constant 0 : i32
    %c0_i32_1 = arith.constant 0 : i32
    return %arg0, %c0_i32, %c0_i32_0 : i32, i32, i32
  }
}

module attributes {stable_mosaic.version = 11 : i64} {
  func.func @_conv_matmul_stats_kernel(%arg0: i32, %arg1: i32, %arg2: memref<512x432xbf16, #tpu.memory_space<vmem>>, %arg3: memref<432x8xbf16, #tpu.memory_space<vmem>>, %arg4: memref<1x8xf32, #tpu.memory_space<vmem>>, %arg5: memref<512x8xbf16, #tpu.memory_space<vmem>>, %arg6: memref<1x2x8xf32, #tpu.memory_space<vmem>>) attributes {dimension_semantics = [#tpu.dimension_semantics<parallel>, #tpu.dimension_semantics<arbitrary>], iteration_bounds = array<i64: 2, 1>, scalar_prefetch = 0 : i64, scratch_operands = 0 : i64, tpu.core_type = #tpu.core_type<tc>, window_params = [{transform_indices = @transform_0, window_bounds = array<i64: 512, 432>}, {pipeline_mode = #tpu.pipeline_mode<synchronous>, transform_indices = @transform_1, window_bounds = array<i64: 432, 8>}, {pipeline_mode = #tpu.pipeline_mode<synchronous>, transform_indices = @transform_2, window_bounds = array<i64: 1, 8>}, {transform_indices = @transform_3, window_bounds = array<i64: 512, 8>}, {transform_indices = @transform_4, window_bounds = array<i64: 1, 2, 8>}]} {
    %c0 = arith.constant 0 : index
    %c0_0 = arith.constant 0 : index
    %0 = vector.load %arg3[%c0, %c0_0] : memref<432x8xbf16, #tpu.memory_space<vmem>>, vector<432x8xbf16>
    %c0_1 = arith.constant 0 : index
    %c0_2 = arith.constant 0 : index
    %1 = vector.load %arg2[%c0_1, %c0_2] : memref<512x432xbf16, #tpu.memory_space<vmem>>, vector<512x432xbf16>
    %cst = arith.constant dense<0.000000e+00> : vector<512x8xf32>
    %2 = tpu.matmul %1, %0, %cst {dimension_numbers = #tpu.dot_dimension_numbers<[1], [0], [0], [1], [0, 0, 1, 1], [], []>} : vector<512x432xbf16>, vector<432x8xbf16>, vector<512x8xf32> -> vector<512x8xf32>
    %c0_3 = arith.constant 0 : index
    %c0_4 = arith.constant 0 : index
    %3 = vector.load %arg4[%c0_3, %c0_4] : memref<1x8xf32, #tpu.memory_space<vmem>>, vector<1x8xf32>
    %4 = vector.broadcast %3 : vector<1x8xf32> to vector<512x8xf32>
    %5 = arith.addf %2, %4 : vector<512x8xf32>
    %6 = arith.truncf %5 : vector<512x8xf32> to vector<512x8xbf16>
    %c0_5 = arith.constant 0 : index
    %c0_6 = arith.constant 0 : index
    %7 = vector.load %arg5[%c0_5, %c0_6] : memref<512x8xbf16, #tpu.memory_space<vmem>>, vector<512x8xbf16>
    tpu.vector_store %arg5[%c0_5, %c0_6], %6 {strides = array<i32>} : memref<512x8xbf16, #tpu.memory_space<vmem>>, vector<512x8xbf16>,
    %cst_7 = arith.constant dense<0.000000e+00> : vector<8xf32>
    %8 = vector.multi_reduction <add>, %5, %cst_7 [0] : vector<512x8xf32> to vector<8xf32>
    %9 = vector.shape_cast %8 : vector<8xf32> to vector<1x8xf32>
    %c0_8 = arith.constant 0 : index
    %c0_9 = arith.constant 0 : index
    %c0_10 = arith.constant 0 : index
    %10 = vector.load %arg6[%c0_8, %c0_9, %c0_10] : memref<1x2x8xf32, #tpu.memory_space<vmem>>, vector<1x1x8xf32>
    %11 = vector.shape_cast %10 : vector<1x1x8xf32> to vector<1x8xf32>
    %12 = vector.shape_cast %9 : vector<1x8xf32> to vector<1x1x8xf32>
    tpu.vector_store %arg6[%c0_8, %c0_9, %c0_10], %12 {strides = array<i32>} : memref<1x2x8xf32, #tpu.memory_space<vmem>>, vector<1x1x8xf32>,
    %13 = arith.mulf %5, %5 : vector<512x8xf32>
    %cst_11 = arith.constant dense<0.000000e+00> : vector<8xf32>
    %14 = vector.multi_reduction <add>, %13, %cst_11 [0] : vector<512x8xf32> to vector<8xf32>
    %15 = vector.shape_cast %14 : vector<8xf32> to vector<1x8xf32>
    %c0_12 = arith.constant 0 : index
    %c1 = arith.constant 1 : index
    %c0_13 = arith.constant 0 : index
    %16 = vector.load %arg6[%c0_12, %c1, %c0_13] : memref<1x2x8xf32, #tpu.memory_space<vmem>>, vector<1x1x8xf32>
    %17 = vector.shape_cast %16 : vector<1x1x8xf32> to vector<1x8xf32>
    %18 = vector.shape_cast %15 : vector<1x8xf32> to vector<1x1x8xf32>
    tpu.vector_store %arg6[%c0_12, %c1, %c0_13], %18 {strides = array<i32>} : memref<1x2x8xf32, #tpu.memory_space<vmem>>, vector<1x1x8xf32>,
    return
  }
  func.func @transform_0(%arg0: i32, %arg1: i32) -> (i32, i32) {
    %c0_i32 = arith.constant 0 : i32
    return %arg0, %arg1 : i32, i32
  }
  func.func @transform_1(%arg0: i32, %arg1: i32) -> (i32, i32) {
    %c0_i32 = arith.constant 0 : i32
    %c0_i32_0 = arith.constant 0 : i32
    %c0_i32_1 = arith.constant 0 : i32
    return %c0_i32, %c0_i32_0 : i32, i32
  }
  func.func @transform_2(%arg0: i32, %arg1: i32) -> (i32, i32) {
    %c0_i32 = arith.constant 0 : i32
    %c0_i32_0 = arith.constant 0 : i32
    %c0_i32_1 = arith.constant 0 : i32
    return %c0_i32, %c0_i32_0 : i32, i32
  }
  func.func @transform_3(%arg0: i32, %arg1: i32) -> (i32, i32) {
    %c0_i32 = arith.constant 0 : i32
    %c0_i32_0 = arith.constant 0 : i32
    return %arg0, %c0_i32 : i32, i32
  }
  func.func @transform_4(%arg0: i32, %arg1: i32) -> (i32, i32, i32) {
    %c0_i32 = arith.constant 0 : i32
    %c0_i32_0 = arith.constant 0 : i32
    %c0_i32_1 = arith.constant 0 : i32
    return %arg0, %c0_i32, %c0_i32_0 : i32, i32, i32
  }
}

module attributes {stable_mosaic.version = 11 : i64} {
  func.func @_conv_matmul_stats_kernel(%arg0: i32, %arg1: i32, %arg2: memref<512x216xbf16, #tpu.memory_space<vmem>>, %arg3: memref<216x1xbf16, #tpu.memory_space<vmem>>, %arg4: memref<1x1xf32, #tpu.memory_space<vmem>>, %arg5: memref<512x1xf32, #tpu.memory_space<vmem>>, %arg6: memref<1x2x1xf32, #tpu.memory_space<vmem>>) attributes {dimension_semantics = [#tpu.dimension_semantics<parallel>, #tpu.dimension_semantics<arbitrary>], iteration_bounds = array<i64: 2, 1>, scalar_prefetch = 0 : i64, scratch_operands = 0 : i64, tpu.core_type = #tpu.core_type<tc>, window_params = [{transform_indices = @transform_0, window_bounds = array<i64: 512, 216>}, {pipeline_mode = #tpu.pipeline_mode<synchronous>, transform_indices = @transform_1, window_bounds = array<i64: 216, 1>}, {pipeline_mode = #tpu.pipeline_mode<synchronous>, transform_indices = @transform_2, window_bounds = array<i64: 1, 1>}, {transform_indices = @transform_3, window_bounds = array<i64: 512, 1>}, {transform_indices = @transform_4, window_bounds = array<i64: 1, 2, 1>}]} {
    %c0 = arith.constant 0 : index
    %c0_0 = arith.constant 0 : index
    %0 = vector.load %arg3[%c0, %c0_0] : memref<216x1xbf16, #tpu.memory_space<vmem>>, vector<216x1xbf16>
    %c0_1 = arith.constant 0 : index
    %c0_2 = arith.constant 0 : index
    %1 = vector.load %arg2[%c0_1, %c0_2] : memref<512x216xbf16, #tpu.memory_space<vmem>>, vector<512x216xbf16>
    %cst = arith.constant dense<0.000000e+00> : vector<512x1xf32>
    %2 = tpu.matmul %1, %0, %cst {dimension_numbers = #tpu.dot_dimension_numbers<[1], [0], [0], [1], [0, 0, 1, 1], [], []>} : vector<512x216xbf16>, vector<216x1xbf16>, vector<512x1xf32> -> vector<512x1xf32>
    %c0_3 = arith.constant 0 : index
    %c0_4 = arith.constant 0 : index
    %3 = vector.load %arg4[%c0_3, %c0_4] : memref<1x1xf32, #tpu.memory_space<vmem>>, vector<1x1xf32>
    %4 = vector.broadcast %3 : vector<1x1xf32> to vector<512x1xf32>
    %5 = arith.addf %2, %4 : vector<512x1xf32>
    %c0_5 = arith.constant 0 : index
    %c0_6 = arith.constant 0 : index
    %6 = vector.load %arg5[%c0_5, %c0_6] : memref<512x1xf32, #tpu.memory_space<vmem>>, vector<512x1xf32>
    tpu.vector_store %arg5[%c0_5, %c0_6], %5 {strides = array<i32>} : memref<512x1xf32, #tpu.memory_space<vmem>>, vector<512x1xf32>,
    %cst_7 = arith.constant dense<0.000000e+00> : vector<1xf32>
    %7 = vector.multi_reduction <add>, %5, %cst_7 [0] : vector<512x1xf32> to vector<1xf32>
    %8 = vector.shape_cast %7 : vector<1xf32> to vector<1x1xf32>
    %c0_8 = arith.constant 0 : index
    %c0_9 = arith.constant 0 : index
    %c0_10 = arith.constant 0 : index
    %9 = vector.load %arg6[%c0_8, %c0_9, %c0_10] : memref<1x2x1xf32, #tpu.memory_space<vmem>>, vector<1x1x1xf32>
    %10 = vector.shape_cast %9 : vector<1x1x1xf32> to vector<1x1xf32>
    %11 = vector.shape_cast %8 : vector<1x1xf32> to vector<1x1x1xf32>
    tpu.vector_store %arg6[%c0_8, %c0_9, %c0_10], %11 {strides = array<i32>} : memref<1x2x1xf32, #tpu.memory_space<vmem>>, vector<1x1x1xf32>,
    %12 = arith.mulf %5, %5 : vector<512x1xf32>
    %cst_11 = arith.constant dense<0.000000e+00> : vector<1xf32>
    %13 = vector.multi_reduction <add>, %12, %cst_11 [0] : vector<512x1xf32> to vector<1xf32>
    %14 = vector.shape_cast %13 : vector<1xf32> to vector<1x1xf32>
    %c0_12 = arith.constant 0 : index
    %c1 = arith.constant 1 : index
    %c0_13 = arith.constant 0 : index
    %15 = vector.load %arg6[%c0_12, %c1, %c0_13] : memref<1x2x1xf32, #tpu.memory_space<vmem>>, vector<1x1x1xf32>
    %16 = vector.shape_cast %15 : vector<1x1x1xf32> to vector<1x1xf32>
    %17 = vector.shape_cast %14 : vector<1x1xf32> to vector<1x1x1xf32>
    tpu.vector_store %arg6[%c0_12, %c1, %c0_13], %17 {strides = array<i32>} : memref<1x2x1xf32, #tpu.memory_space<vmem>>, vector<1x1x1xf32>,
    return
  }
  func.func @transform_0(%arg0: i32, %arg1: i32) -> (i32, i32) {
    %c0_i32 = arith.constant 0 : i32
    return %arg0, %arg1 : i32, i32
  }
  func.func @transform_1(%arg0: i32, %arg1: i32) -> (i32, i32) {
    %c0_i32 = arith.constant 0 : i32
    %c0_i32_0 = arith.constant 0 : i32
    %c0_i32_1 = arith.constant 0 : i32
    return %c0_i32, %c0_i32_0 : i32, i32
  }
  func.func @transform_2(%arg0: i32, %arg1: i32) -> (i32, i32) {
    %c0_i32 = arith.constant 0 : i32
    %c0_i32_0 = arith.constant 0 : i32
    %c0_i32_1 = arith.constant 0 : i32
    return %c0_i32, %c0_i32_0 : i32, i32
  }
  func.func @transform_3(%arg0: i32, %arg1: i32) -> (i32, i32) {
    %c0_i32 = arith.constant 0 : i32
    %c0_i32_0 = arith.constant 0 : i32
    return %arg0, %c0_i32 : i32, i32
  }
  func.func @transform_4(%arg0: i32, %arg1: i32) -> (i32, i32, i32) {
    %c0_i32 = arith.constant 0 : i32
    %c0_i32_0 = arith.constant 0 : i32
    %c0_i32_1 = arith.constant 0 : i32
    return %arg0, %c0_i32, %c0_i32_0 : i32, i32, i32
  }
}

</mosaic_0001>

<bundles_post_ra>
// kernel: tile.141
= control target key start
LH: loop header
LB: loop body
LE: loop exit
PB: predicated region body
PF: predicated region fallthrough
CT: control target
= control target key end

     0   :  { %s28_s0 = inlined_call_operand.vmem [shape: f32[8], index: 0, kind: input, shape index: {}]   ;;  %s29_s1 = inlined_call_operand.vmem [shape: f32[16,8], index: 1, kind: output, shape index: {}]  }
   0x1   :  { %v4_v0 = vld [vmem:[%s28_s0] ss:$0 sm:$0xff] }
   0x2   :  { %5 = vst [vmem:[%s29_s1] sm:$0xff] %v4_v0 }
   0x3   :  { %8 = vst [vmem:[%s29_s1 + $0x8] sm:$0xff] %v4_v0 }

// kernel: tile.146
= control target key start
LH: loop header
LB: loop body
LE: loop exit
PB: predicated region body
PF: predicated region fallthrough
CT: control target
= control target key end

     0   :  { %s131_s10 = smov 120   ;;  %s132_s11 = smov 104   ;;  %vm3_vm0 = vcmask 64512   ;;  %vm9_vm1 = vcmask 1048512   ;;  %vm15_vm2 = vcmask 982912   ;;  %vm21_vm3 = vcmask 917312   ;;  %s207_s0 = inlined_call_operand.vmem [shape: f32[16,8], index: 0, kind: input, shape index: {}]   ;;  %s208_s1 = inlined_call_operand.vmem [shape: f32[1,128], index: 1, kind: output, shape index: {}]  }
   0x1   :  { %v101_v0 = vld [vmem:[%s207_s0 + $0xf] sm:$0x1]   ;;  %v103_v1 = vld [vmem:[%s207_s0 + $0xd] sm:$0x1]   ;;  %v105_v2 = vld [vmem:[%s207_s0 + $0xb] sm:$0x1]  }
   0x2   :  { %7 = vrot.lane.b32.xlu0 %v101_v0, %s131_s10  ;;  %19 = vrot.lane.b32.xlu1 %v103_v1, %s132_s11  ;;  %s133_s14 = smov 88   ;;  %v102_v3 = vld [vmem:[%s207_s0 + $0xe] sm:$0x1]   ;;  %v104_v4 = vld [vmem:[%s207_s0 + $0xc] sm:$0x1]   ;;  %s134_s19 = smov 112  }
   0x3   :  { %31 = vrot.lane.b32.xlu2 %v105_v2, %s133_s14  ;;  %s135_s20 = smov 96   ;;  %v106_v5 = vld [vmem:[%s207_s0 + $0xa] sm:$0x1]   ;;  %s136_s23 = smov 80   ;;  %v107_v6 = vld [vmem:[%s207_s0 + $0x9] sm:$0x1]  }
   0x4   :  { %v108_v7 = vld [vmem:[%s207_s0 + $0x8] sm:$0x1]   ;;  %s137_s28 = smov 72   ;;  %s138_s29 = smov 64   ;;  %v109_v8 = vld [vmem:[%s207_s0 + $0x7] sm:$0x1]  }
   0x5   :  { %s139_s3 = smov 56   ;;  %v110_v9 = vld [vmem:[%s207_s0 + $0x6] sm:$0x1]   ;;  %v111_v10 = vld [vmem:[%s207_s0 + $0x5] sm:$0x1]   ;;  %s140_s8 = smov 48  }
   0x6   :  { %s141_s9 = smov 40   ;;  %v112_v11 = vld [vmem:[%s207_s0 + $0x4] sm:$0x1]   ;;  %s142_s12 = smov 32   ;;  %v113_v12 = vld [vmem:[%s207_s0 + $0x3] sm:$0x1]  }
   0x7   :  { %v114_v13 = vld [vmem:[%s207_s0 + $0x2] sm:$0x1]   ;;  %s143_s17 = smov 24   ;;  %s144_s18 = smov 16   ;;  %v115_v14 = vld [vmem:[%s207_s0 + $0x1] sm:$0x1]  }
   0x8   :  { %s145_s21 = smov 8   ;;  %v2_v15 = vld [vmem:[%s207_s0] sm:$0x1]   ;;  %vm27_vm4 = vcmask 851712   ;;  %vm33_vm5 = vcmask 786112   ;;  %vm39_vm6 = vcmask 720512  }
   0x9   :  { %4 = vst.msk [vmem:[#allocation0] sm:$0x1] %vm3_vm0, %v2_v15   ;;  %vm45_vm7 = vcmask 654912   ;;  %vm51_vm8 = vcmask 589312   ;;  %vm57_vm9 = vcmask 523712   ;;  %vm63_vm10 = vcmask 458112  }
   0xa   :  { %13 = vrot.lane.b32.xlu0 %v102_v3, %s134_s19  ;;  %25 = vrot.lane.b32.xlu1 %v104_v4, %s135_s20  ;;  %vm69_vm11 = vcmask 392512   ;;  %vm75_vm12 = vcmask 326912   ;;  %vm81_vm13 = vcmask 261312   ;;  %vm87_vm14 = vcmask 195712  }
   0xb   :  { %37 = vrot.lane.b32.xlu2 %v106_v5, %s136_s23  ;;  %vm93_vm15 = vcmask 130112  }
  0x12   :  { %43 = vrot.lane.b32.xlu0 %v107_v6, %s137_s28  ;;  %49 = vrot.lane.b32.xlu1 %v108_v7, %s138_s29 }
  0x13   :  { %55 = vrot.lane.b32.xlu2 %v109_v8, %s139_s3 }
  0x1a   :  { %61 = vrot.lane.b32.xlu0 %v110_v9, %s140_s8  ;;  %67 = vrot.lane.b32.xlu1 %v111_v10, %s141_s9 }
  0x1b   :  { %73 = vrot.lane.b32.xlu2 %v112_v11, %s142_s12 }
  0x22   :  { %79 = vrot.lane.b32.xlu0 %v113_v12, %s143_s17  ;;  %85 = vrot.lane.b32.xlu1 %v114_v13, %s144_s18 }
  0x23   :  { %91 = vrot.lane.b32.xlu2 %v115_v14, %s145_s21 }
  0x5d   :  { %v32_v16 = vpop.permute.xlu2 %31  }
  0x65   :  { %v38_v17 = vpop.permute.xlu2 %37  }
  0x6d   :  { %v56_v18 = vpop.permute.xlu2 %55  }
  0x74   :  { %v8_v19 = vpop.permute.xlu0 %7   ;;  %v20_v20 = vpop.permute.xlu1 %19  }
  0x75   :  { %10 = vst.msk [vmem:[#allocation0] sm:$0x1] %vm9_vm1, %v8_v19   ;;  %v74_v21 = vpop.permute.xlu2 %73  }
  0x7c   :  { %v14_v22 = vpop.permute.xlu0 %13   ;;  %v26_v23 = vpop.permute.xlu1 %25  }
  0x7d   :  { %16 = vst.msk [vmem:[#allocation0] sm:$0x1] %vm15_vm2, %v14_v22   ;;  %v92_v24 = vpop.permute.xlu2 %91  }
  0x7e   :  { %22 = vst.msk [vmem:[#allocation0] sm:$0x1] %vm21_vm3, %v20_v20  }
  0x7f   :  { %28 = vst.msk [vmem:[#allocation0] sm:$0x1] %vm27_vm4, %v26_v23  }
  0x80   :  { %34 = vst.msk [vmem:[#allocation0] sm:$0x1] %vm33_vm5, %v32_v16  }
  0x81   :  { %40 = vst.msk [vmem:[#allocation0] sm:$0x1] %vm39_vm6, %v38_v17  }
  0x84   :  { %v44_v25 = vpop.permute.xlu0 %43   ;;  %v50_v26 = vpop.permute.xlu1 %49  }
  0x85   :  { %46 = vst.msk [vmem:[#allocation0] sm:$0x1] %vm45_vm7, %v44_v25  }
  0x86   :  { %52 = vst.msk [vmem:[#allocation0] sm:$0x1] %vm51_vm8, %v50_v26  }
  0x87   :  { %58 = vst.msk [vmem:[#allocation0] sm:$0x1] %vm57_vm9, %v56_v18  }
  0x8c   :  { %v62_v27 = vpop.permute.xlu0 %61   ;;  %v68_v28 = vpop.permute.xlu1 %67  }
  0x8d   :  { %64 = vst.msk [vmem:[#allocation0] sm:$0x1] %vm63_vm10, %v62_v27  }
  0x8e   :  { %70 = vst.msk [vmem:[#allocation0] sm:$0x1] %vm69_vm11, %v68_v28  }
  0x8f   :  { %76 = vst.msk [vmem:[#allocation0] sm:$0x1] %vm75_vm12, %v74_v21  }
  0x94   :  { %v80_v29 = vpop.permute.xlu0 %79   ;;  %v86_v30 = vpop.permute.xlu1 %85  }
  0x95   :  { %82 = vst.msk [vmem:[#allocation0] sm:$0x1] %vm81_vm13, %v80_v29  }
  0x96   :  { %88 = vst.msk [vmem:[#allocation0] sm:$0x1] %vm87_vm14, %v86_v30  }
  0x97   :  { %94 = vst.msk [vmem:[#allocation0] sm:$0x1] %vm93_vm15, %v92_v24  }
  0x9e   :  { %v97_v31 = vld [vmem:[#allocation0] sm:$0x1] }
  0x9f   :  { %100 = vst [vmem:[%s208_s1] sm:$0x1] %v97_v31 }

// kernel: net_forward.28
= control target key start
LH: loop header
LB: loop body
LE: loop exit
PB: predicated region body
PF: predicated region fallthrough
CT: control target
= control target key end

     0   :  { %s176_s0 = inlined_call_operand.vmem [shape: bf16[64,128], index: 0, kind: input, shape index: {}]   ;;  %s177_s1 = inlined_call_operand.vmem [shape: f32[1,128], index: 1, kind: input, shape index: {}]   ;;  %s178_s2 = inlined_call_operand.vmem [shape: f32[1,128], index: 2, kind: input, shape index: {}]   ;;  %s179_s3 = inlined_call_operand.vmem [shape: bf16[64,128], index: 3, kind: output, shape index: {}]  }
   0x1   :  { %v83_v0 = vld [vmem:[%s176_s0] sm:$0xff]   ;;  %v118_v5 = vld [vmem:[%s176_s0 + $0x8] sm:$0xff]   ;;  %v119_v8 = vld [vmem:[%s176_s0 + $0x10] sm:$0xff]  }
   0x2   :  { %v124_v1 = vld [vmem:[%s177_s1] ss:$0 sm:$0xff]  ;;  %v84_v2 = vunpack.c.l.bf16 %v83_v0  ;;  %v85_v3 = vunpack.c.h.bf16 %v83_v0  ;;  %v88_v6 = vunpack.c.l.bf16 %v118_v5  ;;  %v89_v7 = vunpack.c.h.bf16 %v118_v5  ;;  %v120_v9 = vld [vmem:[%s176_s0 + $0x18] sm:$0xff]  }
   0x3   :  { %v125_v4 = vld [vmem:[%s178_s2] ss:$0 sm:$0xff]  ;;  %v92_v12 = vunpack.c.l.bf16 %v119_v8  ;;  %v93_v13 = vunpack.c.h.bf16 %v119_v8  ;;  %v96_v16 = vunpack.c.l.bf16 %v120_v9  ;;  %v97_v17 = vunpack.c.h.bf16 %v120_v9 }
   0x4   :  { %v34_v10 = vmul.f32 %v124_v1, %v84_v2  ;;  %v35_v11 = vmul.f32 %v124_v1, %v85_v3  ;;  %v36_v14 = vmul.f32 %v124_v1, %v88_v6  ;;  %v37_v15 = vmul.f32 %v124_v1, %v89_v7 }
   0x5   :  { %v38_v20 = vmul.f32 %v124_v1, %v92_v12  ;;  %v39_v21 = vmul.f32 %v124_v1, %v93_v13  ;;  %v40_v24 = vmul.f32 %v124_v1, %v96_v16  ;;  %v41_v25 = vmul.f32 %v124_v1, %v97_v17 }
   0x6   :  { %v46_v18 = vadd.f32 %v125_v4, %v34_v10  ;;  %v47_v19 = vadd.f32 %v125_v4, %v35_v11  ;;  %v48_v22 = vadd.f32 %v125_v4, %v36_v14  ;;  %v49_v23 = vadd.f32 %v125_v4, %v37_v15 }
   0x7   :  { %v50_v28 = vadd.f32 %v125_v4, %v38_v20  ;;  %v51_v29 = vadd.f32 %v125_v4, %v39_v21  ;;  %v52_v32 = vadd.f32 %v125_v4, %v40_v24  ;;  %v53_v33 = vadd.f32 %v125_v4, %v41_v25 }
   0x8   :  { %v54_v26 = vmax.f32 %v46_v18, 0.0  ;;  %v55_v27 = vmax.f32 %v47_v19, 0.0  ;;  %v56_v30 = vmax.f32 %v48_v22, 0.0  ;;  %v57_v31 = vmax.f32 %v49_v23, 0.0 }
   0x9   :  { %v58_v35 = vmax.f32 %v50_v28, 0.0  ;;  %v59_v36 = vmax.f32 %v51_v29, 0.0  ;;  %v60_v38 = vmax.f32 %v52_v32, 0.0  ;;  %v61_v39 = vmax.f32 %v53_v33, 0.0 }
   0xa   :  { %v101_v34 = vpack.c.bf16 %v55_v27, %v54_v26  ;;  %v106_v37 = vpack.c.bf16 %v57_v31, %v56_v30 }
   0xb   :  { %v111_v40 = vpack.c.bf16 %v59_v36, %v58_v35  ;;  %v116_v41 = vpack.c.bf16 %v61_v39, %v60_v38 }
   0xc   :  { %102 = vst [vmem:[%s179_s3] sm:$0xff] %v101_v34  }
   0xd   :  { %121 = vst [vmem:[%s179_s3 + $0x8] sm:$0xff] %v106_v37  }
   0xe   :  { %122 = vst [vmem:[%s179_s3 + $0x10] sm:$0xff] %v111_v40  }
   0xf   :  { %123 = vst [vmem:[%s179_s3 + $0x18] sm:$0xff] %v116_v41  }

// kernel: net_forward.27
= control target key start
LH: loop header
LB: loop body
LE: loop exit
PB: predicated region body
PF: predicated region fallthrough
CT: control target
= control target key end

     0   :  { %s1610_s15 = smov 0   ;;  %s1612_s16 = smov 0   ;;  %s2458_s0 = inlined_call_operand.vmem [shape: bf16[1024,27], index: 0, kind: input, shape index: {}]   ;;  %s2459_s1 = inlined_call_operand.vmem [shape: bf16[27,8], index: 1, kind: input, shape index: {}]   ;;  %s2460_s2 = inlined_call_operand.vmem [shape: f32[1,8], index: 2, kind: input, shape index: {}]   ;;  %s2461_s3 = inlined_call_operand.vmem [shape: bf16[1024,8], index: 3, kind: output, shape index: {0}]   ;;  %s2462_s4 = inlined_call_operand.vmem [shape: f32[2,2,8], index: 4, kind: output, shape index: {1}]  }
   0x1   :  { %s1614_s17 = smov 0  }
   0x2 LB: > { %s27_s18 = sadd.s32 1, %s1578_s16  ;;  %p1318_p0 = scmp.ge.s32.totalorder %s1582_s17, 1  ;;  %s1582_s17 = sphi %s1614_s17, %s15_s17   ;;  %s1578_s16 = sphi %s1612_s16, %s2464_s16   ;;  %s1574_s15 = sphi %s1610_s15, %s2463_s15  }
   0x3   : > { %p29_p1 = scmp.ge.s32.totalorder %s27_s18, 2  ;;  %p183_p2 = scmp.lt.s32.totalorder %s1582_s17, 3 }
   0x5   : > { %s2466_s18 = smov (%p29_p1, %s27_s18), 0  ;;  %p184_p3 = pnand %p1318_p0, %p183_p2 }
   0x6   : > { %s1319_s23 = sshll.u32 (!%p184_p3), %s1574_s15, 6  ;;  %p231_p5 = scmp.lt.s32.totalorder (!%p184_p3), %s1574_s15, 1 }
   0x7   : > { %187 = sbr.rel (%p184_p3) target bundleno = 387 (0x183), region = 32  ;;  %p217_p4 = scmp.lt.s32.totalorder (!%p184_p3), %s1319_s23, 127 }
   0xc   : > { %v1458_v0 = vld [vmem:[%s2459_s1 + $0x8] sm:$0xf]  ;;  %v1495_v1 = vld [vmem:[%s2459_s1 + $0x8] sm:$0x30]  ;;  %vm576_vm0 = vcmask 1044480   ;;  %vm577_vm1 = vcmask 1045504  }
   0xd   : > { %v1459_v2 = vor.u32 %v1495_v1, %v1458_v0  ;;  %v1584_v3 = vmov 65535   ;;  %s2468_s23 = smov (!%p217_p4, %s1319_s23), 127  ;;  %v1494_v7 = vld [vmem:[%s2459_s1] sm:$0xff]  ;;  %vm479_vm2 = vcmask 220160   ;;  %vm816_vm3 = vcmask 60416   ;;  %s2470_s15 = smov (!%p231_p5, %s1574_s15), 1 }
   0xe   : > { %v578_v4 = vsel %vm576_vm0, 4294967295, %v1584_v3  ;;  %s1320_s26 = sshll.u32 %s2468_s23, 2  ;;  %v1709_v36 = vld [vmem:[%s2460_s2] ss:$0 sm:$0xff]  ;;  %vm881_vm4 = vcmask 64512   ;;  %s1323_s9 = sshll.u32 %s2470_s15, 1 }
   0xf   : > { %v579_v5 = vsel %vm577_vm1, %v578_v4, 0  ;;  %s1648_s29 = scalar_lea.vmem %s2458_s0, %s1320_s26  ;;  %s1720_s8 = scalar_lea.vmem %s2461_s3, %s1320_s26  ;;  %vm1015_vm5 = vcmask 57344  }
  0x10   : > { %v581_v6 = vand.u32 %v1459_v2, %v579_v5  ;;  %v1496_v8 = vld [vmem:[%s1648_s29] sm:$0xff]  ;;  %v1497_v10 = vld [vmem:[%s1648_s29 + $0x8] sm:$0xff]  ;;  %v1498_v13 = vld [vmem:[%s1648_s29 + $0x10] sm:$0xff]  ;;  %s234_s12 = scalar_lea.vmem %s2462_s4, %s1323_s9 }
  0x11   : > { %v1504_v9 = vld [vmem:[%s1648_s29 + $0x40] sm:$0xff]  ;;  %v1505_v11 = vld [vmem:[%s1648_s29 + $0x48] sm:$0xff]  ;;  %v1506_v14 = vld [vmem:[%s1648_s29 + $0x50] sm:$0xff] }
  0x12   : > { %589 = vmatpush.bf16.msra.mxu0 %v581_v6  ;;  %1528 = vmatpush.bf16.msra.mxu1 %v581_v6  ;;  %v1512_v12 = vld [vmem:[%s1648_s29 + $0x80] sm:$0xff]  ;;  %v1513_v15 = vld [vmem:[%s1648_s29 + $0x88] sm:$0xff]  ;;  %v1499_v16 = vld [vmem:[%s1648_s29 + $0x18] sm:$0xff] }
  0x13   : > { %1529 = vmatpush.bf16.msra.mxu2 %v581_v6  ;;  %1530 = vmatpush.bf16.msra.mxu3 %v581_v6  ;;  %v1507_v17 = vld [vmem:[%s1648_s29 + $0x58] sm:$0xff]  ;;  %v1514_v18 = vld [vmem:[%s1648_s29 + $0x90] sm:$0xff]  ;;  %v1520_v19 = vld [vmem:[%s1648_s29 + $0xc0] sm:$0xff] }
  0x14   : > { %v1500_v20 = vld [vmem:[%s1648_s29 + $0x20] sm:$0xff]  ;;  %v1515_v22 = vld [vmem:[%s1648_s29 + $0x98] sm:$0xff]  ;;  %v1521_v23 = vld [vmem:[%s1648_s29 + $0xc8] sm:$0xff] }
  0x15   : > { %v1508_v21 = vld [vmem:[%s1648_s29 + $0x60] sm:$0xff]  ;;  %v1501_v24 = vld [vmem:[%s1648_s29 + $0x28] sm:$0xff]  ;;  %v1522_v27 = vld [vmem:[%s1648_s29 + $0xd0] sm:$0xff] }
  0x16   : > { %590 = vmatpush.bf16.msra.mxu0 %v1494_v7  ;;  %1531 = vmatpush.bf16.msra.mxu1 %v1494_v7  ;;  %v1509_v25 = vld [vmem:[%s1648_s29 + $0x68] sm:$0xff]  ;;  %v1516_v26 = vld [vmem:[%s1648_s29 + $0xa0] sm:$0xff]  ;;  %v1502_v28 = vld [vmem:[%s1648_s29 + $0x30] sm:$0xff] }
  0x17   : > { %1532 = vmatpush.bf16.msra.mxu2 %v1494_v7  ;;  %1533 = vmatpush.bf16.msra.mxu3 %v1494_v7  ;;  %v1510_v29 = vld [vmem:[%s1648_s29 + $0x70] sm:$0xff]  ;;  %v1517_v30 = vld [vmem:[%s1648_s29 + $0xa8] sm:$0xff]  ;;  %v1523_v31 = vld [vmem:[%s1648_s29 + $0xd8] sm:$0xff] }
  0x18   : > { %v1503_v32 = vld [vmem:[%s1648_s29 + $0x38] sm:$0xff]  ;;  %v1518_v34 = vld [vmem:[%s1648_s29 + $0xb0] sm:$0xff]  ;;  %v1524_v35 = vld [vmem:[%s1648_s29 + $0xe0] sm:$0xff] }
  0x19   : > { %1460 = vmatmul.msk.bf16.vlgmr.msra.gmra.mxu0 %vm479_vm2, %v1496_v8  ;;  %1468 = vmatmul.msk.bf16.vlgmr.msra.gmra.mxu1 %vm479_vm2, %v1504_v9  ;;  %v1511_v33 = vld [vmem:[%s1648_s29 + $0x78] sm:$0xff]  ;;  %v1525_v44 = vld [vmem:[%s1648_s29 + $0xe8] sm:$0xff]  ;;  %v1526_v3 = vld [vmem:[%s1648_s29 + $0xf0] sm:$0xff] }
  0x1a   : > { %1476 = vmatmul.msk.bf16.vlgmr.msra.gmra.mxu2 %vm479_vm2, %v1512_v12  ;;  %1484 = vmatmul.msk.bf16.vlgmr.msra.gmra.mxu3 %vm479_vm2, %v1520_v19  ;;  %v1519_v43 = vld [vmem:[%s1648_s29 + $0xb8] sm:$0xff] }
  0x29   : > { %1461 = vmatmul.msk.bf16.gmra.mxu0 %vm479_vm2, %v1497_v10  ;;  %1469 = vmatmul.msk.bf16.gmra.mxu1 %vm479_vm2, %v1505_v11 }
  0x2a   : > { %1477 = vmatmul.msk.bf16.gmra.mxu2 %vm479_vm2, %v1513_v15  ;;  %1485 = vmatmul.msk.bf16.gmra.mxu3 %vm479_vm2, %v1521_v23 }
  0x39   : > { %1462 = vmatmul.msk.bf16.gmra.mxu0 %vm479_vm2, %v1498_v13  ;;  %1470 = vmatmul.msk.bf16.gmra.mxu1 %vm479_vm2, %v1506_v14 }
  0x3a   : > { %1478 = vmatmul.msk.bf16.gmra.mxu2 %vm479_vm2, %v1514_v18  ;;  %1486 = vmatmul.msk.bf16.gmra.mxu3 %vm479_vm2, %v1522_v27 }
  0x49   : > { %1463 = vmatmul.msk.bf16.gmra.mxu0 %vm479_vm2, %v1499_v16  ;;  %1471 = vmatmul.msk.bf16.gmra.mxu1 %vm479_vm2, %v1507_v17 }
  0x4a   : > { %1479 = vmatmul.msk.bf16.gmra.mxu2 %vm479_vm2, %v1515_v22  ;;  %1487 = vmatmul.msk.bf16.gmra.mxu3 %vm479_vm2, %v1523_v31  ;;  %v1527_v31 = vld [vmem:[%s1648_s29 + $0xf8] sm:$0xff] }
  0x59   : > { %1464 = vmatmul.msk.bf16.gmra.mxu0 %vm479_vm2, %v1500_v20  ;;  %1472 = vmatmul.msk.bf16.gmra.mxu1 %vm479_vm2, %v1508_v21 }
  0x5a   : > { %1480 = vmatmul.msk.bf16.gmra.mxu2 %vm479_vm2, %v1516_v26  ;;  %1488 = vmatmul.msk.bf16.gmra.mxu3 %vm479_vm2, %v1524_v35 }
  0x69   : > { %1465 = vmatmul.msk.bf16.gmra.mxu0 %vm479_vm2, %v1501_v24  ;;  %1473 = vmatmul.msk.bf16.gmra.mxu1 %vm479_vm2, %v1509_v25 }
  0x6a   : > { %1481 = vmatmul.msk.bf16.gmra.mxu2 %vm479_vm2, %v1517_v30  ;;  %1489 = vmatmul.msk.bf16.gmra.mxu3 %vm479_vm2, %v1525_v44 }
  0x79   : > { %1466 = vmatmul.msk.bf16.gmra.mxu0 %vm479_vm2, %v1502_v28  ;;  %1474 = vmatmul.msk.bf16.gmra.mxu1 %vm479_vm2, %v1510_v29 }
  0x7a   : > { %1482 = vmatmul.msk.bf16.gmra.mxu2 %vm479_vm2, %v1518_v34  ;;  %1490 = vmatmul.msk.bf16.gmra.mxu3 %vm479_vm2, %v1526_v3 }
  0x89   : > { %1467 = vmatmul.msk.bf16.gmra.mxu0 %vm479_vm2, %v1503_v32  ;;  %1475 = vmatmul.msk.bf16.gmra.mxu1 %vm479_vm2, %v1511_v33 }
  0x8a   : > { %1483 = vmatmul.msk.bf16.gmra.mxu2 %vm479_vm2, %v1519_v43  ;;  %1491 = vmatmul.msk.bf16.gmra.mxu3 %vm479_vm2, %v1527_v31 }
  0x96   : > { %v592_v37 = vpop.f32.mrf.mxu0  ;;  %v632_v38 = vpop.f32.mrf.mxu1 }
  0x97   : > { %v593_v39 = vadd.f32 %v1709_v36, %v592_v37  ;;  %v1713_v40 = vadd.f32 %v1709_v36, %v632_v38 }
  0x99   : > { %v752_v41 = vpack.c.bf16 %v593_v39, %v593_v39  ;;  %v768_v42 = vpack.c.bf16 %v1713_v40, %v1713_v40  ;;  %v1017_v47 = vmul.f32 %v593_v39, %v593_v39  ;;  %v882_v50 = vsel %vm881_vm4, %v593_v39, 0.0 }
  0x9b   : > { %817 = vst.msk [vmem:[%s1720_s8] sm:$0xf] %vm816_vm3, %v752_v41  ;;  %v1081_v56 = vsel %vm881_vm4, %v1017_v47, 0.0 }
  0x9c   : > { %833 = vst.msk [vmem:[%s1720_s8 + $0x40] sm:$0xf] %vm816_vm3, %v768_v42 }
  0x9d   : > { %v672_v11 = vpop.f32.mrf.mxu2 }
  0x9e   : > { %v594_v45 = vpop.f32.mrf.mxu0  ;;  %v634_v46 = vpop.f32.mrf.mxu1  ;;  %v1773_v19 = vadd.f32 %v1709_v36, %v672_v11 }
  0x9f   : > { %v595_v48 = vadd.f32 %v1709_v36, %v594_v45  ;;  %v1734_v49 = vadd.f32 %v1709_v36, %v634_v46 }
  0xa0   : > { %v784_v22 = vpack.c.bf16 %v1773_v19, %v1773_v19 }
  0xa1   : > { %v753_v51 = vpack.c.bf16 %v595_v48, %v595_v48  ;;  %v883_v52 = vsel %vm881_vm4, %v595_v48, 0.0  ;;  %v1018_v53 = vmul.f32 %v595_v48, %v595_v48  ;;  %v769_v54 = vpack.c.bf16 %v1734_v49, %v1734_v49 }
  0xa2   : > { %v884_v55 = vadd.f32 %v883_v52, %v882_v50  ;;  %849 = vst.msk [vmem:[%s1720_s8 + $0x80] sm:$0xf] %vm816_vm3, %v784_v22 }
  0xa3   : > { %818 = vst.msk [vmem:[%s1720_s8 + $0x4] sm:$0xf] %vm816_vm3, %v753_v51  ;;  %v1082_v57 = vsel %vm881_vm4, %v1018_v53, 0.0 }
  0xa4   : > { %v1083_v58 = vadd.f32 %v1082_v57, %v1081_v56  ;;  %834 = vst.msk [vmem:[%s1720_s8 + $0x44] sm:$0xf] %vm816_vm3, %v769_v54 }
  0xa5   : > { %v674_v25 = vpop.f32.mrf.mxu2 }
  0xa6   : > { %v597_v59 = vpop.f32.mrf.mxu0  ;;  %v637_v60 = vpop.f32.mrf.mxu1  ;;  %v1784_v26 = vadd.f32 %v1709_v36, %v674_v25 }
  0xa7   : > { %v598_v61 = vadd.f32 %v1709_v36, %v597_v59  ;;  %v1748_v62 = vadd.f32 %v1709_v36, %v637_v60 }
  0xa8   : > { %v785_v33 = vpack.c.bf16 %v1784_v26, %v1784_v26 }
  0xa9   : > { %v754_v63 = vpack.c.bf16 %v598_v61, %v598_v61  ;;  %v885_v0 = vsel %vm881_vm4, %v598_v61, 0.0  ;;  %v1019_v1 = vmul.f32 %v598_v61, %v598_v61  ;;  %v770_v2 = vpack.c.bf16 %v1748_v62, %v1748_v62 }
  0xaa   : > { %v886_v4 = vadd.f32 %v885_v0, %v884_v55  ;;  %850 = vst.msk [vmem:[%s1720_s8 + $0x84] sm:$0xf] %vm816_vm3, %v785_v33 }
  0xab   : > { %819 = vst.msk [vmem:[%s1720_s8 + $0x8] sm:$0xf] %vm816_vm3, %v754_v63  ;;  %v1084_v5 = vsel %vm881_vm4, %v1019_v1, 0.0  ;;  %v712_v63 = vpop.f32.mrf.mxu3 }
  0xac   : > { %v1085_v6 = vadd.f32 %v1084_v5, %v1083_v58  ;;  %835 = vst.msk [vmem:[%s1720_s8 + $0x48] sm:$0xf] %vm816_vm3, %v770_v2  ;;  %v1864_v3 = vadd.f32 %v1709_v36, %v712_v63 }
  0xad   : > { %v677_v42 = vpop.f32.mrf.mxu2 }
  0xae   : > { %v599_v7 = vpop.f32.mrf.mxu0  ;;  %v639_v8 = vpop.f32.mrf.mxu1  ;;  %v1819_v45 = vadd.f32 %v1709_v36, %v677_v42 }
  0xaf   : > { %v600_v9 = vadd.f32 %v1709_v36, %v599_v7  ;;  %v1762_v10 = vadd.f32 %v1709_v36, %v639_v8  ;;  %v800_v7 = vpack.c.bf16 %v1864_v3, %v1864_v3 }
  0xb0   : > { %v786_v48 = vpack.c.bf16 %v1819_v45, %v1819_v45 }
  0xb1   : > { %v755_v12 = vpack.c.bf16 %v600_v9, %v600_v9  ;;  %v887_v13 = vsel %vm881_vm4, %v600_v9, 0.0  ;;  %v1020_v14 = vmul.f32 %v600_v9, %v600_v9  ;;  %v771_v15 = vpack.c.bf16 %v1762_v10, %v1762_v10  ;;  %865 = vst.msk [vmem:[%s1720_s8 + $0xc0] sm:$0xf] %vm816_vm3, %v800_v7 }
  0xb2   : > { %v888_v16 = vadd.f32 %v887_v13, %v886_v4  ;;  %851 = vst.msk [vmem:[%s1720_s8 + $0x88] sm:$0xf] %vm816_vm3, %v786_v48 }
  0xb3   : > { %820 = vst.msk [vmem:[%s1720_s8 + $0xc] sm:$0xf] %vm816_vm3, %v755_v12  ;;  %v1086_v17 = vsel %vm881_vm4, %v1020_v14, 0.0  ;;  %v714_v12 = vpop.f32.mrf.mxu3 }
  0xb4   : > { %v1087_v18 = vadd.f32 %v1086_v17, %v1085_v6  ;;  %836 = vst.msk [vmem:[%s1720_s8 + $0x4c] sm:$0xf] %vm816_vm3, %v771_v15  ;;  %v1882_v14 = vadd.f32 %v1709_v36, %v714_v12 }
  0xb5   : > { %v679_v52 = vpop.f32.mrf.mxu2 }
  0xb6   : > { %v602_v20 = vpop.f32.mrf.mxu0  ;;  %v642_v21 = vpop.f32.mrf.mxu1  ;;  %v1832_v53 = vadd.f32 %v1709_v36, %v679_v52 }
  0xb7   : > { %v603_v23 = vadd.f32 %v1709_v36, %v602_v20  ;;  %v1779_v24 = vadd.f32 %v1709_v36, %v642_v21 }
  0xb8   : > { %v787_v56 = vpack.c.bf16 %v1832_v53, %v1832_v53 }
  0xb9   : > { %v756_v27 = vpack.c.bf16 %v603_v23, %v603_v23  ;;  %v889_v28 = vsel %vm881_vm4, %v603_v23, 0.0  ;;  %v1021_v29 = vmul.f32 %v603_v23, %v603_v23  ;;  %v772_v30 = vpack.c.bf16 %v1779_v24, %v1779_v24 }
  0xba   : > { %v1790_v32 = vadd.f32 %v889_v28, %v888_v16  ;;  %852 = vst.msk [vmem:[%s1720_s8 + $0x8c] sm:$0xf] %vm816_vm3, %v787_v56 }
  0xbb   : > { %821 = vst.msk [vmem:[%s1720_s8 + $0x10] sm:$0xf] %vm816_vm3, %v756_v27  ;;  %v1088_v34 = vsel %vm881_vm4, %v1021_v29, 0.0  ;;  %v717_v27 = vpop.f32.mrf.mxu3 }
  0xbc   : > { %v1798_v35 = vadd.f32 %v1088_v34, %v1087_v18  ;;  %837 = vst.msk [vmem:[%s1720_s8 + $0x50] sm:$0xf] %vm816_vm3, %v772_v30  ;;  %v801_v18 = vpack.c.bf16 %v1882_v14, %v1882_v14  ;;  %v1920_v31 = vadd.f32 %v1709_v36, %v717_v27 }
  0xbd   : > { %v682_v61 = vpop.f32.mrf.mxu2 }
  0xbe   : > { %v604_v37 = vpop.f32.mrf.mxu0  ;;  %v644_v38 = vpop.f32.mrf.mxu1  ;;  %v1861_v2 = vadd.f32 %v1709_v36, %v682_v61  ;;  %866 = vst.msk [vmem:[%s1720_s8 + $0xc4] sm:$0xf] %vm816_vm3, %v801_v18 }
  0xbf   : > { %v1805_v39 = vadd.f32 %v1709_v36, %v604_v37  ;;  %v1808_v41 = vadd.f32 %v1709_v36, %v644_v38  ;;  %v802_v38 = vpack.c.bf16 %v1920_v31, %v1920_v31 }
  0xc0   : > { %v788_v6 = vpack.c.bf16 %v1861_v2, %v1861_v2 }
  0xc1   : > { %v757_v43 = vpack.c.bf16 %v1805_v39, %v1805_v39  ;;  %v773_v44 = vpack.c.bf16 %v1808_v41, %v1808_v41  ;;  %867 = vst.msk [vmem:[%s1720_s8 + $0xc8] sm:$0xf] %vm816_vm3, %v802_v38 }
  0xc2   : > { %853 = vst.msk [vmem:[%s1720_s8 + $0x90] sm:$0xf] %vm816_vm3, %v788_v6  ;;  %v1022_v6 = vmul.f32 %v1805_v39, %v1805_v39 }
  0xc3   : > { %822 = vst.msk [vmem:[%s1720_s8 + $0x14] sm:$0xf] %vm816_vm3, %v757_v43 }
  0xc4   : > { %838 = vst.msk [vmem:[%s1720_s8 + $0x54] sm:$0xf] %vm816_vm3, %v773_v44 }
  0xc5   : > { %v684_v11 = vpop.f32.mrf.mxu2 }
  0xc6   : > { %v607_v46 = vpop.f32.mrf.mxu0  ;;  %v647_v47 = vpop.f32.mrf.mxu1  ;;  %v1879_v13 = vadd.f32 %v1709_v36, %v684_v11 }
  0xc7   : > { %v1824_v50 = vadd.f32 %v1709_v36, %v607_v46  ;;  %v1827_v51 = vadd.f32 %v1709_v36, %v647_v47  ;;  %v719_v46 = vpop.f32.mrf.mxu3 }
  0xc8   : > { %v789_v17 = vpack.c.bf16 %v1879_v13, %v1879_v13  ;;  %v1938_v48 = vadd.f32 %v1709_v36, %v719_v46 }
  0xc9   : > { %v758_v54 = vpack.c.bf16 %v1824_v50, %v1824_v50  ;;  %v774_v55 = vpack.c.bf16 %v1827_v51, %v1827_v51  ;;  %v893_v46 = vsel %vm881_vm4, %v1824_v50, 0.0 }
  0xca   : > { %854 = vst.msk [vmem:[%s1720_s8 + $0x94] sm:$0xf] %vm816_vm3, %v789_v17  ;;  %v803_v56 = vpack.c.bf16 %v1938_v48, %v1938_v48 }
  0xcb   : > { %823 = vst.msk [vmem:[%s1720_s8 + $0x18] sm:$0xf] %vm816_vm3, %v758_v54 }
  0xcc   : > { %839 = vst.msk [vmem:[%s1720_s8 + $0x58] sm:$0xf] %vm816_vm3, %v774_v55 }
  0xcd   : > { %v687_v25 = vpop.f32.mrf.mxu2  ;;  %868 = vst.msk [vmem:[%s1720_s8 + $0xcc] sm:$0xf] %vm816_vm3, %v803_v56 }
  0xce   : > { %v609_v57 = vpop.f32.mrf.mxu0  ;;  %v649_v58 = vpop.f32.mrf.mxu1  ;;  %v1917_v30 = vadd.f32 %v1709_v36, %v687_v25 }
  0xcf   : > { %v1847_v59 = vadd.f32 %v1709_v36, %v609_v57  ;;  %v1850_v60 = vadd.f32 %v1709_v36, %v649_v58 }
  0xd0   : > { %v790_v37 = vpack.c.bf16 %v1917_v30, %v1917_v30 }
  0xd1   : > { %v759_v0 = vpack.c.bf16 %v1847_v59, %v1847_v59  ;;  %v775_v1 = vpack.c.bf16 %v1850_v60, %v1850_v60 }
  0xd2   : > { %855 = vst.msk [vmem:[%s1720_s8 + $0x98] sm:$0xf] %vm816_vm3, %v790_v37  ;;  %v1090_v37 = vsel %vm881_vm4, %v1022_v6, 0.0 }
  0xd3   : > { %824 = vst.msk [vmem:[%s1720_s8 + $0x1c] sm:$0xf] %vm816_vm3, %v759_v0 }
  0xd4   : > { %840 = vst.msk [vmem:[%s1720_s8 + $0x5c] sm:$0xf] %vm816_vm3, %v775_v1  ;;  %v722_v1 = vpop.f32.mrf.mxu3 }
  0xd5   : > { %v689_v44 = vpop.f32.mrf.mxu2  ;;  %v1984_v17 = vadd.f32 %v1709_v36, %v722_v1 }
  0xd6   : > { %v612_v4 = vpop.f32.mrf.mxu0  ;;  %v652_v5 = vpop.f32.mrf.mxu1  ;;  %v1935_v47 = vadd.f32 %v1709_v36, %v689_v44  ;;  %v1024_v44 = vmul.f32 %v1847_v59, %v1847_v59 }
  0xd7   : > { %v1871_v8 = vadd.f32 %v1709_v36, %v612_v4  ;;  %v1874_v9 = vadd.f32 %v1709_v36, %v652_v5  ;;  %v804_v38 = vpack.c.bf16 %v1984_v17, %v1984_v17 }
  0xd8   : > { %v791_v55 = vpack.c.bf16 %v1935_v47, %v1935_v47 }
  0xd9   : > { %v760_v15 = vpack.c.bf16 %v1871_v8, %v1871_v8  ;;  %v776_v16 = vpack.c.bf16 %v1874_v9, %v1874_v9  ;;  %v1025_v56 = vmul.f32 %v1871_v8, %v1871_v8  ;;  %869 = vst.msk [vmem:[%s1720_s8 + $0xd0] sm:$0xf] %vm816_vm3, %v804_v38 }
  0xda   : > { %856 = vst.msk [vmem:[%s1720_s8 + $0x9c] sm:$0xf] %vm816_vm3, %v791_v55  ;;  %v1091_v55 = vadd.f32 %v1090_v37, %v1798_v35 }
  0xdb   : > { %825 = vst.msk [vmem:[%s1720_s8 + $0x20] sm:$0xf] %vm816_vm3, %v760_v15 }
  0xdc   : > { %841 = vst.msk [vmem:[%s1720_s8 + $0x60] sm:$0xf] %vm816_vm3, %v776_v16 }
  0xdd   : > { %v692_v0 = vpop.f32.mrf.mxu2 }
  0xde   : > { %v614_v20 = vpop.f32.mrf.mxu0  ;;  %v654_v21 = vpop.f32.mrf.mxu1  ;;  %v1981_v16 = vadd.f32 %v1709_v36, %v692_v0  ;;  %v895_v0 = vsel %vm881_vm4, %v1847_v59, 0.0  ;;  %v897_v59 = vsel %vm881_vm4, %v1871_v8, 0.0 }
  0xdf   : > { %v1903_v22 = vadd.f32 %v1709_v36, %v614_v20  ;;  %v1906_v23 = vadd.f32 %v1709_v36, %v654_v21  ;;  %v724_v20 = vpop.f32.mrf.mxu3  ;;  %v1023_v21 = vmul.f32 %v1824_v50, %v1824_v50 }
  0xe1   : > { %v761_v28 = vpack.c.bf16 %v1903_v22, %v1903_v22  ;;  %v777_v29 = vpack.c.bf16 %v1906_v23, %v1906_v23 }
  0xe3   : > { %826 = vst.msk [vmem:[%s1720_s8 + $0x24] sm:$0xf] %vm816_vm3, %v761_v28 }
  0xe4   : > { %842 = vst.msk [vmem:[%s1720_s8 + $0x64] sm:$0xf] %vm816_vm3, %v777_v29  ;;  %v792_v29 = vpack.c.bf16 %v1981_v16, %v1981_v16 }
  0xe5   : > { %v694_v18 = vpop.f32.mrf.mxu2 }
  0xe6   : > { %v617_v33 = vpop.f32.mrf.mxu0  ;;  %v657_v34 = vpop.f32.mrf.mxu1  ;;  %v1993_v28 = vadd.f32 %v1709_v36, %v694_v18  ;;  %857 = vst.msk [vmem:[%s1720_s8 + $0xa0] sm:$0xf] %vm816_vm3, %v792_v29 }
  0xe7   : > { %v1927_v42 = vadd.f32 %v1709_v36, %v617_v33  ;;  %v1930_v43 = vadd.f32 %v1709_v36, %v657_v34  ;;  %v1998_v33 = vadd.f32 %v1709_v36, %v724_v20  ;;  %v891_v34 = vsel %vm881_vm4, %v1805_v39, 0.0 }
  0xe8   : > { %v793_v39 = vpack.c.bf16 %v1993_v28, %v1993_v28 }
  0xe9   : > { %v762_v52 = vpack.c.bf16 %v1927_v42, %v1927_v42  ;;  %v778_v54 = vpack.c.bf16 %v1930_v43, %v1930_v43  ;;  %v805_v50 = vpack.c.bf16 %v1998_v33, %v1998_v33 }
  0xea   : > { %858 = vst.msk [vmem:[%s1720_s8 + $0xa4] sm:$0xf] %vm816_vm3, %v793_v39 }
  0xeb   : > { %827 = vst.msk [vmem:[%s1720_s8 + $0x28] sm:$0xf] %vm816_vm3, %v762_v52  ;;  %v1092_v52 = vsel %vm881_vm4, %v1023_v21, 0.0 }
  0xec   : > { %843 = vst.msk [vmem:[%s1720_s8 + $0x68] sm:$0xf] %vm816_vm3, %v778_v54  ;;  %v892_v54 = vadd.f32 %v891_v34, %v1790_v32  ;;  %v1093_v6 = vadd.f32 %v1092_v52, %v1091_v55  ;;  %v899_v34 = vsel %vm881_vm4, %v1903_v22, 0.0 }
  0xed   : > { %v697_v35 = vpop.f32.mrf.mxu2  ;;  %870 = vst.msk [vmem:[%s1720_s8 + $0xd4] sm:$0xf] %vm816_vm3, %v805_v50 }
  0xee   : > { %v619_v57 = vpop.f32.mrf.mxu0  ;;  %v659_v58 = vpop.f32.mrf.mxu1  ;;  %v2067_v50 = vadd.f32 %v1709_v36, %v697_v35 }
  0xef   : > { %v1959_v61 = vadd.f32 %v1709_v36, %v619_v57  ;;  %v1962_v63 = vadd.f32 %v1709_v36, %v659_v58 }
  0xf1   : > { %v763_v4 = vpack.c.bf16 %v1959_v61, %v1959_v61  ;;  %v779_v5 = vpack.c.bf16 %v1962_v63, %v1962_v63  ;;  %v1028_v37 = vmul.f32 %v1959_v61, %v1959_v61 }
  0xf3   : > { %828 = vst.msk [vmem:[%s1720_s8 + $0x2c] sm:$0xf] %vm816_vm3, %v763_v4  ;;  %v727_v4 = vpop.f32.mrf.mxu3 }
  0xf4   : > { %844 = vst.msk [vmem:[%s1720_s8 + $0x6c] sm:$0xf] %vm816_vm3, %v779_v5  ;;  %v894_v5 = vadd.f32 %v893_v46, %v892_v54  ;;  %v901_v46 = vsel %vm881_vm4, %v1927_v42, 0.0 }
  0xf6   : > { %v622_v7 = vpop.f32.mrf.mxu0  ;;  %v662_v11 = vpop.f32.mrf.mxu1  ;;  %v896_v21 = vadd.f32 %v895_v0, %v894_v5 }
  0xf7   : > { %v1975_v12 = vadd.f32 %v1709_v36, %v622_v7  ;;  %v1978_v15 = vadd.f32 %v1709_v36, %v662_v11  ;;  %v1094_v7 = vsel %vm881_vm4, %v1024_v44, 0.0  ;;  %v1026_v11 = vmul.f32 %v1903_v22, %v1903_v22  ;;  %v699_v0 = vpop.f32.mrf.mxu2 }
  0xf8   : > { %v1095_v29 = vadd.f32 %v1094_v7, %v1093_v6  ;;  %v898_v8 = vadd.f32 %v897_v59, %v896_v21  ;;  %v903_v22 = vsel %vm881_vm4, %v1959_v61, 0.0  ;;  %v1102_v7 = vsel %vm881_vm4, %v1028_v37, 0.0 }
  0xf9   : > { %v764_v25 = vpack.c.bf16 %v1975_v12, %v1975_v12  ;;  %v780_v27 = vpack.c.bf16 %v1978_v15, %v1978_v15  ;;  %v1098_v44 = vsel %vm881_vm4, %v1026_v11, 0.0  ;;  %v1029_v54 = vmul.f32 %v1975_v12, %v1975_v12 }
  0xfa   : > { %v900_v52 = vadd.f32 %v899_v34, %v898_v8  ;;  %v905_v59 = vsel %vm881_vm4, %v1975_v12, 0.0 }
  0xfb   : > { %829 = vst.msk [vmem:[%s1720_s8 + $0x30] sm:$0xf] %vm816_vm3, %v764_v25  ;;  %v1096_v25 = vsel %vm881_vm4, %v1025_v56, 0.0  ;;  %v729_v5 = vpop.f32.mrf.mxu3  ;;  %v1104_v12 = vsel %vm881_vm4, %v1029_v54, 0.0 }
  0xfc   : > { %845 = vst.msk [vmem:[%s1720_s8 + $0x70] sm:$0xf] %vm816_vm3, %v780_v27  ;;  %v1027_v27 = vmul.f32 %v1927_v42, %v1927_v42  ;;  %v1097_v38 = vadd.f32 %v1096_v25, %v1095_v29  ;;  %v2070_v42 = vadd.f32 %v1709_v36, %v727_v4  ;;  %v902_v6 = vadd.f32 %v901_v46, %v900_v52 }
  0xfd   : > { %v2078_v4 = vadd.f32 %v1709_v36, %v699_v0  ;;  %v794_v25 = vpack.c.bf16 %v2067_v50, %v2067_v50 }
  0xfe   : > { %v624_v57 = vpop.f32.mrf.mxu0  ;;  %v664_v58 = vpop.f32.mrf.mxu1  ;;  %v1100_v39 = vsel %vm881_vm4, %v1027_v27, 0.0  ;;  %v1099_v61 = vadd.f32 %v1098_v44, %v1097_v38  ;;  %v904_v21 = vadd.f32 %v903_v22, %v902_v6  ;;  %v2083_v27 = vadd.f32 %v1709_v36, %v729_v5 }
  0xff   : > { %v625_v1 = vadd.f32 %v1709_v36, %v624_v57  ;;  %v2030_v32 = vadd.f32 %v1709_v36, %v664_v58  ;;  %v806_v8 = vpack.c.bf16 %v2070_v42, %v2070_v42  ;;  %859 = vst.msk [vmem:[%s1720_s8 + $0xa8] sm:$0xf] %vm816_vm3, %v794_v25  ;;  %v702_v5 = vpop.f32.mrf.mxu2  ;;  %v1033_v6 = vmul.f32 %v1713_v40, %v1713_v40 }
 0x100   : > { %v906_v38 = vadd.f32 %v905_v59, %v904_v21  ;;  %v1034_v21 = vmul.f32 %v1734_v49, %v1734_v49 }
 0x101   : > { %v765_v18 = vpack.c.bf16 %v625_v1, %v625_v1  ;;  %v781_v20 = vpack.c.bf16 %v2030_v32, %v2030_v32  ;;  %v1030_v11 = vmul.f32 %v625_v1, %v625_v1  ;;  %v907_v29 = vsel %vm881_vm4, %v625_v1, 0.0  ;;  %871 = vst.msk [vmem:[%s1720_s8 + $0xd8] sm:$0xf] %vm816_vm3, %v806_v8 }
 0x102   : > { %v795_v1 = vpack.c.bf16 %v2078_v4, %v2078_v4 }
 0x103   : > { %830 = vst.msk [vmem:[%s1720_s8 + $0x34] sm:$0xf] %vm816_vm3, %v765_v18  ;;  %v1106_v44 = vsel %vm881_vm4, %v1030_v11, 0.0 }
 0x104   : > { %846 = vst.msk [vmem:[%s1720_s8 + $0x74] sm:$0xf] %vm816_vm3, %v781_v20  ;;  %v1101_v20 = vadd.f32 %v1100_v39, %v1099_v61  ;;  %v908_v39 = vadd.f32 %v907_v29, %v906_v38  ;;  %v732_v61 = vpop.f32.mrf.mxu3  ;;  %v913_v29 = vsel %vm881_vm4, %v1713_v40, 0.0  ;;  %v917_v40 = vsel %vm881_vm4, %v1748_v62, 0.0 }
 0x105   : > { %860 = vst.msk [vmem:[%s1720_s8 + $0xac] sm:$0xf] %vm816_vm3, %v795_v1  ;;  %v1114_v1 = vsel %vm881_vm4, %v1034_v21, 0.0 }
 0x106   : > { %v627_v55 = vpop.f32.mrf.mxu0  ;;  %v667_v56 = vpop.f32.mrf.mxu1  ;;  %v1103_v37 = vadd.f32 %v1102_v7, %v1101_v20 }
 0x107   : > { %v628_v57 = vadd.f32 %v1709_v36, %v627_v55  ;;  %v2064_v58 = vadd.f32 %v1709_v36, %v667_v56  ;;  %v807_v55 = vpack.c.bf16 %v2083_v27, %v2083_v27 }
 0x108   : > { %v1105_v52 = vadd.f32 %v1104_v12, %v1103_v37 }
 0x109   : > { %v766_v18 = vpack.c.bf16 %v628_v57, %v628_v57  ;;  %v782_v35 = vpack.c.bf16 %v2064_v58, %v2064_v58  ;;  %v1031_v34 = vmul.f32 %v628_v57, %v628_v57  ;;  %v909_v46 = vsel %vm881_vm4, %v628_v57, 0.0  ;;  %872 = vst.msk [vmem:[%s1720_s8 + $0xdc] sm:$0xf] %vm816_vm3, %v807_v55 }
 0x10a   : > { %v1107_v7 = vadd.f32 %v1106_v44, %v1105_v52  ;;  %v910_v59 = vadd.f32 %v909_v46, %v908_v39  ;;  %v1112_v44 = vsel %vm881_vm4, %v1033_v6, 0.0  ;;  %v915_v46 = vsel %vm881_vm4, %v1734_v49, 0.0  ;;  %v704_v49 = vpop.f32.mrf.mxu2 }
 0x10b   : > { %831 = vst.msk [vmem:[%s1720_s8 + $0x38] sm:$0xf] %vm816_vm3, %v766_v18  ;;  %v1108_v56 = vsel %vm881_vm4, %v1031_v34, 0.0  ;;  %v1035_v34 = vmul.f32 %v1748_v62, %v1748_v62  ;;  %v2138_v55 = vadd.f32 %v1709_v36, %v702_v5  ;;  %v2144_v62 = vadd.f32 %v1709_v36, %v704_v49 }
 0x10c   : > { %847 = vst.msk [vmem:[%s1720_s8 + $0x78] sm:$0xf] %vm816_vm3, %v782_v35  ;;  %v1109_v25 = vadd.f32 %v1108_v56, %v1107_v7  ;;  %v2141_v56 = vadd.f32 %v1709_v36, %v732_v61  ;;  %v1037_v5 = vmul.f32 %v1779_v24, %v1779_v24 }
 0x10d   : > { %v796_v61 = vpack.c.bf16 %v2138_v55, %v2138_v55 }
 0x10e   : > { %v629_v22 = vpop.f32.mrf.mxu0  ;;  %v669_v54 = vpop.f32.mrf.mxu1 }
 0x10f   : > { %v630_v0 = vadd.f32 %v1709_v36, %v629_v22  ;;  %v2106_v57 = vadd.f32 %v1709_v36, %v669_v54  ;;  %v1116_v22 = vsel %vm881_vm4, %v1035_v34, 0.0  ;;  %v1036_v54 = vmul.f32 %v1762_v10, %v1762_v10  ;;  %861 = vst.msk [vmem:[%s1720_s8 + $0xb0] sm:$0xf] %vm816_vm3, %v796_v61 }
 0x110   : > { %v929_v61 = vsel %vm881_vm4, %v1874_v9, 0.0 }
 0x111   : > { %v767_v11 = vpack.c.bf16 %v630_v0, %v630_v0  ;;  %v911_v18 = vsel %vm881_vm4, %v630_v0, 0.0  ;;  %v1032_v35 = vmul.f32 %v630_v0, %v630_v0  ;;  %v783_v20 = vpack.c.bf16 %v2106_v57, %v2106_v57  ;;  %v734_v0 = vpop.f32.mrf.mxu3 }
 0x112   : > { %v912_v12 = vadd.f32 %v911_v18, %v910_v59  ;;  %v2147_v59 = vadd.f32 %v1709_v36, %v734_v0  ;;  %v808_v18 = vpack.c.bf16 %v2141_v56, %v2141_v56  ;;  %v1118_v21 = vsel %vm881_vm4, %v1036_v54, 0.0 }
 0x113   : > { %832 = vst.msk [vmem:[%s1720_s8 + $0x3c] sm:$0xf] %vm816_vm3, %v767_v11  ;;  %v1110_v8 = vsel %vm881_vm4, %v1032_v35, 0.0  ;;  %v919_v11 = vsel %vm881_vm4, %v1762_v10, 0.0  ;;  %v1038_v10 = vmul.f32 %v1808_v41, %v1808_v41  ;;  %v927_v0 = vsel %vm881_vm4, %v1850_v60, 0.0 }
 0x114   : > { %v914_v37 = vadd.f32 %v913_v29, %v912_v12  ;;  %v1111_v38 = vadd.f32 %v1110_v8, %v1109_v25  ;;  %848 = vst.msk [vmem:[%s1720_s8 + $0x7c] sm:$0xf] %vm816_vm3, %v783_v20  ;;  %v921_v25 = vsel %vm881_vm4, %v1779_v24, 0.0  ;;  %v797_v12 = vpack.c.bf16 %v2144_v62, %v2144_v62 }
 0x115   : > { %873 = vst.msk [vmem:[%s1720_s8 + $0xe0] sm:$0xf] %vm816_vm3, %v808_v18  ;;  %v809_v8 = vpack.c.bf16 %v2147_v59, %v2147_v59  ;;  %v923_v24 = vsel %vm881_vm4, %v1808_v41, 0.0  ;;  %v1043_v18 = vmul.f32 %v1930_v43, %v1930_v43 }
 0x116   : > { %v916_v52 = vadd.f32 %v915_v46, %v914_v37  ;;  %v1113_v39 = vadd.f32 %v1112_v44, %v1111_v38  ;;  %v1120_v37 = vsel %vm881_vm4, %v1037_v5, 0.0  ;;  %v1039_v38 = vmul.f32 %v1827_v51, %v1827_v51  ;;  %862 = vst.msk [vmem:[%s1720_s8 + $0xb4] sm:$0xf] %vm816_vm3, %v797_v12 }
 0x117   : > { %874 = vst.msk [vmem:[%s1720_s8 + $0xe4] sm:$0xf] %vm816_vm3, %v809_v8 }
 0x118   : > { %v918_v6 = vadd.f32 %v917_v40, %v916_v52  ;;  %v1115_v7 = vadd.f32 %v1114_v1, %v1113_v39  ;;  %v1122_v1 = vsel %vm881_vm4, %v1038_v10, 0.0  ;;  %v925_v40 = vsel %vm881_vm4, %v1827_v51, 0.0  ;;  %v707_v39 = vpop.f32.mrf.mxu2 }
 0x119   : > { %v1040_v52 = vmul.f32 %v1850_v60, %v1850_v60  ;;  %v1124_v49 = vsel %vm881_vm4, %v1039_v38, 0.0  ;;  %v933_v10 = vsel %vm881_vm4, %v1930_v43, 0.0  ;;  %v2206_v8 = vadd.f32 %v1709_v36, %v707_v39 }
 0x11a   : > { %v920_v35 = vadd.f32 %v919_v11, %v918_v6  ;;  %v1117_v20 = vadd.f32 %v1116_v22, %v1115_v7  ;;  %v737_v22 = vpop.f32.mrf.mxu3  ;;  %v1041_v6 = vmul.f32 %v1874_v9, %v1874_v9  ;;  %v1042_v7 = vmul.f32 %v1906_v23, %v1906_v23 }
 0x11b   : > { %v1126_v5 = vsel %vm881_vm4, %v1040_v52, 0.0  ;;  %v1044_v9 = vmul.f32 %v1962_v63, %v1962_v63  ;;  %v798_v52 = vpack.c.bf16 %v2206_v8, %v2206_v8 }
 0x11c   : > { %v922_v29 = vadd.f32 %v921_v25, %v920_v35  ;;  %v1119_v34 = vadd.f32 %v1118_v21, %v1117_v20  ;;  %v1128_v60 = vsel %vm881_vm4, %v1041_v6, 0.0  ;;  %v931_v21 = vsel %vm881_vm4, %v1906_v23, 0.0 }
 0x11d   : > { %v1130_v25 = vsel %vm881_vm4, %v1042_v7, 0.0  ;;  %863 = vst.msk [vmem:[%s1720_s8 + $0xb8] sm:$0xf] %vm816_vm3, %v798_v52 }
 0x11e   : > { %v924_v44 = vadd.f32 %v923_v24, %v922_v29  ;;  %v1121_v46 = vadd.f32 %v1120_v37, %v1119_v34  ;;  %v1132_v34 = vsel %vm881_vm4, %v1043_v18, 0.0  ;;  %v2209_v37 = vadd.f32 %v1709_v36, %v737_v22 }
 0x120   : > { %v1123_v41 = vadd.f32 %v1122_v1, %v1121_v46  ;;  %v926_v54 = vadd.f32 %v925_v40, %v924_v44  ;;  %v709_v23 = vpop.f32.mrf.mxu2  ;;  %v935_v1 = vsel %vm881_vm4, %v1962_v63, 0.0  ;;  %v1045_v40 = vmul.f32 %v1978_v15, %v1978_v15 }
 0x121   : > { %v2212_v43 = vadd.f32 %v1709_v36, %v709_v23  ;;  %v810_v39 = vpack.c.bf16 %v2209_v37, %v2209_v37  ;;  %v1046_v63 = vmul.f32 %v2030_v32, %v2030_v32  ;;  %v945_v23 = vsel %vm881_vm4, %v1773_v19, 0.0 }
 0x122   : > { %v928_v11 = vadd.f32 %v927_v0, %v926_v54  ;;  %v1125_v51 = vadd.f32 %v1124_v49, %v1123_v41  ;;  %v739_v24 = vpop.f32.mrf.mxu3  ;;  %v1134_v54 = vsel %vm881_vm4, %v1044_v9, 0.0  ;;  %v937_v49 = vsel %vm881_vm4, %v1978_v15, 0.0 }
 0x123   : > { %v2215_v46 = vadd.f32 %v1709_v36, %v739_v24  ;;  %v799_v0 = vpack.c.bf16 %v2212_v43, %v2212_v43  ;;  %875 = vst.msk [vmem:[%s1720_s8 + $0xe8] sm:$0xf] %vm816_vm3, %v810_v39  ;;  %v939_v15 = vsel %vm881_vm4, %v2030_v32, 0.0 }
 0x124   : > { %v930_v35 = vadd.f32 %v929_v61, %v928_v11  ;;  %v1127_v20 = vadd.f32 %v1126_v5, %v1125_v51  ;;  %v1136_v51 = vsel %vm881_vm4, %v1045_v40, 0.0  ;;  %v1047_v5 = vmul.f32 %v2064_v58, %v2064_v58 }
 0x125   : > { %v811_v11 = vpack.c.bf16 %v2215_v46, %v2215_v46  ;;  %864 = vst.msk [vmem:[%s1720_s8 + $0xbc] sm:$0xf] %vm816_vm3, %v799_v0  ;;  %v947_v40 = vsel %vm881_vm4, %v1784_v26, 0.0 }
 0x126   : > { %v932_v12 = vadd.f32 %v931_v21, %v930_v35  ;;  %v1129_v29 = vadd.f32 %v1128_v60, %v1127_v20  ;;  %v1138_v35 = vsel %vm881_vm4, %v1046_v63, 0.0  ;;  %v941_v20 = vsel %vm881_vm4, %v2064_v58, 0.0 }
 0x127   : > { %876 = vst.msk [vmem:[%s1720_s8 + $0xec] sm:$0xf] %vm816_vm3, %v811_v11  ;;  %v1048_v60 = vmul.f32 %v2106_v57, %v2106_v57  ;;  %v1050_v58 = vmul.f32 %v1784_v26, %v1784_v26 }
 0x128   : > { %v934_v38 = vadd.f32 %v933_v10, %v932_v12  ;;  %v1131_v44 = vadd.f32 %v1130_v25, %v1129_v29  ;;  %v1049_v10 = vmul.f32 %v1773_v19, %v1773_v19  ;;  %v1140_v12 = vsel %vm881_vm4, %v1047_v5, 0.0 }
 0x129   : > { %v943_v29 = vsel %vm881_vm4, %v2106_v57, 0.0  ;;  %v1142_v24 = vsel %vm881_vm4, %v1048_v60, 0.0  ;;  %v1051_v57 = vmul.f32 %v1819_v45, %v1819_v45  ;;  %v949_v19 = vsel %vm881_vm4, %v1819_v45, 0.0 }
 0x12a   : > { %v936_v22 = vadd.f32 %v935_v1, %v934_v38  ;;  %v1133_v41 = vadd.f32 %v1132_v34, %v1131_v44  ;;  %v742_v21 = vpop.f32.mrf.mxu3  ;;  %v1144_v1 = vsel %vm881_vm4, %v1049_v10, 0.0  ;;  %v1053_v45 = vmul.f32 %v1861_v2, %v1861_v2 }
 0x12c   : > { %v938_v6 = vadd.f32 %v937_v49, %v936_v22  ;;  %v1135_v7 = vadd.f32 %v1134_v54, %v1133_v41  ;;  %v1146_v22 = vsel %vm881_vm4, %v1050_v58, 0.0  ;;  %v1052_v41 = vmul.f32 %v1832_v53, %v1832_v53 }
 0x12d   : > { %v2273_v54 = vadd.f32 %v1709_v36, %v742_v21  ;;  %v1152_v60 = vsel %vm881_vm4, %v1053_v45, 0.0  ;;  %v955_v21 = vsel %vm881_vm4, %v1879_v13, 0.0 }
 0x12e   : > { %v1137_v61 = vadd.f32 %v1136_v51, %v1135_v7  ;;  %v940_v18 = vadd.f32 %v939_v15, %v938_v6  ;;  %v1148_v6 = vsel %vm881_vm4, %v1051_v57, 0.0  ;;  %v951_v7 = vsel %vm881_vm4, %v1832_v53, 0.0 }
 0x12f   : > { %v812_v11 = vpack.c.bf16 %v2273_v54, %v2273_v54 }
 0x130   : > { %v1139_v25 = vadd.f32 %v1138_v35, %v1137_v61  ;;  %v942_v32 = vadd.f32 %v941_v20, %v940_v18  ;;  %v1150_v61 = vsel %vm881_vm4, %v1052_v41, 0.0  ;;  %v953_v18 = vsel %vm881_vm4, %v1861_v2, 0.0 }
 0x131   : > { %v1054_v35 = vmul.f32 %v1879_v13, %v1879_v13  ;;  %877 = vst.msk [vmem:[%s1720_s8 + $0xf0] sm:$0xf] %vm816_vm3, %v812_v11  ;;  %v959_v13 = vsel %vm881_vm4, %v1935_v47, 0.0 }
 0x132   : > { %v1141_v34 = vadd.f32 %v1140_v12, %v1139_v25  ;;  %v944_v9 = vadd.f32 %v943_v29, %v942_v32  ;;  %v744_v49 = vpop.f32.mrf.mxu3  ;;  %v1055_v25 = vmul.f32 %v1917_v30, %v1917_v30  ;;  %v957_v12 = vsel %vm881_vm4, %v1917_v30, 0.0 }
 0x133   : > { %v2276_v0 = vadd.f32 %v1709_v36, %v744_v49  ;;  %v1154_v2 = vsel %vm881_vm4, %v1054_v35, 0.0  ;;  %v1056_v29 = vmul.f32 %v1935_v47, %v1935_v47  ;;  %v961_v30 = vsel %vm881_vm4, %v1981_v16, 0.0 }
 0x134   : > { %v946_v38 = vadd.f32 %v945_v23, %v944_v9  ;;  %v1143_v44 = vadd.f32 %v1142_v24, %v1141_v34  ;;  %v1156_v58 = vsel %vm881_vm4, %v1055_v25, 0.0  ;;  %v1057_v24 = vmul.f32 %v1981_v16, %v1981_v16 }
 0x135   : > { %v813_v5 = vpack.c.bf16 %v2276_v0, %v2276_v0  ;;  %v963_v47 = vsel %vm881_vm4, %v1993_v28, 0.0  ;;  %v965_v16 = vsel %vm881_vm4, %v2067_v50, 0.0  ;;  %v1063_v25 = vmul.f32 %v2206_v8, %v2206_v8 }
 0x136   : > { %v948_v52 = vadd.f32 %v947_v40, %v946_v38  ;;  %v1145_v39 = vadd.f32 %v1144_v1, %v1143_v44  ;;  %v1158_v1 = vsel %vm881_vm4, %v1056_v29, 0.0  ;;  %v1058_v40 = vmul.f32 %v1993_v28, %v1993_v28 }
 0x137   : > { %878 = vst.msk [vmem:[%s1720_s8 + $0xf4] sm:$0xf] %vm816_vm3, %v813_v5 }
 0x138   : > { %v950_v63 = vadd.f32 %v949_v19, %v948_v52  ;;  %v1147_v26 = vadd.f32 %v1146_v22, %v1145_v39  ;;  %v1160_v39 = vsel %vm881_vm4, %v1057_v24, 0.0  ;;  %v1059_v22 = vmul.f32 %v2067_v50, %v2067_v50 }
 0x139   : > { %v1162_v49 = vsel %vm881_vm4, %v1058_v40, 0.0  ;;  %v1061_v50 = vmul.f32 %v2138_v55, %v2138_v55  ;;  %v977_v24 = vsel %vm881_vm4, %v1864_v3, 0.0  ;;  %v979_v40 = vsel %vm881_vm4, %v1882_v14, 0.0 }
 0x13a   : > { %v952_v51 = vadd.f32 %v951_v7, %v950_v63  ;;  %v1149_v15 = vadd.f32 %v1148_v6, %v1147_v26  ;;  %v747_v34 = vpop.f32.mrf.mxu3  ;;  %v1060_v63 = vmul.f32 %v2078_v4, %v2078_v4  ;;  %v1164_v11 = vsel %vm881_vm4, %v1059_v22, 0.0 }
 0x13b   : > { %v2327_v26 = vadd.f32 %v1709_v36, %v747_v34 }
 0x13c   : > { %v954_v53 = vadd.f32 %v953_v18, %v952_v51  ;;  %v1151_v20 = vadd.f32 %v1150_v61, %v1149_v15  ;;  %v967_v51 = vsel %vm881_vm4, %v2078_v4, 0.0  ;;  %v1166_v35 = vsel %vm881_vm4, %v1060_v63, 0.0 }
 0x13d   : > { %v814_v15 = vpack.c.bf16 %v2327_v26, %v2327_v26 }
 0x13e   : > { %v1153_v32 = vadd.f32 %v1152_v60, %v1151_v20  ;;  %v956_v10 = vadd.f32 %v955_v21, %v954_v53  ;;  %v1062_v53 = vmul.f32 %v2144_v62, %v2144_v62  ;;  %v1168_v60 = vsel %vm881_vm4, %v1061_v50, 0.0 }
 0x13f   : > { %879 = vst.msk [vmem:[%s1720_s8 + $0xf8] sm:$0xf] %vm816_vm3, %v814_v15  ;;  %v971_v21 = vsel %vm881_vm4, %v2144_v62, 0.0  ;;  %v1172_v62 = vsel %vm881_vm4, %v1063_v25, 0.0  ;;  %v1071_v50 = vmul.f32 %v2070_v42, %v2070_v42  ;;  %v1074_v25 = vmul.f32 %v2147_v59, %v2147_v59 }
 0x140   : > { %v958_v9 = vadd.f32 %v957_v12, %v956_v10  ;;  %v1155_v23 = vadd.f32 %v1154_v2, %v1153_v32  ;;  %v973_v2 = vsel %vm881_vm4, %v2206_v8, 0.0  ;;  %v1064_v12 = vmul.f32 %v2212_v43, %v2212_v43 }
 0x141   : > { %v1066_v8 = vmul.f32 %v1882_v14, %v1882_v14  ;;  %v983_v14 = vsel %vm881_vm4, %v1938_v48, 0.0 }
 0x142   : > { %v960_v38 = vadd.f32 %v959_v13, %v958_v9  ;;  %v1157_v44 = vadd.f32 %v1156_v58, %v1155_v23  ;;  %v749_v6 = vpop.f32.mrf.mxu3  ;;  %v1065_v9 = vmul.f32 %v1864_v3, %v1864_v3  ;;  %v975_v23 = vsel %vm881_vm4, %v2212_v43, 0.0 }
 0x143   : > { %v2330_v45 = vadd.f32 %v1709_v36, %v749_v6  ;;  %v969_v36 = vsel %vm881_vm4, %v2138_v55, 0.0  ;;  %v1170_v55 = vsel %vm881_vm4, %v1062_v53, 0.0  ;;  %v1067_v43 = vmul.f32 %v1920_v31, %v1920_v31 }
 0x144   : > { %v962_v57 = vadd.f32 %v961_v30, %v960_v38  ;;  %v1159_v52 = vadd.f32 %v1158_v1, %v1157_v44  ;;  %v1174_v38 = vsel %vm881_vm4, %v1064_v12, 0.0  ;;  %v1176_v30 = vsel %vm881_vm4, %v1065_v9, 0.0 }
 0x145   : > { %v815_v18 = vpack.c.bf16 %v2330_v45, %v2330_v45  ;;  %v981_v3 = vsel %vm881_vm4, %v1920_v31, 0.0  ;;  %v985_v31 = vsel %vm881_vm4, %v1984_v17, 0.0  ;;  %v1188_v53 = vsel %vm881_vm4, %v1071_v50, 0.0 }
 0x146   : > { %v964_v19 = vadd.f32 %v963_v47, %v962_v57  ;;  %v1161_v41 = vadd.f32 %v1160_v39, %v1159_v52  ;;  %v1178_v39 = vsel %vm881_vm4, %v1066_v8, 0.0  ;;  %v1068_v47 = vmul.f32 %v1938_v48, %v1938_v48 }
 0x147   : > { %880 = vst.msk [vmem:[%s1720_s8 + $0xfc] sm:$0xf] %vm816_vm3, %v815_v18  ;;  %v987_v48 = vsel %vm881_vm4, %v1998_v33, 0.0  ;;  %v1072_v18 = vmul.f32 %v2083_v27, %v2083_v27  ;;  %v1076_v9 = vmul.f32 %v2215_v46, %v2215_v46 }
 0x148   : > { %v966_v7 = vadd.f32 %v965_v16, %v964_v19  ;;  %v1163_v28 = vadd.f32 %v1162_v49, %v1161_v41  ;;  %v1180_v41 = vsel %vm881_vm4, %v1067_v43, 0.0  ;;  %v1069_v49 = vmul.f32 %v1984_v17, %v1984_v17 }
 0x149   : > { %v1182_v6 = vsel %vm881_vm4, %v1068_v47, 0.0  ;;  %v989_v17 = vsel %vm881_vm4, %v2070_v42, 0.0  ;;  %v993_v42 = vsel %vm881_vm4, %v2141_v56, 0.0  ;;  %v1079_v43 = vmul.f32 %v2327_v26, %v2327_v26 }
 0x14a   : > { %v968_v5 = vadd.f32 %v967_v51, %v966_v7  ;;  %v1165_v61 = vadd.f32 %v1164_v11, %v1163_v28  ;;  %v1070_v7 = vmul.f32 %v1998_v33, %v1998_v33  ;;  %v1184_v51 = vsel %vm881_vm4, %v1069_v49, 0.0 }
 0x14b   : > { %v991_v33 = vsel %vm881_vm4, %v2083_v27, 0.0  ;;  %v995_v27 = vsel %vm881_vm4, %v2147_v59, 0.0  ;;  %v999_v59 = vsel %vm881_vm4, %v2215_v46, 0.0  ;;  %v1003_v46 = vsel %vm881_vm4, %v2276_v0, 0.0 }
 0x14c   : > { %v1167_v4 = vadd.f32 %v1166_v35, %v1165_v61  ;;  %v970_v20 = vadd.f32 %v969_v36, %v968_v5  ;;  %v1186_v61 = vsel %vm881_vm4, %v1070_v7, 0.0 }
 0x14e   : > { %v1169_v32 = vadd.f32 %v1168_v60, %v1167_v4  ;;  %v972_v10 = vadd.f32 %v971_v21, %v970_v20  ;;  %v1073_v4 = vmul.f32 %v2141_v56, %v2141_v56  ;;  %v1190_v21 = vsel %vm881_vm4, %v1072_v18, 0.0 }
 0x14f   : > { %v997_v56 = vsel %vm881_vm4, %v2209_v37, 0.0 }
 0x150   : > { %v1171_v29 = vadd.f32 %v1170_v55, %v1169_v32  ;;  %v974_v34 = vadd.f32 %v973_v2, %v972_v10  ;;  %v1192_v55 = vsel %vm881_vm4, %v1073_v4, 0.0  ;;  %v1075_v2 = vmul.f32 %v2209_v37, %v2209_v37 }
 0x151   : > { %v1001_v37 = vsel %vm881_vm4, %v2273_v54, 0.0 }
 0x152   : > { %v1173_v58 = vadd.f32 %v1172_v62, %v1171_v29  ;;  %v976_v13 = vadd.f32 %v975_v23, %v974_v34  ;;  %v1194_v34 = vsel %vm881_vm4, %v1074_v25, 0.0 }
 0x154   : > { %v978_v44 = vadd.f32 %v977_v24, %v976_v13  ;;  %v1175_v1 = vadd.f32 %v1174_v38, %v1173_v58  ;;  %v1196_v58 = vsel %vm881_vm4, %v1075_v2, 0.0  ;;  %v1077_v13 = vmul.f32 %v2273_v54, %v2273_v54 }
 0x155   : > { %v1198_v38 = vsel %vm881_vm4, %v1076_v9, 0.0  ;;  %v1005_v54 = vsel %vm881_vm4, %v2327_v26, 0.0 }
 0x156   : > { %v980_v57 = vadd.f32 %v979_v40, %v978_v44  ;;  %v1177_v52 = vadd.f32 %v1176_v30, %v1175_v1  ;;  %v1078_v44 = vmul.f32 %v2276_v0, %v2276_v0  ;;  %v1200_v40 = vsel %vm881_vm4, %v1077_v13, 0.0 }
 0x157   : > { %v1007_v0 = vsel %vm881_vm4, %v2330_v45, 0.0 }
 0x158   : > { %v982_v22 = vadd.f32 %v981_v3, %v980_v57  ;;  %v1179_v19 = vadd.f32 %v1178_v39, %v1177_v52  ;;  %v1202_v39 = vsel %vm881_vm4, %v1078_v44, 0.0  ;;  %v1080_v3 = vmul.f32 %v2330_v45, %v2330_v45 }
 0x15a   : > { %v984_v16 = vadd.f32 %v983_v14, %v982_v22  ;;  %v1181_v63 = vadd.f32 %v1180_v41, %v1179_v19  ;;  %v1204_v19 = vsel %vm881_vm4, %v1079_v43, 0.0  ;;  %v1206_v49 = vsel %vm881_vm4, %v1080_v3, 0.0 }
 0x15c   : > { %v986_v28 = vadd.f32 %v985_v31, %v984_v16  ;;  %v1183_v11 = vadd.f32 %v1182_v6, %v1181_v63 }
 0x15e   : > { %v1185_v15 = vadd.f32 %v1184_v51, %v1183_v11  ;;  %v988_v5 = vadd.f32 %v987_v48, %v986_v28 }
 0x160   : > { %v990_v35 = vadd.f32 %v989_v17, %v988_v5  ;;  %v1187_v36 = vadd.f32 %v1186_v61, %v1185_v15 }
 0x162   : > { %v992_v20 = vadd.f32 %v991_v33, %v990_v35  ;;  %v1189_v60 = vadd.f32 %v1188_v53, %v1187_v36 }
 0x164   : > { %v994_v32 = vadd.f32 %v993_v42, %v992_v20  ;;  %v1191_v10 = vadd.f32 %v1190_v21, %v1189_v60 }
 0x166   : > { %v996_v12 = vadd.f32 %v995_v27, %v994_v32  ;;  %v1193_v29 = vadd.f32 %v1192_v55, %v1191_v10 }
 0x168   : > { %v998_v62 = vadd.f32 %v997_v56, %v996_v12  ;;  %v1195_v23 = vadd.f32 %v1194_v34, %v1193_v29 }
 0x16a   : > { %v1000_v24 = vadd.f32 %v999_v59, %v998_v62  ;;  %v1197_v8 = vadd.f32 %v1196_v58, %v1195_v23 }
 0x16c   : > { %v1199_v1 = vadd.f32 %v1198_v38, %v1197_v8  ;;  %v1002_v30 = vadd.f32 %v1001_v37, %v1000_v24 }
 0x16e   : > { %v1201_v57 = vadd.f32 %v1200_v40, %v1199_v1  ;;  %v1004_v52 = vadd.f32 %v1003_v46, %v1002_v30 }
 0x170   : > { %v1203_v47 = vadd.f32 %v1202_v39, %v1201_v57  ;;  %v1006_v22 = vadd.f32 %v1005_v54, %v1004_v52 }
 0x172   : > { %v1205_v41 = vadd.f32 %v1204_v19, %v1203_v47  ;;  %v1008_v14 = vadd.f32 %v1007_v0, %v1006_v22 }
 0x174   : > { %v1009_v16 = vrot.slane %v1008_v14, 4  ;;  %v1207_v63 = vadd.f32 %v1206_v49, %v1205_v41 }
 0x176   : > { %v1010_v6 = vadd.f32 %v1009_v16, %v1008_v14  ;;  %v1208_v26 = vrot.slane %v1207_v63, 4 }
 0x178   : > { %v1011_v31 = vrot.slane %v1010_v6, 2  ;;  %v1209_v7 = vadd.f32 %v1208_v26, %v1207_v63 }
 0x17a   : > { %v1012_v28 = vadd.f32 %v1011_v31, %v1010_v6  ;;  %v1210_v11 = vrot.slane %v1209_v7, 2 }
 0x17c   : > { %v1013_v51 = vrot.slane %v1012_v28, 1  ;;  %v1211_v48 = vadd.f32 %v1210_v11, %v1209_v7 }
 0x17e   : > { %v1014_v45 = vadd.f32 %v1013_v51, %v1012_v28  ;;  %v1212_v50 = vrot.slane %v1211_v48, 1 }
 0x180   : > { %1016 = vst.msk [vmem:[%s234_s12] sm:$0x1] %vm1015_vm5, %v1014_v45  ;;  %v1213_v15 = vadd.f32 %v1212_v50, %v1211_v48 }
 0x182   : > { %1214 = vst.msk [vmem:[%s234_s12 + $0x1] sm:$0x1] %vm1015_vm5, %v1213_v15 }
 0x183 PF: > { %s15_s17 = sadd.s32 1, %s1582_s17   ;;  %s2463_s15 = smov %s1578_s16 }
 0x184   : > { %p12_p6 = scmp.ge.s32.totalorder %s15_s17, 4   ;;  %s2464_s16 = smov %s2466_s18 }
 0x186   :  { %14 = sbr.rel (!%p12_p6) target bundleno = 2 (0x2), region = 74 }

// kernel: net_forward.29
= control target key start
LH: loop header
LB: loop body
LE: loop exit
PB: predicated region body
PF: predicated region fallthrough
CT: control target
= control target key end

     0   :  { %s2232_s15 = smov 0   ;;  %s2234_s16 = smov 0   ;;  %s3063_s0 = inlined_call_operand.vmem [shape: bf16[1024,216], index: 0, kind: input, shape index: {}]   ;;  %s3064_s1 = inlined_call_operand.vmem [shape: bf16[216,8], index: 1, kind: input, shape index: {}]   ;;  %s3065_s2 = inlined_call_operand.vmem [shape: f32[1,8], index: 2, kind: input, shape index: {}]   ;;  %s3066_s3 = inlined_call_operand.vmem [shape: bf16[1024,8], index: 3, kind: output, shape index: {0}]   ;;  %s3067_s4 = inlined_call_operand.vmem [shape: f32[2,2,8], index: 4, kind: output, shape index: {1}]  }
   0x1   :  { %s2236_s17 = smov 0  }
   0x2 LB: > { %s27_s18 = sadd.s32 1, %s2201_s16  ;;  %p1716_p0 = scmp.ge.s32.totalorder %s2205_s17, 1  ;;  %s2205_s17 = sphi %s2236_s17, %s15_s17   ;;  %s2201_s16 = sphi %s2234_s16, %s3069_s16   ;;  %s2197_s15 = sphi %s2232_s15, %s3068_s15  }
   0x3   : > { %p29_p1 = scmp.ge.s32.totalorder %s27_s18, 2  ;;  %p186_p2 = scmp.lt.s32.totalorder %s2205_s17, 3 }
   0x5   : > { %s3071_s18 = smov (%p29_p1, %s27_s18), 0  ;;  %p187_p3 = pnand %p1716_p0, %p186_p2 }
   0x6   : > { %s1717_s25 = sshll.u32 (!%p187_p3), %s2197_s15, 6  ;;  %p239_p5 = scmp.lt.s32.totalorder (!%p187_p3), %s2197_s15, 1 }
   0x7   : > { %190 = sbr.rel (%p187_p3) target bundleno = 511 (0x1ff), region = 32  ;;  %p223_p4 = scmp.lt.s32.totalorder (!%p187_p3), %s1717_s25, 127 }
   0xc   : > { %v2073_v0 = vld [vmem:[%s3064_s1 + $0x38] sm:$0xff]  ;;  %v270_v1 = vld [vmem:[%s3064_s1 + $0x68] sm:$0xf]  ;;  %vm805_vm0 = vcmask 1043456   ;;  %v2072_v3 = vld [vmem:[%s3064_s1 + $0x30] sm:$0xff]  ;;  %s3073_s25 = smov (!%p223_p4, %s1717_s25), 127 }
   0xd   : > { %v680_v2 = vunpack.c.l.b16 %v270_v1  ;;  %809 = vmatpush.bf16.msra.mxu0 %v2073_v0  ;;  %2143 = vmatpush.bf16.msra.mxu2 %v2073_v0  ;;  %v2078_v6 = vld [vmem:[%s3064_s1 + $0x60] sm:$0xff]  ;;  %v2071_v7 = vld [vmem:[%s3064_s1 + $0x28] sm:$0xff]  ;;  %v2077_v8 = vld [vmem:[%s3064_s1 + $0x58] sm:$0xff]  ;;  %s2065_s12 = sshll.u32 %s3073_s25, 3  ;;  %vm708_vm1 = vcmask 719872   ;;  %s1721_s7 = sshll.u32 %s3073_s25, 2 }
   0xe   : > { %v2070_v9 = vld [vmem:[%s3064_s1 + $0x20] sm:$0xff]  ;;  %v2076_v10 = vld [vmem:[%s3064_s1 + $0x50] sm:$0xff]  ;;  %v2069_v11 = vld [vmem:[%s3064_s1 + $0x18] sm:$0xff]  ;;  %s2292_s23 = scalar_lea.vmem %s3063_s0, %s2065_s12  ;;  %s2390_s10 = scalar_lea.vmem %s3066_s3, %s1721_s7  ;;  %vm1211_vm2 = vcmask 60416   ;;  %vm1276_vm3 = vcmask 64512   ;;  %vm1410_vm4 = vcmask 57344  }
   0xf   : > { %v694_v4 = vpack.c.b16 %v680_v2, %v680_v2  ;;  %v2075_v12 = vld [vmem:[%s3064_s1 + $0x48] sm:$0xff]  ;;  %v2068_v13 = vld [vmem:[%s3064_s1 + $0x10] sm:$0xff]  ;;  %v2074_v14 = vld [vmem:[%s3064_s1 + $0x40] sm:$0xff]  ;;  %s3075_s15 = smov (!%p239_p5, %s2197_s15), 1 }
  0x10   : > { %v2067_v15 = vld [vmem:[%s3064_s1 + $0x8] sm:$0xff]  ;;  %v2079_v16 = vld [vmem:[%s2292_s23 + $0x4] sm:$0xf]  ;;  %v1725_v20 = vld [vmem:[%s2292_s23] sm:$0xf]  ;;  %s1722_s12 = sshll.u32 %s3075_s15, 1 }
  0x11   : > { %v807_v5 = vsel %vm805_vm0, %v694_v4, 0  ;;  %810 = vmatpush.bf16.msra.mxu0 %v2072_v3  ;;  %2144 = vmatpush.bf16.msra.mxu2 %v2072_v3  ;;  %v1727_v17 = vld [vmem:[%s2292_s23 + $0x8] sm:$0xf0]  ;;  %v2066_v19 = vld [vmem:[%s3064_s1] sm:$0xff]  ;;  %v2080_v21 = vld [vmem:[%s2292_s23 + $0x4] sm:$0xf0]  ;;  %s242_s19 = scalar_lea.vmem %s3067_s4, %s1722_s12 }
  0x12   : > { %980 = vmatpush.bf16.msra.mxu1 %v807_v5  ;;  %2151 = vmatpush.bf16.msra.mxu3 %v807_v5  ;;  %v1730_v18 = vor.u32 %v2079_v16, %v1727_v17  ;;  %v1726_v22 = vor.u32 %v2080_v21, %v1725_v20  ;;  %v2081_v23 = vld [vmem:[%s2292_s23 + $0x14] sm:$0xf]  ;;  %v1735_v24 = vld [vmem:[%s2292_s23 + $0x18] sm:$0xf0]  ;;  %v1733_v26 = vld [vmem:[%s2292_s23 + $0x10] sm:$0xf] }
  0x13   : > { %v1738_v25 = vor.u32 %v2081_v23, %v1735_v24  ;;  %v2082_v27 = vld [vmem:[%s2292_s23 + $0x14] sm:$0xf0]  ;;  %v1853_v29 = vld [vmem:[%s2292_s23 + $0x100] sm:$0xf]  ;;  %v2112_v30 = vld [vmem:[%s2292_s23 + $0x104] sm:$0xf0] }
  0x14   : > { %v1734_v28 = vor.u32 %v2082_v27, %v1733_v26  ;;  %v1854_v31 = vor.u32 %v2112_v30, %v1853_v29  ;;  %v2083_v32 = vld [vmem:[%s2292_s23 + $0x24] sm:$0xf]  ;;  %v1743_v33 = vld [vmem:[%s2292_s23 + $0x28] sm:$0xf0]  ;;  %v1741_v35 = vld [vmem:[%s2292_s23 + $0x20] sm:$0xf] }
  0x15   : > { %811 = vmatpush.bf16.msra.mxu0 %v2071_v7  ;;  %2145 = vmatpush.bf16.msra.mxu2 %v2071_v7  ;;  %v1746_v34 = vor.u32 %v2083_v32, %v1743_v33  ;;  %v2084_v36 = vld [vmem:[%s2292_s23 + $0x24] sm:$0xf0]  ;;  %v1861_v38 = vld [vmem:[%s2292_s23 + $0x110] sm:$0xf]  ;;  %v2114_v39 = vld [vmem:[%s2292_s23 + $0x114] sm:$0xf0] }
  0x16   : > { %981 = vmatpush.bf16.msra.mxu1 %v2078_v6  ;;  %2152 = vmatpush.bf16.msra.mxu3 %v2078_v6  ;;  %v1742_v37 = vor.u32 %v2084_v36, %v1741_v35  ;;  %v2113_v40 = vld [vmem:[%s2292_s23 + $0x114] sm:$0xf]  ;;  %v1862_v41 = vor.u32 %v2114_v39, %v1861_v38  ;;  %v1863_v42 = vld [vmem:[%s2292_s23 + $0x118] sm:$0xf0]  ;;  %v1749_v47 = vld [vmem:[%s2292_s23 + $0x30] sm:$0xf] }
  0x17   : > { %v1866_v43 = vor.u32 %v2113_v40, %v1863_v42  ;;  %v2085_v44 = vld [vmem:[%s2292_s23 + $0x34] sm:$0xf]  ;;  %v1751_v45 = vld [vmem:[%s2292_s23 + $0x38] sm:$0xf0]  ;;  %v2086_v48 = vld [vmem:[%s2292_s23 + $0x34] sm:$0xf0] }
  0x18   : > { %v1754_v46 = vor.u32 %v2085_v44, %v1751_v45  ;;  %v1750_v49 = vor.u32 %v2086_v48, %v1749_v47  ;;  %v1869_v50 = vld [vmem:[%s2292_s23 + $0x120] sm:$0xf]  ;;  %v2116_v51 = vld [vmem:[%s2292_s23 + $0x124] sm:$0xf0]  ;;  %v2115_v52 = vld [vmem:[%s2292_s23 + $0x124] sm:$0xf] }
  0x19   : > { %812 = vmatpush.bf16.msra.mxu0 %v2070_v9  ;;  %2146 = vmatpush.bf16.msra.mxu2 %v2070_v9  ;;  %v1870_v53 = vor.u32 %v2116_v51, %v1869_v50  ;;  %v1871_v54 = vld [vmem:[%s2292_s23 + $0x128] sm:$0xf0]  ;;  %v2087_v56 = vld [vmem:[%s2292_s23 + $0x44] sm:$0xf]  ;;  %v1757_v59 = vld [vmem:[%s2292_s23 + $0x40] sm:$0xf] }
  0x1a   : > { %982 = vmatpush.bf16.msra.mxu1 %v2077_v8  ;;  %2153 = vmatpush.bf16.msra.mxu3 %v2077_v8  ;;  %v1874_v55 = vor.u32 %v2115_v52, %v1871_v54  ;;  %v1759_v57 = vld [vmem:[%s2292_s23 + $0x48] sm:$0xf0]  ;;  %v2088_v60 = vld [vmem:[%s2292_s23 + $0x44] sm:$0xf0]  ;;  %v1877_v62 = vld [vmem:[%s2292_s23 + $0x130] sm:$0xf] }
  0x1b   : > { %v1762_v58 = vor.u32 %v2087_v56, %v1759_v57  ;;  %v1758_v61 = vor.u32 %v2088_v60, %v1757_v59  ;;  %v2118_v63 = vld [vmem:[%s2292_s23 + $0x134] sm:$0xf0]  ;;  %v2117_v0 = vld [vmem:[%s2292_s23 + $0x134] sm:$0xf]  ;;  %v1879_v2 = vld [vmem:[%s2292_s23 + $0x138] sm:$0xf0] }
  0x1c   : > { %v1878_v1 = vor.u32 %v2118_v63, %v1877_v62  ;;  %v1882_v3 = vor.u32 %v2117_v0, %v1879_v2  ;;  %v2089_v4 = vld [vmem:[%s2292_s23 + $0x54] sm:$0xf]  ;;  %v1767_v5 = vld [vmem:[%s2292_s23 + $0x58] sm:$0xf0]  ;;  %v1765_v7 = vld [vmem:[%s2292_s23 + $0x50] sm:$0xf] }
  0x1d   : > { %813 = vmatpush.bf16.msra.mxu0 %v2069_v11  ;;  %2147 = vmatpush.bf16.msra.mxu2 %v2069_v11  ;;  %v1770_v6 = vor.u32 %v2089_v4, %v1767_v5  ;;  %v2090_v8 = vld [vmem:[%s2292_s23 + $0x54] sm:$0xf0]  ;;  %v2120_v11 = vld [vmem:[%s2292_s23 + $0x144] sm:$0xf0]  ;;  %v1887_v16 = vld [vmem:[%s2292_s23 + $0x148] sm:$0xf0] }
  0x1e   : > { %983 = vmatpush.bf16.msra.mxu1 %v2076_v10  ;;  %2154 = vmatpush.bf16.msra.mxu3 %v2076_v10  ;;  %v1766_v9 = vor.u32 %v2090_v8, %v1765_v7  ;;  %v1885_v10 = vld [vmem:[%s2292_s23 + $0x140] sm:$0xf]  ;;  %v2092_v20 = vld [vmem:[%s2292_s23 + $0x64] sm:$0xf0]  ;;  %v1783_v23 = vld [vmem:[%s2292_s23 + $0x78] sm:$0xf0] }
  0x1f   : > { %v1893_v24 = vld [vmem:[%s2292_s23 + $0x150] sm:$0xf]  ;;  %v2121_v27 = vld [vmem:[%s2292_s23 + $0x154] sm:$0xf]  ;;  %v2094_v32 = vld [vmem:[%s2292_s23 + $0x74] sm:$0xf0] }
  0x20   : > { %v1791_v35 = vld [vmem:[%s2292_s23 + $0x88] sm:$0xf0]  ;;  %v1901_v36 = vld [vmem:[%s2292_s23 + $0x160] sm:$0xf]  ;;  %v2123_v39 = vld [vmem:[%s2292_s23 + $0x164] sm:$0xf] }
  0x21   : > { %814 = vmatpush.bf16.msra.mxu0 %v2068_v13  ;;  %2148 = vmatpush.bf16.msra.mxu2 %v2068_v13  ;;  %v2091_v13 = vld [vmem:[%s2292_s23 + $0x64] sm:$0xf]  ;;  %v1903_v40 = vld [vmem:[%s2292_s23 + $0x168] sm:$0xf0]  ;;  %v1789_v44 = vld [vmem:[%s2292_s23 + $0x80] sm:$0xf] }
  0x22   : > { %984 = vmatpush.bf16.msra.mxu1 %v2075_v12  ;;  %2155 = vmatpush.bf16.msra.mxu3 %v2075_v12  ;;  %v1886_v12 = vor.u32 %v2120_v11, %v1885_v10  ;;  %v1906_v42 = vor.u32 %v2123_v39, %v1903_v40  ;;  %v2096_v45 = vld [vmem:[%s2292_s23 + $0x84] sm:$0xf0]  ;;  %v1909_v56 = vld [vmem:[%s2292_s23 + $0x170] sm:$0xf]  ;;  %v2126_v57 = vld [vmem:[%s2292_s23 + $0x174] sm:$0xf0] }
  0x23   : > { %v1790_v47 = vor.u32 %v2096_v45, %v1789_v44  ;;  %v1910_v59 = vor.u32 %v2126_v57, %v1909_v56  ;;  %v2125_v60 = vld [vmem:[%s2292_s23 + $0x174] sm:$0xf]  ;;  %v2098_v4 = vld [vmem:[%s2292_s23 + $0x94] sm:$0xf0] }
  0x25   : > { %815 = vmatpush.bf16.msra.mxu0 %v2067_v15  ;;  %2149 = vmatpush.bf16.msra.mxu2 %v2067_v15  ;;  %v2119_v15 = vld [vmem:[%s2292_s23 + $0x144] sm:$0xf] }
  0x26   : > { %985 = vmatpush.bf16.msra.mxu1 %v2074_v14  ;;  %2156 = vmatpush.bf16.msra.mxu3 %v2074_v14  ;;  %v1775_v14 = vld [vmem:[%s2292_s23 + $0x68] sm:$0xf0] }
  0x27   : > { %v1778_v17 = vor.u32 %v2091_v13, %v1775_v14 }
  0x29   : > { %2031 = vmatmul.msk.bf16.vlgmr.msra.gmra.mxu1 %vm708_vm1, %v1730_v18  ;;  %816 = vmatpush.bf16.msra.mxu0 %v2066_v19  ;;  %v1890_v18 = vor.u32 %v2119_v15, %v1887_v16 }
  0x2a   : > { %2150 = vmatpush.bf16.msra.mxu2 %v2066_v19  ;;  %2048 = vmatmul.msk.bf16.vlgmr.msra.gmra.mxu3 %vm708_vm1, %v1866_v43  ;;  %v1773_v19 = vld [vmem:[%s2292_s23 + $0x60] sm:$0xf] }
  0x2b   : > { %v1774_v21 = vor.u32 %v2092_v20, %v1773_v19 }
  0x2c   : > { %817 = vmatmul.bf16.vlgmr.msra.gmra.mxu0 %v1726_v22  ;;  %v2093_v22 = vld [vmem:[%s2292_s23 + $0x74] sm:$0xf] }
  0x2d   : > { %897 = vmatmul.bf16.vlgmr.msra.gmra.mxu2 %v1854_v31  ;;  %v1786_v29 = vor.u32 %v2093_v22, %v1783_v23  ;;  %v1781_v31 = vld [vmem:[%s2292_s23 + $0x70] sm:$0xf]  ;;  %v2099_v23 = vld [vmem:[%s2292_s23 + $0xa4] sm:$0xf] }
  0x2e   : > { %v1782_v33 = vor.u32 %v2094_v32, %v1781_v31  ;;  %v2127_v31 = vld [vmem:[%s2292_s23 + $0x184] sm:$0xf]  ;;  %v1919_v32 = vld [vmem:[%s2292_s23 + $0x188] sm:$0xf0] }
  0x39   : > { %2032 = vmatmul.msk.bf16.gmra.mxu1 %vm708_vm1, %v1738_v25  ;;  %v2122_v25 = vld [vmem:[%s2292_s23 + $0x154] sm:$0xf0] }
  0x3a   : > { %2049 = vmatmul.msk.bf16.gmra.mxu3 %vm708_vm1, %v1874_v55  ;;  %v1894_v26 = vor.u32 %v2122_v25, %v1893_v24  ;;  %v1799_v55 = vld [vmem:[%s2292_s23 + $0x98] sm:$0xf0] }
  0x3c   : > { %822 = vmatmul.bf16.gmra.mxu0 %v1734_v28  ;;  %v1895_v28 = vld [vmem:[%s2292_s23 + $0x158] sm:$0xf0] }
  0x3d   : > { %902 = vmatmul.bf16.gmra.mxu2 %v1862_v41  ;;  %v1898_v30 = vor.u32 %v2121_v27, %v1895_v28  ;;  %v1917_v27 = vld [vmem:[%s2292_s23 + $0x180] sm:$0xf]  ;;  %v2128_v28 = vld [vmem:[%s2292_s23 + $0x184] sm:$0xf0] }
  0x49   : > { %2033 = vmatmul.msk.bf16.gmra.mxu1 %vm708_vm1, %v1746_v34  ;;  %v2095_v34 = vld [vmem:[%s2292_s23 + $0x84] sm:$0xf] }
  0x4a   : > { %2050 = vmatmul.msk.bf16.gmra.mxu3 %vm708_vm1, %v1882_v3  ;;  %v1794_v41 = vor.u32 %v2095_v34, %v1791_v35  ;;  %v1797_v3 = vld [vmem:[%s2292_s23 + $0x90] sm:$0xf]  ;;  %v1922_v35 = vor.u32 %v2127_v31, %v1919_v32  ;;  %v2103_v32 = vld [vmem:[%s2292_s23 + $0xc4] sm:$0xf] }
  0x4c   : > { %827 = vmatmul.bf16.gmra.mxu0 %v1742_v37  ;;  %v2124_v37 = vld [vmem:[%s2292_s23 + $0x164] sm:$0xf0] }
  0x4d   : > { %907 = vmatmul.bf16.gmra.mxu2 %v1870_v53  ;;  %v1902_v38 = vor.u32 %v2124_v37, %v1901_v36  ;;  %v2097_v53 = vld [vmem:[%s2292_s23 + $0x94] sm:$0xf]  ;;  %v1805_v37 = vld [vmem:[%s2292_s23 + $0xa0] sm:$0xf] }
  0x4e   : > { %v1802_v0 = vor.u32 %v2097_v53, %v1799_v55 }
  0x59   : > { %2034 = vmatmul.msk.bf16.gmra.mxu1 %vm708_vm1, %v1754_v46  ;;  %v2381_v46 = vld [vmem:[%s3065_s2] ss:$0 sm:$0xff] }
  0x5a   : > { %2051 = vmatmul.msk.bf16.gmra.mxu3 %vm708_vm1, %v1890_v18 }
  0x5c   : > { %832 = vmatmul.bf16.gmra.mxu0 %v1750_v49 }
  0x5d   : > { %912 = vmatmul.bf16.gmra.mxu2 %v1878_v1 }
  0x69   : > { %2035 = vmatmul.msk.bf16.gmra.mxu1 %vm708_vm1, %v1762_v58 }
  0x6a   : > { %2052 = vmatmul.msk.bf16.gmra.mxu3 %vm708_vm1, %v1898_v30  ;;  %v1918_v30 = vor.u32 %v2128_v28, %v1917_v27 }
  0x6c   : > { %837 = vmatmul.bf16.gmra.mxu0 %v1758_v61  ;;  %v1911_v61 = vld [vmem:[%s2292_s23 + $0x178] sm:$0xf0] }
  0x6d   : > { %917 = vmatmul.bf16.gmra.mxu2 %v1886_v12  ;;  %v1914_v1 = vor.u32 %v2125_v60, %v1911_v61  ;;  %v1798_v12 = vor.u32 %v2098_v4, %v1797_v3  ;;  %v1815_v61 = vld [vmem:[%s2292_s23 + $0xb8] sm:$0xf0] }
  0x6e   : > { %v1927_v3 = vld [vmem:[%s2292_s23 + $0x198] sm:$0xf0] }
  0x79   : > { %2036 = vmatmul.msk.bf16.gmra.mxu1 %vm708_vm1, %v1770_v6 }
  0x7a   : > { %2053 = vmatmul.msk.bf16.gmra.mxu3 %vm708_vm1, %v1906_v42 }
  0x7c   : > { %842 = vmatmul.bf16.gmra.mxu0 %v1766_v9 }
  0x7d   : > { %922 = vmatmul.bf16.gmra.mxu2 %v1894_v26  ;;  %v1807_v26 = vld [vmem:[%s2292_s23 + $0xa8] sm:$0xf0] }
  0x7e   : > { %v1810_v34 = vor.u32 %v2099_v23, %v1807_v26 }
  0x89   : > { %2037 = vmatmul.msk.bf16.gmra.mxu1 %vm708_vm1, %v1778_v17 }
  0x8a   : > { %2054 = vmatmul.msk.bf16.gmra.mxu3 %vm708_vm1, %v1914_v1 }
  0x8c   : > { %847 = vmatmul.bf16.gmra.mxu0 %v1774_v21 }
  0x8d   : > { %927 = vmatmul.bf16.gmra.mxu2 %v1902_v38  ;;  %v2100_v38 = vld [vmem:[%s2292_s23 + $0xa4] sm:$0xf0] }
  0x8e   : > { %v1806_v45 = vor.u32 %v2100_v38, %v1805_v37  ;;  %v1933_v38 = vld [vmem:[%s2292_s23 + $0x1a0] sm:$0xf] }
  0x99   : > { %2038 = vmatmul.msk.bf16.gmra.mxu1 %vm708_vm1, %v1786_v29 }
  0x9a   : > { %2055 = vmatmul.msk.bf16.gmra.mxu3 %vm708_vm1, %v1922_v35 }
  0x9c   : > { %852 = vmatmul.bf16.gmra.mxu0 %v1782_v33 }
  0x9d   : > { %932 = vmatmul.bf16.gmra.mxu2 %v1910_v59 }
  0xa6   : > { %v987_v43 = vpop.f32.mrf.mxu1 }
  0xa9   : > { %2039 = vmatmul.msk.bf16.gmra.mxu1 %vm708_vm1, %v1794_v41  ;;  %v818_v48 = vpop.f32.mrf.mxu0 }
  0xaa   : > { %v819_v49 = vadd.f32 %v2381_v46, %v818_v48 }
  0xac   : > { %v988_v50 = vadd.f32 %v987_v43, %v819_v49  ;;  %857 = vmatmul.bf16.gmra.mxu0 %v1790_v47 }
  0xad   : > { %937 = vmatmul.bf16.gmra.mxu2 %v1918_v30 }
  0xae   : > { %v989_v51 = vpop.f32.mrf.mxu1  ;;  %v1147_v52 = vpack.c.bf16 %v988_v50, %v988_v50  ;;  %v1412_v62 = vmul.f32 %v988_v50, %v988_v50  ;;  %v1277_v5 = vsel %vm1276_vm3, %v988_v50, 0.0 }
  0xb0   : > { %1212 = vst.msk [vmem:[%s2390_s10] sm:$0xf] %vm1211_vm2, %v1147_v52  ;;  %v1476_v10 = vsel %vm1276_vm3, %v1412_v62, 0.0  ;;  %v2427_v43 = vpop.f32.mrf.mxu2  ;;  %v1925_v62 = vld [vmem:[%s2292_s23 + $0x190] sm:$0xf] }
  0xb1   : > { %v820_v54 = vpop.f32.mrf.mxu0 }
  0xb2   : > { %v821_v58 = vadd.f32 %v2381_v46, %v820_v54 }
  0xb4   : > { %v990_v63 = vadd.f32 %v989_v51, %v821_v58  ;;  %v2101_v58 = vld [vmem:[%s2292_s23 + $0xb4] sm:$0xf] }
  0xb6   : > { %v992_v2 = vpop.f32.mrf.mxu1  ;;  %v1148_v6 = vpack.c.bf16 %v990_v63, %v990_v63  ;;  %v1278_v7 = vsel %vm1276_vm3, %v990_v63, 0.0  ;;  %v1413_v8 = vmul.f32 %v990_v63, %v990_v63  ;;  %v2130_v63 = vld [vmem:[%s2292_s23 + $0x194] sm:$0xf0] }
  0xb7   : > { %v1279_v9 = vadd.f32 %v1278_v7, %v1277_v5  ;;  %v1926_v1 = vor.u32 %v2130_v63, %v1925_v62  ;;  %v1818_v5 = vor.u32 %v2101_v58, %v1815_v61 }
  0xb8   : > { %1213 = vst.msk [vmem:[%s2390_s10 + $0x4] sm:$0xf] %vm1211_vm2, %v1148_v6  ;;  %v1477_v11 = vsel %vm1276_vm3, %v1413_v8, 0.0  ;;  %v2435_v56 = vpop.f32.mrf.mxu2  ;;  %v1813_v8 = vld [vmem:[%s2292_s23 + $0xb0] sm:$0xf] }
  0xb9   : > { %2040 = vmatmul.msk.bf16.gmra.mxu1 %vm708_vm1, %v1802_v0  ;;  %v1478_v13 = vadd.f32 %v1477_v11, %v1476_v10  ;;  %v823_v14 = vpop.f32.mrf.mxu0 }
  0xba   : > { %v824_v15 = vadd.f32 %v2381_v46, %v823_v14 }
  0xbc   : > { %v993_v16 = vadd.f32 %v992_v2, %v824_v15  ;;  %862 = vmatmul.bf16.gmra.mxu0 %v1798_v12  ;;  %v2129_v2 = vld [vmem:[%s2292_s23 + $0x194] sm:$0xf] }
  0xbd   : > { %942 = vmatmul.bf16.gmra.mxu2 %v1926_v1  ;;  %v1930_v6 = vor.u32 %v2129_v2, %v1927_v3 }
  0xbe   : > { %v994_v17 = vpop.f32.mrf.mxu1  ;;  %v1149_v18 = vpack.c.bf16 %v993_v16, %v993_v16  ;;  %v1280_v19 = vsel %vm1276_vm3, %v993_v16, 0.0  ;;  %v1414_v20 = vmul.f32 %v993_v16, %v993_v16 }
  0xbf   : > { %v1281_v21 = vadd.f32 %v1280_v19, %v1279_v9  ;;  %v2102_v9 = vld [vmem:[%s2292_s23 + $0xb4] sm:$0xf0]  ;;  %2056 = vmatmul.msk.bf16.gmra.mxu3 %vm708_vm1, %v1930_v6 }
  0xc0   : > { %1214 = vst.msk [vmem:[%s2390_s10 + $0x8] sm:$0xf] %vm1211_vm2, %v1149_v18  ;;  %v1479_v22 = vsel %vm1276_vm3, %v1414_v20, 0.0  ;;  %v903_v14 = vpop.f32.mrf.mxu2  ;;  %v1814_v16 = vor.u32 %v2102_v9, %v1813_v8  ;;  %v1072_v20 = vpop.f32.mrf.mxu3 }
  0xc1   : > { %v1480_v24 = vadd.f32 %v1479_v22, %v1478_v13  ;;  %v825_v25 = vpop.f32.mrf.mxu0  ;;  %v904_v19 = vadd.f32 %v2381_v46, %v903_v14 }
  0xc2   : > { %v826_v29 = vadd.f32 %v2381_v46, %v825_v25 }
  0xc3   : > { %v2457_v22 = vadd.f32 %v1072_v20, %v904_v19  ;;  %v1941_v19 = vld [vmem:[%s2292_s23 + $0x1b0] sm:$0xf]  ;;  %v2134_v20 = vld [vmem:[%s2292_s23 + $0x1b4] sm:$0xf0] }
  0xc4   : > { %v995_v33 = vadd.f32 %v994_v17, %v826_v29 }
  0xc5   : > { %v1181_v25 = vpack.c.bf16 %v2457_v22, %v2457_v22 }
  0xc6   : > { %v997_v36 = vpop.f32.mrf.mxu1  ;;  %v1150_v39 = vpack.c.bf16 %v995_v33, %v995_v33  ;;  %v1282_v40 = vsel %vm1276_vm3, %v995_v33, 0.0  ;;  %v1415_v41 = vmul.f32 %v995_v33, %v995_v33 }
  0xc7   : > { %v1283_v42 = vadd.f32 %v1282_v40, %v1281_v21  ;;  %1246 = vst.msk [vmem:[%s2390_s10 + $0x88] sm:$0xf] %vm1211_vm2, %v1181_v25  ;;  %v2133_v25 = vld [vmem:[%s2292_s23 + $0x1b4] sm:$0xf] }
  0xc8   : > { %1215 = vst.msk [vmem:[%s2390_s10 + $0xc] sm:$0xf] %vm1211_vm2, %v1150_v39  ;;  %v1481_v44 = vsel %vm1276_vm3, %v1415_v41, 0.0  ;;  %v905_v30 = vpop.f32.mrf.mxu2  ;;  %v1074_v37 = vpop.f32.mrf.mxu3  ;;  %v2132_v39 = vld [vmem:[%s2292_s23 + $0x1a4] sm:$0xf0] }
  0xc9   : > { %2041 = vmatmul.msk.bf16.gmra.mxu1 %vm708_vm1, %v1810_v34  ;;  %v1482_v47 = vadd.f32 %v1481_v44, %v1480_v24  ;;  %v828_v48 = vpop.f32.mrf.mxu0  ;;  %v906_v33 = vadd.f32 %v2381_v46, %v905_v30  ;;  %v2131_v44 = vld [vmem:[%s2292_s23 + $0x1a4] sm:$0xf] }
  0xca   : > { %v829_v49 = vadd.f32 %v2381_v46, %v828_v48 }
  0xcb   : > { %v2473_v41 = vadd.f32 %v1074_v37, %v906_v33 }
  0xcc   : > { %v998_v50 = vadd.f32 %v997_v36, %v829_v49  ;;  %867 = vmatmul.bf16.gmra.mxu0 %v1806_v45  ;;  %v1823_v36 = vld [vmem:[%s2292_s23 + $0xc8] sm:$0xf0] }
  0xcd   : > { %v1935_v45 = vld [vmem:[%s2292_s23 + $0x1a8] sm:$0xf0]  ;;  %v1826_v48 = vor.u32 %v2103_v32, %v1823_v36  ;;  %v1182_v49 = vpack.c.bf16 %v2473_v41, %v2473_v41  ;;  %v2106_v32 = vld [vmem:[%s2292_s23 + $0xd4] sm:$0xf0] }
  0xce   : > { %v999_v51 = vpop.f32.mrf.mxu1  ;;  %v1151_v52 = vpack.c.bf16 %v998_v50, %v998_v50  ;;  %v1284_v53 = vsel %vm1276_vm3, %v998_v50, 0.0  ;;  %v1416_v54 = vmul.f32 %v998_v50, %v998_v50 }
  0xcf   : > { %v1285_v55 = vadd.f32 %v1284_v53, %v1283_v42  ;;  %v1934_v42 = vor.u32 %v2132_v39, %v1933_v38  ;;  %v1938_v53 = vor.u32 %v2131_v44, %v1935_v45  ;;  %1247 = vst.msk [vmem:[%s2390_s10 + $0x8c] sm:$0xf] %vm1211_vm2, %v1182_v49 }
  0xd0   : > { %1216 = vst.msk [vmem:[%s2390_s10 + $0x10] sm:$0xf] %vm1211_vm2, %v1151_v52  ;;  %v1483_v57 = vsel %vm1276_vm3, %v1416_v54, 0.0  ;;  %v2104_v52 = vld [vmem:[%s2292_s23 + $0xc4] sm:$0xf0]  ;;  %v1077_v1 = vpop.f32.mrf.mxu3 }
  0xd1   : > { %v1484_v59 = vadd.f32 %v1483_v57, %v1482_v47  ;;  %v830_v60 = vpop.f32.mrf.mxu0  ;;  %947 = vmatmul.bf16.gmra.mxu2 %v1934_v42  ;;  %2057 = vmatmul.msk.bf16.gmra.mxu3 %vm708_vm1, %v1938_v53 }
  0xd2   : > { %v831_v0 = vadd.f32 %v2381_v46, %v830_v60 }
  0xd4   : > { %v1000_v4 = vadd.f32 %v999_v51, %v831_v0  ;;  %v1821_v51 = vld [vmem:[%s2292_s23 + $0xc0] sm:$0xf] }
  0xd5   : > { %v1822_v61 = vor.u32 %v2104_v52, %v1821_v51 }
  0xd6   : > { %v1002_v7 = vpop.f32.mrf.mxu1  ;;  %v1152_v10 = vpack.c.bf16 %v1000_v4, %v1000_v4  ;;  %v1286_v11 = vsel %vm1276_vm3, %v1000_v4, 0.0  ;;  %v1417_v12 = vmul.f32 %v1000_v4, %v1000_v4 }
  0xd7   : > { %v1287_v13 = vadd.f32 %v1286_v11, %v1285_v55 }
  0xd8   : > { %1217 = vst.msk [vmem:[%s2390_s10 + $0x14] sm:$0xf] %vm1211_vm2, %v1152_v10  ;;  %v1485_v15 = vsel %vm1276_vm3, %v1417_v12, 0.0 }
  0xd9   : > { %2042 = vmatmul.msk.bf16.gmra.mxu1 %vm708_vm1, %v1818_v5  ;;  %v1486_v17 = vadd.f32 %v1485_v15, %v1484_v59  ;;  %v833_v18 = vpop.f32.mrf.mxu0  ;;  %v908_v59 = vpop.f32.mrf.mxu2 }
  0xda   : > { %v834_v21 = vadd.f32 %v2381_v46, %v833_v18  ;;  %v909_v0 = vadd.f32 %v2381_v46, %v908_v59  ;;  %v1079_v18 = vpop.f32.mrf.mxu3 }
  0xdc   : > { %v1003_v23 = vadd.f32 %v1002_v7, %v834_v21  ;;  %872 = vmatmul.bf16.gmra.mxu0 %v1814_v16  ;;  %v2491_v3 = vadd.f32 %v1077_v1, %v909_v0  ;;  %v1839_v0 = vld [vmem:[%s2292_s23 + $0xe8] sm:$0xf0] }
  0xde   : > { %v1004_v24 = vpop.f32.mrf.mxu1  ;;  %v1153_v26 = vpack.c.bf16 %v1003_v23, %v1003_v23  ;;  %v1288_v27 = vsel %vm1276_vm3, %v1003_v23, 0.0  ;;  %v1418_v28 = vmul.f32 %v1003_v23, %v1003_v23  ;;  %v1183_v6 = vpack.c.bf16 %v2491_v3, %v2491_v3 }
  0xdf   : > { %v1289_v29 = vadd.f32 %v1288_v27, %v1287_v13  ;;  %v2105_v13 = vld [vmem:[%s2292_s23 + $0xd4] sm:$0xf] }
  0xe0   : > { %1218 = vst.msk [vmem:[%s2390_s10 + $0x18] sm:$0xf] %vm1211_vm2, %v1153_v26  ;;  %v1487_v31 = vsel %vm1276_vm3, %v1418_v28, 0.0  ;;  %v1943_v26 = vld [vmem:[%s2292_s23 + $0x1b8] sm:$0xf0] }
  0xe1   : > { %v1488_v34 = vadd.f32 %v1487_v31, %v1486_v17  ;;  %v835_v35 = vpop.f32.mrf.mxu0  ;;  %1248 = vst.msk [vmem:[%s2390_s10 + $0x90] sm:$0xf] %vm1211_vm2, %v1183_v6  ;;  %v910_v11 = vpop.f32.mrf.mxu2  ;;  %v1831_v17 = vld [vmem:[%s2292_s23 + $0xd8] sm:$0xf0]  ;;  %v1829_v31 = vld [vmem:[%s2292_s23 + $0xd0] sm:$0xf]  ;;  %v1946_v33 = vor.u32 %v2133_v25, %v1943_v26 }
  0xe2   : > { %v836_v40 = vadd.f32 %v2381_v46, %v835_v35  ;;  %v911_v14 = vadd.f32 %v2381_v46, %v910_v11  ;;  %v1834_v28 = vor.u32 %v2105_v13, %v1831_v17 }
  0xe3   : > { %2058 = vmatmul.msk.bf16.gmra.mxu3 %vm708_vm1, %v1946_v33 }
  0xe4   : > { %v1005_v47 = vadd.f32 %v1004_v24, %v836_v40  ;;  %v2507_v23 = vadd.f32 %v1079_v18, %v911_v14  ;;  %v1942_v24 = vor.u32 %v2134_v20, %v1941_v19  ;;  %v1830_v40 = vor.u32 %v2106_v32, %v1829_v31  ;;  %v1837_v14 = vld [vmem:[%s2292_s23 + $0xe0] sm:$0xf] }
  0xe6   : > { %v1007_v50 = vpop.f32.mrf.mxu1  ;;  %v1154_v54 = vpack.c.bf16 %v1005_v47, %v1005_v47  ;;  %v1290_v55 = vsel %vm1276_vm3, %v1005_v47, 0.0  ;;  %v1419_v57 = vmul.f32 %v1005_v47, %v1005_v47  ;;  %952 = vmatmul.bf16.gmra.mxu2 %v1942_v24  ;;  %v1082_v47 = vpop.f32.mrf.mxu3 }
  0xe7   : > { %v1291_v58 = vadd.f32 %v1290_v55, %v1289_v29  ;;  %v1184_v29 = vpack.c.bf16 %v2507_v23, %v2507_v23 }
  0xe8   : > { %1219 = vst.msk [vmem:[%s2390_s10 + $0x1c] sm:$0xf] %vm1211_vm2, %v1154_v54  ;;  %v1489_v60 = vsel %vm1276_vm3, %v1419_v57, 0.0 }
  0xe9   : > { %2043 = vmatmul.msk.bf16.gmra.mxu1 %vm708_vm1, %v1826_v48  ;;  %v1490_v62 = vadd.f32 %v1489_v60, %v1488_v34  ;;  %v838_v63 = vpop.f32.mrf.mxu0  ;;  %1249 = vst.msk [vmem:[%s2390_s10 + $0x94] sm:$0xf] %vm1211_vm2, %v1184_v29  ;;  %v913_v38 = vpop.f32.mrf.mxu2  ;;  %v2107_v60 = vld [vmem:[%s2292_s23 + $0xe4] sm:$0xf] }
  0xea   : > { %v839_v2 = vadd.f32 %v2381_v46, %v838_v63  ;;  %v914_v45 = vadd.f32 %v2381_v46, %v913_v38  ;;  %v1842_v11 = vor.u32 %v2107_v60, %v1839_v0  ;;  %v2110_v0 = vld [vmem:[%s2292_s23 + $0xf4] sm:$0xf0] }
  0xec   : > { %v1008_v4 = vadd.f32 %v1007_v50, %v839_v2  ;;  %877 = vmatmul.bf16.gmra.mxu0 %v1822_v61  ;;  %v2525_v49 = vadd.f32 %v1082_v47, %v914_v45  ;;  %v1949_v2 = vld [vmem:[%s2292_s23 + $0x1c0] sm:$0xf] }
  0xee   : > { %v1009_v5 = vpop.f32.mrf.mxu1  ;;  %v1155_v7 = vpack.c.bf16 %v1008_v4, %v1008_v4  ;;  %v1292_v8 = vsel %vm1276_vm3, %v1008_v4, 0.0  ;;  %v1420_v9 = vmul.f32 %v1008_v4, %v1008_v4  ;;  %v1185_v52 = vpack.c.bf16 %v2525_v49, %v2525_v49  ;;  %v1084_v1 = vpop.f32.mrf.mxu3  ;;  %v2136_v4 = vld [vmem:[%s2292_s23 + $0x1c4] sm:$0xf0] }
  0xef   : > { %v1293_v10 = vadd.f32 %v1292_v8, %v1291_v58  ;;  %v2135_v8 = vld [vmem:[%s2292_s23 + $0x1c4] sm:$0xf] }
  0xf0   : > { %1220 = vst.msk [vmem:[%s2390_s10 + $0x20] sm:$0xf] %vm1211_vm2, %v1155_v7  ;;  %v1491_v12 = vsel %vm1276_vm3, %v1420_v9, 0.0  ;;  %v1950_v7 = vor.u32 %v2136_v4, %v1949_v2  ;;  %v1951_v9 = vld [vmem:[%s2292_s23 + $0x1c8] sm:$0xf0] }
  0xf1   : > { %v1492_v15 = vadd.f32 %v1491_v12, %v1490_v62  ;;  %v840_v16 = vpop.f32.mrf.mxu0  ;;  %1250 = vst.msk [vmem:[%s2390_s10 + $0x98] sm:$0xf] %vm1211_vm2, %v1185_v52  ;;  %v915_v58 = vpop.f32.mrf.mxu2  ;;  %v2138_v52 = vld [vmem:[%s2292_s23 + $0x1d4] sm:$0xf0] }
  0xf2   : > { %v841_v21 = vadd.f32 %v2381_v46, %v840_v16  ;;  %v916_v61 = vadd.f32 %v2381_v46, %v915_v58  ;;  %v1954_v16 = vor.u32 %v2135_v8, %v1951_v9  ;;  %v1959_v58 = vld [vmem:[%s2292_s23 + $0x1d8] sm:$0xf0] }
  0xf4   : > { %v1010_v27 = vadd.f32 %v1009_v5, %v841_v21  ;;  %v2541_v6 = vadd.f32 %v1084_v1, %v916_v61  ;;  %2059 = vmatmul.msk.bf16.gmra.mxu3 %vm708_vm1, %v1954_v16 }
  0xf6   : > { %v1012_v30 = vpop.f32.mrf.mxu1  ;;  %v1156_v34 = vpack.c.bf16 %v1010_v27, %v1010_v27  ;;  %v1294_v35 = vsel %vm1276_vm3, %v1010_v27, 0.0  ;;  %v1421_v36 = vmul.f32 %v1010_v27, %v1010_v27  ;;  %v1186_v12 = vpack.c.bf16 %v2541_v6, %v2541_v6  ;;  %957 = vmatmul.bf16.gmra.mxu2 %v1950_v7  ;;  %v1087_v29 = vpop.f32.mrf.mxu3 }
  0xf7   : > { %v1295_v37 = vadd.f32 %v1294_v35, %v1293_v10 }
  0xf8   : > { %1221 = vst.msk [vmem:[%s2390_s10 + $0x24] sm:$0xf] %vm1211_vm2, %v1156_v34  ;;  %v1493_v39 = vsel %vm1276_vm3, %v1421_v36, 0.0 }
  0xf9   : > { %2044 = vmatmul.msk.bf16.gmra.mxu1 %vm708_vm1, %v1834_v28  ;;  %v1494_v42 = vadd.f32 %v1493_v39, %v1492_v15  ;;  %v843_v44 = vpop.f32.mrf.mxu0  ;;  %v2108_v15 = vld [vmem:[%s2292_s23 + $0xe4] sm:$0xf0]  ;;  %1251 = vst.msk [vmem:[%s2390_s10 + $0x9c] sm:$0xf] %vm1211_vm2, %v1186_v12  ;;  %v918_v21 = vpop.f32.mrf.mxu2 }
  0xfa   : > { %v844_v48 = vadd.f32 %v2381_v46, %v843_v44  ;;  %v1838_v25 = vor.u32 %v2108_v15, %v1837_v14  ;;  %v919_v28 = vadd.f32 %v2381_v46, %v918_v21 }
  0xfc   : > { %v1013_v50 = vadd.f32 %v1012_v30, %v844_v48  ;;  %882 = vmatmul.bf16.gmra.mxu0 %v1830_v40  ;;  %v2559_v31 = vadd.f32 %v1087_v29, %v919_v28  ;;  %v1847_v48 = vld [vmem:[%s2292_s23 + $0xf8] sm:$0xf0]  ;;  %v2111_v28 = vld [vmem:[%s2292_s23 + $0x104] sm:$0xf] }
  0xfe   : > { %v1014_v51 = vpop.f32.mrf.mxu1  ;;  %v1157_v53 = vpack.c.bf16 %v1013_v50, %v1013_v50  ;;  %v1296_v54 = vsel %vm1276_vm3, %v1013_v50, 0.0  ;;  %v1422_v55 = vmul.f32 %v1013_v50, %v1013_v50  ;;  %v1187_v34 = vpack.c.bf16 %v2559_v31, %v2559_v31  ;;  %v1089_v50 = vpop.f32.mrf.mxu3 }
  0xff   : > { %v1297_v57 = vadd.f32 %v1296_v54, %v1295_v37 }
 0x100   : > { %1222 = vst.msk [vmem:[%s2390_s10 + $0x28] sm:$0xf] %vm1211_vm2, %v1157_v53  ;;  %v1495_v59 = vsel %vm1276_vm3, %v1422_v55, 0.0 }
 0x101   : > { %v1496_v62 = vadd.f32 %v1495_v59, %v1494_v42  ;;  %v845_v63 = vpop.f32.mrf.mxu0  ;;  %1252 = vst.msk [vmem:[%s2390_s10 + $0xa0] sm:$0xf] %vm1211_vm2, %v1187_v34  ;;  %v920_v39 = vpop.f32.mrf.mxu2  ;;  %v2109_v42 = vld [vmem:[%s2292_s23 + $0xf4] sm:$0xf] }
 0x102   : > { %v846_v5 = vadd.f32 %v2381_v46, %v845_v63  ;;  %v921_v44 = vadd.f32 %v2381_v46, %v920_v39  ;;  %v1850_v60 = vor.u32 %v2109_v42, %v1847_v48  ;;  %v1845_v63 = vld [vmem:[%s2292_s23 + $0xf0] sm:$0xf]  ;;  %v1967_v42 = vld [vmem:[%s2292_s23 + $0x1e8] sm:$0xf0] }
 0x104   : > { %v1015_v10 = vadd.f32 %v1014_v51, %v846_v5  ;;  %v1957_v51 = vld [vmem:[%s2292_s23 + $0x1d0] sm:$0xf]  ;;  %v2575_v54 = vadd.f32 %v1089_v50, %v921_v44 }
 0x105   : > { %v1958_v55 = vor.u32 %v2138_v52, %v1957_v51 }
 0x106   : > { %v1017_v13 = vpop.f32.mrf.mxu1  ;;  %v1158_v17 = vpack.c.bf16 %v1015_v10, %v1015_v10  ;;  %v1298_v18 = vsel %vm1276_vm3, %v1015_v10, 0.0  ;;  %v1423_v19 = vmul.f32 %v1015_v10, %v1015_v10  ;;  %v1188_v61 = vpack.c.bf16 %v2575_v54, %v2575_v54  ;;  %v1092_v14 = vpop.f32.mrf.mxu3 }
 0x107   : > { %v1299_v20 = vadd.f32 %v1298_v18, %v1297_v57  ;;  %v2137_v57 = vld [vmem:[%s2292_s23 + $0x1d4] sm:$0xf]  ;;  %962 = vmatmul.bf16.gmra.mxu2 %v1958_v55  ;;  %v1846_v10 = vor.u32 %v2110_v0, %v1845_v63 }
 0x108   : > { %1223 = vst.msk [vmem:[%s2390_s10 + $0x2c] sm:$0xf] %vm1211_vm2, %v1158_v17  ;;  %v1497_v24 = vsel %vm1276_vm3, %v1423_v19, 0.0  ;;  %v1962_v1 = vor.u32 %v2137_v57, %v1959_v58 }
 0x109   : > { %2045 = vmatmul.msk.bf16.gmra.mxu1 %vm708_vm1, %v1842_v11  ;;  %v1498_v26 = vadd.f32 %v1497_v24, %v1496_v62  ;;  %v848_v27 = vpop.f32.mrf.mxu0  ;;  %1253 = vst.msk [vmem:[%s2390_s10 + $0xa4] sm:$0xf] %vm1211_vm2, %v1188_v61  ;;  %v923_v8 = vpop.f32.mrf.mxu2 }
 0x10a   : > { %v849_v30 = vadd.f32 %v2381_v46, %v848_v27  ;;  %2060 = vmatmul.msk.bf16.gmra.mxu3 %vm708_vm1, %v1962_v1 }
 0x10c   : > { %v1018_v32 = vadd.f32 %v1017_v13, %v849_v30  ;;  %887 = vmatmul.bf16.gmra.mxu0 %v1838_v25  ;;  %v924_v13 = vadd.f32 %v2381_v46, %v923_v8 }
 0x10e   : > { %v1019_v33 = vpop.f32.mrf.mxu1  ;;  %v1159_v35 = vpack.c.bf16 %v1018_v32, %v1018_v32  ;;  %v1300_v36 = vsel %vm1276_vm3, %v1018_v32, 0.0  ;;  %v1424_v37 = vmul.f32 %v1018_v32, %v1018_v32  ;;  %v2593_v16 = vadd.f32 %v1092_v14, %v924_v13  ;;  %v1094_v34 = vpop.f32.mrf.mxu3 }
 0x10f   : > { %v1301_v38 = vadd.f32 %v1300_v36, %v1299_v20  ;;  %v2140_v36 = vld [vmem:[%s2292_s23 + $0x1e4] sm:$0xf0] }
 0x110   : > { %1224 = vst.msk [vmem:[%s2390_s10 + $0x30] sm:$0xf] %vm1211_vm2, %v1159_v35  ;;  %v1499_v40 = vsel %vm1276_vm3, %v1424_v37, 0.0  ;;  %v1189_v19 = vpack.c.bf16 %v2593_v16, %v2593_v16  ;;  %v1965_v35 = vld [vmem:[%s2292_s23 + $0x1e0] sm:$0xf] }
 0x111   : > { %v1500_v45 = vadd.f32 %v1499_v40, %v1498_v26  ;;  %v850_v47 = vpop.f32.mrf.mxu0  ;;  %v925_v26 = vpop.f32.mrf.mxu2  ;;  %v1966_v39 = vor.u32 %v2140_v36, %v1965_v35  ;;  %v2139_v40 = vld [vmem:[%s2292_s23 + $0x1e4] sm:$0xf] }
 0x112   : > { %v851_v53 = vadd.f32 %v2381_v46, %v850_v47  ;;  %1254 = vst.msk [vmem:[%s2390_s10 + $0xa8] sm:$0xf] %vm1211_vm2, %v1189_v19  ;;  %v926_v29 = vadd.f32 %v2381_v46, %v925_v26  ;;  %v1970_v50 = vor.u32 %v2139_v40, %v1967_v42 }
 0x114   : > { %v1020_v59 = vadd.f32 %v1019_v33, %v851_v53  ;;  %v1855_v33 = vld [vmem:[%s2292_s23 + $0x108] sm:$0xf0] }
 0x116   : > { %v1022_v62 = vpop.f32.mrf.mxu1  ;;  %v1160_v2 = vpack.c.bf16 %v1020_v59, %v1020_v59  ;;  %v1302_v4 = vsel %vm1276_vm3, %v1020_v59, 0.0  ;;  %v1425_v5 = vmul.f32 %v1020_v59, %v1020_v59 }
 0x117   : > { %v1303_v7 = vadd.f32 %v1302_v4, %v1301_v38  ;;  %v2609_v38 = vadd.f32 %v1094_v34, %v926_v29  ;;  %967 = vmatmul.bf16.gmra.mxu2 %v1966_v39 }
 0x118   : > { %1225 = vst.msk [vmem:[%s2390_s10 + $0x34] sm:$0xf] %vm1211_vm2, %v1160_v2  ;;  %v1501_v9 = vsel %vm1276_vm3, %v1425_v5, 0.0 }
 0x119   : > { %2046 = vmatmul.msk.bf16.gmra.mxu1 %vm708_vm1, %v1850_v60  ;;  %v1502_v11 = vadd.f32 %v1501_v9, %v1500_v45  ;;  %v853_v12 = vpop.f32.mrf.mxu0  ;;  %v1858_v45 = vor.u32 %v2111_v28, %v1855_v33  ;;  %v1190_v47 = vpack.c.bf16 %v2609_v38, %v2609_v38  ;;  %v928_v57 = vpop.f32.mrf.mxu2 }
 0x11a   : > { %v854_v15 = vadd.f32 %v2381_v46, %v853_v12  ;;  %2061 = vmatmul.msk.bf16.gmra.mxu3 %vm708_vm1, %v1970_v50  ;;  %v929_v61 = vadd.f32 %v2381_v46, %v928_v57 }
 0x11b   : > { %1255 = vst.msk [vmem:[%s2390_s10 + $0xac] sm:$0xf] %vm1211_vm2, %v1190_v47 }
 0x11c   : > { %v1023_v17 = vadd.f32 %v1022_v62, %v854_v15  ;;  %892 = vmatmul.bf16.gmra.mxu0 %v1846_v10  ;;  %v1097_v62 = vpop.f32.mrf.mxu3 }
 0x11d   : > { %v2625_v0 = vadd.f32 %v1097_v62, %v929_v61 }
 0x11e   : > { %v1024_v18 = vpop.f32.mrf.mxu1  ;;  %v1161_v20 = vpack.c.bf16 %v1023_v17, %v1023_v17  ;;  %v1304_v21 = vsel %vm1276_vm3, %v1023_v17, 0.0  ;;  %v1426_v24 = vmul.f32 %v1023_v17, %v1023_v17  ;;  %v1973_v17 = vld [vmem:[%s2292_s23 + $0x1f0] sm:$0xf] }
 0x11f   : > { %v1305_v25 = vadd.f32 %v1304_v21, %v1303_v7  ;;  %v1191_v4 = vpack.c.bf16 %v2625_v0, %v2625_v0 }
 0x120   : > { %1226 = vst.msk [vmem:[%s2390_s10 + $0x38] sm:$0xf] %vm1211_vm2, %v1161_v20  ;;  %v1503_v27 = vsel %vm1276_vm3, %v1426_v24, 0.0  ;;  %v2141_v24 = vld [vmem:[%s2292_s23 + $0x1f4] sm:$0xf] }
 0x121   : > { %v1504_v30 = vadd.f32 %v1503_v27, %v1502_v11  ;;  %v855_v32 = vpop.f32.mrf.mxu0  ;;  %1256 = vst.msk [vmem:[%s2390_s10 + $0xb0] sm:$0xf] %vm1211_vm2, %v1191_v4  ;;  %v930_v10 = vpop.f32.mrf.mxu2 }
 0x122   : > { %v856_v37 = vadd.f32 %v2381_v46, %v855_v32  ;;  %v931_v12 = vadd.f32 %v2381_v46, %v930_v10 }
 0x124   : > { %v1025_v44 = vadd.f32 %v1024_v18, %v856_v37  ;;  %v1099_v15 = vpop.f32.mrf.mxu3  ;;  %v2142_v18 = vld [vmem:[%s2292_s23 + $0x1f4] sm:$0xf0] }
 0x125   : > { %v2639_v20 = vadd.f32 %v1099_v15, %v931_v12  ;;  %v1974_v21 = vor.u32 %v2142_v18, %v1973_v17 }
 0x126   : > { %v1027_v48 = vpop.f32.mrf.mxu1  ;;  %v1162_v51 = vpack.c.bf16 %v1025_v44, %v1025_v44  ;;  %v1306_v52 = vsel %vm1276_vm3, %v1025_v44, 0.0  ;;  %v1427_v53 = vmul.f32 %v1025_v44, %v1025_v44 }
 0x127   : > { %v1307_v55 = vadd.f32 %v1306_v52, %v1305_v25  ;;  %v1975_v25 = vld [vmem:[%s2292_s23 + $0x1f8] sm:$0xf0]  ;;  %v1192_v27 = vpack.c.bf16 %v2639_v20, %v2639_v20  ;;  %972 = vmatmul.bf16.gmra.mxu2 %v1974_v21 }
 0x128   : > { %1227 = vst.msk [vmem:[%s2390_s10 + $0x3c] sm:$0xf] %vm1211_vm2, %v1162_v51  ;;  %v1505_v58 = vsel %vm1276_vm3, %v1427_v53, 0.0  ;;  %v1978_v29 = vor.u32 %v2141_v24, %v1975_v25 }
 0x129   : > { %2047 = vmatmul.msk.bf16.gmra.mxu1 %vm708_vm1, %v1858_v45  ;;  %v1506_v59 = vadd.f32 %v1505_v58, %v1504_v30  ;;  %v858_v60 = vpop.f32.mrf.mxu0  ;;  %1257 = vst.msk [vmem:[%s2390_s10 + $0xb4] sm:$0xf] %vm1211_vm2, %v1192_v27  ;;  %v933_v35 = vpop.f32.mrf.mxu2 }
 0x12a   : > { %v859_v63 = vadd.f32 %v2381_v46, %v858_v60  ;;  %2062 = vmatmul.msk.bf16.gmra.mxu3 %vm708_vm1, %v1978_v29  ;;  %v934_v40 = vadd.f32 %v2381_v46, %v933_v35 }
 0x12c   : > { %v1028_v1 = vadd.f32 %v1027_v48, %v859_v63  ;;  %v1102_v42 = vpop.f32.mrf.mxu3 }
 0x12d   : > { %v2654_v45 = vadd.f32 %v1102_v42, %v934_v40 }
 0x12e   : > { %v1029_v2 = vpop.f32.mrf.mxu1  ;;  %v1163_v5 = vpack.c.bf16 %v1028_v1, %v1028_v1  ;;  %v1308_v7 = vsel %vm1276_vm3, %v1028_v1, 0.0  ;;  %v1428_v8 = vmul.f32 %v1028_v1, %v1028_v1 }
 0x12f   : > { %v1309_v9 = vadd.f32 %v1308_v7, %v1307_v55  ;;  %v1193_v50 = vpack.c.bf16 %v2654_v45, %v2654_v45 }
 0x130   : > { %1228 = vst.msk [vmem:[%s2390_s10 + $0x40] sm:$0xf] %vm1211_vm2, %v1163_v5  ;;  %v1507_v11 = vsel %vm1276_vm3, %v1428_v8, 0.0 }
 0x131   : > { %v1508_v13 = vadd.f32 %v1507_v11, %v1506_v59  ;;  %v860_v14 = vpop.f32.mrf.mxu0  ;;  %1258 = vst.msk [vmem:[%s2390_s10 + $0xb8] sm:$0xf] %vm1211_vm2, %v1193_v50  ;;  %v935_v57 = vpop.f32.mrf.mxu2 }
 0x132   : > { %v861_v19 = vadd.f32 %v2381_v46, %v860_v14  ;;  %v936_v59 = vadd.f32 %v2381_v46, %v935_v57 }
 0x134   : > { %v1030_v26 = vadd.f32 %v1029_v2, %v861_v19  ;;  %v1104_v62 = vpop.f32.mrf.mxu3 }
 0x135   : > { %v2666_v1 = vadd.f32 %v1104_v62, %v936_v59 }
 0x136   : > { %v1032_v28 = vpop.f32.mrf.mxu1  ;;  %v1164_v30 = vpack.c.bf16 %v1030_v26, %v1030_v26  ;;  %v1310_v32 = vsel %vm1276_vm3, %v1030_v26, 0.0  ;;  %v1429_v33 = vmul.f32 %v1030_v26, %v1030_v26 }
 0x137   : > { %v1311_v34 = vadd.f32 %v1310_v32, %v1309_v9  ;;  %v1194_v4 = vpack.c.bf16 %v2666_v1, %v2666_v1 }
 0x138   : > { %1229 = vst.msk [vmem:[%s2390_s10 + $0x44] sm:$0xf] %vm1211_vm2, %v1164_v30  ;;  %v1509_v36 = vsel %vm1276_vm3, %v1429_v33, 0.0 }
 0x139   : > { %v1510_v37 = vadd.f32 %v1509_v36, %v1508_v13  ;;  %v863_v39 = vpop.f32.mrf.mxu0  ;;  %1259 = vst.msk [vmem:[%s2390_s10 + $0xbc] sm:$0xf] %vm1211_vm2, %v1194_v4  ;;  %v938_v11 = vpop.f32.mrf.mxu2 }
 0x13a   : > { %v864_v44 = vadd.f32 %v2381_v46, %v863_v39  ;;  %v939_v15 = vadd.f32 %v2381_v46, %v938_v11 }
 0x13c   : > { %v1033_v47 = vadd.f32 %v1032_v28, %v864_v44  ;;  %v1107_v17 = vpop.f32.mrf.mxu3 }
 0x13d   : > { %v2678_v19 = vadd.f32 %v1107_v17, %v939_v15 }
 0x13e   : > { %v1034_v48 = vpop.f32.mrf.mxu1  ;;  %v1165_v51 = vpack.c.bf16 %v1033_v47, %v1033_v47  ;;  %v1312_v52 = vsel %vm1276_vm3, %v1033_v47, 0.0  ;;  %v1430_v53 = vmul.f32 %v1033_v47, %v1033_v47 }
 0x13f   : > { %v1313_v55 = vadd.f32 %v1312_v52, %v1311_v34  ;;  %v1195_v25 = vpack.c.bf16 %v2678_v19, %v2678_v19 }
 0x140   : > { %1230 = vst.msk [vmem:[%s2390_s10 + $0x48] sm:$0xf] %vm1211_vm2, %v1165_v51  ;;  %v1511_v58 = vsel %vm1276_vm3, %v1430_v53, 0.0 }
 0x141   : > { %v1512_v60 = vadd.f32 %v1511_v58, %v1510_v37  ;;  %v865_v61 = vpop.f32.mrf.mxu0  ;;  %1260 = vst.msk [vmem:[%s2390_s10 + $0xc0] sm:$0xf] %vm1211_vm2, %v1195_v25  ;;  %v940_v30 = vpop.f32.mrf.mxu2 }
 0x142   : > { %v866_v63 = vadd.f32 %v2381_v46, %v865_v61  ;;  %v941_v33 = vadd.f32 %v2381_v46, %v940_v30 }
 0x144   : > { %v1035_v2 = vadd.f32 %v1034_v48, %v866_v63  ;;  %v1109_v36 = vpop.f32.mrf.mxu3 }
 0x145   : > { %v2690_v39 = vadd.f32 %v1109_v36, %v941_v33 }
 0x146   : > { %v1037_v5 = vpop.f32.mrf.mxu1  ;;  %v1166_v7 = vpack.c.bf16 %v1035_v2, %v1035_v2  ;;  %v1314_v8 = vsel %vm1276_vm3, %v1035_v2, 0.0  ;;  %v1431_v9 = vmul.f32 %v1035_v2, %v1035_v2 }
 0x147   : > { %v1315_v10 = vadd.f32 %v1314_v8, %v1313_v55  ;;  %v1196_v42 = vpack.c.bf16 %v2690_v39, %v2690_v39 }
 0x148   : > { %1231 = vst.msk [vmem:[%s2390_s10 + $0x4c] sm:$0xf] %vm1211_vm2, %v1166_v7  ;;  %v1513_v12 = vsel %vm1276_vm3, %v1431_v9, 0.0 }
 0x149   : > { %v1514_v13 = vadd.f32 %v1513_v12, %v1512_v60  ;;  %v868_v14 = vpop.f32.mrf.mxu0  ;;  %1261 = vst.msk [vmem:[%s2390_s10 + $0xc4] sm:$0xf] %vm1211_vm2, %v1196_v42  ;;  %v943_v52 = vpop.f32.mrf.mxu2 }
 0x14a   : > { %v869_v18 = vadd.f32 %v2381_v46, %v868_v14  ;;  %v944_v58 = vadd.f32 %v2381_v46, %v943_v52 }
 0x14c   : > { %v1038_v21 = vadd.f32 %v1037_v5, %v869_v18  ;;  %v1112_v59 = vpop.f32.mrf.mxu3 }
 0x14d   : > { %v2706_v61 = vadd.f32 %v1112_v59, %v944_v58 }
 0x14e   : > { %v1039_v24 = vpop.f32.mrf.mxu1  ;;  %v1167_v26 = vpack.c.bf16 %v1038_v21, %v1038_v21  ;;  %v1316_v27 = vsel %vm1276_vm3, %v1038_v21, 0.0  ;;  %v1432_v28 = vmul.f32 %v1038_v21, %v1038_v21 }
 0x14f   : > { %v1317_v29 = vadd.f32 %v1316_v27, %v1315_v10  ;;  %v1197_v2 = vpack.c.bf16 %v2706_v61, %v2706_v61 }
 0x150   : > { %1232 = vst.msk [vmem:[%s2390_s10 + $0x50] sm:$0xf] %vm1211_vm2, %v1167_v26  ;;  %v1515_v32 = vsel %vm1276_vm3, %v1432_v28, 0.0 }
 0x151   : > { %v1516_v34 = vadd.f32 %v1515_v32, %v1514_v13  ;;  %v870_v35 = vpop.f32.mrf.mxu0  ;;  %1262 = vst.msk [vmem:[%s2390_s10 + $0xc8] sm:$0xf] %vm1211_vm2, %v1197_v2  ;;  %v945_v5 = vpop.f32.mrf.mxu2 }
 0x152   : > { %v871_v37 = vadd.f32 %v2381_v46, %v870_v35  ;;  %v946_v7 = vadd.f32 %v2381_v46, %v945_v5 }
 0x154   : > { %v1040_v40 = vadd.f32 %v1039_v24, %v871_v37  ;;  %v1114_v9 = vpop.f32.mrf.mxu3 }
 0x155   : > { %v2720_v11 = vadd.f32 %v1114_v9, %v946_v7 }
 0x156   : > { %v1042_v44 = vpop.f32.mrf.mxu1  ;;  %v1168_v47 = vpack.c.bf16 %v1040_v40, %v1040_v40  ;;  %v1318_v48 = vsel %vm1276_vm3, %v1040_v40, 0.0  ;;  %v1433_v50 = vmul.f32 %v1040_v40, %v1040_v40 }
 0x157   : > { %v2697_v51 = vadd.f32 %v1318_v48, %v1317_v29  ;;  %v1198_v13 = vpack.c.bf16 %v2720_v11, %v2720_v11 }
 0x158   : > { %1233 = vst.msk [vmem:[%s2390_s10 + $0x54] sm:$0xf] %vm1211_vm2, %v1168_v47  ;;  %v1517_v53 = vsel %vm1276_vm3, %v1433_v50, 0.0 }
 0x159   : > { %v2702_v55 = vadd.f32 %v1517_v53, %v1516_v34  ;;  %v873_v57 = vpop.f32.mrf.mxu0  ;;  %1263 = vst.msk [vmem:[%s2390_s10 + $0xcc] sm:$0xf] %vm1211_vm2, %v1198_v13  ;;  %v948_v17 = vpop.f32.mrf.mxu2 }
 0x15a   : > { %v874_v60 = vadd.f32 %v2381_v46, %v873_v57  ;;  %v949_v21 = vadd.f32 %v2381_v46, %v948_v17 }
 0x15c   : > { %v2708_v62 = vadd.f32 %v1042_v44, %v874_v60  ;;  %v1117_v25 = vpop.f32.mrf.mxu3 }
 0x15d   : > { %v2734_v26 = vadd.f32 %v1117_v25, %v949_v21 }
 0x15e   : > { %v1044_v63 = vpop.f32.mrf.mxu1  ;;  %v1169_v4 = vpack.c.bf16 %v2708_v62, %v2708_v62 }
 0x15f   : > { %v1199_v29 = vpack.c.bf16 %v2734_v26, %v2734_v26 }
 0x160   : > { %1234 = vst.msk [vmem:[%s2390_s10 + $0x58] sm:$0xf] %vm1211_vm2, %v1169_v4 }
 0x161   : > { %v875_v8 = vpop.f32.mrf.mxu0  ;;  %1264 = vst.msk [vmem:[%s2390_s10 + $0xd0] sm:$0xf] %vm1211_vm2, %v1199_v29  ;;  %v950_v32 = vpop.f32.mrf.mxu2 }
 0x162   : > { %v876_v10 = vadd.f32 %v2381_v46, %v875_v8 }
 0x164   : > { %v2722_v12 = vadd.f32 %v1044_v63, %v876_v10  ;;  %v1119_v36 = vpop.f32.mrf.mxu3 }
 0x166   : > { %v1047_v14 = vpop.f32.mrf.mxu1  ;;  %v1170_v15 = vpack.c.bf16 %v2722_v12, %v2722_v12 }
 0x168   : > { %1235 = vst.msk [vmem:[%s2390_s10 + $0x5c] sm:$0xf] %vm1211_vm2, %v1170_v15 }
 0x169   : > { %v878_v18 = vpop.f32.mrf.mxu0  ;;  %v953_v48 = vpop.f32.mrf.mxu2 }
 0x16a   : > { %v879_v24 = vadd.f32 %v2381_v46, %v878_v18  ;;  %v2749_v46 = vld [vmem:[%s3065_s2] ss:$0 sm:$0xff] }
 0x16b   : > { %v951_v33 = vadd.f32 %v2749_v46, %v950_v32  ;;  %v954_v52 = vadd.f32 %v2749_v46, %v953_v48  ;;  %v1435_v48 = vmul.f32 %v2722_v12, %v2722_v12 }
 0x16c   : > { %v2736_v27 = vadd.f32 %v1047_v14, %v879_v24  ;;  %v1122_v57 = vpop.f32.mrf.mxu3 }
 0x16d   : > { %v2753_v37 = vadd.f32 %v1119_v36, %v951_v33  ;;  %v2767_v58 = vadd.f32 %v1122_v57, %v954_v52  ;;  %v1434_v36 = vmul.f32 %v2708_v62, %v2708_v62 }
 0x16e   : > { %v1049_v28 = vpop.f32.mrf.mxu1  ;;  %v1171_v30 = vpack.c.bf16 %v2736_v27, %v2736_v27 }
 0x16f   : > { %v1200_v44 = vpack.c.bf16 %v2753_v37, %v2753_v37  ;;  %v1201_v63 = vpack.c.bf16 %v2767_v58, %v2767_v58  ;;  %v1519_v57 = vsel %vm1276_vm3, %v1434_v36, 0.0 }
 0x170   : > { %1236 = vst.msk [vmem:[%s2390_s10 + $0x60] sm:$0xf] %vm1211_vm2, %v1171_v30 }
 0x171   : > { %v880_v34 = vpop.f32.mrf.mxu0  ;;  %1265 = vst.msk [vmem:[%s2390_s10 + $0xd4] sm:$0xf] %vm1211_vm2, %v1200_v44  ;;  %v955_v4 = vpop.f32.mrf.mxu2 }
 0x172   : > { %v881_v35 = vadd.f32 %v2749_v46, %v880_v34  ;;  %1266 = vst.msk [vmem:[%s2390_s10 + $0xd8] sm:$0xf] %vm1211_vm2, %v1201_v63  ;;  %v956_v5 = vadd.f32 %v2749_v46, %v955_v4  ;;  %v1436_v63 = vmul.f32 %v2736_v27, %v2736_v27 }
 0x174   : > { %v2755_v40 = vadd.f32 %v1049_v28, %v881_v35  ;;  %v1124_v9 = vpop.f32.mrf.mxu3 }
 0x175   : > { %v2777_v10 = vadd.f32 %v1124_v9, %v956_v5 }
 0x176   : > { %v1052_v42 = vpop.f32.mrf.mxu1  ;;  %v1172_v47 = vpack.c.bf16 %v2755_v40, %v2755_v40  ;;  %v1437_v9 = vmul.f32 %v2755_v40, %v2755_v40 }
 0x177   : > { %v1202_v15 = vpack.c.bf16 %v2777_v10, %v2777_v10 }
 0x178   : > { %1237 = vst.msk [vmem:[%s2390_s10 + $0x64] sm:$0xf] %vm1211_vm2, %v1172_v47  ;;  %v1320_v47 = vsel %vm1276_vm3, %v2708_v62, 0.0 }
 0x179   : > { %v883_v50 = vpop.f32.mrf.mxu0  ;;  %1267 = vst.msk [vmem:[%s2390_s10 + $0xdc] sm:$0xf] %vm1211_vm2, %v1202_v15  ;;  %v958_v18 = vpop.f32.mrf.mxu2  ;;  %v1321_v62 = vadd.f32 %v1320_v47, %v2697_v51  ;;  %v1523_v51 = vsel %vm1276_vm3, %v1436_v63, 0.0 }
 0x17a   : > { %v884_v53 = vadd.f32 %v2749_v46, %v883_v50  ;;  %v959_v28 = vadd.f32 %v2749_v46, %v958_v18  ;;  %v1326_v18 = vsel %vm1276_vm3, %v2755_v40, 0.0 }
 0x17c   : > { %v1053_v59 = vadd.f32 %v1052_v42, %v884_v53  ;;  %v1127_v25 = vpop.f32.mrf.mxu3 }
 0x17d   : > { %v2787_v32 = vadd.f32 %v1127_v25, %v959_v28  ;;  %v1525_v28 = vsel %vm1276_vm3, %v1437_v9, 0.0 }
 0x17e   : > { %v1054_v60 = vpop.f32.mrf.mxu1  ;;  %v1173_v2 = vpack.c.bf16 %v1053_v59, %v1053_v59 }
 0x17f   : > { %v1203_v34 = vpack.c.bf16 %v2787_v32, %v2787_v32 }
 0x180   : > { %1238 = vst.msk [vmem:[%s2390_s10 + $0x68] sm:$0xf] %vm1211_vm2, %v1173_v2 }
 0x181   : > { %v885_v7 = vpop.f32.mrf.mxu0  ;;  %v960_v35 = vpop.f32.mrf.mxu2  ;;  %1268 = vst.msk [vmem:[%s2390_s10 + $0xe0] sm:$0xf] %vm1211_vm2, %v1203_v34 }
 0x182   : > { %v886_v8 = vadd.f32 %v2749_v46, %v885_v7  ;;  %v961_v42 = vadd.f32 %v2749_v46, %v960_v35  ;;  %v1521_v7 = vsel %vm1276_vm3, %v1435_v48, 0.0 }
 0x184   : > { %v1055_v13 = vadd.f32 %v1054_v60, %v886_v8  ;;  %v1129_v52 = vpop.f32.mrf.mxu3  ;;  %v1322_v60 = vsel %vm1276_vm3, %v2722_v12, 0.0  ;;  %v1324_v8 = vsel %vm1276_vm3, %v2736_v27, 0.0 }
 0x185   : > { %v2803_v53 = vadd.f32 %v1129_v52, %v961_v42  ;;  %v1323_v15 = vadd.f32 %v1322_v60, %v1321_v62 }
 0x186   : > { %v1057_v14 = vpop.f32.mrf.mxu1  ;;  %v1174_v17 = vpack.c.bf16 %v1055_v13, %v1055_v13 }
 0x187   : > { %v1204_v5 = vpack.c.bf16 %v2803_v53, %v2803_v53  ;;  %v1325_v27 = vadd.f32 %v1324_v8, %v1323_v15 }
 0x188   : > { %1239 = vst.msk [vmem:[%s2390_s10 + $0x6c] sm:$0xf] %vm1211_vm2, %v1174_v17 }
 0x189   : > { %v888_v21 = vpop.f32.mrf.mxu0  ;;  %1269 = vst.msk [vmem:[%s2390_s10 + $0xe4] sm:$0xf] %vm1211_vm2, %v1204_v5  ;;  %v1327_v36 = vadd.f32 %v1326_v18, %v1325_v27 }
 0x18a   : > { %v889_v24 = vadd.f32 %v2749_v46, %v888_v21  ;;  %v963_v17 = vpop.f32.mrf.mxu2  ;;  %v1438_v21 = vmul.f32 %v1053_v59, %v1053_v59 }
 0x18c   : > { %v1058_v29 = vadd.f32 %v1057_v14, %v889_v24  ;;  %v1520_v14 = vadd.f32 %v1519_v57, %v2702_v55  ;;  %v1439_v55 = vmul.f32 %v1055_v13, %v1055_v13  ;;  %v1527_v40 = vsel %vm1276_vm3, %v1438_v21, 0.0 }
 0x18d   : > { %v1132_v34 = vpop.f32.mrf.mxu3 }
 0x18e   : > { %v1059_v30 = vpop.f32.mrf.mxu1  ;;  %v1175_v33 = vpack.c.bf16 %v1058_v29, %v1058_v29  ;;  %v1522_v24 = vadd.f32 %v1521_v7, %v1520_v14  ;;  %v1440_v42 = vmul.f32 %v1058_v29, %v1058_v29  ;;  %v1529_v57 = vsel %vm1276_vm3, %v1439_v55, 0.0 }
 0x190   : > { %1240 = vst.msk [vmem:[%s2390_s10 + $0x70] sm:$0xf] %vm1211_vm2, %v1175_v33  ;;  %v1524_v35 = vadd.f32 %v1523_v51, %v1522_v24  ;;  %v1531_v7 = vsel %vm1276_vm3, %v1440_v42, 0.0 }
 0x191   : > { %v890_v44 = vpop.f32.mrf.mxu0 }
 0x192   : > { %v891_v50 = vadd.f32 %v2749_v46, %v890_v44  ;;  %v1330_v44 = vsel %vm1276_vm3, %v1055_v13, 0.0  ;;  %v1526_v48 = vadd.f32 %v1525_v28, %v1524_v35  ;;  %v965_v8 = vpop.f32.mrf.mxu2 }
 0x194   : > { %v1060_v2 = vadd.f32 %v1059_v30, %v891_v50  ;;  %v1328_v30 = vsel %vm1276_vm3, %v1053_v59, 0.0  ;;  %v1332_v59 = vsel %vm1276_vm3, %v1058_v29, 0.0  ;;  %v1528_v62 = vadd.f32 %v1527_v40, %v1526_v48 }
 0x195   : > { %v1329_v50 = vadd.f32 %v1328_v30, %v1327_v36  ;;  %v1134_v27 = vpop.f32.mrf.mxu3 }
 0x196   : > { %v1062_v4 = vpop.f32.mrf.mxu1  ;;  %v1176_v12 = vpack.c.bf16 %v1060_v2, %v1060_v2  ;;  %v1441_v60 = vmul.f32 %v1060_v2, %v1060_v2  ;;  %v1334_v9 = vsel %vm1276_vm3, %v1060_v2, 0.0  ;;  %v1530_v14 = vadd.f32 %v1529_v57, %v1528_v62 }
 0x197   : > { %v1331_v5 = vadd.f32 %v1330_v44, %v1329_v50 }
 0x198   : > { %1241 = vst.msk [vmem:[%s2390_s10 + $0x74] sm:$0xf] %vm1211_vm2, %v1176_v12  ;;  %v966_v12 = vadd.f32 %v2749_v46, %v965_v8  ;;  %v1533_v29 = vsel %vm1276_vm3, %v1441_v60, 0.0  ;;  %v1532_v2 = vadd.f32 %v1531_v7, %v1530_v14  ;;  %v1446_v14 = vmul.f32 %v2457_v22, %v2457_v22 }
 0x199   : > { %v893_v25 = vpop.f32.mrf.mxu0  ;;  %v1333_v15 = vadd.f32 %v1332_v59, %v1331_v5 }
 0x19a   : > { %v894_v33 = vadd.f32 %v2749_v46, %v893_v25  ;;  %v2844_v28 = vadd.f32 %v1134_v27, %v966_v12  ;;  %v1534_v35 = vadd.f32 %v1533_v29, %v1532_v2 }
 0x19b   : > { %v1335_v25 = vadd.f32 %v1334_v9, %v1333_v15 }
 0x19c   : > { %v1063_v47 = vadd.f32 %v1062_v4, %v894_v33  ;;  %v964_v4 = vadd.f32 %v2749_v46, %v963_v17  ;;  %v899_v17 = vadd.f32 %v2749_v46, %v2427_v43  ;;  %v1206_v42 = vpack.c.bf16 %v2844_v28, %v2844_v28 }
 0x19d   : > { %v1137_v8 = vpop.f32.mrf.mxu3 }
 0x19e   : > { %v1064_v52 = vpop.f32.mrf.mxu1  ;;  %v1177_v63 = vpack.c.bf16 %v1063_v47, %v1063_v47  ;;  %v1442_v13 = vmul.f32 %v1063_v47, %v1063_v47  ;;  %v1336_v18 = vsel %vm1276_vm3, %v1063_v47, 0.0  ;;  %v2842_v24 = vadd.f32 %v1132_v34, %v964_v4  ;;  %1271 = vst.msk [vmem:[%s2390_s10 + $0xec] sm:$0xf] %vm1211_vm2, %v1206_v42 }
 0x19f   : > { %v1337_v34 = vadd.f32 %v1336_v18, %v1335_v25  ;;  %v1344_v25 = vsel %vm1276_vm3, %v2457_v22, 0.0  ;;  %v1346_v22 = vsel %vm1276_vm3, %v2473_v41, 0.0  ;;  %v1448_v42 = vmul.f32 %v2491_v3, %v2491_v3 }
 0x1a0   : > { %1242 = vst.msk [vmem:[%s2390_s10 + $0x78] sm:$0xf] %vm1211_vm2, %v1177_v63  ;;  %v1535_v30 = vsel %vm1276_vm3, %v1442_v13, 0.0  ;;  %v1205_v33 = vpack.c.bf16 %v2842_v24, %v2842_v24  ;;  %v901_v13 = vadd.f32 %v2749_v46, %v2435_v56  ;;  %v1447_v56 = vmul.f32 %v2473_v41, %v2473_v41 }
 0x1a1   : > { %v895_v51 = vpop.f32.mrf.mxu0  ;;  %v1536_v43 = vadd.f32 %v1535_v30, %v1534_v35 }
 0x1a2   : > { %v896_v21 = vadd.f32 %v2749_v46, %v895_v51  ;;  %1270 = vst.msk [vmem:[%s2390_s10 + $0xe8] sm:$0xf] %vm1211_vm2, %v1205_v33 }
 0x1a4   : > { %v1065_v55 = vadd.f32 %v1064_v52, %v896_v21  ;;  %v968_v52 = vpop.f32.mrf.mxu2 }
 0x1a5   : > { %v969_v21 = vadd.f32 %v2749_v46, %v968_v52  ;;  %v1449_v52 = vmul.f32 %v2507_v23, %v2507_v23 }
 0x1a6   : > { %v1067_v36 = vpop.f32.mrf.mxu1  ;;  %v1178_v40 = vpack.c.bf16 %v1065_v55, %v1065_v55  ;;  %v1338_v44 = vsel %vm1276_vm3, %v1065_v55, 0.0  ;;  %v1443_v47 = vmul.f32 %v1065_v55, %v1065_v55  ;;  %v1139_v55 = vpop.f32.mrf.mxu3 }
 0x1a7   : > { %v1068_v48 = vadd.f32 %v1067_v36, %v899_v17  ;;  %v1339_v50 = vadd.f32 %v1338_v44, %v1337_v34  ;;  %v2879_v30 = vadd.f32 %v1137_v8, %v969_v21  ;;  %v1543_v36 = vsel %vm1276_vm3, %v1446_v14, 0.0 }
 0x1a8   : > { %1243 = vst.msk [vmem:[%s2390_s10 + $0x7c] sm:$0xf] %vm1211_vm2, %v1178_v40  ;;  %v1537_v57 = vsel %vm1276_vm3, %v1443_v47, 0.0  ;;  %v1352_v8 = vsel %vm1276_vm3, %v2525_v49, 0.0  ;;  %v1453_v21 = vmul.f32 %v2575_v54, %v2575_v54 }
 0x1a9   : > { %v1179_v59 = vpack.c.bf16 %v1068_v48, %v1068_v48  ;;  %v1340_v60 = vsel %vm1276_vm3, %v1068_v48, 0.0  ;;  %v1444_v63 = vmul.f32 %v1068_v48, %v1068_v48  ;;  %v1538_v5 = vadd.f32 %v1537_v57, %v1536_v43 }
 0x1aa   : > { %v1341_v62 = vadd.f32 %v1340_v60, %v1339_v50  ;;  %v1207_v40 = vpack.c.bf16 %v2879_v30, %v2879_v30  ;;  %v1545_v43 = vsel %vm1276_vm3, %v1447_v56, 0.0  ;;  %v1348_v50 = vsel %vm1276_vm3, %v2491_v3, 0.0 }
 0x1ab   : > { %1244 = vst.msk [vmem:[%s2390_s10 + $0x80] sm:$0xf] %vm1211_vm2, %v1179_v59  ;;  %v1539_v7 = vsel %vm1276_vm3, %v1444_v63, 0.0  ;;  %v1547_v60 = vsel %vm1276_vm3, %v1448_v42, 0.0  ;;  %v1350_v63 = vsel %vm1276_vm3, %v2507_v23, 0.0  ;;  %v1455_v42 = vmul.f32 %v2609_v38, %v2609_v38 }
 0x1ac   : > { %v1540_v9 = vadd.f32 %v1539_v7, %v1538_v5  ;;  %v970_v15 = vpop.f32.mrf.mxu2  ;;  %1272 = vst.msk [vmem:[%s2390_s10 + $0xf0] sm:$0xf] %vm1211_vm2, %v1207_v40  ;;  %v1549_v7 = vsel %vm1276_vm3, %v1449_v52, 0.0 }
 0x1ad   : > { %v971_v2 = vadd.f32 %v2749_v46, %v970_v15  ;;  %v1354_v15 = vsel %vm1276_vm3, %v2541_v6, 0.0 }
 0x1ae   : > { %v1069_v4 = vpop.f32.mrf.mxu1 }
 0x1af   : > { %v1070_v12 = vadd.f32 %v1069_v4, %v901_v13  ;;  %v2881_v34 = vadd.f32 %v1139_v55, %v971_v2  ;;  %v1142_v13 = vpop.f32.mrf.mxu3  ;;  %v1452_v4 = vmul.f32 %v2559_v31, %v2559_v31 }
 0x1b1   : > { %v1180_v51 = vpack.c.bf16 %v1070_v12, %v1070_v12  ;;  %v1342_v29 = vsel %vm1276_vm3, %v1070_v12, 0.0  ;;  %v1445_v18 = vmul.f32 %v1070_v12, %v1070_v12  ;;  %v1208_v48 = vpack.c.bf16 %v2881_v34, %v2881_v34 }
 0x1b2   : > { %v1343_v27 = vadd.f32 %v1342_v29, %v1341_v62  ;;  %v1450_v62 = vmul.f32 %v2525_v49, %v2525_v49  ;;  %v1356_v49 = vsel %vm1276_vm3, %v2559_v31, 0.0 }
 0x1b3   : > { %1245 = vst.msk [vmem:[%s2390_s10 + $0x84] sm:$0xf] %vm1211_vm2, %v1180_v51  ;;  %v1541_v17 = vsel %vm1276_vm3, %v1445_v18, 0.0 }
 0x1b4   : > { %v1345_v33 = vadd.f32 %v1344_v25, %v1343_v27  ;;  %v1542_v35 = vadd.f32 %v1541_v17, %v1540_v9  ;;  %1273 = vst.msk [vmem:[%s2390_s10 + $0xf4] sm:$0xf] %vm1211_vm2, %v1208_v48  ;;  %v973_v59 = vpop.f32.mrf.mxu2  ;;  %v1451_v9 = vmul.f32 %v2541_v6, %v2541_v6  ;;  %v1551_v23 = vsel %vm1276_vm3, %v1450_v62, 0.0 }
 0x1b5   : > { %v1555_v27 = vsel %vm1276_vm3, %v1452_v4, 0.0  ;;  %v1358_v17 = vsel %vm1276_vm3, %v2575_v54, 0.0  ;;  %v1454_v6 = vmul.f32 %v2593_v16, %v2593_v16  ;;  %v974_v55 = vadd.f32 %v2749_v46, %v973_v59 }
 0x1b6   : > { %v1347_v44 = vadd.f32 %v1346_v22, %v1345_v33  ;;  %v1544_v47 = vadd.f32 %v1543_v36, %v1542_v35  ;;  %v1553_v18 = vsel %vm1276_vm3, %v1451_v9, 0.0  ;;  %v1557_v36 = vsel %vm1276_vm3, %v1453_v21, 0.0 }
 0x1b7   : > { %v1360_v22 = vsel %vm1276_vm3, %v2593_v16, 0.0  ;;  %v2933_v40 = vadd.f32 %v1142_v13, %v974_v55  ;;  %v1144_v54 = vpop.f32.mrf.mxu3  ;;  %v1456_v16 = vmul.f32 %v2625_v0, %v2625_v0  ;;  %v1561_v59 = vsel %vm1276_vm3, %v1455_v42, 0.0 }
 0x1b8   : > { %v1349_v41 = vadd.f32 %v1348_v50, %v1347_v44  ;;  %v1546_v57 = vadd.f32 %v1545_v43, %v1544_v47  ;;  %v1362_v43 = vsel %vm1276_vm3, %v2609_v38, 0.0  ;;  %v1368_v13 = vsel %vm1276_vm3, %v2654_v45, 0.0 }
 0x1b9   : > { %v1209_v50 = vpack.c.bf16 %v2933_v40, %v2933_v40  ;;  %v1459_v4 = vmul.f32 %v2666_v1, %v2666_v1  ;;  %v1463_v55 = vmul.f32 %v2720_v11, %v2720_v11 }
 0x1ba   : > { %v1351_v5 = vadd.f32 %v1350_v63, %v1349_v41  ;;  %v1548_v3 = vadd.f32 %v1547_v60, %v1546_v57  ;;  %v1364_v60 = vsel %vm1276_vm3, %v2625_v0, 0.0  ;;  %v1457_v63 = vmul.f32 %v2639_v20, %v2639_v20 }
 0x1bb   : > { %1274 = vst.msk [vmem:[%s2390_s10 + $0xf8] sm:$0xf] %vm1211_vm2, %v1209_v50 }
 0x1bc   : > { %v1353_v12 = vadd.f32 %v1352_v8, %v1351_v5  ;;  %v1550_v14 = vadd.f32 %v1549_v7, %v1548_v3  ;;  %v975_v56 = vpop.f32.mrf.mxu2  ;;  %v1563_v5 = vsel %vm1276_vm3, %v1456_v16, 0.0  ;;  %v1366_v3 = vsel %vm1276_vm3, %v2639_v20, 0.0 }
 0x1bd   : > { %v976_v33 = vadd.f32 %v2749_v46, %v975_v56  ;;  %v1559_v46 = vsel %vm1276_vm3, %v1454_v6, 0.0  ;;  %v1458_v7 = vmul.f32 %v2654_v45, %v2654_v45  ;;  %v1565_v0 = vsel %vm1276_vm3, %v1457_v63, 0.0 }
 0x1be   : > { %v1355_v51 = vadd.f32 %v1354_v15, %v1353_v12  ;;  %v1552_v29 = vadd.f32 %v1551_v23, %v1550_v14  ;;  %v1370_v20 = vsel %vm1276_vm3, %v2666_v1, 0.0  ;;  %v1460_v15 = vmul.f32 %v2678_v19, %v2678_v19 }
 0x1bf   : > { %v2935_v48 = vadd.f32 %v1144_v54, %v976_v33  ;;  %v1567_v23 = vsel %vm1276_vm3, %v1458_v7, 0.0  ;;  %v1372_v45 = vsel %vm1276_vm3, %v2678_v19, 0.0  ;;  %v1374_v1 = vsel %vm1276_vm3, %v2690_v39, 0.0 }
 0x1c0   : > { %v1357_v2 = vadd.f32 %v1356_v49, %v1355_v51  ;;  %v1554_v25 = vadd.f32 %v1553_v18, %v1552_v29  ;;  %v1569_v18 = vsel %vm1276_vm3, %v1459_v4, 0.0  ;;  %v1461_v49 = vmul.f32 %v2690_v39, %v2690_v39 }
 0x1c1   : > { %v1210_v57 = vpack.c.bf16 %v2935_v48, %v2935_v48  ;;  %v1376_v19 = vsel %vm1276_vm3, %v2706_v61, 0.0  ;;  %v1378_v39 = vsel %vm1276_vm3, %v2720_v11, 0.0  ;;  %v1577_v54 = vsel %vm1276_vm3, %v1463_v55, 0.0 }
 0x1c2   : > { %v1359_v35 = vadd.f32 %v1358_v17, %v1357_v2  ;;  %v1556_v31 = vadd.f32 %v1555_v27, %v1554_v25  ;;  %v1571_v2 = vsel %vm1276_vm3, %v1460_v15, 0.0  ;;  %v1462_v25 = vmul.f32 %v2706_v61, %v2706_v61 }
 0x1c3   : > { %1275 = vst.msk [vmem:[%s2390_s10 + $0xfc] sm:$0xf] %vm1211_vm2, %v1210_v57  ;;  %v1573_v6 = vsel %vm1276_vm3, %v1461_v49, 0.0  ;;  %v1380_v61 = vsel %vm1276_vm3, %v2734_v26, 0.0  ;;  %v1382_v11 = vsel %vm1276_vm3, %v2753_v37, 0.0  ;;  %v1466_v16 = vmul.f32 %v2767_v58, %v2767_v58 }
 0x1c4   : > { %v1361_v44 = vadd.f32 %v1360_v22, %v1359_v35  ;;  %v1558_v47 = vadd.f32 %v1557_v36, %v1556_v31  ;;  %v1575_v31 = vsel %vm1276_vm3, %v1462_v25, 0.0  ;;  %v1464_v36 = vmul.f32 %v2734_v26, %v2734_v26 }
 0x1c5   : > { %v1384_v26 = vsel %vm1276_vm3, %v2767_v58, 0.0  ;;  %v1467_v57 = vmul.f32 %v2777_v10, %v2777_v10  ;;  %v1583_v63 = vsel %vm1276_vm3, %v1466_v16, 0.0  ;;  %v1388_v58 = vsel %vm1276_vm3, %v2787_v32, 0.0 }
 0x1c6   : > { %v1363_v52 = vadd.f32 %v1362_v43, %v1361_v44  ;;  %v1560_v41 = vadd.f32 %v1559_v46, %v1558_v47  ;;  %v1465_v44 = vmul.f32 %v2753_v37, %v2753_v37  ;;  %v1579_v43 = vsel %vm1276_vm3, %v1464_v36, 0.0 }
 0x1c7   : > { %v1386_v37 = vsel %vm1276_vm3, %v2777_v10, 0.0  ;;  %v1469_v7 = vmul.f32 %v2803_v53, %v2803_v53  ;;  %v1390_v10 = vsel %vm1276_vm3, %v2803_v53, 0.0  ;;  %v1394_v53 = vsel %vm1276_vm3, %v2844_v28, 0.0 }
 0x1c8   : > { %v1365_v38 = vadd.f32 %v1364_v60, %v1363_v52  ;;  %v1562_v62 = vadd.f32 %v1561_v59, %v1560_v41  ;;  %v1581_v41 = vsel %vm1276_vm3, %v1465_v44, 0.0  ;;  %v1474_v25 = vmul.f32 %v2933_v40, %v2933_v40 }
 0x1ca   : > { %v1564_v8 = vadd.f32 %v1563_v5, %v1562_v62  ;;  %v1367_v9 = vadd.f32 %v1366_v3, %v1365_v38  ;;  %v1468_v38 = vmul.f32 %v2787_v32, %v2787_v32  ;;  %v1585_v3 = vsel %vm1276_vm3, %v1467_v57, 0.0 }
 0x1cb   : > { %v1392_v32 = vsel %vm1276_vm3, %v2842_v24, 0.0 }
 0x1cc   : > { %v1369_v12 = vadd.f32 %v1368_v13, %v1367_v9  ;;  %v1566_v14 = vadd.f32 %v1565_v0, %v1564_v8  ;;  %v1587_v0 = vsel %vm1276_vm3, %v1468_v38, 0.0  ;;  %v1470_v13 = vmul.f32 %v2842_v24, %v2842_v24 }
 0x1cd   : > { %v1396_v24 = vsel %vm1276_vm3, %v2879_v30, 0.0 }
 0x1ce   : > { %v1371_v51 = vadd.f32 %v1370_v20, %v1369_v12  ;;  %v1568_v29 = vadd.f32 %v1567_v23, %v1566_v14  ;;  %v1589_v14 = vsel %vm1276_vm3, %v1469_v7, 0.0  ;;  %v1471_v23 = vmul.f32 %v2844_v28, %v2844_v28 }
 0x1cf   : > { %v1398_v28 = vsel %vm1276_vm3, %v2881_v34, 0.0 }
 0x1d0   : > { %v1373_v21 = vadd.f32 %v1372_v45, %v1371_v51  ;;  %v1570_v27 = vadd.f32 %v1569_v18, %v1568_v29  ;;  %v1591_v51 = vsel %vm1276_vm3, %v1470_v13, 0.0  ;;  %v1472_v29 = vmul.f32 %v2879_v30, %v2879_v30 }
 0x1d1   : > { %v1593_v49 = vsel %vm1276_vm3, %v1471_v23, 0.0  ;;  %v1400_v30 = vsel %vm1276_vm3, %v2933_v40, 0.0 }
 0x1d2   : > { %v1375_v56 = vadd.f32 %v1374_v1, %v1373_v21  ;;  %v1572_v17 = vadd.f32 %v1571_v2, %v1570_v27  ;;  %v1473_v21 = vmul.f32 %v2881_v34, %v2881_v34  ;;  %v1595_v1 = vsel %vm1276_vm3, %v1472_v29, 0.0 }
 0x1d3   : > { %v1402_v34 = vsel %vm1276_vm3, %v2935_v48, 0.0 }
 0x1d4   : > { %v1377_v33 = vadd.f32 %v1376_v19, %v1375_v56  ;;  %v1574_v35 = vadd.f32 %v1573_v6, %v1572_v17  ;;  %v1597_v6 = vsel %vm1276_vm3, %v1473_v21, 0.0  ;;  %v1475_v19 = vmul.f32 %v2935_v48, %v2935_v48 }
 0x1d6   : > { %v1379_v22 = vadd.f32 %v1378_v39, %v1377_v33  ;;  %v1576_v42 = vadd.f32 %v1575_v31, %v1574_v35  ;;  %v1599_v35 = vsel %vm1276_vm3, %v1474_v25, 0.0  ;;  %v1601_v36 = vsel %vm1276_vm3, %v1475_v19, 0.0 }
 0x1d8   : > { %v1381_v47 = vadd.f32 %v1380_v61, %v1379_v22  ;;  %v1578_v46 = vadd.f32 %v1577_v54, %v1576_v42 }
 0x1da   : > { %v1383_v50 = vadd.f32 %v1382_v11, %v1381_v47  ;;  %v1580_v52 = vadd.f32 %v1579_v43, %v1578_v46 }
 0x1dc   : > { %v1385_v59 = vadd.f32 %v1384_v26, %v1383_v50  ;;  %v1582_v60 = vadd.f32 %v1581_v41, %v1580_v52 }
 0x1de   : > { %v1387_v62 = vadd.f32 %v1386_v37, %v1385_v59  ;;  %v1584_v5 = vadd.f32 %v1583_v63, %v1582_v60 }
 0x1e0   : > { %v1389_v8 = vadd.f32 %v1388_v58, %v1387_v62  ;;  %v1586_v9 = vadd.f32 %v1585_v3, %v1584_v5 }
 0x1e2   : > { %v1391_v4 = vadd.f32 %v1390_v10, %v1389_v8  ;;  %v1588_v12 = vadd.f32 %v1587_v0, %v1586_v9 }
 0x1e4   : > { %v1590_v20 = vadd.f32 %v1589_v14, %v1588_v12  ;;  %v1393_v15 = vadd.f32 %v1392_v32, %v1391_v4 }
 0x1e6   : > { %v1592_v18 = vadd.f32 %v1591_v51, %v1590_v20  ;;  %v1395_v45 = vadd.f32 %v1394_v53, %v1393_v15 }
 0x1e8   : > { %v1594_v27 = vadd.f32 %v1593_v49, %v1592_v18  ;;  %v1397_v2 = vadd.f32 %v1396_v24, %v1395_v45 }
 0x1ea   : > { %v1596_v56 = vadd.f32 %v1595_v1, %v1594_v27  ;;  %v1399_v17 = vadd.f32 %v1398_v28, %v1397_v2 }
 0x1ec   : > { %v1598_v55 = vadd.f32 %v1597_v6, %v1596_v56  ;;  %v1401_v33 = vadd.f32 %v1400_v30, %v1399_v17 }
 0x1ee   : > { %v1600_v31 = vadd.f32 %v1599_v35, %v1598_v55  ;;  %v1403_v39 = vadd.f32 %v1402_v34, %v1401_v33 }
 0x1f0   : > { %v1404_v22 = vrot.slane %v1403_v39, 4  ;;  %v1602_v42 = vadd.f32 %v1601_v36, %v1600_v31 }
 0x1f2   : > { %v1405_v54 = vadd.f32 %v1404_v22, %v1403_v39  ;;  %v1603_v40 = vrot.slane %v1602_v42, 4 }
 0x1f4   : > { %v1406_v61 = vrot.slane %v1405_v54, 2  ;;  %v1604_v44 = vadd.f32 %v1603_v40, %v1602_v42 }
 0x1f6   : > { %v1407_v47 = vadd.f32 %v1406_v61, %v1405_v54  ;;  %v1605_v46 = vrot.slane %v1604_v44, 2 }
 0x1f8   : > { %v1408_v43 = vrot.slane %v1407_v47, 1  ;;  %v1606_v11 = vadd.f32 %v1605_v46, %v1604_v44 }
 0x1fa   : > { %v1409_v48 = vadd.f32 %v1408_v43, %v1407_v47  ;;  %v1607_v16 = vrot.slane %v1606_v11, 1 }
 0x1fc   : > { %1411 = vst.msk [vmem:[%s242_s19] sm:$0x1] %vm1410_vm4, %v1409_v48  ;;  %v1608_v50 = vadd.f32 %v1607_v16, %v1606_v11 }
 0x1fe   : > { %1609 = vst.msk [vmem:[%s242_s19 + $0x1] sm:$0x1] %vm1410_vm4, %v1608_v50 }
 0x1ff PF: > { %s15_s17 = sadd.s32 1, %s2205_s17   ;;  %s3068_s15 = smov %s2201_s16 }
 0x200   : > { %p12_p6 = scmp.ge.s32.totalorder %s15_s17, 4   ;;  %s3069_s16 = smov %s3071_s18 }
 0x202   :  { %14 = sbr.rel (!%p12_p6) target bundleno = 2 (0x2), region = 74 }

// kernel: net_forward.31
= control target key start
LH: loop header
LB: loop body
LE: loop exit
PB: predicated region body
PF: predicated region fallthrough
CT: control target
= control target key end

     0   :  { %s654_s15 = smov 0   ;;  %s656_s16 = smov 0   ;;  %s747_s0 = inlined_call_operand.vmem [shape: bf16[128,64], index: 0, kind: input, shape index: {}]   ;;  %s748_s1 = inlined_call_operand.vmem [shape: bf16[64,8], index: 1, kind: input, shape index: {}]   ;;  %s749_s2 = inlined_call_operand.vmem [shape: f32[1,8], index: 2, kind: input, shape index: {}]   ;;  %s750_s3 = inlined_call_operand.vmem [shape: bf16[128,8], index: 3, kind: output, shape index: {0}]   ;;  %s751_s4 = inlined_call_operand.vmem [shape: f32[2,2,8], index: 4, kind: output, shape index: {1}]  }
   0x1   :  { %s658_s17 = smov 0  }
   0x2 LB: > { %s27_s18 = sadd.s32 1, %s623_s16  ;;  %p516_p0 = scmp.ge.s32.totalorder %s627_s17, 1  ;;  %s627_s17 = sphi %s658_s17, %s15_s17   ;;  %s623_s16 = sphi %s656_s16, %s753_s16   ;;  %s619_s15 = sphi %s654_s15, %s752_s15  }
   0x3   : > { %p29_p1 = scmp.ge.s32.totalorder %s27_s18, 2  ;;  %p183_p2 = scmp.lt.s32.totalorder %s627_s17, 3 }
   0x5   : > { %s755_s18 = smov (%p29_p1, %s27_s18), 0  ;;  %p184_p3 = pnand %p516_p0, %p183_p2 }
   0x6   : > { %s517_s21 = sshll.u32 (!%p184_p3), %s619_s15, 3  ;;  %p231_p5 = scmp.lt.s32.totalorder (!%p184_p3), %s619_s15, 1 }
   0x7   : > { %187 = sbr.rel (%p184_p3) target bundleno = 194 (0xc2), region = 32  ;;  %p217_p4 = scmp.lt.s32.totalorder (!%p184_p3), %s517_s21, 15 }
   0xc   : > { %v563_v0 = vld [vmem:[%s748_s1 + $0x18] sm:$0xff]  ;;  %v562_v1 = vld [vmem:[%s748_s1 + $0x10] sm:$0xff]  ;;  %s757_s21 = smov (!%p217_p4, %s517_s21), 15  ;;  %v561_v2 = vld [vmem:[%s748_s1 + $0x8] sm:$0xff]  ;;  %vm300_vm0 = vcmask 523264   ;;  %vm350_vm1 = vcmask 60416  }
   0xd   : > { %317 = vmatpush.bf16.msra.mxu0 %v563_v0  ;;  %568 = vmatpush.bf16.msra.mxu1 %v563_v0  ;;  %s518_s26 = sshll.u32 %s757_s21, 2  ;;  %v560_v3 = vld [vmem:[%s748_s1] sm:$0xff]  ;;  %vm359_vm2 = vcmask 64512   ;;  %s759_s15 = smov (!%p231_p5, %s619_s15), 1  ;;  %vm381_vm3 = vcmask 57344  }
   0xe   : > { %569 = vmatpush.bf16.msra.mxu2 %v563_v0  ;;  %570 = vmatpush.bf16.msra.mxu3 %v563_v0  ;;  %s223_s5 = scalar_lea.vmem %s747_s0, %s518_s26  ;;  %v604_v8 = vld [vmem:[%s749_s2] ss:$0 sm:$0xff]  ;;  %s699_s10 = scalar_lea.vmem %s750_s3, %s518_s26 }
   0xf   : > { %v564_v4 = vld [vmem:[%s223_s5] sm:$0xff]  ;;  %v565_v5 = vld [vmem:[%s223_s5 + $0x8] sm:$0xff]  ;;  %v566_v6 = vld [vmem:[%s223_s5 + $0x10] sm:$0xff]  ;;  %s521_s11 = sshll.u32 %s759_s15, 1 }
  0x10   : > { %v567_v7 = vld [vmem:[%s223_s5 + $0x18] sm:$0xff]  ;;  %s234_s14 = scalar_lea.vmem %s751_s4, %s521_s11 }
  0x11   : > { %318 = vmatpush.bf16.msra.mxu0 %v562_v1  ;;  %571 = vmatpush.bf16.msra.mxu1 %v562_v1 }
  0x12   : > { %572 = vmatpush.bf16.msra.mxu2 %v562_v1  ;;  %573 = vmatpush.bf16.msra.mxu3 %v562_v1 }
  0x15   : > { %319 = vmatpush.bf16.msra.mxu0 %v561_v2  ;;  %574 = vmatpush.bf16.msra.mxu1 %v561_v2 }
  0x16   : > { %575 = vmatpush.bf16.msra.mxu2 %v561_v2  ;;  %576 = vmatpush.bf16.msra.mxu3 %v561_v2 }
  0x19   : > { %320 = vmatpush.bf16.msra.mxu0 %v560_v3  ;;  %577 = vmatpush.bf16.msra.mxu1 %v560_v3 }
  0x1a   : > { %578 = vmatpush.bf16.msra.mxu2 %v560_v3  ;;  %579 = vmatpush.bf16.msra.mxu3 %v560_v3 }
  0x1c   : > { %554 = vmatmul.msk.bf16.vlgmr.msra.gmra.mxu0 %vm300_vm0, %v564_v4  ;;  %555 = vmatmul.msk.bf16.vlgmr.msra.gmra.mxu1 %vm300_vm0, %v565_v5 }
  0x1d   : > { %556 = vmatmul.msk.bf16.vlgmr.msra.gmra.mxu2 %vm300_vm0, %v566_v6  ;;  %557 = vmatmul.msk.bf16.vlgmr.msra.gmra.mxu3 %vm300_vm0, %v567_v7 }
  0x99   : > { %v322_v9 = vpop.f32.mrf.mxu0  ;;  %v327_v10 = vpop.f32.mrf.mxu1 }
  0x9a   : > { %v323_v11 = vadd.f32 %v604_v8, %v322_v9  ;;  %v328_v12 = vadd.f32 %v604_v8, %v327_v10 }
  0x9c   : > { %v342_v13 = vpack.c.bf16 %v323_v11, %v323_v11  ;;  %v344_v14 = vpack.c.bf16 %v328_v12, %v328_v12  ;;  %v383_v23 = vmul.f32 %v323_v11, %v323_v11  ;;  %v360_v26 = vsel %vm359_vm2, %v323_v11, 0.0 }
  0x9d   : > { %v385_v27 = vmul.f32 %v328_v12, %v328_v12  ;;  %v363_v33 = vsel %vm359_vm2, %v328_v12, 0.0 }
  0x9e   : > { %351 = vst.msk [vmem:[%s699_s10] sm:$0xf] %vm350_vm1, %v342_v13  ;;  %v391_v34 = vsel %vm359_vm2, %v383_v23, 0.0 }
  0x9f   : > { %353 = vst.msk [vmem:[%s699_s10 + $0x8] sm:$0xf] %vm350_vm1, %v344_v14  ;;  %v394_v38 = vsel %vm359_vm2, %v385_v27, 0.0 }
  0xa0   : > { %v332_v15 = vpop.f32.mrf.mxu2  ;;  %v337_v16 = vpop.f32.mrf.mxu3 }
  0xa1   : > { %v333_v17 = vadd.f32 %v604_v8, %v332_v15  ;;  %v338_v18 = vadd.f32 %v604_v8, %v337_v16  ;;  %v324_v19 = vpop.f32.mrf.mxu0  ;;  %v329_v20 = vpop.f32.mrf.mxu1 }
  0xa2   : > { %v325_v21 = vadd.f32 %v604_v8, %v324_v19  ;;  %v330_v22 = vadd.f32 %v604_v8, %v329_v20 }
  0xa3   : > { %v346_v24 = vpack.c.bf16 %v333_v17, %v333_v17  ;;  %v348_v25 = vpack.c.bf16 %v338_v18, %v338_v18  ;;  %v387_v43 = vmul.f32 %v333_v17, %v333_v17  ;;  %v367_v47 = vsel %vm359_vm2, %v333_v17, 0.0 }
  0xa4   : > { %v343_v28 = vpack.c.bf16 %v325_v21, %v325_v21  ;;  %v361_v29 = vsel %vm359_vm2, %v325_v21, 0.0  ;;  %v384_v31 = vmul.f32 %v325_v21, %v325_v21  ;;  %v345_v32 = vpack.c.bf16 %v330_v22, %v330_v22 }
  0xa5   : > { %355 = vst.msk [vmem:[%s699_s10 + $0x10] sm:$0xf] %vm350_vm1, %v346_v24  ;;  %v362_v30 = vadd.f32 %v361_v29, %v360_v26  ;;  %v386_v37 = vmul.f32 %v330_v22, %v330_v22  ;;  %v365_v40 = vsel %vm359_vm2, %v330_v22, 0.0  ;;  %v398_v56 = vsel %vm359_vm2, %v387_v43, 0.0 }
  0xa6   : > { %357 = vst.msk [vmem:[%s699_s10 + $0x18] sm:$0xf] %vm350_vm1, %v348_v25  ;;  %v392_v35 = vsel %vm359_vm2, %v384_v31, 0.0  ;;  %v389_v57 = vmul.f32 %v338_v18, %v338_v18  ;;  %v371_v59 = vsel %vm359_vm2, %v338_v18, 0.0 }
  0xa7   : > { %352 = vst.msk [vmem:[%s699_s10 + $0x4] sm:$0xf] %vm350_vm1, %v343_v28  ;;  %v364_v36 = vadd.f32 %v363_v33, %v362_v30  ;;  %v393_v39 = vadd.f32 %v392_v35, %v391_v34  ;;  %v396_v49 = vsel %vm359_vm2, %v386_v37, 0.0 }
  0xa8   : > { %354 = vst.msk [vmem:[%s699_s10 + $0xc] sm:$0xf] %vm350_vm1, %v345_v32  ;;  %v334_v41 = vpop.f32.mrf.mxu2  ;;  %v339_v42 = vpop.f32.mrf.mxu3  ;;  %v402_v2 = vsel %vm359_vm2, %v389_v57, 0.0 }
  0xa9   : > { %v366_v44 = vadd.f32 %v365_v40, %v364_v36  ;;  %v335_v45 = vadd.f32 %v604_v8, %v334_v41  ;;  %v340_v46 = vadd.f32 %v604_v8, %v339_v42  ;;  %v395_v48 = vadd.f32 %v394_v38, %v393_v39 }
  0xab   : > { %v347_v50 = vpack.c.bf16 %v335_v45, %v335_v45  ;;  %v368_v51 = vadd.f32 %v367_v47, %v366_v44  ;;  %v388_v52 = vmul.f32 %v335_v45, %v335_v45  ;;  %v397_v53 = vadd.f32 %v396_v49, %v395_v48 }
  0xac   : > { %v369_v54 = vsel %vm359_vm2, %v335_v45, 0.0  ;;  %v349_v55 = vpack.c.bf16 %v340_v46, %v340_v46  ;;  %v390_v63 = vmul.f32 %v340_v46, %v340_v46  ;;  %v373_v1 = vsel %vm359_vm2, %v340_v46, 0.0 }
  0xad   : > { %356 = vst.msk [vmem:[%s699_s10 + $0x14] sm:$0xf] %vm350_vm1, %v347_v50  ;;  %v370_v58 = vadd.f32 %v369_v54, %v368_v51  ;;  %v399_v60 = vadd.f32 %v398_v56, %v397_v53  ;;  %v400_v61 = vsel %vm359_vm2, %v388_v52, 0.0 }
  0xae   : > { %358 = vst.msk [vmem:[%s699_s10 + $0x1c] sm:$0xf] %vm350_vm1, %v349_v55  ;;  %v404_v6 = vsel %vm359_vm2, %v390_v63, 0.0 }
  0xaf   : > { %v372_v62 = vadd.f32 %v371_v59, %v370_v58  ;;  %v401_v0 = vadd.f32 %v400_v61, %v399_v60 }
  0xb1   : > { %v374_v3 = vadd.f32 %v373_v1, %v372_v62  ;;  %v403_v4 = vadd.f32 %v402_v2, %v401_v0 }
  0xb3   : > { %v375_v5 = vrot.slane %v374_v3, 4  ;;  %v405_v7 = vadd.f32 %v404_v6, %v403_v4 }
  0xb5   : > { %v376_v8 = vadd.f32 %v375_v5, %v374_v3  ;;  %v406_v9 = vrot.slane %v405_v7, 4 }
  0xb7   : > { %v377_v10 = vrot.slane %v376_v8, 2  ;;  %v407_v11 = vadd.f32 %v406_v9, %v405_v7 }
  0xb9   : > { %v378_v12 = vadd.f32 %v377_v10, %v376_v8  ;;  %v408_v13 = vrot.slane %v407_v11, 2 }
  0xbb   : > { %v379_v14 = vrot.slane %v378_v12, 1  ;;  %v409_v15 = vadd.f32 %v408_v13, %v407_v11 }
  0xbd   : > { %v380_v16 = vadd.f32 %v379_v14, %v378_v12  ;;  %v410_v17 = vrot.slane %v409_v15, 1 }
  0xbf   : > { %382 = vst.msk [vmem:[%s234_s14] sm:$0x1] %vm381_vm3, %v380_v16  ;;  %v411_v18 = vadd.f32 %v410_v17, %v409_v15 }
  0xc1   : > { %412 = vst.msk [vmem:[%s234_s14 + $0x1] sm:$0x1] %vm381_vm3, %v411_v18 }
  0xc2 PF: > { %s15_s17 = sadd.s32 1, %s627_s17   ;;  %s752_s15 = smov %s623_s16 }
  0xc3   : > { %p12_p6 = scmp.ge.s32.totalorder %s15_s17, 4   ;;  %s753_s16 = smov %s755_s18 }
  0xc5   :  { %14 = sbr.rel (!%p12_p6) target bundleno = 2 (0x2), region = 74 }

// kernel: net_forward.32
= control target key start
LH: loop header
LB: loop body
LE: loop exit
PB: predicated region body
PF: predicated region fallthrough
CT: control target
= control target key end

     0   :  { %s67_s0 = inlined_call_operand.vmem [shape: bf16[8,128], index: 0, kind: input, shape index: {}]   ;;  %s68_s1 = inlined_call_operand.vmem [shape: f32[1,128], index: 1, kind: input, shape index: {}]   ;;  %s69_s2 = inlined_call_operand.vmem [shape: f32[1,128], index: 2, kind: input, shape index: {}]   ;;  %s70_s3 = inlined_call_operand.vmem [shape: bf16[8,128], index: 3, kind: output, shape index: {}]  }
   0x1   :  { %v14_v0 = vld [vmem:[%s67_s0] sm:$0xf] }
   0x2   :  { %v33_v1 = vld [vmem:[%s68_s1] ss:$0 sm:$0xff]  ;;  %v15_v2 = vunpack.c.l.bf16 %v14_v0 }
   0x3   :  { %v34_v3 = vld [vmem:[%s69_s2] ss:$0 sm:$0xff] }
   0x4   :  { %v20_v4 = vmul.f32 %v33_v1, %v15_v2 }
   0x6   :  { %v25_v5 = vadd.f32 %v34_v3, %v20_v4 }
   0x8   :  { %v26_v6 = vmax.f32 %v25_v5, 0.0 }
   0xa   :  { %v27_v7 = vpack.c.bf16 %v26_v6, %v26_v6 }
   0xc   :  { %28 = vst [vmem:[%s70_s3] sm:$0xf] %v27_v7 }

// kernel: net_forward.33
= control target key start
LH: loop header
LB: loop body
LE: loop exit
PB: predicated region body
PF: predicated region fallthrough
CT: control target
= control target key end

     0   :  { %s859_s15 = smov 0   ;;  %s861_s16 = smov 0   ;;  %s1015_s0 = inlined_call_operand.vmem [shape: bf16[128,216], index: 0, kind: input, shape index: {}]   ;;  %s1016_s1 = inlined_call_operand.vmem [shape: bf16[216,16], index: 1, kind: input, shape index: {}]   ;;  %s1017_s2 = inlined_call_operand.vmem [shape: f32[1,16], index: 2, kind: input, shape index: {}]   ;;  %s1018_s3 = inlined_call_operand.vmem [shape: bf16[128,16], index: 3, kind: output, shape index: {0}]   ;;  %s1019_s4 = inlined_call_operand.vmem [shape: f32[2,2,16], index: 4, kind: output, shape index: {1}]  }
   0x1   :  { %s863_s17 = smov 0  }
   0x2 LB: > { %s27_s18 = sadd.s32 1, %s828_s16  ;;  %p652_p0 = scmp.ge.s32.totalorder %s832_s17, 1  ;;  %s832_s17 = sphi %s863_s17, %s15_s17   ;;  %s828_s16 = sphi %s861_s16, %s1021_s16   ;;  %s824_s15 = sphi %s859_s15, %s1020_s15  }
   0x3   : > { %p29_p1 = scmp.ge.s32.totalorder %s27_s18, 2  ;;  %p186_p2 = scmp.lt.s32.totalorder %s832_s17, 3 }
   0x5   : > { %s1023_s18 = smov (%p29_p1, %s27_s18), 0  ;;  %p187_p3 = pnand %p652_p0, %p186_p2 }
   0x6   : > { %s653_s25 = sshll.u32 (!%p187_p3), %s824_s15, 3  ;;  %p239_p5 = scmp.lt.s32.totalorder (!%p187_p3), %s824_s15, 1 }
   0x7   : > { %190 = sbr.rel (%p187_p3) target bundleno = 233 (0xe9), region = 32  ;;  %p223_p4 = scmp.lt.s32.totalorder (!%p187_p3), %s653_s25, 15 }
   0xc   : > { %v757_v0 = vld [vmem:[%s1016_s1 + $0x38] sm:$0xff]  ;;  %v270_v1 = vld [vmem:[%s1016_s1 + $0x68] sm:$0xf]  ;;  %vm413_vm0 = vcmask 1043456   ;;  %v756_v3 = vld [vmem:[%s1016_s1 + $0x30] sm:$0xff]  ;;  %s1025_s25 = smov (!%p223_p4, %s653_s25), 15 }
   0xd   : > { %v372_v2 = vunpack.c.l.b16 %v270_v1  ;;  %417 = vmatpush.bf16.msra.mxu0 %v757_v0  ;;  %771 = vmatpush.bf16.msra.mxu2 %v757_v0  ;;  %v762_v6 = vld [vmem:[%s1016_s1 + $0x60] sm:$0xff]  ;;  %v755_v7 = vld [vmem:[%s1016_s1 + $0x28] sm:$0xff]  ;;  %v761_v8 = vld [vmem:[%s1016_s1 + $0x58] sm:$0xff]  ;;  %s749_s12 = sshll.u32 %s1025_s25, 3  ;;  %vm400_vm1 = vcmask 719872   ;;  %s657_s7 = sshll.u32 %s1025_s25, 2 }
   0xe   : > { %v754_v9 = vld [vmem:[%s1016_s1 + $0x20] sm:$0xff]  ;;  %v760_v10 = vld [vmem:[%s1016_s1 + $0x50] sm:$0xff]  ;;  %v753_v11 = vld [vmem:[%s1016_s1 + $0x18] sm:$0xff]  ;;  %s919_s23 = scalar_lea.vmem %s1015_s0, %s749_s12  ;;  %s960_s10 = scalar_lea.vmem %s1018_s3, %s657_s7  ;;  %vm483_vm2 = vcmask 125952   ;;  %vm492_vm3 = vcmask 130048   ;;  %vm514_vm4 = vcmask 122880  }
   0xf   : > { %v386_v4 = vpack.c.b16 %v372_v2, %v372_v2  ;;  %v759_v12 = vld [vmem:[%s1016_s1 + $0x48] sm:$0xff]  ;;  %v752_v13 = vld [vmem:[%s1016_s1 + $0x10] sm:$0xff]  ;;  %v758_v14 = vld [vmem:[%s1016_s1 + $0x40] sm:$0xff]  ;;  %s1027_s15 = smov (!%p239_p5, %s824_s15), 1 }
  0x10   : > { %v751_v15 = vld [vmem:[%s1016_s1 + $0x8] sm:$0xff]  ;;  %v765_v16 = vld [vmem:[%s919_s23 + $0x14] sm:$0xf]  ;;  %v671_v17 = vld [vmem:[%s919_s23 + $0x18] sm:$0xf0]  ;;  %s658_s25 = sshll.u32 %s1027_s15, 1 }
  0x11   : > { %v415_v5 = vsel %vm413_vm0, %v386_v4, 0  ;;  %418 = vmatpush.bf16.msra.mxu0 %v756_v3  ;;  %772 = vmatpush.bf16.msra.mxu2 %v756_v3  ;;  %v763_v18 = vld [vmem:[%s919_s23 + $0x4] sm:$0xf]  ;;  %v663_v19 = vld [vmem:[%s919_s23 + $0x8] sm:$0xf0]  ;;  %v674_v20 = vor.u32 %v765_v16, %v671_v17  ;;  %s242_s13 = scalar_lea.vmem %s1019_s4, %s658_s25 }
  0x12   : > { %779 = vmatpush.bf16.msra.mxu3 %v415_v5  ;;  %448 = vmatpush.bf16.msra.mxu1 %v415_v5  ;;  %v750_v21 = vld [vmem:[%s1016_s1] sm:$0xff]  ;;  %v764_v23 = vld [vmem:[%s919_s23 + $0x4] sm:$0xf0]  ;;  %v666_v24 = vor.u32 %v763_v18, %v663_v19  ;;  %v679_v30 = vld [vmem:[%s919_s23 + $0x28] sm:$0xf0] }
  0x13   : > { %v661_v22 = vld [vmem:[%s919_s23] sm:$0xf]  ;;  %v768_v26 = vld [vmem:[%s919_s23 + $0x24] sm:$0xf0]  ;;  %v767_v29 = vld [vmem:[%s919_s23 + $0x24] sm:$0xf] }
  0x14   : > { %v677_v25 = vld [vmem:[%s919_s23 + $0x20] sm:$0xf]  ;;  %v662_v27 = vor.u32 %v764_v23, %v661_v22  ;;  %v682_v31 = vor.u32 %v767_v29, %v679_v30  ;;  %v669_v32 = vld [vmem:[%s919_s23 + $0x10] sm:$0xf]  ;;  %v766_v33 = vld [vmem:[%s919_s23 + $0x14] sm:$0xf0] }
  0x15   : > { %419 = vmatpush.bf16.msra.mxu0 %v755_v7  ;;  %773 = vmatpush.bf16.msra.mxu2 %v755_v7  ;;  %v678_v28 = vor.u32 %v768_v26, %v677_v25  ;;  %v685_v34 = vld [vmem:[%s919_s23 + $0x30] sm:$0xf]  ;;  %v770_v35 = vld [vmem:[%s919_s23 + $0x34] sm:$0xf0]  ;;  %v670_v36 = vor.u32 %v766_v33, %v669_v32  ;;  %v769_v38 = vld [vmem:[%s919_s23 + $0x34] sm:$0xf] }
  0x16   : > { %780 = vmatpush.bf16.msra.mxu3 %v762_v6  ;;  %449 = vmatpush.bf16.msra.mxu1 %v762_v6  ;;  %v686_v37 = vor.u32 %v770_v35, %v685_v34  ;;  %v687_v39 = vld [vmem:[%s919_s23 + $0x38] sm:$0xf0]  ;;  %v953_v41 = vld [vmem:[%s1017_s2] ss:$0 sm:$0xff] }
  0x17   : > { %v690_v40 = vor.u32 %v769_v38, %v687_v39 }
  0x19   : > { %420 = vmatpush.bf16.msra.mxu0 %v754_v9  ;;  %774 = vmatpush.bf16.msra.mxu2 %v754_v9 }
  0x1a   : > { %781 = vmatpush.bf16.msra.mxu3 %v761_v8  ;;  %450 = vmatpush.bf16.msra.mxu1 %v761_v8 }
  0x1d   : > { %421 = vmatpush.bf16.msra.mxu0 %v753_v11  ;;  %775 = vmatpush.bf16.msra.mxu2 %v753_v11 }
  0x1e   : > { %782 = vmatpush.bf16.msra.mxu3 %v760_v10  ;;  %451 = vmatpush.bf16.msra.mxu1 %v760_v10 }
  0x21   : > { %422 = vmatpush.bf16.msra.mxu0 %v752_v13  ;;  %776 = vmatpush.bf16.msra.mxu2 %v752_v13 }
  0x22   : > { %783 = vmatpush.bf16.msra.mxu3 %v759_v12  ;;  %452 = vmatpush.bf16.msra.mxu1 %v759_v12 }
  0x25   : > { %423 = vmatpush.bf16.msra.mxu0 %v751_v15  ;;  %777 = vmatpush.bf16.msra.mxu2 %v751_v15 }
  0x26   : > { %784 = vmatpush.bf16.msra.mxu3 %v758_v14  ;;  %453 = vmatpush.bf16.msra.mxu1 %v758_v14 }
  0x29   : > { %744 = vmatmul.msk.bf16.vlgmr.msra.gmra.mxu3 %vm400_vm1, %v674_v20  ;;  %424 = vmatpush.bf16.msra.mxu0 %v750_v21 }
  0x2a   : > { %743 = vmatmul.msk.bf16.vlgmr.msra.gmra.mxu1 %vm400_vm1, %v666_v24  ;;  %778 = vmatpush.bf16.msra.mxu2 %v750_v21 }
  0x2c   : > { %425 = vmatmul.bf16.vlgmr.msra.gmra.mxu0 %v662_v27 }
  0x2d   : > { %435 = vmatmul.bf16.vlgmr.msra.gmra.mxu2 %v678_v28 }
  0x39   : > { %745 = vmatmul.msk.bf16.gmra.mxu3 %vm400_vm1, %v682_v31 }
  0x3c   : > { %430 = vmatmul.bf16.gmra.mxu0 %v670_v36 }
  0x3d   : > { %440 = vmatmul.bf16.gmra.mxu2 %v686_v37 }
  0x49   : > { %746 = vmatmul.msk.bf16.gmra.mxu3 %vm400_vm1, %v690_v40 }
  0xa7   : > { %v455_v42 = vpop.f32.mrf.mxu1 }
  0xa9   : > { %v426_v43 = vpop.f32.mrf.mxu0 }
  0xaa   : > { %v427_v44 = vadd.f32 %v953_v41, %v426_v43 }
  0xac   : > { %v460_v45 = vpop.f32.mrf.mxu3  ;;  %v456_v46 = vadd.f32 %v455_v42, %v427_v44 }
  0xae   : > { %v475_v47 = vpack.c.bf16 %v456_v46, %v456_v46  ;;  %v516_v0 = vmul.f32 %v456_v46, %v456_v46  ;;  %v493_v5 = vsel %vm492_vm3, %v456_v46, 0.0 }
  0xaf   : > { %v457_v48 = vpop.f32.mrf.mxu1 }
  0xb0   : > { %484 = vst.msk [vmem:[%s960_s10] sm:$0xf] %vm483_vm2, %v475_v47  ;;  %v436_v49 = vpop.f32.mrf.mxu2  ;;  %v524_v11 = vsel %vm492_vm3, %v516_v0, 0.0 }
  0xb1   : > { %v428_v50 = vpop.f32.mrf.mxu0  ;;  %v437_v55 = vadd.f32 %v953_v41, %v436_v49 }
  0xb2   : > { %v429_v51 = vadd.f32 %v953_v41, %v428_v50 }
  0xb4   : > { %v462_v52 = vpop.f32.mrf.mxu3  ;;  %v458_v53 = vadd.f32 %v457_v48, %v429_v51 }
  0xb6   : > { %v476_v54 = vpack.c.bf16 %v458_v53, %v458_v53  ;;  %v517_v1 = vmul.f32 %v458_v53, %v458_v53  ;;  %v494_v7 = vsel %vm492_vm3, %v458_v53, 0.0 }
  0xb7   : > { %v495_v18 = vadd.f32 %v494_v7, %v493_v5 }
  0xb8   : > { %485 = vst.msk [vmem:[%s960_s10 + $0x4] sm:$0xf] %vm483_vm2, %v476_v54  ;;  %v438_v58 = vpop.f32.mrf.mxu2  ;;  %v525_v12 = vsel %vm492_vm3, %v517_v1, 0.0 }
  0xb9   : > { %v431_v56 = vpop.f32.mrf.mxu0  ;;  %v439_v3 = vadd.f32 %v953_v41, %v438_v58  ;;  %v526_v22 = vadd.f32 %v525_v12, %v524_v11 }
  0xba   : > { %v432_v57 = vadd.f32 %v953_v41, %v431_v56 }
  0xbc   : > { %v465_v59 = vpop.f32.mrf.mxu3  ;;  %v461_v60 = vadd.f32 %v460_v45, %v432_v57 }
  0xbd   : > { %v466_v61 = vadd.f32 %v465_v59, %v437_v55 }
  0xbe   : > { %v477_v62 = vpack.c.bf16 %v461_v60, %v461_v60  ;;  %v518_v8 = vmul.f32 %v461_v60, %v461_v60  ;;  %v496_v14 = vsel %vm492_vm3, %v461_v60, 0.0 }
  0xbf   : > { %v479_v63 = vpack.c.bf16 %v466_v61, %v466_v61  ;;  %v497_v23 = vadd.f32 %v496_v14, %v495_v18  ;;  %v520_v28 = vmul.f32 %v466_v61, %v466_v61  ;;  %v500_v31 = vsel %vm492_vm3, %v466_v61, 0.0 }
  0xc0   : > { %486 = vst.msk [vmem:[%s960_s10 + $0x8] sm:$0xf] %vm483_vm2, %v477_v62  ;;  %v441_v13 = vpop.f32.mrf.mxu2  ;;  %v527_v19 = vsel %vm492_vm3, %v518_v8, 0.0 }
  0xc1   : > { %488 = vst.msk [vmem:[%s960_s10 + $0x10] sm:$0xf] %vm483_vm2, %v479_v63  ;;  %v433_v2 = vpop.f32.mrf.mxu0  ;;  %v442_v20 = vadd.f32 %v953_v41, %v441_v13  ;;  %v528_v25 = vadd.f32 %v527_v19, %v526_v22  ;;  %v531_v35 = vsel %vm492_vm3, %v520_v28, 0.0 }
  0xc2   : > { %v434_v4 = vadd.f32 %v953_v41, %v433_v2 }
  0xc4   : > { %v467_v6 = vpop.f32.mrf.mxu3  ;;  %v463_v9 = vadd.f32 %v462_v52, %v434_v4 }
  0xc5   : > { %v468_v10 = vadd.f32 %v467_v6, %v439_v3 }
  0xc6   : > { %v478_v15 = vpack.c.bf16 %v463_v9, %v463_v9  ;;  %v519_v16 = vmul.f32 %v463_v9, %v463_v9  ;;  %v498_v21 = vsel %vm492_vm3, %v463_v9, 0.0 }
  0xc7   : > { %v480_v17 = vpack.c.bf16 %v468_v10, %v468_v10  ;;  %v499_v26 = vadd.f32 %v498_v21, %v497_v23  ;;  %v521_v36 = vmul.f32 %v468_v10, %v468_v10  ;;  %v502_v39 = vsel %vm492_vm3, %v468_v10, 0.0 }
  0xc8   : > { %487 = vst.msk [vmem:[%s960_s10 + $0xc] sm:$0xf] %vm483_vm2, %v478_v15  ;;  %v529_v24 = vsel %vm492_vm3, %v519_v16, 0.0  ;;  %v443_v34 = vpop.f32.mrf.mxu2 }
  0xc9   : > { %489 = vst.msk [vmem:[%s960_s10 + $0x14] sm:$0xf] %vm483_vm2, %v480_v17  ;;  %v530_v30 = vadd.f32 %v529_v24, %v528_v25  ;;  %v501_v33 = vadd.f32 %v500_v31, %v499_v26  ;;  %v444_v40 = vadd.f32 %v953_v41, %v443_v34  ;;  %v533_v45 = vsel %vm492_vm3, %v521_v36, 0.0 }
  0xcb   : > { %v532_v38 = vadd.f32 %v531_v35, %v530_v30  ;;  %v503_v43 = vadd.f32 %v502_v39, %v501_v33 }
  0xcc   : > { %v470_v27 = vpop.f32.mrf.mxu3 }
  0xcd   : > { %v471_v29 = vadd.f32 %v470_v27, %v442_v20  ;;  %v534_v48 = vadd.f32 %v533_v45, %v532_v38 }
  0xcf   : > { %v481_v32 = vpack.c.bf16 %v471_v29, %v471_v29  ;;  %v522_v37 = vmul.f32 %v471_v29, %v471_v29  ;;  %v504_v42 = vsel %vm492_vm3, %v471_v29, 0.0 }
  0xd0   : > { %v505_v49 = vadd.f32 %v504_v42, %v503_v43 }
  0xd1   : > { %490 = vst.msk [vmem:[%s960_s10 + $0x18] sm:$0xf] %vm483_vm2, %v481_v32  ;;  %v535_v46 = vsel %vm492_vm3, %v522_v37, 0.0 }
  0xd2   : > { %v536_v53 = vadd.f32 %v535_v46, %v534_v48 }
  0xd4   : > { %v472_v44 = vpop.f32.mrf.mxu3 }
  0xd5   : > { %v473_v47 = vadd.f32 %v472_v44, %v444_v40 }
  0xd7   : > { %v482_v50 = vpack.c.bf16 %v473_v47, %v473_v47  ;;  %v506_v51 = vsel %vm492_vm3, %v473_v47, 0.0  ;;  %v523_v52 = vmul.f32 %v473_v47, %v473_v47 }
  0xd8   : > { %v507_v54 = vadd.f32 %v506_v51, %v505_v49 }
  0xd9   : > { %491 = vst.msk [vmem:[%s960_s10 + $0x1c] sm:$0xf] %vm483_vm2, %v482_v50  ;;  %v537_v41 = vsel %vm492_vm3, %v523_v52, 0.0 }
  0xda   : > { %v508_v55 = vrot.slane %v507_v54, 4  ;;  %v538_v56 = vadd.f32 %v537_v41, %v536_v53 }
  0xdc   : > { %v509_v57 = vadd.f32 %v508_v55, %v507_v54  ;;  %v539_v58 = vrot.slane %v538_v56, 4 }
  0xde   : > { %v510_v59 = vrot.slane %v509_v57, 2  ;;  %v540_v60 = vadd.f32 %v539_v58, %v538_v56 }
  0xe0   : > { %v511_v61 = vadd.f32 %v510_v59, %v509_v57  ;;  %v541_v62 = vrot.slane %v540_v60, 2 }
  0xe2   : > { %v512_v63 = vrot.slane %v511_v61, 1  ;;  %v542_v0 = vadd.f32 %v541_v62, %v540_v60 }
  0xe4   : > { %v513_v1 = vadd.f32 %v512_v63, %v511_v61  ;;  %v543_v2 = vrot.slane %v542_v0, 1 }
  0xe6   : > { %515 = vst.msk [vmem:[%s242_s13] sm:$0x1] %vm514_vm4, %v513_v1  ;;  %v544_v3 = vadd.f32 %v543_v2, %v542_v0 }
  0xe8   : > { %545 = vst.msk [vmem:[%s242_s13 + $0x1] sm:$0x1] %vm514_vm4, %v544_v3 }
  0xe9 PF: > { %s15_s17 = sadd.s32 1, %s832_s17   ;;  %s1020_s15 = smov %s828_s16 }
  0xea   : > { %p12_p6 = scmp.ge.s32.totalorder %s15_s17, 4   ;;  %s1021_s16 = smov %s1023_s18 }
  0xec   :  { %14 = sbr.rel (!%p12_p6) target bundleno = 2 (0x2), region = 74 }

// kernel: tile.171
= control target key start
LH: loop header
LB: loop body
LE: loop exit
PB: predicated region body
PF: predicated region fallthrough
CT: control target
= control target key end

     0   :  { %s22_s0 = inlined_call_operand.vmem [shape: f32[16], index: 0, kind: input, shape index: {}]   ;;  %s23_s1 = inlined_call_operand.vmem [shape: f32[8,16], index: 1, kind: output, shape index: {}]  }
   0x1   :  { %v4_v0 = vld [vmem:[%s22_s0] ss:$0 sm:$0xff] }
   0x2   :  { %5 = vst [vmem:[%s23_s1] sm:$0xff] %v4_v0 }

// kernel: tile.176
= control target key start
LH: loop header
LB: loop body
LE: loop exit
PB: predicated region body
PF: predicated region fallthrough
CT: control target
= control target key end

     0   :  { %s67_s10 = smov 112   ;;  %s68_s11 = smov 80   ;;  %vm3_vm0 = vcmask 130048   ;;  %vm9_vm1 = vcmask 1048448   ;;  %vm15_vm2 = vcmask 917248   ;;  %vm21_vm3 = vcmask 786048   ;;  %s111_s0 = inlined_call_operand.vmem [shape: f32[8,16], index: 0, kind: input, shape index: {}]   ;;  %s112_s1 = inlined_call_operand.vmem [shape: f32[1,128], index: 1, kind: output, shape index: {}]  }
   0x1   :  { %v53_v0 = vld [vmem:[%s111_s0 + $0x7] sm:$0x1]   ;;  %v55_v1 = vld [vmem:[%s111_s0 + $0x5] sm:$0x1]   ;;  %v57_v2 = vld [vmem:[%s111_s0 + $0x3] sm:$0x1]  }
   0x2   :  { %7 = vrot.lane.b32.xlu0 %v53_v0, %s67_s10  ;;  %19 = vrot.lane.b32.xlu1 %v55_v1, %s68_s11  ;;  %s69_s14 = smov 48   ;;  %v54_v3 = vld [vmem:[%s111_s0 + $0x6] sm:$0x1]   ;;  %v56_v4 = vld [vmem:[%s111_s0 + $0x4] sm:$0x1]   ;;  %s70_s21 = smov 96  }
   0x3   :  { %31 = vrot.lane.b32.xlu2 %v57_v2, %s69_s14  ;;  %v58_v5 = vld [vmem:[%s111_s0 + $0x2] sm:$0x1]   ;;  %s71_s22 = smov 64   ;;  %s72_s23 = smov 32   ;;  %v59_v6 = vld [vmem:[%s111_s0 + $0x1] sm:$0x1]  }
   0x4   :  { %s73_s26 = smov 16   ;;  %v2_v7 = vld [vmem:[%s111_s0] sm:$0x1]   ;;  %vm27_vm4 = vcmask 654848   ;;  %vm33_vm5 = vcmask 523648   ;;  %vm39_vm6 = vcmask 392448  }
   0x5   :  { %4 = vst.msk [vmem:[#allocation0] sm:$0x1] %vm3_vm0, %v2_v7   ;;  %vm45_vm7 = vcmask 261248  }
   0xa   :  { %13 = vrot.lane.b32.xlu0 %v54_v3, %s70_s21  ;;  %25 = vrot.lane.b32.xlu1 %v56_v4, %s71_s22 }
   0xb   :  { %37 = vrot.lane.b32.xlu2 %v58_v5, %s72_s23 }
  0x12   :  { %43 = vrot.lane.b32.xlu0 %v59_v6, %s73_s26 }
  0x5d   :  { %v32_v8 = vpop.permute.xlu2 %31  }
  0x65   :  { %v38_v9 = vpop.permute.xlu2 %37  }
  0x74   :  { %v8_v10 = vpop.permute.xlu0 %7   ;;  %v20_v11 = vpop.permute.xlu1 %19  }
  0x75   :  { %10 = vst.msk [vmem:[#allocation0] sm:$0x1] %vm9_vm1, %v8_v10  }
  0x7c   :  { %v14_v12 = vpop.permute.xlu0 %13   ;;  %v26_v13 = vpop.permute.xlu1 %25  }
  0x7d   :  { %16 = vst.msk [vmem:[#allocation0] sm:$0x1] %vm15_vm2, %v14_v12  }
  0x7e   :  { %22 = vst.msk [vmem:[#allocation0] sm:$0x1] %vm21_vm3, %v20_v11  }
  0x7f   :  { %28 = vst.msk [vmem:[#allocation0] sm:$0x1] %vm27_vm4, %v26_v13  }
  0x80   :  { %34 = vst.msk [vmem:[#allocation0] sm:$0x1] %vm33_vm5, %v32_v8  }
  0x81   :  { %40 = vst.msk [vmem:[#allocation0] sm:$0x1] %vm39_vm6, %v38_v9  }
  0x84   :  { %v44_v14 = vpop.permute.xlu0 %43  }
  0x85   :  { %46 = vst.msk [vmem:[#allocation0] sm:$0x1] %vm45_vm7, %v44_v14  }
  0x8c   :  { %v49_v15 = vld [vmem:[#allocation0] sm:$0x1] }
  0x8d   :  { %52 = vst [vmem:[%s112_s1] sm:$0x1] %v49_v15 }

// kernel: net_forward.34
= control target key start
LH: loop header
LB: loop body
LE: loop exit
PB: predicated region body
PF: predicated region fallthrough
CT: control target
= control target key end

     0   :  { %s83_s0 = inlined_call_operand.vmem [shape: bf16[16,128], index: 0, kind: input, shape index: {}]   ;;  %s84_s1 = inlined_call_operand.vmem [shape: f32[1,128], index: 1, kind: input, shape index: {}]   ;;  %s85_s2 = inlined_call_operand.vmem [shape: f32[1,128], index: 2, kind: input, shape index: {}]   ;;  %s86_s3 = inlined_call_operand.vmem [shape: bf16[16,128], index: 3, kind: output, shape index: {}]  }
   0x1   :  { %v41_v0 = vld [vmem:[%s83_s0] sm:$0xff]  }
   0x2   :  { %v49_v1 = vld [vmem:[%s84_s1] ss:$0 sm:$0xff]  ;;  %v42_v2 = vunpack.c.l.bf16 %v41_v0  ;;  %v43_v3 = vunpack.c.h.bf16 %v41_v0 }
   0x3   :  { %v50_v4 = vld [vmem:[%s85_s2] ss:$0 sm:$0xff] }
   0x4   :  { %v22_v5 = vmul.f32 %v49_v1, %v42_v2  ;;  %v23_v6 = vmul.f32 %v49_v1, %v43_v3 }
   0x6   :  { %v28_v7 = vadd.f32 %v50_v4, %v22_v5  ;;  %v29_v8 = vadd.f32 %v50_v4, %v23_v6 }
   0x8   :  { %v30_v9 = vmax.f32 %v28_v7, 0.0  ;;  %v31_v10 = vmax.f32 %v29_v8, 0.0 }
   0xa   :  { %v47_v11 = vpack.c.bf16 %v31_v10, %v30_v9 }
   0xc   :  { %48 = vst [vmem:[%s86_s3] sm:$0xff] %v47_v11  }

// kernel: net_forward.35
= control target key start
LH: loop header
LB: loop body
LE: loop exit
PB: predicated region body
PF: predicated region fallthrough
CT: control target
= control target key end

     0   :  { %s1165_s15 = smov 0   ;;  %s1167_s16 = smov 0   ;;  %s1376_s0 = inlined_call_operand.vmem [shape: bf16[128,432], index: 0, kind: input, shape index: {}]   ;;  %s1377_s1 = inlined_call_operand.vmem [shape: bf16[432,16], index: 1, kind: input, shape index: {}]   ;;  %s1378_s2 = inlined_call_operand.vmem [shape: f32[1,16], index: 2, kind: input, shape index: {}]   ;;  %s1379_s3 = inlined_call_operand.vmem [shape: bf16[128,16], index: 3, kind: output, shape index: {0}]   ;;  %s1380_s4 = inlined_call_operand.vmem [shape: f32[2,2,16], index: 4, kind: output, shape index: {1}]  }
   0x1   :  { %s1169_s17 = smov 0  }
   0x2 LB: > { %s27_s18 = sadd.s32 1, %s1134_s16  ;;  %p862_p0 = scmp.ge.s32.totalorder %s1138_s17, 1  ;;  %s1138_s17 = sphi %s1169_s17, %s15_s17   ;;  %s1134_s16 = sphi %s1167_s16, %s1382_s16   ;;  %s1130_s15 = sphi %s1165_s15, %s1381_s15  }
   0x3   : > { %p29_p1 = scmp.ge.s32.totalorder %s27_s18, 2  ;;  %p186_p2 = scmp.lt.s32.totalorder %s1138_s17, 3 }
   0x5   : > { %s1384_s18 = smov (%p29_p1, %s27_s18), 0  ;;  %p187_p3 = pnand %p862_p0, %p186_p2 }
   0x6   : > { %s863_s25 = sshll.u32 (!%p187_p3), %s1130_s15, 3  ;;  %p239_p5 = scmp.lt.s32.totalorder (!%p187_p3), %s1130_s15, 1 }
   0x7   : > { %190 = sbr.rel (%p187_p3) target bundleno = 256 (0x100), region = 32  ;;  %p223_p4 = scmp.lt.s32.totalorder (!%p187_p3), %s863_s25, 15 }
   0xc   : > { %v1055_v0 = vld [vmem:[%s1377_s1 + $0x38] sm:$0xff]  ;;  %v1054_v3 = vld [vmem:[%s1377_s1 + $0x30] sm:$0xff]  ;;  %s1386_s25 = smov (!%p223_p4, %s863_s25), 15  ;;  %v1053_v7 = vld [vmem:[%s1377_s1 + $0x28] sm:$0xff]  ;;  %vm556_vm0 = vcmask 392192   ;;  %vm693_vm1 = vcmask 125952  }
   0xd   : > { %v1063_v1 = vld [vmem:[%s1377_s1 + $0x78] sm:$0xff]  ;;  %569 = vmatpush.bf16.msra.mxu0 %v1055_v0  ;;  %v1062_v4 = vld [vmem:[%s1377_s1 + $0x70] sm:$0xff]  ;;  %v1061_v8 = vld [vmem:[%s1377_s1 + $0x68] sm:$0xff]  ;;  %s1047_s12 = sshll.u32 %s1386_s25, 4  ;;  %vm702_vm2 = vcmask 130048   ;;  %s1388_s15 = smov (!%p239_p5, %s1130_s15), 1 }
   0xe   : > { %v1071_v2 = vld [vmem:[%s1377_s1 + $0xb8] sm:$0xff]  ;;  %598 = vmatpush.bf16.msra.mxu1 %v1063_v1  ;;  %v1070_v5 = vld [vmem:[%s1377_s1 + $0xb0] sm:$0xff]  ;;  %v1069_v9 = vld [vmem:[%s1377_s1 + $0xa8] sm:$0xff]  ;;  %s1225_s23 = scalar_lea.vmem %s1376_s0, %s1047_s12  ;;  %vm724_vm3 = vcmask 122880  }
   0xf   : > { %627 = vmatpush.bf16.msra.mxu2 %v1071_v2  ;;  %v1074_v6 = vld [vmem:[%s1377_s1 + $0xd0] sm:$0xff]  ;;  %v1073_v10 = vld [vmem:[%s1377_s1 + $0xc8] sm:$0xff]  ;;  %v1052_v11 = vld [vmem:[%s1377_s1 + $0x20] sm:$0xff] }
  0x10   : > { %661 = vmatpush.bf16.msra.mxu3 %v1074_v6  ;;  %v1060_v12 = vld [vmem:[%s1377_s1 + $0x60] sm:$0xff]  ;;  %v1076_v15 = vld [vmem:[%s1225_s23 + $0xc] sm:$0xf]  ;;  %v881_v16 = vld [vmem:[%s1225_s23 + $0x18] sm:$0xf0] }
  0x11   : > { %570 = vmatpush.bf16.msra.mxu0 %v1054_v3  ;;  %v1068_v13 = vld [vmem:[%s1377_s1 + $0xa0] sm:$0xff]  ;;  %v1051_v17 = vld [vmem:[%s1377_s1 + $0x18] sm:$0xff]  ;;  %v884_v20 = vor.u32 %v1076_v15, %v881_v16  ;;  %v1050_v21 = vld [vmem:[%s1377_s1 + $0x10] sm:$0xff] }
  0x12   : > { %599 = vmatpush.bf16.msra.mxu1 %v1062_v4  ;;  %v1072_v14 = vld [vmem:[%s1377_s1 + $0xc0] sm:$0xff]  ;;  %v1059_v18 = vld [vmem:[%s1377_s1 + $0x58] sm:$0xff]  ;;  %v1058_v22 = vld [vmem:[%s1377_s1 + $0x50] sm:$0xff] }
  0x13   : > { %628 = vmatpush.bf16.msra.mxu2 %v1070_v5  ;;  %v1067_v19 = vld [vmem:[%s1377_s1 + $0x98] sm:$0xff]  ;;  %v1066_v23 = vld [vmem:[%s1377_s1 + $0x90] sm:$0xff]  ;;  %v1049_v24 = vld [vmem:[%s1377_s1 + $0x8] sm:$0xff] }
  0x14   : > { %662 = vmatpush.bf16.msra.mxu3 %v1073_v10  ;;  %v1057_v25 = vld [vmem:[%s1377_s1 + $0x48] sm:$0xff]  ;;  %v1048_v27 = vld [vmem:[%s1377_s1] sm:$0xff]  ;;  %v1077_v30 = vld [vmem:[%s1225_s23 + $0xc] sm:$0xf0] }
  0x15   : > { %571 = vmatpush.bf16.msra.mxu0 %v1053_v7  ;;  %v1065_v26 = vld [vmem:[%s1377_s1 + $0x88] sm:$0xff]  ;;  %v1056_v28 = vld [vmem:[%s1377_s1 + $0x40] sm:$0xff]  ;;  %v873_v32 = vld [vmem:[%s1225_s23 + $0x10] sm:$0xf0] }
  0x16   : > { %600 = vmatpush.bf16.msra.mxu1 %v1061_v8  ;;  %v871_v29 = vld [vmem:[%s1225_s23] sm:$0xf]  ;;  %v1075_v31 = vld [vmem:[%s1225_s23 + $0x4] sm:$0xf]  ;;  %v879_v34 = vld [vmem:[%s1225_s23 + $0x8] sm:$0xf] }
  0x17   : > { %629 = vmatpush.bf16.msra.mxu2 %v1069_v9  ;;  %v1064_v33 = vld [vmem:[%s1377_s1 + $0x80] sm:$0xff]  ;;  %v1078_v35 = vld [vmem:[%s1225_s23 + $0x14] sm:$0xf0]  ;;  %v1080_v36 = vld [vmem:[%s1225_s23 + $0x2c] sm:$0xf]  ;;  %v872_v38 = vor.u32 %v1077_v30, %v871_v29  ;;  %v876_v39 = vor.u32 %v1075_v31, %v873_v32 }
  0x18   : > { %663 = vmatpush.bf16.msra.mxu3 %v1072_v14  ;;  %v897_v37 = vld [vmem:[%s1225_s23 + $0x38] sm:$0xf0]  ;;  %v880_v40 = vor.u32 %v1078_v35, %v879_v34  ;;  %v887_v42 = vld [vmem:[%s1225_s23 + $0x20] sm:$0xf]  ;;  %v1081_v43 = vld [vmem:[%s1225_s23 + $0x2c] sm:$0xf0] }
  0x19   : > { %572 = vmatpush.bf16.msra.mxu0 %v1052_v11  ;;  %v900_v41 = vor.u32 %v1080_v36, %v897_v37  ;;  %v1079_v44 = vld [vmem:[%s1225_s23 + $0x24] sm:$0xf]  ;;  %v889_v45 = vld [vmem:[%s1225_s23 + $0x30] sm:$0xf0]  ;;  %v895_v46 = vld [vmem:[%s1225_s23 + $0x28] sm:$0xf]  ;;  %v888_v50 = vor.u32 %v1081_v43, %v887_v42 }
  0x1a   : > { %601 = vmatpush.bf16.msra.mxu1 %v1060_v12  ;;  %v1082_v47 = vld [vmem:[%s1225_s23 + $0x34] sm:$0xf0]  ;;  %v1084_v48 = vld [vmem:[%s1225_s23 + $0x4c] sm:$0xf]  ;;  %v913_v49 = vld [vmem:[%s1225_s23 + $0x58] sm:$0xf0]  ;;  %v892_v51 = vor.u32 %v1079_v44, %v889_v45 }
  0x1b   : > { %630 = vmatpush.bf16.msra.mxu2 %v1068_v13  ;;  %1041 = vmatmul.msk.bf16.vlgmr.msra.gmra.mxu3 %vm556_vm0, %v884_v20  ;;  %v896_v52 = vor.u32 %v1082_v47, %v895_v46  ;;  %v916_v53 = vor.u32 %v1084_v48, %v913_v49  ;;  %v903_v54 = vld [vmem:[%s1225_s23 + $0x40] sm:$0xf]  ;;  %v1085_v55 = vld [vmem:[%s1225_s23 + $0x4c] sm:$0xf0]  ;;  %v1083_v56 = vld [vmem:[%s1225_s23 + $0x44] sm:$0xf] }
  0x1c   : > { %v905_v57 = vld [vmem:[%s1225_s23 + $0x50] sm:$0xf0]  ;;  %v911_v58 = vld [vmem:[%s1225_s23 + $0x48] sm:$0xf]  ;;  %v1086_v59 = vld [vmem:[%s1225_s23 + $0x54] sm:$0xf0]  ;;  %v904_v62 = vor.u32 %v1085_v55, %v903_v54 }
  0x1d   : > { %573 = vmatpush.bf16.msra.mxu0 %v1051_v17  ;;  %v1088_v60 = vld [vmem:[%s1225_s23 + $0x6c] sm:$0xf]  ;;  %v929_v61 = vld [vmem:[%s1225_s23 + $0x78] sm:$0xf0]  ;;  %v908_v63 = vor.u32 %v1083_v56, %v905_v57  ;;  %v912_v0 = vor.u32 %v1086_v59, %v911_v58  ;;  %v919_v2 = vld [vmem:[%s1225_s23 + $0x60] sm:$0xf] }
  0x1e   : > { %602 = vmatpush.bf16.msra.mxu1 %v1059_v18  ;;  %v932_v1 = vor.u32 %v1088_v60, %v929_v61  ;;  %v1089_v3 = vld [vmem:[%s1225_s23 + $0x6c] sm:$0xf0]  ;;  %v1087_v4 = vld [vmem:[%s1225_s23 + $0x64] sm:$0xf]  ;;  %v921_v5 = vld [vmem:[%s1225_s23 + $0x70] sm:$0xf0] }
  0x1f   : > { %631 = vmatpush.bf16.msra.mxu2 %v1067_v19  ;;  %v927_v6 = vld [vmem:[%s1225_s23 + $0x68] sm:$0xf]  ;;  %v1090_v7 = vld [vmem:[%s1225_s23 + $0x74] sm:$0xf0]  ;;  %v920_v8 = vor.u32 %v1089_v3, %v919_v2  ;;  %v924_v9 = vor.u32 %v1087_v4, %v921_v5  ;;  %v1314_v12 = vld [vmem:[%s1378_s2] ss:$0 sm:$0xff] }
  0x20   : > { %v928_v10 = vor.u32 %v1090_v7, %v927_v6  ;;  %s867_s23 = sshll.u32 %s1386_s25, 2  ;;  %s868_s25 = sshll.u32 %s1388_s15, 1 }
  0x21   : > { %574 = vmatpush.bf16.msra.mxu0 %v1050_v21  ;;  %s1322_s19 = scalar_lea.vmem %s1379_s3, %s867_s23  ;;  %s242_s22 = scalar_lea.vmem %s1380_s4, %s868_s25 }
  0x22   : > { %603 = vmatpush.bf16.msra.mxu1 %v1058_v22 }
  0x23   : > { %632 = vmatpush.bf16.msra.mxu2 %v1066_v23 }
  0x25   : > { %575 = vmatpush.bf16.msra.mxu0 %v1049_v24 }
  0x26   : > { %604 = vmatpush.bf16.msra.mxu1 %v1057_v25 }
  0x27   : > { %633 = vmatpush.bf16.msra.mxu2 %v1065_v26 }
  0x29   : > { %576 = vmatpush.bf16.msra.mxu0 %v1048_v27 }
  0x2a   : > { %605 = vmatpush.bf16.msra.mxu1 %v1056_v28 }
  0x2b   : > { %634 = vmatpush.bf16.msra.mxu2 %v1064_v33  ;;  %1042 = vmatmul.msk.bf16.gmra.mxu3 %vm556_vm0, %v900_v41 }
  0x2c   : > { %577 = vmatmul.bf16.vlgmr.msra.gmra.mxu0 %v872_v38 }
  0x2d   : > { %606 = vmatmul.bf16.vlgmr.msra.gmra.mxu1 %v876_v39 }
  0x2e   : > { %635 = vmatmul.bf16.vlgmr.msra.gmra.mxu2 %v880_v40 }
  0x3b   : > { %1043 = vmatmul.msk.bf16.gmra.mxu3 %vm556_vm0, %v916_v53 }
  0x3c   : > { %582 = vmatmul.bf16.gmra.mxu0 %v888_v50 }
  0x3d   : > { %611 = vmatmul.bf16.gmra.mxu1 %v892_v51 }
  0x3e   : > { %640 = vmatmul.bf16.gmra.mxu2 %v896_v52 }
  0x4b   : > { %1044 = vmatmul.msk.bf16.gmra.mxu3 %vm556_vm0, %v932_v1 }
  0x4c   : > { %587 = vmatmul.bf16.gmra.mxu0 %v904_v62 }
  0x4d   : > { %616 = vmatmul.bf16.gmra.mxu1 %v908_v63 }
  0x4e   : > { %645 = vmatmul.bf16.gmra.mxu2 %v912_v0 }
  0x5c   : > { %592 = vmatmul.bf16.gmra.mxu0 %v920_v8 }
  0x5d   : > { %621 = vmatmul.bf16.gmra.mxu1 %v924_v9 }
  0x5e   : > { %650 = vmatmul.bf16.gmra.mxu2 %v928_v10 }
  0x9e   : > { %v665_v11 = vpop.f32.mrf.mxu3 }
  0xa6   : > { %v667_v17 = vpop.f32.mrf.mxu3 }
  0xa9   : > { %v578_v13 = vpop.f32.mrf.mxu0 }
  0xaa   : > { %v607_v14 = vpop.f32.mrf.mxu1  ;;  %v579_v15 = vadd.f32 %v1314_v12, %v578_v13 }
  0xac   : > { %v608_v16 = vadd.f32 %v607_v14, %v579_v15 }
  0xae   : > { %v670_v27 = vpop.f32.mrf.mxu3 }
  0xb1   : > { %v636_v18 = vpop.f32.mrf.mxu2  ;;  %v580_v20 = vpop.f32.mrf.mxu0 }
  0xb2   : > { %v637_v19 = vadd.f32 %v636_v18, %v608_v16  ;;  %v609_v21 = vpop.f32.mrf.mxu1  ;;  %v581_v23 = vadd.f32 %v1314_v12, %v580_v20 }
  0xb4   : > { %v666_v22 = vadd.f32 %v665_v11, %v637_v19  ;;  %v610_v25 = vadd.f32 %v609_v21, %v581_v23 }
  0xb6   : > { %v685_v24 = vpack.c.bf16 %v666_v22, %v666_v22  ;;  %v672_v39 = vpop.f32.mrf.mxu3  ;;  %v726_v7 = vmul.f32 %v666_v22, %v666_v22  ;;  %v703_v10 = vsel %vm702_vm2, %v666_v22, 0.0 }
  0xb8   : > { %694 = vst.msk [vmem:[%s1322_s19] sm:$0xf] %vm693_vm1, %v685_v24  ;;  %v734_v19 = vsel %vm702_vm2, %v726_v7, 0.0 }
  0xb9   : > { %v638_v26 = vpop.f32.mrf.mxu2  ;;  %v583_v29 = vpop.f32.mrf.mxu0 }
  0xba   : > { %v639_v28 = vadd.f32 %v638_v26, %v610_v25  ;;  %v612_v30 = vpop.f32.mrf.mxu1  ;;  %v584_v31 = vadd.f32 %v1314_v12, %v583_v29 }
  0xbc   : > { %v668_v32 = vadd.f32 %v667_v17, %v639_v28  ;;  %v613_v34 = vadd.f32 %v612_v30, %v584_v31 }
  0xbe   : > { %v686_v33 = vpack.c.bf16 %v668_v32, %v668_v32  ;;  %v675_v50 = vpop.f32.mrf.mxu3  ;;  %v727_v4 = vmul.f32 %v668_v32, %v668_v32  ;;  %v704_v9 = vsel %vm702_vm2, %v668_v32, 0.0 }
  0xbf   : > { %v705_v20 = vadd.f32 %v704_v9, %v703_v10 }
  0xc0   : > { %695 = vst.msk [vmem:[%s1322_s19 + $0x4] sm:$0xf] %vm693_vm1, %v686_v33  ;;  %v735_v14 = vsel %vm702_vm2, %v727_v4, 0.0 }
  0xc1   : > { %v641_v35 = vpop.f32.mrf.mxu2  ;;  %v585_v37 = vpop.f32.mrf.mxu0  ;;  %v736_v26 = vadd.f32 %v735_v14, %v734_v19 }
  0xc2   : > { %v642_v36 = vadd.f32 %v641_v35, %v613_v34  ;;  %v614_v38 = vpop.f32.mrf.mxu1  ;;  %v586_v41 = vadd.f32 %v1314_v12, %v585_v37 }
  0xc4   : > { %v671_v40 = vadd.f32 %v670_v27, %v642_v36  ;;  %v615_v43 = vadd.f32 %v614_v38, %v586_v41 }
  0xc6   : > { %v687_v42 = vpack.c.bf16 %v671_v40, %v671_v40  ;;  %v677_v60 = vpop.f32.mrf.mxu3  ;;  %v728_v8 = vmul.f32 %v671_v40, %v671_v40  ;;  %v706_v15 = vsel %vm702_vm2, %v671_v40, 0.0 }
  0xc7   : > { %v707_v27 = vadd.f32 %v706_v15, %v705_v20 }
  0xc8   : > { %696 = vst.msk [vmem:[%s1322_s19 + $0x8] sm:$0xf] %vm693_vm1, %v687_v42  ;;  %v737_v21 = vsel %vm702_vm2, %v728_v8, 0.0 }
  0xc9   : > { %v643_v44 = vpop.f32.mrf.mxu2  ;;  %v588_v46 = vpop.f32.mrf.mxu0  ;;  %v738_v32 = vadd.f32 %v737_v21, %v736_v26 }
  0xca   : > { %v644_v45 = vadd.f32 %v643_v44, %v615_v43  ;;  %v617_v47 = vpop.f32.mrf.mxu1  ;;  %v589_v48 = vadd.f32 %v1314_v12, %v588_v46 }
  0xcc   : > { %v673_v49 = vadd.f32 %v672_v39, %v644_v45  ;;  %v618_v52 = vadd.f32 %v617_v47, %v589_v48 }
  0xce   : > { %v688_v51 = vpack.c.bf16 %v673_v49, %v673_v49  ;;  %v680_v11 = vpop.f32.mrf.mxu3  ;;  %v729_v16 = vmul.f32 %v673_v49, %v673_v49  ;;  %v708_v23 = vsel %vm702_vm2, %v673_v49, 0.0 }
  0xcf   : > { %v709_v33 = vadd.f32 %v708_v23, %v707_v27 }
  0xd0   : > { %697 = vst.msk [vmem:[%s1322_s19 + $0xc] sm:$0xf] %vm693_vm1, %v688_v51  ;;  %v739_v28 = vsel %vm702_vm2, %v729_v16, 0.0 }
  0xd1   : > { %v646_v53 = vpop.f32.mrf.mxu2  ;;  %v590_v55 = vpop.f32.mrf.mxu0 }
  0xd2   : > { %v647_v54 = vadd.f32 %v646_v53, %v618_v52  ;;  %v619_v56 = vpop.f32.mrf.mxu1  ;;  %v591_v58 = vadd.f32 %v1314_v12, %v590_v55 }
  0xd4   : > { %v676_v57 = vadd.f32 %v675_v50, %v647_v54  ;;  %v620_v61 = vadd.f32 %v619_v56, %v591_v58 }
  0xd6   : > { %v689_v59 = vpack.c.bf16 %v676_v57, %v676_v57  ;;  %v730_v24 = vmul.f32 %v676_v57, %v676_v57  ;;  %v710_v29 = vsel %vm702_vm2, %v676_v57, 0.0  ;;  %v682_v46 = vpop.f32.mrf.mxu3 }
  0xd7   : > { %v711_v39 = vadd.f32 %v710_v29, %v709_v33 }
  0xd8   : > { %698 = vst.msk [vmem:[%s1322_s19 + $0x10] sm:$0xf] %vm693_vm1, %v689_v59  ;;  %v741_v35 = vsel %vm702_vm2, %v730_v24, 0.0 }
  0xd9   : > { %v648_v62 = vpop.f32.mrf.mxu2  ;;  %v593_v0 = vpop.f32.mrf.mxu0 }
  0xda   : > { %v649_v63 = vadd.f32 %v648_v62, %v620_v61  ;;  %v594_v1 = vadd.f32 %v1314_v12, %v593_v0  ;;  %v622_v3 = vpop.f32.mrf.mxu1 }
  0xdc   : > { %v678_v2 = vadd.f32 %v677_v60, %v649_v63  ;;  %v623_v6 = vadd.f32 %v622_v3, %v594_v1 }
  0xde   : > { %v690_v5 = vpack.c.bf16 %v678_v2, %v678_v2  ;;  %v731_v30 = vmul.f32 %v678_v2, %v678_v2  ;;  %v712_v36 = vsel %vm702_vm2, %v678_v2, 0.0 }
  0xdf   : > { %v713_v45 = vadd.f32 %v712_v36, %v711_v39 }
  0xe0   : > { %699 = vst.msk [vmem:[%s1322_s19 + $0x14] sm:$0xf] %vm693_vm1, %v690_v5  ;;  %v743_v41 = vsel %vm702_vm2, %v731_v30, 0.0 }
  0xe1   : > { %v651_v13 = vpop.f32.mrf.mxu2  ;;  %v595_v18 = vpop.f32.mrf.mxu0 }
  0xe2   : > { %v652_v17 = vadd.f32 %v651_v13, %v623_v6  ;;  %v596_v22 = vadd.f32 %v1314_v12, %v595_v18  ;;  %v624_v34 = vpop.f32.mrf.mxu1  ;;  %v740_v12 = vadd.f32 %v739_v28, %v738_v32 }
  0xe4   : > { %v681_v25 = vadd.f32 %v680_v11, %v652_v17  ;;  %v625_v38 = vadd.f32 %v624_v34, %v596_v22  ;;  %v742_v44 = vadd.f32 %v741_v35, %v740_v12 }
  0xe6   : > { %v691_v31 = vpack.c.bf16 %v681_v25, %v681_v25  ;;  %v732_v37 = vmul.f32 %v681_v25, %v681_v25  ;;  %v714_v42 = vsel %vm702_vm2, %v681_v25, 0.0  ;;  %v744_v49 = vadd.f32 %v743_v41, %v742_v44 }
  0xe7   : > { %v715_v50 = vadd.f32 %v714_v42, %v713_v45 }
  0xe8   : > { %700 = vst.msk [vmem:[%s1322_s19 + $0x18] sm:$0xf] %vm693_vm1, %v691_v31  ;;  %v745_v47 = vsel %vm702_vm2, %v732_v37, 0.0 }
  0xe9   : > { %v653_v40 = vpop.f32.mrf.mxu2  ;;  %v746_v54 = vadd.f32 %v745_v47, %v744_v49 }
  0xea   : > { %v654_v43 = vadd.f32 %v653_v40, %v625_v38 }
  0xec   : > { %v683_v48 = vadd.f32 %v682_v46, %v654_v43 }
  0xee   : > { %v692_v51 = vpack.c.bf16 %v683_v48, %v683_v48  ;;  %v716_v52 = vsel %vm702_vm2, %v683_v48, 0.0  ;;  %v733_v53 = vmul.f32 %v683_v48, %v683_v48 }
  0xef   : > { %v717_v55 = vadd.f32 %v716_v52, %v715_v50 }
  0xf0   : > { %701 = vst.msk [vmem:[%s1322_s19 + $0x1c] sm:$0xf] %vm693_vm1, %v692_v51  ;;  %v747_v56 = vsel %vm702_vm2, %v733_v53, 0.0 }
  0xf1   : > { %v718_v57 = vrot.slane %v717_v55, 4  ;;  %v748_v58 = vadd.f32 %v747_v56, %v746_v54 }
  0xf3   : > { %v719_v59 = vadd.f32 %v718_v57, %v717_v55  ;;  %v749_v60 = vrot.slane %v748_v58, 4 }
  0xf5   : > { %v720_v61 = vrot.slane %v719_v59, 2  ;;  %v750_v62 = vadd.f32 %v749_v60, %v748_v58 }
  0xf7   : > { %v721_v63 = vadd.f32 %v720_v61, %v719_v59  ;;  %v751_v0 = vrot.slane %v750_v62, 2 }
  0xf9   : > { %v722_v1 = vrot.slane %v721_v63, 1  ;;  %v752_v2 = vadd.f32 %v751_v0, %v750_v62 }
  0xfb   : > { %v723_v3 = vadd.f32 %v722_v1, %v721_v63  ;;  %v753_v4 = vrot.slane %v752_v2, 1 }
  0xfd   : > { %725 = vst.msk [vmem:[%s242_s22] sm:$0x1] %vm724_vm3, %v723_v3  ;;  %v754_v5 = vadd.f32 %v753_v4, %v752_v2 }
  0xff   : > { %755 = vst.msk [vmem:[%s242_s22 + $0x1] sm:$0x1] %vm724_vm3, %v754_v5 }
 0x100 PF: > { %s15_s17 = sadd.s32 1, %s1138_s17   ;;  %s1381_s15 = smov %s1134_s16 }
 0x101   : > { %p12_p6 = scmp.ge.s32.totalorder %s15_s17, 4   ;;  %s1382_s16 = smov %s1384_s18 }
 0x103   :  { %14 = sbr.rel (!%p12_p6) target bundleno = 2 (0x2), region = 74 }

// kernel: net_forward.37
= control target key start
LH: loop header
LB: loop body
LE: loop exit
PB: predicated region body
PF: predicated region fallthrough
CT: control target
= control target key end

     0   :  { %s550_s15 = smov 0   ;;  %s552_s16 = smov 0   ;;  %s617_s0 = inlined_call_operand.vmem [shape: bf16[16,128], index: 0, kind: input, shape index: {}]   ;;  %s618_s1 = inlined_call_operand.vmem [shape: bf16[128,16], index: 1, kind: input, shape index: {}]   ;;  %s619_s2 = inlined_call_operand.vmem [shape: f32[1,16], index: 2, kind: input, shape index: {}]   ;;  %s620_s3 = inlined_call_operand.vmem [shape: bf16[16,16], index: 3, kind: output, shape index: {0}]   ;;  %s621_s4 = inlined_call_operand.vmem [shape: f32[2,2,16], index: 4, kind: output, shape index: {1}]  }
   0x1   :  { %s554_s17 = smov 0  }
   0x2 LB: > { %s27_s18 = sadd.s32 1, %s519_s16  ;;  %p430_p0 = scmp.ge.s32.totalorder %s523_s17, 1  ;;  %s523_s17 = sphi %s554_s17, %s15_s17   ;;  %s519_s16 = sphi %s552_s16, %s623_s16   ;;  %s515_s15 = sphi %s550_s15, %s622_s15  }
   0x3   : > { %p29_p1 = scmp.ge.s32.totalorder %s27_s18, 2  ;;  %p181_p2 = scmp.lt.s32.totalorder %s523_s17, 3 }
   0x5   : > { %s625_s18 = smov (%p29_p1, %s27_s18), 0  ;;  %p182_p3 = pnand %p430_p0, %p181_p2 }
   0x6   : > { %p212_p4 = scmp.lt.s32.totalorder (!%p182_p3), %s515_s15, 1 }
   0x7   : > { %185 = sbr.rel (%p182_p3) target bundleno = 188 (0xbc), region = 32 }
   0xc   : > { %v475_v0 = vld [vmem:[%s618_s1 + $0x38] sm:$0xff]  ;;  %v474_v1 = vld [vmem:[%s618_s1 + $0x30] sm:$0xff]  ;;  %v473_v2 = vld [vmem:[%s618_s1 + $0x28] sm:$0xff]  ;;  %s627_s15 = smov (!%p212_p4, %s515_s15), 1  ;;  %vm312_vm0 = vcmask 130048   ;;  %vm310_vm1 = vcmask 125952  }
   0xd   : > { %296 = vmatpush.bf16.msra.mxu0 %v475_v0  ;;  %v472_v3 = vld [vmem:[%s618_s1 + $0x20] sm:$0xff]  ;;  %v471_v4 = vld [vmem:[%s618_s1 + $0x18] sm:$0xff]  ;;  %v470_v5 = vld [vmem:[%s618_s1 + $0x10] sm:$0xff]  ;;  %s431_s7 = sshll.u32 %s627_s15, 2  ;;  %s433_s22 = sshll.u32 %s627_s15, 1  ;;  %vm320_vm2 = vcmask 122880  }
   0xe   : > { %v469_v6 = vld [vmem:[%s618_s1 + $0x8] sm:$0xff]  ;;  %v468_v7 = vld [vmem:[%s618_s1] sm:$0xff]  ;;  %s218_s12 = scalar_lea.vmem %s617_s0, %s431_s7  ;;  %s222_s21 = scalar_lea.vmem %s620_s3, %s431_s7 }
   0xf   : > { %v243_v8 = vld [vmem:[%s218_s12] sm:$0xf]  ;;  %s226_s25 = scalar_lea.vmem %s621_s4, %s433_s22 }
  0x10   : > { %v500_v9 = vld [vmem:[%s619_s2] ss:$0 sm:$0xff] }
  0x11   : > { %297 = vmatpush.bf16.msra.mxu0 %v474_v1 }
  0x15   : > { %298 = vmatpush.bf16.msra.mxu0 %v473_v2 }
  0x19   : > { %299 = vmatpush.bf16.msra.mxu0 %v472_v3 }
  0x1d   : > { %300 = vmatpush.bf16.msra.mxu0 %v471_v4 }
  0x21   : > { %301 = vmatpush.bf16.msra.mxu0 %v470_v5 }
  0x25   : > { %302 = vmatpush.bf16.msra.mxu0 %v469_v6 }
  0x29   : > { %303 = vmatpush.bf16.msra.mxu0 %v468_v7 }
  0x2c   : > { %304 = vmatmul.bf16.vlgmr.msra.gmra.mxu0 %v243_v8 }
  0xa9   : > { %v305_v10 = vpop.f32.mrf.mxu0 }
  0xaa   : > { %v306_v11 = vadd.f32 %v500_v9, %v305_v10 }
  0xac   : > { %v309_v12 = vpack.c.bf16 %v306_v11, %v306_v11  ;;  %v313_v13 = vsel %vm312_vm0, %v306_v11, 0.0  ;;  %v322_v14 = vmul.f32 %v306_v11, %v306_v11 }
  0xad   : > { %v314_v15 = vrot.slane %v313_v13, 4 }
  0xae   : > { %311 = vst.msk [vmem:[%s222_s21] sm:$0xf] %vm310_vm1, %v309_v12  ;;  %v323_v16 = vsel %vm312_vm0, %v322_v14, 0.0 }
  0xaf   : > { %v315_v17 = vadd.f32 %v314_v15, %v313_v13  ;;  %v324_v18 = vrot.slane %v323_v16, 4 }
  0xb1   : > { %v316_v19 = vrot.slane %v315_v17, 2  ;;  %v325_v20 = vadd.f32 %v324_v18, %v323_v16  ;;  %v307_v21 = vpop.f32.mrf.mxu0 }
  0xb3   : > { %v317_v22 = vadd.f32 %v316_v19, %v315_v17  ;;  %v326_v23 = vrot.slane %v325_v20, 2 }
  0xb5   : > { %v318_v24 = vrot.slane %v317_v22, 1  ;;  %v327_v25 = vadd.f32 %v326_v23, %v325_v20 }
  0xb7   : > { %v319_v26 = vadd.f32 %v318_v24, %v317_v22  ;;  %v328_v27 = vrot.slane %v327_v25, 1 }
  0xb9   : > { %321 = vst.msk [vmem:[%s226_s25] sm:$0x1] %vm320_vm2, %v319_v26  ;;  %v329_v28 = vadd.f32 %v328_v27, %v327_v25 }
  0xbb   : > { %330 = vst.msk [vmem:[%s226_s25 + $0x1] sm:$0x1] %vm320_vm2, %v329_v28 }
  0xbc PF: > { %s15_s17 = sadd.s32 1, %s523_s17   ;;  %s622_s15 = smov %s519_s16 }
  0xbd   : > { %p12_p5 = scmp.ge.s32.totalorder %s15_s17, 4   ;;  %s623_s16 = smov %s625_s18 }
  0xbf   :  { %14 = sbr.rel (!%p12_p5) target bundleno = 2 (0x2), region = 74 }

// kernel: net_forward.38
= control target key start
LH: loop header
LB: loop body
LE: loop exit
PB: predicated region body
PF: predicated region fallthrough
CT: control target
= control target key end

     0   :  { %s67_s0 = inlined_call_operand.vmem [shape: bf16[2,128], index: 0, kind: input, shape index: {}]   ;;  %s68_s1 = inlined_call_operand.vmem [shape: f32[1,128], index: 1, kind: input, shape index: {}]   ;;  %s69_s2 = inlined_call_operand.vmem [shape: f32[1,128], index: 2, kind: input, shape index: {}]   ;;  %s70_s3 = inlined_call_operand.vmem [shape: bf16[2,128], index: 3, kind: output, shape index: {}]  }
   0x1   :  { %v14_v0 = vld [vmem:[%s67_s0] sm:$0x1] }
   0x2   :  { %v33_v1 = vld [vmem:[%s68_s1] ss:$0 sm:$0xff]  ;;  %v15_v2 = vunpack.c.l.bf16 %v14_v0 }
   0x3   :  { %v34_v3 = vld [vmem:[%s69_s2] ss:$0 sm:$0xff] }
   0x4   :  { %v20_v4 = vmul.f32 %v33_v1, %v15_v2 }
   0x6   :  { %v25_v5 = vadd.f32 %v34_v3, %v20_v4 }
   0x8   :  { %v26_v6 = vmax.f32 %v25_v5, 0.0 }
   0xa   :  { %v27_v7 = vpack.c.bf16 %v26_v6, %v26_v6 }
   0xc   :  { %28 = vst [vmem:[%s70_s3] sm:$0x1] %v27_v7 }

// kernel: tile.201
= control target key start
LH: loop header
LB: loop body
LE: loop exit
PB: predicated region body
PF: predicated region fallthrough
CT: control target
= control target key end

     0   :  { %s22_s0 = inlined_call_operand.vmem [shape: f32[32], index: 0, kind: input, shape index: {}]   ;;  %s23_s1 = inlined_call_operand.vmem [shape: f32[4,32], index: 1, kind: output, shape index: {}]  }
   0x1   :  { %v4_v0 = vld [vmem:[%s22_s0] ss:$0 sm:$0xff] }
   0x2   :  { %5 = vst [vmem:[%s23_s1] sm:$0xf] %v4_v0 }

// kernel: tile.206
= control target key start
LH: loop header
LB: loop body
LE: loop exit
PB: predicated region body
PF: predicated region fallthrough
CT: control target
= control target key end

     0   :  { %s37_s8 = smov 32   ;;  %s38_s9 = smov 64   ;;  %vm7_vm0 = vcmask 261120   ;;  %vm13_vm1 = vcmask 1048320   ;;  %vm19_vm2 = vcmask 785920   ;;  %vm25_vm3 = vcmask 523520   ;;  %s55_s0 = inlined_call_operand.vmem [shape: f32[4,32], index: 0, kind: input, shape index: {}]   ;;  %s56_s1 = inlined_call_operand.vmem [shape: f32[1,128], index: 1, kind: output, shape index: {}]  }
   0x1   :  { %v4_v0 = vld [vmem:[%s55_s0] sm:$0xf]  ;;  %s36_s0 = smov 96  }
   0x2   :  { %5 = vst [vmem:[#allocation1] sm:$0xf] %v4_v0 }
   0x9   :  { %v10_v1 = vld [vmem:[#allocation1 + $0x3] sm:$0x1]   ;;  %v22_v2 = vld [vmem:[#allocation1 + $0x1] sm:$0x1]   ;;  %v16_v3 = vld [vmem:[#allocation1 + $0x2] sm:$0x1]  }
   0xa   :  { %11 = vrot.lane.b32.xlu0 %v10_v1, %s36_s0  ;;  %23 = vrot.lane.b32.xlu1 %v22_v2, %s37_s8  ;;  %v6_v4 = vld [vmem:[#allocation1] sm:$0x1]  }
   0xb   :  { %8 = vst.msk [vmem:[#allocation0] sm:$0x1] %vm7_vm0, %v6_v4  }
  0x12   :  { %17 = vrot.lane.b32.xlu0 %v16_v3, %s38_s9 }
  0x7c   :  { %v12_v5 = vpop.permute.xlu0 %11   ;;  %v24_v6 = vpop.permute.xlu1 %23  }
  0x7d   :  { %14 = vst.msk [vmem:[#allocation0] sm:$0x1] %vm13_vm1, %v12_v5  }
  0x84   :  { %v18_v7 = vpop.permute.xlu0 %17  }
  0x85   :  { %20 = vst.msk [vmem:[#allocation0] sm:$0x1] %vm19_vm2, %v18_v7  }
  0x86   :  { %26 = vst.msk [vmem:[#allocation0] sm:$0x1] %vm25_vm3, %v24_v6  }
  0x8d   :  { %v29_v8 = vld [vmem:[#allocation0] sm:$0x1] }
  0x8e   :  { %32 = vst [vmem:[%s56_s1] sm:$0x1] %v29_v8 }

// kernel: net_forward.40
= control target key start
LH: loop header
LB: loop body
LE: loop exit
PB: predicated region body
PF: predicated region fallthrough
CT: control target
= control target key end

     0   :  { %s67_s0 = inlined_call_operand.vmem [shape: bf16[4,128], index: 0, kind: input, shape index: {}]   ;;  %s68_s1 = inlined_call_operand.vmem [shape: f32[1,128], index: 1, kind: input, shape index: {}]   ;;  %s69_s2 = inlined_call_operand.vmem [shape: f32[1,128], index: 2, kind: input, shape index: {}]   ;;  %s70_s3 = inlined_call_operand.vmem [shape: bf16[4,128], index: 3, kind: output, shape index: {}]  }
   0x1   :  { %v14_v0 = vld [vmem:[%s67_s0] sm:$0x3] }
   0x2   :  { %v33_v1 = vld [vmem:[%s68_s1] ss:$0 sm:$0xff]  ;;  %v15_v2 = vunpack.c.l.bf16 %v14_v0 }
   0x3   :  { %v34_v3 = vld [vmem:[%s69_s2] ss:$0 sm:$0xff] }
   0x4   :  { %v20_v4 = vmul.f32 %v33_v1, %v15_v2 }
   0x6   :  { %v25_v5 = vadd.f32 %v34_v3, %v20_v4 }
   0x8   :  { %v26_v6 = vmax.f32 %v25_v5, 0.0 }
   0xa   :  { %v27_v7 = vpack.c.bf16 %v26_v6, %v26_v6 }
   0xc   :  { %28 = vst [vmem:[%s70_s3] sm:$0x3] %v27_v7 }

// kernel: net_forward.41
= control target key start
LH: loop header
LB: loop body
LE: loop exit
PB: predicated region body
PF: predicated region fallthrough
CT: control target
= control target key end

     0   :  { %s473_s15 = smov 0   ;;  %s475_s16 = smov 0   ;;  %s518_s0 = inlined_call_operand.vmem [shape: bf16[16,32], index: 0, kind: input, shape index: {}]   ;;  %s519_s1 = inlined_call_operand.vmem [shape: bf16[32,128], index: 1, kind: input, shape index: {}]   ;;  %s520_s2 = inlined_call_operand.vmem [shape: f32[1,128], index: 2, kind: input, shape index: {}]   ;;  %s521_s3 = inlined_call_operand.vmem [shape: bf16[16,128], index: 3, kind: output, shape index: {0}]   ;;  %s522_s4 = inlined_call_operand.vmem [shape: f32[2,2,128], index: 4, kind: output, shape index: {1}]  }
   0x1   :  { %s477_s17 = smov 0  }
   0x2 LB: > { %s27_s18 = sadd.s32 1, %s442_s16  ;;  %p382_p0 = scmp.ge.s32.totalorder %s446_s17, 1  ;;  %s446_s17 = sphi %s477_s17, %s15_s17   ;;  %s442_s16 = sphi %s475_s16, %s524_s16   ;;  %s438_s15 = sphi %s473_s15, %s523_s15  }
   0x3   : > { %p29_p1 = scmp.ge.s32.totalorder %s27_s18, 2  ;;  %p181_p2 = scmp.lt.s32.totalorder %s446_s17, 3 }
   0x5   : > { %s526_s18 = smov (%p29_p1, %s27_s18), 0  ;;  %p182_p3 = pnand %p382_p0, %p181_p2 }
   0x6   : > { %p212_p4 = scmp.lt.s32.totalorder (!%p182_p3), %s438_s15, 1 }
   0x7   : > { %185 = sbr.rel (%p182_p3) target bundleno = 163 (0xa3), region = 32 }
   0xc   : > { %v398_v0 = vld [vmem:[%s519_s1 + $0x8] sm:$0xff]  ;;  %v397_v1 = vld [vmem:[%s519_s1] sm:$0xff]  ;;  %s528_s15 = smov (!%p212_p4, %s438_s15), 1  ;;  %vm249_vm0 = vcmask 261120  }
   0xd   : > { %259 = vmatpush.bf16.msra.mxu0 %v398_v0  ;;  %s383_s23 = sshll.u32 %s528_s15, 2  ;;  %v423_v3 = vld [vmem:[%s520_s2] ss:$0 sm:$0xff]  ;;  %s385_s6 = sshll.u32 %s528_s15, 1 }
   0xe   : > { %s218_s26 = scalar_lea.vmem %s518_s0, %s383_s23  ;;  %s222_s5 = scalar_lea.vmem %s521_s3, %s383_s23 }
   0xf   : > { %v232_v2 = vld [vmem:[%s218_s26] sm:$0xf]  ;;  %s226_s9 = scalar_lea.vmem %s522_s4, %s385_s6 }
  0x11   : > { %260 = vmatpush.bf16.msra.mxu0 %v397_v1 }
  0x14   : > { %394 = vmatmul.msk.bf16.vlgmr.msra.gmra.mxu0 %vm249_vm0, %v232_v2 }
  0x91   : > { %v262_v4 = vpop.f32.mrf.mxu0 }
  0x92   : > { %v263_v5 = vadd.f32 %v423_v3, %v262_v4 }
  0x94   : > { %v266_v6 = vpack.c.bf16 %v263_v5, %v263_v5  ;;  %v268_v7 = vrot.slane %v263_v5, 4  ;;  %v275_v8 = vmul.f32 %v263_v5, %v263_v5 }
  0x96   : > { %267 = vst [vmem:[%s222_s5] sm:$0xf] %v266_v6  ;;  %v269_v9 = vadd.f32 %v268_v7, %v263_v5  ;;  %v276_v10 = vrot.slane %v275_v8, 4 }
  0x98   : > { %v270_v11 = vrot.slane %v269_v9, 2  ;;  %v277_v12 = vadd.f32 %v276_v10, %v275_v8 }
  0x99   : > { %v264_v13 = vpop.f32.mrf.mxu0 }
  0x9a   : > { %v271_v14 = vadd.f32 %v270_v11, %v269_v9  ;;  %v278_v15 = vrot.slane %v277_v12, 2 }
  0x9c   : > { %v272_v16 = vrot.slane %v271_v14, 1  ;;  %v279_v17 = vadd.f32 %v278_v15, %v277_v12 }
  0x9e   : > { %v273_v18 = vadd.f32 %v272_v16, %v271_v14  ;;  %v280_v19 = vrot.slane %v279_v17, 1 }
  0xa0   : > { %274 = vst [vmem:[%s226_s9] sm:$0x1] %v273_v18  ;;  %v281_v20 = vadd.f32 %v280_v19, %v279_v17 }
  0xa2   : > { %282 = vst [vmem:[%s226_s9 + $0x1] sm:$0x1] %v281_v20 }
  0xa3 PF: > { %s15_s17 = sadd.s32 1, %s446_s17   ;;  %s523_s15 = smov %s442_s16 }
  0xa4   : > { %p12_p5 = scmp.ge.s32.totalorder %s15_s17, 4   ;;  %s524_s16 = smov %s526_s18 }
  0xa6   :  { %14 = sbr.rel (!%p12_p5) target bundleno = 2 (0x2), region = 74 }

// kernel: net_forward.39
= control target key start
LH: loop header
LB: loop body
LE: loop exit
PB: predicated region body
PF: predicated region fallthrough
CT: control target
= control target key end

     0   :  { %s869_s15 = smov 0   ;;  %s871_s16 = smov 0   ;;  %s998_s0 = inlined_call_operand.vmem [shape: bf16[16,432], index: 0, kind: input, shape index: {}]   ;;  %s999_s1 = inlined_call_operand.vmem [shape: bf16[432,32], index: 1, kind: input, shape index: {}]   ;;  %s1000_s2 = inlined_call_operand.vmem [shape: f32[1,32], index: 2, kind: input, shape index: {}]   ;;  %s1001_s3 = inlined_call_operand.vmem [shape: bf16[16,32], index: 3, kind: output, shape index: {0}]   ;;  %s1002_s4 = inlined_call_operand.vmem [shape: f32[2,2,32], index: 4, kind: output, shape index: {1}]  }
   0x1   :  { %s873_s17 = smov 0  }
   0x2 LB: > { %s27_s18 = sadd.s32 1, %s838_s16  ;;  %p651_p0 = scmp.ge.s32.totalorder %s842_s17, 1  ;;  %s842_s17 = sphi %s873_s17, %s15_s17   ;;  %s838_s16 = sphi %s871_s16, %s1004_s16   ;;  %s834_s15 = sphi %s869_s15, %s1003_s15  }
   0x3   : > { %p29_p1 = scmp.ge.s32.totalorder %s27_s18, 2  ;;  %p184_p2 = scmp.lt.s32.totalorder %s842_s17, 3 }
   0x5   : > { %s1006_s18 = smov (%p29_p1, %s27_s18), 0  ;;  %p185_p3 = pnand %p651_p0, %p184_p2 }
   0x6   : > { %p218_p4 = scmp.lt.s32.totalorder (!%p185_p3), %s834_s15, 1 }
   0x7   : > { %188 = sbr.rel (%p185_p3) target bundleno = 198 (0xc6), region = 32 }
   0xc   : > { %v775_v0 = vld [vmem:[%s999_s1 + $0x38] sm:$0xff]  ;;  %v774_v3 = vld [vmem:[%s999_s1 + $0x30] sm:$0xff]  ;;  %s1008_s15 = smov (!%p218_p4, %s834_s15), 1  ;;  %v773_v7 = vld [vmem:[%s999_s1 + $0x28] sm:$0xff]  ;;  %vm471_vm0 = vcmask 392192   ;;  %vm530_vm1 = vcmask 261120  }
   0xd   : > { %v783_v1 = vld [vmem:[%s999_s1 + $0x78] sm:$0xff]  ;;  %475 = vmatpush.bf16.msra.mxu0 %v775_v0  ;;  %v782_v4 = vld [vmem:[%s999_s1 + $0x70] sm:$0xff]  ;;  %s767_s7 = sshll.u32 %s1008_s15, 4  ;;  %v781_v8 = vld [vmem:[%s999_s1 + $0x68] sm:$0xff]  ;;  %s654_s9 = sshll.u32 %s1008_s15, 2  ;;  %vm528_vm2 = vcmask 257024  }
   0xe   : > { %v791_v2 = vld [vmem:[%s999_s1 + $0xb8] sm:$0xff]  ;;  %488 = vmatpush.bf16.msra.mxu1 %v783_v1  ;;  %v790_v5 = vld [vmem:[%s999_s1 + $0xb0] sm:$0xff]  ;;  %s914_s10 = scalar_lea.vmem %s998_s0, %s767_s7  ;;  %v789_v9 = vld [vmem:[%s999_s1 + $0xa8] sm:$0xff]  ;;  %s230_s13 = scalar_lea.vmem %s1001_s3, %s654_s9  ;;  %vm538_vm3 = vcmask 253952  }
   0xf   : > { %501 = vmatpush.bf16.msra.mxu2 %v791_v2  ;;  %v794_v6 = vld [vmem:[%s999_s1 + $0xd0] sm:$0xff]  ;;  %v793_v10 = vld [vmem:[%s999_s1 + $0xc8] sm:$0xff]  ;;  %v772_v12 = vld [vmem:[%s999_s1 + $0x20] sm:$0xff]  ;;  %s655_s14 = sshll.u32 %s1008_s15, 1 }
  0x10   : > { %519 = vmatpush.bf16.msra.mxu3 %v794_v6  ;;  %v291_v11 = vld [vmem:[%s914_s10 + $0x8] sm:$0xff]  ;;  %v780_v13 = vld [vmem:[%s999_s1 + $0x60] sm:$0xff]  ;;  %v771_v17 = vld [vmem:[%s999_s1 + $0x18] sm:$0xff]  ;;  %s234_s21 = scalar_lea.vmem %s1002_s4, %s655_s14 }
  0x11   : > { %476 = vmatpush.bf16.msra.mxu0 %v774_v3  ;;  %v788_v14 = vld [vmem:[%s999_s1 + $0xa0] sm:$0xff]  ;;  %v301_v16 = vunpack.c.h.b16 %v291_v11  ;;  %v779_v18 = vld [vmem:[%s999_s1 + $0x58] sm:$0xff]  ;;  %v770_v21 = vld [vmem:[%s999_s1 + $0x10] sm:$0xff]  ;;  %v300_v32 = vunpack.c.l.b16 %v291_v11 }
  0x12   : > { %489 = vmatpush.bf16.msra.mxu1 %v782_v4  ;;  %v792_v15 = vld [vmem:[%s999_s1 + $0xc0] sm:$0xff]  ;;  %v787_v19 = vld [vmem:[%s999_s1 + $0x98] sm:$0xff]  ;;  %v778_v22 = vld [vmem:[%s999_s1 + $0x50] sm:$0xff] }
  0x13   : > { %502 = vmatpush.bf16.msra.mxu2 %v790_v5  ;;  %v305_v20 = vpack.c.b16 %v301_v16, %v301_v16  ;;  %v786_v23 = vld [vmem:[%s999_s1 + $0x90] sm:$0xff]  ;;  %v769_v24 = vld [vmem:[%s999_s1 + $0x8] sm:$0xff]  ;;  %v290_v26 = vld [vmem:[%s914_s10] sm:$0xff]  ;;  %v304_v36 = vpack.c.b16 %v300_v32, %v300_v32 }
  0x14   : > { %520 = vmatpush.bf16.msra.mxu3 %v793_v10  ;;  %v777_v25 = vld [vmem:[%s999_s1 + $0x48] sm:$0xff]  ;;  %v298_v28 = vunpack.c.l.b16 %v290_v26  ;;  %v299_v29 = vunpack.c.h.b16 %v290_v26  ;;  %v768_v30 = vld [vmem:[%s999_s1] sm:$0xff] }
  0x15   : > { %477 = vmatpush.bf16.msra.mxu0 %v773_v7  ;;  %v785_v27 = vld [vmem:[%s999_s1 + $0x88] sm:$0xff]  ;;  %v776_v31 = vld [vmem:[%s999_s1 + $0x40] sm:$0xff] }
  0x16   : > { %490 = vmatpush.bf16.msra.mxu1 %v781_v8  ;;  %v784_v33 = vld [vmem:[%s999_s1 + $0x80] sm:$0xff]  ;;  %v302_v34 = vpack.c.b16 %v298_v28, %v298_v28  ;;  %v303_v35 = vpack.c.b16 %v299_v29, %v299_v29 }
  0x17   : > { %503 = vmatpush.bf16.msra.mxu2 %v789_v9  ;;  %v819_v38 = vld [vmem:[%s1000_s2] ss:$0 sm:$0xff] }
  0x18   : > { %521 = vmatpush.bf16.msra.mxu3 %v792_v15 }
  0x19   : > { %478 = vmatpush.bf16.msra.mxu0 %v772_v12 }
  0x1a   : > { %491 = vmatpush.bf16.msra.mxu1 %v780_v13 }
  0x1b   : > { %504 = vmatpush.bf16.msra.mxu2 %v788_v14  ;;  %764 = vmatmul.msk.bf16.vlgmr.msra.gmra.mxu3 %vm471_vm0, %v305_v20 }
  0x1d   : > { %479 = vmatpush.bf16.msra.mxu0 %v771_v17 }
  0x1e   : > { %492 = vmatpush.bf16.msra.mxu1 %v779_v18 }
  0x1f   : > { %505 = vmatpush.bf16.msra.mxu2 %v787_v19 }
  0x21   : > { %480 = vmatpush.bf16.msra.mxu0 %v770_v21 }
  0x22   : > { %493 = vmatpush.bf16.msra.mxu1 %v778_v22 }
  0x23   : > { %506 = vmatpush.bf16.msra.mxu2 %v786_v23 }
  0x25   : > { %481 = vmatpush.bf16.msra.mxu0 %v769_v24 }
  0x26   : > { %494 = vmatpush.bf16.msra.mxu1 %v777_v25 }
  0x27   : > { %507 = vmatpush.bf16.msra.mxu2 %v785_v27 }
  0x29   : > { %482 = vmatpush.bf16.msra.mxu0 %v768_v30 }
  0x2a   : > { %495 = vmatpush.bf16.msra.mxu1 %v776_v31 }
  0x2b   : > { %508 = vmatpush.bf16.msra.mxu2 %v784_v33 }
  0x2c   : > { %483 = vmatmul.bf16.vlgmr.msra.gmra.mxu0 %v302_v34 }
  0x2d   : > { %496 = vmatmul.bf16.vlgmr.msra.gmra.mxu1 %v303_v35 }
  0x2e   : > { %509 = vmatmul.bf16.vlgmr.msra.gmra.mxu2 %v304_v36 }
  0x9e   : > { %v523_v37 = vpop.f32.mrf.mxu3 }
  0xa6   : > { %v525_v42 = vpop.f32.mrf.mxu3 }
  0xa9   : > { %v484_v39 = vpop.f32.mrf.mxu0 }
  0xaa   : > { %v497_v40 = vpop.f32.mrf.mxu1  ;;  %v485_v41 = vadd.f32 %v819_v38, %v484_v39 }
  0xac   : > { %v498_v43 = vadd.f32 %v497_v40, %v485_v41 }
  0xb1   : > { %v510_v44 = vpop.f32.mrf.mxu2  ;;  %v486_v46 = vpop.f32.mrf.mxu0 }
  0xb2   : > { %v511_v45 = vadd.f32 %v510_v44, %v498_v43  ;;  %v499_v47 = vpop.f32.mrf.mxu1 }
  0xb4   : > { %v524_v48 = vadd.f32 %v523_v37, %v511_v45 }
  0xb6   : > { %v527_v49 = vpack.c.bf16 %v524_v48, %v524_v48  ;;  %v531_v50 = vsel %vm530_vm1, %v524_v48, 0.0  ;;  %v540_v51 = vmul.f32 %v524_v48, %v524_v48 }
  0xb7   : > { %v532_v52 = vrot.slane %v531_v50, 4 }
  0xb8   : > { %529 = vst.msk [vmem:[%s230_s13] sm:$0xf] %vm528_vm2, %v527_v49  ;;  %v541_v53 = vsel %vm530_vm1, %v540_v51, 0.0 }
  0xb9   : > { %v533_v54 = vadd.f32 %v532_v52, %v531_v50  ;;  %v542_v55 = vrot.slane %v541_v53, 4  ;;  %v512_v56 = vpop.f32.mrf.mxu2 }
  0xbb   : > { %v534_v57 = vrot.slane %v533_v54, 2  ;;  %v543_v58 = vadd.f32 %v542_v55, %v541_v53 }
  0xbd   : > { %v535_v59 = vadd.f32 %v534_v57, %v533_v54  ;;  %v544_v60 = vrot.slane %v543_v58, 2 }
  0xbf   : > { %v536_v61 = vrot.slane %v535_v59, 1  ;;  %v545_v62 = vadd.f32 %v544_v60, %v543_v58 }
  0xc1   : > { %v537_v63 = vadd.f32 %v536_v61, %v535_v59  ;;  %v546_v0 = vrot.slane %v545_v62, 1 }
  0xc3   : > { %539 = vst.msk [vmem:[%s234_s21] sm:$0x1] %vm538_vm3, %v537_v63  ;;  %v547_v1 = vadd.f32 %v546_v0, %v545_v62 }
  0xc5   : > { %548 = vst.msk [vmem:[%s234_s21 + $0x1] sm:$0x1] %vm538_vm3, %v547_v1 }
  0xc6 PF: > { %s15_s17 = sadd.s32 1, %s842_s17   ;;  %s1003_s15 = smov %s838_s16 }
  0xc7   : > { %p12_p5 = scmp.ge.s32.totalorder %s15_s17, 4   ;;  %s1004_s16 = smov %s1006_s18 }
  0xc9   :  { %14 = sbr.rel (!%p12_p5) target bundleno = 2 (0x2), region = 74 }

// kernel: tile.241
= control target key start
LH: loop header
LB: loop body
LE: loop exit
PB: predicated region body
PF: predicated region fallthrough
CT: control target
= control target key end

     0   :  { %s22_s0 = inlined_call_operand.vmem [shape: f32[8], index: 0, kind: input, shape index: {}]   ;;  %s23_s1 = inlined_call_operand.vmem [shape: f32[8,8], index: 1, kind: output, shape index: {}]  }
   0x1   :  { %v4_v0 = vld [vmem:[%s22_s0] ss:$0 sm:$0xff] }
   0x2   :  { %5 = vst [vmem:[%s23_s1] sm:$0xff] %v4_v0 }

// kernel: tile.248
= control target key start
LH: loop header
LB: loop body
LE: loop exit
PB: predicated region body
PF: predicated region fallthrough
CT: control target
= control target key end

     0   :  { %s67_s10 = smov 56   ;;  %s68_s11 = smov 40   ;;  %vm3_vm0 = vcmask 64512   ;;  %vm9_vm1 = vcmask 523712   ;;  %vm15_vm2 = vcmask 458112   ;;  %vm21_vm3 = vcmask 392512   ;;  %s111_s0 = inlined_call_operand.vmem [shape: f32[8,8], index: 0, kind: input, shape index: {}]   ;;  %s112_s1 = inlined_call_operand.vmem [shape: f32[64], index: 1, kind: output, shape index: {}]  }
   0x1   :  { %v53_v0 = vld [vmem:[%s111_s0 + $0x7] sm:$0x1]   ;;  %v55_v1 = vld [vmem:[%s111_s0 + $0x5] sm:$0x1]   ;;  %v57_v2 = vld [vmem:[%s111_s0 + $0x3] sm:$0x1]  }
   0x2   :  { %7 = vrot.lane.b32.xlu0 %v53_v0, %s67_s10  ;;  %19 = vrot.lane.b32.xlu1 %v55_v1, %s68_s11  ;;  %s69_s14 = smov 24   ;;  %v54_v3 = vld [vmem:[%s111_s0 + $0x6] sm:$0x1]   ;;  %v56_v4 = vld [vmem:[%s111_s0 + $0x4] sm:$0x1]   ;;  %s70_s21 = smov 48  }
   0x3   :  { %31 = vrot.lane.b32.xlu2 %v57_v2, %s69_s14  ;;  %v58_v5 = vld [vmem:[%s111_s0 + $0x2] sm:$0x1]   ;;  %s71_s22 = smov 32   ;;  %s72_s23 = smov 16   ;;  %v59_v6 = vld [vmem:[%s111_s0 + $0x1] sm:$0x1]  }
   0x4   :  { %s73_s26 = smov 8   ;;  %v2_v7 = vld [vmem:[%s111_s0] sm:$0x1]   ;;  %vm27_vm4 = vcmask 326912   ;;  %vm33_vm5 = vcmask 261312   ;;  %vm39_vm6 = vcmask 195712  }
   0x5   :  { %4 = vst.msk [vmem:[#allocation0] sm:$0x1] %vm3_vm0, %v2_v7   ;;  %vm45_vm7 = vcmask 130112  }
   0xa   :  { %13 = vrot.lane.b32.xlu0 %v54_v3, %s70_s21  ;;  %25 = vrot.lane.b32.xlu1 %v56_v4, %s71_s22 }
   0xb   :  { %37 = vrot.lane.b32.xlu2 %v58_v5, %s72_s23 }
  0x12   :  { %43 = vrot.lane.b32.xlu0 %v59_v6, %s73_s26 }
  0x5d   :  { %v32_v8 = vpop.permute.xlu2 %31  }
  0x65   :  { %v38_v9 = vpop.permute.xlu2 %37  }
  0x74   :  { %v8_v10 = vpop.permute.xlu0 %7   ;;  %v20_v11 = vpop.permute.xlu1 %19  }
  0x75   :  { %10 = vst.msk [vmem:[#allocation0] sm:$0x1] %vm9_vm1, %v8_v10  }
  0x7c   :  { %v14_v12 = vpop.permute.xlu0 %13   ;;  %v26_v13 = vpop.permute.xlu1 %25  }
  0x7d   :  { %16 = vst.msk [vmem:[#allocation0] sm:$0x1] %vm15_vm2, %v14_v12  }
  0x7e   :  { %22 = vst.msk [vmem:[#allocation0] sm:$0x1] %vm21_vm3, %v20_v11  }
  0x7f   :  { %28 = vst.msk [vmem:[#allocation0] sm:$0x1] %vm27_vm4, %v26_v13  }
  0x80   :  { %34 = vst.msk [vmem:[#allocation0] sm:$0x1] %vm33_vm5, %v32_v8  }
  0x81   :  { %40 = vst.msk [vmem:[#allocation0] sm:$0x1] %vm39_vm6, %v38_v9  }
  0x84   :  { %v44_v14 = vpop.permute.xlu0 %43  }
  0x85   :  { %46 = vst.msk [vmem:[#allocation0] sm:$0x1] %vm45_vm7, %v44_v14  }
  0x8c   :  { %v49_v15 = vld [vmem:[#allocation0] sm:$0x1] }
  0x8d   :  { %52 = vst [vmem:[%s112_s1] sm:$0x1] %v49_v15 }

// kernel: tile.249
= control target key start
LH: loop header
LB: loop body
LE: loop exit
PB: predicated region body
PF: predicated region fallthrough
CT: control target
= control target key end

     0   :  { %s22_s0 = inlined_call_operand.vmem [shape: f32[64], index: 0, kind: input, shape index: {}]   ;;  %s23_s1 = inlined_call_operand.vmem [shape: f32[2,64], index: 1, kind: output, shape index: {}]  }
   0x1   :  { %v4_v0 = vld [vmem:[%s22_s0] ss:$0 sm:$0xff] }
   0x2   :  { %5 = vst [vmem:[%s23_s1] sm:$0x3] %v4_v0 }

// kernel: tile.254
= control target key start
LH: loop header
LB: loop body
LE: loop exit
PB: predicated region body
PF: predicated region fallthrough
CT: control target
= control target key end

     0   :  { %vm7_vm0 = vcmask 523264   ;;  %vm13_vm1 = vcmask 1048064   ;;  %s39_s0 = inlined_call_operand.vmem [shape: f32[2,64], index: 0, kind: input, shape index: {}]   ;;  %s40_s1 = inlined_call_operand.vmem [shape: f32[1,128], index: 1, kind: output, shape index: {}]  }
   0x1   :  { %v4_v0 = vld [vmem:[%s39_s0] sm:$0x3]  ;;  %s22_s0 = smov 64  }
   0x2   :  { %5 = vst [vmem:[#allocation1] sm:$0x3] %v4_v0 }
   0x9   :  { %v10_v1 = vld [vmem:[#allocation1 + $0x1] sm:$0x1]   ;;  %v6_v2 = vld [vmem:[#allocation1] sm:$0x1]  }
   0xa   :  { %11 = vrot.lane.b32.xlu0 %v10_v1, %s22_s0  ;;  %8 = vst.msk [vmem:[#allocation0] sm:$0x1] %vm7_vm0, %v6_v2  }
  0x7c   :  { %v12_v3 = vpop.permute.xlu0 %11  }
  0x7d   :  { %14 = vst.msk [vmem:[#allocation0] sm:$0x1] %vm13_vm1, %v12_v3  }
  0x84   :  { %v17_v4 = vld [vmem:[#allocation0] sm:$0x1] }
  0x85   :  { %20 = vst [vmem:[%s40_s1] sm:$0x1] %v17_v4 }

// kernel: net_forward.47
= control target key start
LH: loop header
LB: loop body
LE: loop exit
PB: predicated region body
PF: predicated region fallthrough
CT: control target
= control target key end

     0   :  { %s606_s15 = smov 0   ;;  %s608_s16 = smov 0   ;;  %s687_s0 = inlined_call_operand.vmem [shape: bf16[128,16], index: 0, kind: input, shape index: {}]   ;;  %s688_s1 = inlined_call_operand.vmem [shape: bf16[16,64], index: 1, kind: input, shape index: {}]   ;;  %s689_s2 = inlined_call_operand.vmem [shape: f32[1,64], index: 2, kind: input, shape index: {}]   ;;  %s690_s3 = inlined_call_operand.vmem [shape: bf16[128,64], index: 3, kind: output, shape index: {0}]   ;;  %s691_s4 = inlined_call_operand.vmem [shape: f32[2,2,64], index: 4, kind: output, shape index: {1}]  }
   0x1   :  { %s610_s17 = smov 0  }
   0x2 LB: > { %s27_s18 = sadd.s32 1, %s575_s16  ;;  %p492_p0 = scmp.ge.s32.totalorder %s579_s17, 1  ;;  %s579_s17 = sphi %s610_s17, %s15_s17   ;;  %s575_s16 = sphi %s608_s16, %s693_s16   ;;  %s571_s15 = sphi %s606_s15, %s692_s15  }
   0x3   : > { %p29_p1 = scmp.ge.s32.totalorder %s27_s18, 2  ;;  %p183_p2 = scmp.lt.s32.totalorder %s579_s17, 3 }
   0x5   : > { %s695_s18 = smov (%p29_p1, %s27_s18), 0  ;;  %p184_p3 = pnand %p492_p0, %p183_p2 }
   0x6   : > { %s493_s21 = sshll.u32 (!%p184_p3), %s571_s15, 3  ;;  %p231_p5 = scmp.lt.s32.totalorder (!%p184_p3), %s571_s15, 1 }
   0x7   : > { %187 = sbr.rel (%p184_p3) target bundleno = 182 (0xb6), region = 32  ;;  %p217_p4 = scmp.lt.s32.totalorder (!%p184_p3), %s493_s21, 15 }
   0xc   : > { %v524_v0 = vld [vmem:[%s688_s1] sm:$0xff]  ;;  %s697_s21 = smov (!%p217_p4, %s493_s21), 15  ;;  %vm276_vm0 = vcmask 130048   ;;  %vm326_vm1 = vcmask 519168   ;;  %vm335_vm2 = vcmask 523264   ;;  %s699_s15 = smov (!%p231_p5, %s571_s15), 1 }
   0xd   : > { %296 = vmatpush.bf16.msra.mxu0 %v524_v0  ;;  %529 = vmatpush.bf16.msra.mxu1 %v524_v0  ;;  %s494_s22 = sshll.u32 %s697_s21, 2  ;;  %v556_v5 = vld [vmem:[%s689_s2] ss:$0 sm:$0xff]  ;;  %s497_s5 = sshll.u32 %s699_s15, 1  ;;  %vm357_vm3 = vcmask 516096  }
   0xe   : > { %530 = vmatpush.bf16.msra.mxu2 %v524_v0  ;;  %531 = vmatpush.bf16.msra.mxu3 %v524_v0  ;;  %s223_s25 = scalar_lea.vmem %s687_s0, %s494_s22  ;;  %s639_s30 = scalar_lea.vmem %s690_s3, %s494_s22 }
   0xf   : > { %v525_v1 = vld [vmem:[%s223_s25] sm:$0xff]  ;;  %v526_v2 = vld [vmem:[%s223_s25 + $0x8] sm:$0xff]  ;;  %v527_v3 = vld [vmem:[%s223_s25 + $0x10] sm:$0xff]  ;;  %s234_s8 = scalar_lea.vmem %s691_s4, %s497_s5 }
  0x10   : > { %v528_v4 = vld [vmem:[%s223_s25 + $0x18] sm:$0xff]  ;;  %518 = vmatmul.msk.bf16.vlgmr.msra.gmra.mxu0 %vm276_vm0, %v525_v1  ;;  %519 = vmatmul.msk.bf16.vlgmr.msra.gmra.mxu1 %vm276_vm0, %v526_v2 }
  0x11   : > { %520 = vmatmul.msk.bf16.vlgmr.msra.gmra.mxu2 %vm276_vm0, %v527_v3  ;;  %521 = vmatmul.msk.bf16.vlgmr.msra.gmra.mxu3 %vm276_vm0, %v528_v4 }
  0x8d   : > { %v298_v6 = vpop.f32.mrf.mxu0  ;;  %v303_v7 = vpop.f32.mrf.mxu1 }
  0x8e   : > { %v299_v8 = vadd.f32 %v556_v5, %v298_v6  ;;  %v304_v9 = vadd.f32 %v556_v5, %v303_v7 }
  0x90   : > { %v318_v10 = vpack.c.bf16 %v299_v8, %v299_v8  ;;  %v320_v11 = vpack.c.bf16 %v304_v9, %v304_v9  ;;  %v359_v20 = vmul.f32 %v299_v8, %v299_v8  ;;  %v336_v23 = vsel %vm335_vm2, %v299_v8, 0.0 }
  0x91   : > { %v361_v24 = vmul.f32 %v304_v9, %v304_v9  ;;  %v339_v30 = vsel %vm335_vm2, %v304_v9, 0.0 }
  0x92   : > { %327 = vst.msk [vmem:[%s639_s30] sm:$0xf] %vm326_vm1, %v318_v10  ;;  %v367_v31 = vsel %vm335_vm2, %v359_v20, 0.0 }
  0x93   : > { %329 = vst.msk [vmem:[%s639_s30 + $0x8] sm:$0xf] %vm326_vm1, %v320_v11  ;;  %v370_v35 = vsel %vm335_vm2, %v361_v24, 0.0 }
  0x94   : > { %v308_v12 = vpop.f32.mrf.mxu2  ;;  %v313_v13 = vpop.f32.mrf.mxu3 }
  0x95   : > { %v309_v14 = vadd.f32 %v556_v5, %v308_v12  ;;  %v314_v15 = vadd.f32 %v556_v5, %v313_v13  ;;  %v300_v16 = vpop.f32.mrf.mxu0  ;;  %v305_v17 = vpop.f32.mrf.mxu1 }
  0x96   : > { %v301_v18 = vadd.f32 %v556_v5, %v300_v16  ;;  %v306_v19 = vadd.f32 %v556_v5, %v305_v17 }
  0x97   : > { %v322_v21 = vpack.c.bf16 %v309_v14, %v309_v14  ;;  %v324_v22 = vpack.c.bf16 %v314_v15, %v314_v15  ;;  %v363_v40 = vmul.f32 %v309_v14, %v309_v14  ;;  %v343_v44 = vsel %vm335_vm2, %v309_v14, 0.0 }
  0x98   : > { %v319_v25 = vpack.c.bf16 %v301_v18, %v301_v18  ;;  %v337_v26 = vsel %vm335_vm2, %v301_v18, 0.0  ;;  %v360_v28 = vmul.f32 %v301_v18, %v301_v18  ;;  %v321_v29 = vpack.c.bf16 %v306_v19, %v306_v19 }
  0x99   : > { %331 = vst.msk [vmem:[%s639_s30 + $0x10] sm:$0xf] %vm326_vm1, %v322_v21  ;;  %v338_v27 = vadd.f32 %v337_v26, %v336_v23  ;;  %v362_v34 = vmul.f32 %v306_v19, %v306_v19  ;;  %v341_v37 = vsel %vm335_vm2, %v306_v19, 0.0  ;;  %v374_v53 = vsel %vm335_vm2, %v363_v40, 0.0 }
  0x9a   : > { %333 = vst.msk [vmem:[%s639_s30 + $0x18] sm:$0xf] %vm326_vm1, %v324_v22  ;;  %v368_v32 = vsel %vm335_vm2, %v360_v28, 0.0  ;;  %v365_v54 = vmul.f32 %v314_v15, %v314_v15  ;;  %v347_v56 = vsel %vm335_vm2, %v314_v15, 0.0 }
  0x9b   : > { %328 = vst.msk [vmem:[%s639_s30 + $0x4] sm:$0xf] %vm326_vm1, %v319_v25  ;;  %v340_v33 = vadd.f32 %v339_v30, %v338_v27  ;;  %v369_v36 = vadd.f32 %v368_v32, %v367_v31  ;;  %v372_v46 = vsel %vm335_vm2, %v362_v34, 0.0 }
  0x9c   : > { %330 = vst.msk [vmem:[%s639_s30 + $0xc] sm:$0xf] %vm326_vm1, %v321_v29  ;;  %v310_v38 = vpop.f32.mrf.mxu2  ;;  %v315_v39 = vpop.f32.mrf.mxu3  ;;  %v378_v63 = vsel %vm335_vm2, %v365_v54, 0.0 }
  0x9d   : > { %v342_v41 = vadd.f32 %v341_v37, %v340_v33  ;;  %v311_v42 = vadd.f32 %v556_v5, %v310_v38  ;;  %v316_v43 = vadd.f32 %v556_v5, %v315_v39  ;;  %v371_v45 = vadd.f32 %v370_v35, %v369_v36 }
  0x9f   : > { %v323_v47 = vpack.c.bf16 %v311_v42, %v311_v42  ;;  %v344_v48 = vadd.f32 %v343_v44, %v342_v41  ;;  %v364_v49 = vmul.f32 %v311_v42, %v311_v42  ;;  %v373_v50 = vadd.f32 %v372_v46, %v371_v45 }
  0xa0   : > { %v345_v51 = vsel %vm335_vm2, %v311_v42, 0.0  ;;  %v325_v52 = vpack.c.bf16 %v316_v43, %v316_v43  ;;  %v366_v60 = vmul.f32 %v316_v43, %v316_v43  ;;  %v349_v62 = vsel %vm335_vm2, %v316_v43, 0.0 }
  0xa1   : > { %332 = vst.msk [vmem:[%s639_s30 + $0x14] sm:$0xf] %vm326_vm1, %v323_v47  ;;  %v346_v55 = vadd.f32 %v345_v51, %v344_v48  ;;  %v375_v57 = vadd.f32 %v374_v53, %v373_v50  ;;  %v376_v58 = vsel %vm335_vm2, %v364_v49, 0.0 }
  0xa2   : > { %334 = vst.msk [vmem:[%s639_s30 + $0x1c] sm:$0xf] %vm326_vm1, %v325_v52  ;;  %v380_v3 = vsel %vm335_vm2, %v366_v60, 0.0 }
  0xa3   : > { %v348_v59 = vadd.f32 %v347_v56, %v346_v55  ;;  %v377_v61 = vadd.f32 %v376_v58, %v375_v57 }
  0xa5   : > { %v350_v0 = vadd.f32 %v349_v62, %v348_v59  ;;  %v379_v1 = vadd.f32 %v378_v63, %v377_v61 }
  0xa7   : > { %v351_v2 = vrot.slane %v350_v0, 4  ;;  %v381_v4 = vadd.f32 %v380_v3, %v379_v1 }
  0xa9   : > { %v352_v5 = vadd.f32 %v351_v2, %v350_v0  ;;  %v382_v6 = vrot.slane %v381_v4, 4 }
  0xab   : > { %v353_v7 = vrot.slane %v352_v5, 2  ;;  %v383_v8 = vadd.f32 %v382_v6, %v381_v4 }
  0xad   : > { %v354_v9 = vadd.f32 %v353_v7, %v352_v5  ;;  %v384_v10 = vrot.slane %v383_v8, 2 }
  0xaf   : > { %v355_v11 = vrot.slane %v354_v9, 1  ;;  %v385_v12 = vadd.f32 %v384_v10, %v383_v8 }
  0xb1   : > { %v356_v13 = vadd.f32 %v355_v11, %v354_v9  ;;  %v386_v14 = vrot.slane %v385_v12, 1 }
  0xb3   : > { %358 = vst.msk [vmem:[%s234_s8] sm:$0x1] %vm357_vm3, %v356_v13  ;;  %v387_v15 = vadd.f32 %v386_v14, %v385_v12 }
  0xb5   : > { %388 = vst.msk [vmem:[%s234_s8 + $0x1] sm:$0x1] %vm357_vm3, %v387_v15 }
  0xb6 PF: > { %s15_s17 = sadd.s32 1, %s579_s17   ;;  %s692_s15 = smov %s575_s16 }
  0xb7   : > { %p12_p6 = scmp.ge.s32.totalorder %s15_s17, 4   ;;  %s693_s16 = smov %s695_s18 }
  0xb9   :  { %14 = sbr.rel (!%p12_p6) target bundleno = 2 (0x2), region = 74 }

// kernel: net_forward.43
= control target key start
LH: loop header
LB: loop body
LE: loop exit
PB: predicated region body
PF: predicated region fallthrough
CT: control target
= control target key end

     0   :  { %s1764_s15 = smov 0   ;;  %s1766_s16 = smov 0   ;;  %s2157_s0 = inlined_call_operand.vmem [shape: bf16[128,864], index: 0, kind: input, shape index: {}]   ;;  %s2158_s1 = inlined_call_operand.vmem [shape: bf16[864,16], index: 1, kind: input, shape index: {}]   ;;  %s2159_s2 = inlined_call_operand.vmem [shape: f32[1,16], index: 2, kind: input, shape index: {}]   ;;  %s2160_s3 = inlined_call_operand.vmem [shape: bf16[128,16], index: 3, kind: output, shape index: {0}]   ;;  %s2161_s4 = inlined_call_operand.vmem [shape: f32[2,2,16], index: 4, kind: output, shape index: {1}]  }
   0x1   :  { %s1768_s17 = smov 0  }
   0x2 LB: > { %s27_s18 = sadd.s32 1, %s1733_s16  ;;  %p1245_p0 = scmp.ge.s32.totalorder %s1737_s17, 1  ;;  %s1737_s17 = sphi %s1768_s17, %s15_s17   ;;  %s1733_s16 = sphi %s1766_s16, %s2163_s16   ;;  %s1729_s15 = sphi %s1764_s15, %s2162_s15  }
   0x3   : > { %p29_p1 = scmp.ge.s32.totalorder %s27_s18, 2  ;;  %p186_p2 = scmp.lt.s32.totalorder %s1737_s17, 3 }
   0x5   : > { %s2165_s18 = smov (%p29_p1, %s27_s18), 0  ;;  %p187_p3 = pnand %p1245_p0, %p186_p2 }
   0x6   : > { %s1246_s11 = sshll.u32 (!%p187_p3), %s1729_s15, 3  ;;  %p239_p5 = scmp.lt.s32.totalorder (!%p187_p3), %s1729_s15, 1 }
   0x7   : > { %190 = sbr.rel (%p187_p3) target bundleno = 308 (0x134), region = 32  ;;  %p223_p4 = scmp.lt.s32.totalorder (!%p187_p3), %s1246_s11, 15 }
   0xc   : > { %v1592_v0 = vld [vmem:[%s2158_s1 + $0x38] sm:$0xff]  ;;  %v1591_v3 = vld [vmem:[%s2158_s1 + $0x30] sm:$0xff]  ;;  %v1590_v6 = vld [vmem:[%s2158_s1 + $0x28] sm:$0xff]  ;;  %s2167_s11 = smov (!%p223_p4, %s1246_s11), 15  ;;  %vm852_vm0 = vcmask 785408   ;;  %vm1076_vm1 = vcmask 125952  }
   0xd   : > { %v1600_v1 = vld [vmem:[%s2158_s1 + $0x78] sm:$0xff]  ;;  %865 = vmatpush.bf16.msra.mxu0 %v1592_v0  ;;  %1667 = vmatpush.bf16.msra.mxu3 %v1592_v0  ;;  %v1599_v4 = vld [vmem:[%s2158_s1 + $0x70] sm:$0xff]  ;;  %v1598_v7 = vld [vmem:[%s2158_s1 + $0x68] sm:$0xff]  ;;  %s1689_s30 = smul.u32 28, %s2167_s11  ;;  %vm1085_vm2 = vcmask 130048   ;;  %s2169_s15 = smov (!%p239_p5, %s1729_s15), 1 }
   0xe   : > { %v1608_v2 = vld [vmem:[%s2158_s1 + $0xb8] sm:$0xff]  ;;  %894 = vmatpush.bf16.msra.mxu1 %v1600_v1  ;;  %v1607_v5 = vld [vmem:[%s2158_s1 + $0xb0] sm:$0xff]  ;;  %v1606_v8 = vld [vmem:[%s2158_s1 + $0xa8] sm:$0xff]  ;;  %vm1107_vm3 = vcmask 122880  }
   0xf   : > { %923 = vmatpush.bf16.msra.mxu2 %v1608_v2  ;;  %v1589_v9 = vld [vmem:[%s2158_s1 + $0x20] sm:$0xff]  ;;  %v1588_v12 = vld [vmem:[%s2158_s1 + $0x18] sm:$0xff]  ;;  %v1587_v15 = vld [vmem:[%s2158_s1 + $0x10] sm:$0xff]  ;;  %s1848_s14 = scalar_lea.vmem %s2157_s0, %s1689_s30 }
  0x10   : > { %v1597_v10 = vld [vmem:[%s2158_s1 + $0x60] sm:$0xff]  ;;  %v1596_v13 = vld [vmem:[%s2158_s1 + $0x58] sm:$0xff]  ;;  %v1595_v16 = vld [vmem:[%s2158_s1 + $0x50] sm:$0xff] }
  0x11   : > { %866 = vmatpush.bf16.msra.mxu0 %v1591_v3  ;;  %1668 = vmatpush.bf16.msra.mxu3 %v1591_v3  ;;  %v1605_v11 = vld [vmem:[%s2158_s1 + $0xa0] sm:$0xff]  ;;  %v1604_v14 = vld [vmem:[%s2158_s1 + $0x98] sm:$0xff]  ;;  %v1603_v17 = vld [vmem:[%s2158_s1 + $0x90] sm:$0xff] }
  0x12   : > { %895 = vmatpush.bf16.msra.mxu1 %v1599_v4  ;;  %v1586_v18 = vld [vmem:[%s2158_s1 + $0x8] sm:$0xff]  ;;  %v1585_v21 = vld [vmem:[%s2158_s1] sm:$0xff]  ;;  %v1642_v25 = vld [vmem:[%s1848_s14 + $0x18] sm:$0xf0] }
  0x13   : > { %924 = vmatpush.bf16.msra.mxu2 %v1607_v5  ;;  %v1594_v19 = vld [vmem:[%s2158_s1 + $0x48] sm:$0xff]  ;;  %v1593_v22 = vld [vmem:[%s2158_s1 + $0x40] sm:$0xff]  ;;  %v1309_v26 = vld [vmem:[%s1848_s14 + $0x70] sm:$0xf] }
  0x14   : > { %v1602_v20 = vld [vmem:[%s2158_s1 + $0x88] sm:$0xff]  ;;  %v1601_v23 = vld [vmem:[%s2158_s1 + $0x80] sm:$0xff]  ;;  %v1624_v32 = vld [vmem:[%s2158_s1 + $0x138] sm:$0xff] }
  0x15   : > { %867 = vmatpush.bf16.msra.mxu0 %v1590_v6  ;;  %1669 = vmatpush.bf16.msra.mxu3 %v1590_v6  ;;  %v1253_v24 = vld [vmem:[%s1848_s14] sm:$0xf]  ;;  %v1656_v27 = vld [vmem:[%s1848_s14 + $0x88] sm:$0xf0]  ;;  %v1639_v28 = vld [vmem:[%s1848_s14 + $0x4] sm:$0xf] }
  0x16   : > { %896 = vmatpush.bf16.msra.mxu1 %v1598_v7  ;;  %v1255_v29 = vld [vmem:[%s1848_s14 + $0x1c] sm:$0xf0]  ;;  %v1261_v30 = vld [vmem:[%s1848_s14 + $0x8] sm:$0xf]  ;;  %v1643_v31 = vld [vmem:[%s1848_s14 + $0x20] sm:$0xf0]  ;;  %v1254_v34 = vor.u32 %v1642_v25, %v1253_v24  ;;  %v1310_v35 = vor.u32 %v1656_v27, %v1309_v26 }
  0x17   : > { %925 = vmatpush.bf16.msra.mxu2 %v1606_v8  ;;  %v1616_v33 = vld [vmem:[%s2158_s1 + $0xf8] sm:$0xff]  ;;  %v1258_v36 = vor.u32 %v1639_v28, %v1255_v29  ;;  %v1262_v37 = vor.u32 %v1643_v31, %v1261_v30  ;;  %v1882_v38 = vld [vmem:[%s2158_s1 + $0x1a8] sm:$0xff]  ;;  %v1623_v40 = vld [vmem:[%s2158_s1 + $0x130] sm:$0xff] }
  0x18   : > { %v1887_v39 = vld [vmem:[%s2158_s1 + $0x178] sm:$0xff]  ;;  %v1615_v41 = vld [vmem:[%s2158_s1 + $0xf0] sm:$0xff]  ;;  %v1900_v42 = vld [vmem:[%s2158_s1 + $0x1a0] sm:$0xff] }
  0x19   : > { %868 = vmatpush.bf16.msra.mxu0 %v1589_v9  ;;  %1670 = vmatpush.bf16.msra.mxu3 %v1589_v9  ;;  %v1905_v43 = vld [vmem:[%s2158_s1 + $0x170] sm:$0xff]  ;;  %v1622_v44 = vld [vmem:[%s2158_s1 + $0x128] sm:$0xff]  ;;  %v1918_v46 = vld [vmem:[%s2158_s1 + $0x198] sm:$0xff] }
  0x1a   : > { %897 = vmatpush.bf16.msra.mxu1 %v1597_v10  ;;  %v1614_v45 = vld [vmem:[%s2158_s1 + $0xe8] sm:$0xff]  ;;  %v1621_v48 = vld [vmem:[%s2158_s1 + $0x120] sm:$0xff]  ;;  %v1281_v50 = vld [vmem:[%s1848_s14 + $0x38] sm:$0xf] }
  0x1b   : > { %926 = vmatpush.bf16.msra.mxu2 %v1605_v11  ;;  %v1923_v47 = vld [vmem:[%s2158_s1 + $0x168] sm:$0xff]  ;;  %v1613_v49 = vld [vmem:[%s2158_s1 + $0xe0] sm:$0xff]  ;;  %v1649_v51 = vld [vmem:[%s1848_s14 + $0x50] sm:$0xf0] }
  0x1c   : > { %v1337_v52 = vld [vmem:[%s1848_s14 + $0xa8] sm:$0xf]  ;;  %v1663_v53 = vld [vmem:[%s1848_s14 + $0xc0] sm:$0xf0]  ;;  %v1646_v54 = vld [vmem:[%s1848_s14 + $0x3c] sm:$0xf]  ;;  %v1282_v62 = vor.u32 %v1649_v51, %v1281_v50 }
  0x1d   : > { %869 = vmatpush.bf16.msra.mxu0 %v1588_v12  ;;  %1671 = vmatpush.bf16.msra.mxu3 %v1588_v12  ;;  %v1283_v55 = vld [vmem:[%s1848_s14 + $0x54] sm:$0xf0]  ;;  %v1289_v56 = vld [vmem:[%s1848_s14 + $0x40] sm:$0xf]  ;;  %v1650_v57 = vld [vmem:[%s1848_s14 + $0x58] sm:$0xf0]  ;;  %v1338_v63 = vor.u32 %v1663_v53, %v1337_v52 }
  0x1e   : > { %898 = vmatpush.bf16.msra.mxu1 %v1596_v13  ;;  %v1944_v58 = vld [vmem:[%s2158_s1 + $0x160] sm:$0xff]  ;;  %v1949_v59 = vld [vmem:[%s2158_s1 + $0x190] sm:$0xff]  ;;  %v1620_v60 = vld [vmem:[%s2158_s1 + $0x118] sm:$0xff]  ;;  %v1286_v0 = vor.u32 %v1646_v54, %v1283_v55  ;;  %v1290_v1 = vor.u32 %v1650_v57, %v1289_v56 }
  0x1f   : > { %927 = vmatpush.bf16.msra.mxu2 %v1604_v14  ;;  %v1612_v61 = vld [vmem:[%s2158_s1 + $0xd8] sm:$0xff]  ;;  %v1967_v3 = vld [vmem:[%s2158_s1 + $0x188] sm:$0xff]  ;;  %v1619_v4 = vld [vmem:[%s2158_s1 + $0x110] sm:$0xff] }
  0x20   : > { %v1962_v2 = vld [vmem:[%s2158_s1 + $0x158] sm:$0xff]  ;;  %v1611_v5 = vld [vmem:[%s2158_s1 + $0xd0] sm:$0xff]  ;;  %v1633_v7 = vld [vmem:[%s2158_s1 + $0x180] sm:$0xff] }
  0x21   : > { %870 = vmatpush.bf16.msra.mxu0 %v1587_v15  ;;  %1672 = vmatpush.bf16.msra.mxu3 %v1587_v15  ;;  %v1627_v6 = vld [vmem:[%s2158_s1 + $0x150] sm:$0xff]  ;;  %v1618_v8 = vld [vmem:[%s2158_s1 + $0x108] sm:$0xff]  ;;  %v1617_v11 = vld [vmem:[%s2158_s1 + $0x100] sm:$0xff] }
  0x22   : > { %899 = vmatpush.bf16.msra.mxu1 %v1595_v16  ;;  %v1610_v9 = vld [vmem:[%s2158_s1 + $0xc8] sm:$0xff]  ;;  %v1609_v12 = vld [vmem:[%s2158_s1 + $0xc0] sm:$0xff]  ;;  %v1653_v13 = vld [vmem:[%s1848_s14 + $0x74] sm:$0xf] }
  0x23   : > { %928 = vmatpush.bf16.msra.mxu2 %v1603_v17  ;;  %v1626_v10 = vld [vmem:[%s2158_s1 + $0x148] sm:$0xff]  ;;  %v1311_v14 = vld [vmem:[%s1848_s14 + $0x8c] sm:$0xf0]  ;;  %v1647_v27 = vld [vmem:[%s1848_s14 + $0x44] sm:$0xf] }
  0x24   : > { %v1640_v15 = vld [vmem:[%s1848_s14 + $0xc] sm:$0xf]  ;;  %v1263_v16 = vld [vmem:[%s1848_s14 + $0x24] sm:$0xf0]  ;;  %v1269_v17 = vld [vmem:[%s1848_s14 + $0x10] sm:$0xf]  ;;  %v1314_v24 = vor.u32 %v1653_v13, %v1311_v14 }
  0x25   : > { %871 = vmatpush.bf16.msra.mxu0 %v1586_v18  ;;  %1673 = vmatpush.bf16.msra.mxu3 %v1586_v18  ;;  %v1644_v18 = vld [vmem:[%s1848_s14 + $0x28] sm:$0xf0]  ;;  %v1291_v28 = vld [vmem:[%s1848_s14 + $0x5c] sm:$0xf0]  ;;  %v1297_v29 = vld [vmem:[%s1848_s14 + $0x48] sm:$0xf] }
  0x26   : > { %900 = vmatpush.bf16.msra.mxu1 %v1594_v19  ;;  %v1317_v19 = vld [vmem:[%s1848_s14 + $0x78] sm:$0xf]  ;;  %v1660_v26 = vld [vmem:[%s1848_s14 + $0xac] sm:$0xf]  ;;  %v1651_v30 = vld [vmem:[%s1848_s14 + $0x60] sm:$0xf0] }
  0x27   : > { %929 = vmatpush.bf16.msra.mxu2 %v1602_v20  ;;  %v1657_v20 = vld [vmem:[%s1848_s14 + $0x90] sm:$0xf0]  ;;  %v1339_v31 = vld [vmem:[%s1848_s14 + $0xc4] sm:$0xf0]  ;;  %v1347_v51 = vld [vmem:[%s1848_s14 + $0xcc] sm:$0xf0] }
  0x28   : > { %v1318_v25 = vor.u32 %v1657_v20, %v1317_v19  ;;  %v1661_v50 = vld [vmem:[%s1848_s14 + $0xb4] sm:$0xf]  ;;  %v1353_v52 = vld [vmem:[%s1848_s14 + $0xb8] sm:$0xf]  ;;  %v1655_v54 = vld [vmem:[%s1848_s14 + $0x84] sm:$0xf] }
  0x29   : > { %872 = vmatpush.bf16.msra.mxu0 %v1585_v21  ;;  %1674 = vmatpush.bf16.msra.mxu3 %v1585_v21  ;;  %v1625_v21 = vld [vmem:[%s2158_s1 + $0x140] sm:$0xff]  ;;  %v1665_v53 = vld [vmem:[%s1848_s14 + $0xd0] sm:$0xf0]  ;;  %v1305_v56 = vld [vmem:[%s1848_s14 + $0x50] sm:$0xf] }
  0x2a   : > { %901 = vmatpush.bf16.msra.mxu1 %v1593_v22  ;;  %v1266_v22 = vor.u32 %v1640_v15, %v1263_v16  ;;  %v1327_v55 = vld [vmem:[%s1848_s14 + $0x9c] sm:$0xf0]  ;;  %v1652_v57 = vld [vmem:[%s1848_s14 + $0x68] sm:$0xf0] }
  0x2b   : > { %930 = vmatpush.bf16.msra.mxu2 %v1601_v23  ;;  %v1270_v23 = vor.u32 %v1644_v18, %v1269_v17 }
  0x2c   : > { %873 = vmatmul.bf16.vlgmr.msra.gmra.mxu0 %v1254_v34  ;;  %883 = vmatmul.bf16.vlgmr.msra.gmra.mxu3 %v1310_v35  ;;  %v1294_v34 = vor.u32 %v1647_v27, %v1291_v28  ;;  %v1298_v35 = vor.u32 %v1651_v30, %v1297_v29 }
  0x2d   : > { %981 = vmatpush.bf16.msrb.mxu0 %v1624_v32  ;;  %952 = vmatpush.bf16.msrb.mxu3 %v1616_v33  ;;  %v1345_v32 = vld [vmem:[%s1848_s14 + $0xb0] sm:$0xf]  ;;  %v1664_v33 = vld [vmem:[%s1848_s14 + $0xc8] sm:$0xf0] }
  0x2e   : > { %902 = vmatmul.bf16.vlgmr.msra.gmra.mxu1 %v1258_v36  ;;  %931 = vmatmul.bf16.vlgmr.msra.gmra.mxu2 %v1262_v37  ;;  %v1342_v36 = vor.u32 %v1660_v26, %v1339_v31  ;;  %v1346_v37 = vor.u32 %v1664_v33, %v1345_v32 }
  0x2f   : > { %1041 = vmatpush.bf16.msrb.mxu2 %v1882_v38  ;;  %1675 = vmatpush.bf16.msrb.mxu1 %v1887_v39 }
  0x31   : > { %982 = vmatpush.bf16.msrb.mxu0 %v1623_v40  ;;  %953 = vmatpush.bf16.msrb.mxu3 %v1615_v41  ;;  %v1325_v40 = vld [vmem:[%s1848_s14 + $0x80] sm:$0xf]  ;;  %v1658_v41 = vld [vmem:[%s1848_s14 + $0x98] sm:$0xf0] }
  0x33   : > { %1042 = vmatpush.bf16.msrb.mxu2 %v1900_v42  ;;  %1676 = vmatpush.bf16.msrb.mxu1 %v1905_v43 }
  0x35   : > { %983 = vmatpush.bf16.msrb.mxu0 %v1622_v44  ;;  %954 = vmatpush.bf16.msrb.mxu3 %v1614_v45  ;;  %v1277_v44 = vld [vmem:[%s1848_s14 + $0x18] sm:$0xf]  ;;  %v1645_v45 = vld [vmem:[%s1848_s14 + $0x30] sm:$0xf0] }
  0x37   : > { %1043 = vmatpush.bf16.msrb.mxu2 %v1918_v46  ;;  %1677 = vmatpush.bf16.msrb.mxu1 %v1923_v47 }
  0x39   : > { %984 = vmatpush.bf16.msrb.mxu0 %v1621_v48  ;;  %955 = vmatpush.bf16.msrb.mxu3 %v1613_v49  ;;  %v1278_v49 = vor.u32 %v1645_v45, %v1277_v44 }
  0x3b   : > { %1678 = vmatpush.bf16.msrb.mxu1 %v1944_v58  ;;  %1044 = vmatpush.bf16.msrb.mxu2 %v1949_v59 }
  0x3c   : > { %878 = vmatmul.bf16.gmra.mxu0 %v1282_v62  ;;  %888 = vmatmul.bf16.gmra.mxu3 %v1338_v63  ;;  %v1641_v62 = vld [vmem:[%s1848_s14 + $0x14] sm:$0xf]  ;;  %v1271_v63 = vld [vmem:[%s1848_s14 + $0x2c] sm:$0xf0] }
  0x3d   : > { %985 = vmatpush.bf16.msrb.mxu0 %v1620_v60  ;;  %956 = vmatpush.bf16.msrb.mxu3 %v1612_v61  ;;  %v1330_v60 = vor.u32 %v1655_v54, %v1327_v55  ;;  %v1306_v61 = vor.u32 %v1652_v57, %v1305_v56 }
  0x3e   : > { %907 = vmatmul.bf16.gmra.mxu1 %v1286_v0  ;;  %936 = vmatmul.bf16.gmra.mxu2 %v1290_v1  ;;  %v1662_v0 = vld [vmem:[%s1848_s14 + $0xbc] sm:$0xf]  ;;  %v1361_v1 = vld [vmem:[%s1848_s14 + $0xc0] sm:$0xf] }
  0x3f   : > { %1679 = vmatpush.bf16.msrb.mxu1 %v1962_v2  ;;  %1045 = vmatpush.bf16.msrb.mxu2 %v1967_v3 }
  0x41   : > { %986 = vmatpush.bf16.msrb.mxu0 %v1619_v4  ;;  %957 = vmatpush.bf16.msrb.mxu3 %v1611_v5  ;;  %v1333_v4 = vld [vmem:[%s1848_s14 + $0x88] sm:$0xf]  ;;  %v1659_v5 = vld [vmem:[%s1848_s14 + $0xa0] sm:$0xf0] }
  0x43   : > { %1680 = vmatpush.bf16.msrb.mxu1 %v1627_v6  ;;  %1046 = vmatpush.bf16.msrb.mxu2 %v1633_v7 }
  0x45   : > { %987 = vmatpush.bf16.msrb.mxu0 %v1618_v8  ;;  %958 = vmatpush.bf16.msrb.mxu3 %v1610_v9  ;;  %v1334_v9 = vor.u32 %v1659_v5, %v1333_v4 }
  0x47   : > { %1681 = vmatpush.bf16.msrb.mxu1 %v1626_v10 }
  0x49   : > { %988 = vmatpush.bf16.msrb.mxu0 %v1617_v11  ;;  %959 = vmatpush.bf16.msrb.mxu3 %v1609_v12 }
  0x4b   : > { %1682 = vmatpush.bf16.msrb.mxu1 %v1625_v21 }
  0x4c   : > { %960 = vmatmul.bf16.vlgmr.msrb.gmra.mxu3 %v1266_v22  ;;  %989 = vmatmul.bf16.vlgmr.msrb.gmra.mxu0 %v1270_v23 }
  0x4d   : > { %1010 = vmatpush.bf16.msra.mxu0 %v1887_v39  ;;  %1683 = vmatpush.bf16.msra.mxu3 %v1882_v38  ;;  %v1654_v38 = vld [vmem:[%s1848_s14 + $0x7c] sm:$0xf]  ;;  %v1319_v39 = vld [vmem:[%s1848_s14 + $0x94] sm:$0xf0] }
  0x4e   : > { %912 = vmatmul.bf16.gmra.mxu1 %v1314_v24  ;;  %941 = vmatmul.bf16.gmra.mxu2 %v1318_v25 }
  0x51   : > { %1011 = vmatpush.bf16.msra.mxu0 %v1905_v43  ;;  %1684 = vmatpush.bf16.msra.mxu3 %v1900_v42  ;;  %v1648_v42 = vld [vmem:[%s1848_s14 + $0x4c] sm:$0xf]  ;;  %v1299_v43 = vld [vmem:[%s1848_s14 + $0x64] sm:$0xf0] }
  0x52   : > { %v1302_v48 = vor.u32 %v1648_v42, %v1299_v43 }
  0x55   : > { %1012 = vmatpush.bf16.msra.mxu0 %v1923_v47  ;;  %1685 = vmatpush.bf16.msra.mxu3 %v1918_v46  ;;  %v1322_v46 = vor.u32 %v1654_v38, %v1319_v39  ;;  %v1326_v47 = vor.u32 %v1658_v41, %v1325_v40 }
  0x59   : > { %1013 = vmatpush.bf16.msra.mxu0 %v1944_v58  ;;  %1686 = vmatpush.bf16.msra.mxu3 %v1949_v59  ;;  %v1350_v58 = vor.u32 %v1661_v50, %v1347_v51  ;;  %v1354_v59 = vor.u32 %v1665_v53, %v1353_v52 }
  0x5c   : > { %965 = vmatmul.bf16.gmra.mxu3 %v1294_v34  ;;  %994 = vmatmul.bf16.gmra.mxu0 %v1298_v35 }
  0x5d   : > { %1014 = vmatpush.bf16.msra.mxu0 %v1962_v2  ;;  %1687 = vmatpush.bf16.msra.mxu3 %v1967_v3  ;;  %v1666_v2 = vld [vmem:[%s1848_s14 + $0xd8] sm:$0xf0]  ;;  %v1355_v3 = vld [vmem:[%s1848_s14 + $0xd4] sm:$0xf0]  ;;  %s1249_s14 = sshll.u32 %s2167_s11, 2  ;;  %s1250_s11 = sshll.u32 %s2169_s15, 1 }
  0x5e   : > { %917 = vmatmul.bf16.gmra.mxu1 %v1342_v36  ;;  %946 = vmatmul.bf16.gmra.mxu2 %v1346_v37  ;;  %v1358_v8 = vor.u32 %v1662_v0, %v1355_v3  ;;  %s2091_s7 = scalar_lea.vmem %s2160_s3, %s1249_s14  ;;  %s242_s10 = scalar_lea.vmem %s2161_s4, %s1250_s11 }
  0x61   : > { %1015 = vmatpush.bf16.msra.mxu0 %v1627_v6  ;;  %1688 = vmatpush.bf16.msra.mxu3 %v1633_v7  ;;  %v1274_v6 = vor.u32 %v1641_v62, %v1271_v63  ;;  %v1362_v7 = vor.u32 %v1666_v2, %v1361_v1 }
  0x65   : > { %1016 = vmatpush.bf16.msra.mxu0 %v1626_v10  ;;  %v2058_v10 = vld [vmem:[%s2159_s2] ss:$0 sm:$0xff] }
  0x69   : > { %1017 = vmatpush.bf16.msra.mxu0 %v1625_v21 }
  0x6c   : > { %970 = vmatmul.bf16.gmra.mxu3 %v1322_v46  ;;  %999 = vmatmul.bf16.gmra.mxu0 %v1326_v47 }
  0x6e   : > { %1023 = vmatmul.bf16.vlgmr.msrb.gmra.mxu1 %v1302_v48  ;;  %1579 = vmatmul.msk.bf16.vlgmr.msrb.gmra.mxu2 %vm852_vm0, %v1278_v49 }
  0x7c   : > { %975 = vmatmul.bf16.gmra.mxu3 %v1350_v58  ;;  %1004 = vmatmul.bf16.gmra.mxu0 %v1354_v59 }
  0x7e   : > { %1028 = vmatmul.bf16.gmra.mxu1 %v1330_v60  ;;  %1580 = vmatmul.msk.bf16.gmra.mxu2 %vm852_vm0, %v1306_v61 }
  0x8c   : > { %1018 = vmatmul.bf16.vlgmr.msra.gmra.mxu0 %v1274_v6  ;;  %1582 = vmatmul.msk.bf16.vlgmr.msra.gmra.mxu3 %vm852_vm0, %v1362_v7 }
  0x8e   : > { %1033 = vmatmul.bf16.gmra.mxu1 %v1358_v8  ;;  %1581 = vmatmul.msk.bf16.gmra.mxu2 %vm852_vm0, %v1334_v9 }
  0xa9   : > { %v874_v11 = vpop.f32.mrf.mxu0 }
  0xaa   : > { %v875_v12 = vadd.f32 %v2058_v10, %v874_v11 }
  0xab   : > { %v903_v13 = vpop.f32.mrf.mxu1 }
  0xac   : > { %v904_v14 = vadd.f32 %v903_v13, %v875_v12 }
  0xaf   : > { %v2061_v15 = vpop.f32.mrf.mxu3 }
  0xb0   : > { %v885_v12 = vadd.f32 %v2058_v10, %v2061_v15 }
  0xb1   : > { %v932_v16 = vpop.f32.mrf.mxu2  ;;  %v876_v18 = vpop.f32.mrf.mxu0 }
  0xb2   : > { %v2063_v17 = vadd.f32 %v932_v16, %v904_v14  ;;  %v877_v19 = vadd.f32 %v2058_v10, %v876_v18 }
  0xb3   : > { %v905_v20 = vpop.f32.mrf.mxu1 }
  0xb4   : > { %v906_v21 = vadd.f32 %v905_v20, %v877_v19 }
  0xb7   : > { %v2066_v22 = vpop.f32.mrf.mxu3 }
  0xb9   : > { %v934_v23 = vpop.f32.mrf.mxu2  ;;  %v879_v25 = vpop.f32.mrf.mxu0 }
  0xba   : > { %v2068_v24 = vadd.f32 %v934_v23, %v906_v21  ;;  %v880_v53 = vadd.f32 %v2058_v10, %v879_v25 }
  0xbb   : > { %v908_v26 = vpop.f32.mrf.mxu1 }
  0xbc   : > { %v909_v56 = vadd.f32 %v908_v26, %v880_v53 }
  0xbf   : > { %v889_v27 = vpop.f32.mrf.mxu3 }
  0xc0   : > { %v890_v9 = vadd.f32 %v2058_v10, %v889_v27 }
  0xc1   : > { %v937_v28 = vpop.f32.mrf.mxu2  ;;  %v881_v29 = vpop.f32.mrf.mxu0 }
  0xc2   : > { %v938_v57 = vadd.f32 %v937_v28, %v909_v56  ;;  %v882_v60 = vadd.f32 %v2058_v10, %v881_v29 }
  0xc3   : > { %v910_v30 = vpop.f32.mrf.mxu1 }
  0xc4   : > { %v911_v0 = vadd.f32 %v910_v30, %v882_v60 }
  0xc7   : > { %v2070_v31 = vpop.f32.mrf.mxu3 }
  0xc9   : > { %v939_v32 = vpop.f32.mrf.mxu2  ;;  %v990_v33 = vpop.f32.mrf.mxu0 }
  0xca   : > { %v940_v2 = vadd.f32 %v939_v32, %v911_v0  ;;  %v892_v32 = vadd.f32 %v2058_v10, %v2070_v31 }
  0xcb   : > { %v913_v34 = vpop.f32.mrf.mxu1 }
  0xcc   : > { %v914_v18 = vadd.f32 %v913_v34, %v885_v12  ;;  %v887_v34 = vadd.f32 %v2058_v10, %v2066_v22 }
  0xcf   : > { %v961_v35 = vpop.f32.mrf.mxu3 }
  0xd0   : > { %v962_v14 = vadd.f32 %v961_v35, %v2063_v17 }
  0xd1   : > { %v942_v36 = vpop.f32.mrf.mxu2  ;;  %v2072_v37 = vpop.f32.mrf.mxu0 }
  0xd2   : > { %v943_v21 = vadd.f32 %v942_v36, %v914_v18  ;;  %v991_v28 = vadd.f32 %v990_v33, %v962_v14 }
  0xd3   : > { %v2074_v38 = vpop.f32.mrf.mxu1 }
  0xd4   : > { %v916_v33 = vadd.f32 %v2074_v38, %v887_v34 }
  0xd7   : > { %v963_v39 = vpop.f32.mrf.mxu3 }
  0xd8   : > { %v964_v36 = vadd.f32 %v963_v39, %v2068_v24 }
  0xd9   : > { %v2076_v40 = vpop.f32.mrf.mxu2  ;;  %v995_v41 = vpop.f32.mrf.mxu0 }
  0xdb   : > { %v918_v42 = vpop.f32.mrf.mxu1 }
  0xdc   : > { %v919_v16 = vadd.f32 %v918_v42, %v890_v9 }
  0xdf   : > { %v966_v43 = vpop.f32.mrf.mxu3 }
  0xe0   : > { %v967_v61 = vadd.f32 %v966_v43, %v938_v57 }
  0xe1   : > { %v947_v44 = vpop.f32.mrf.mxu2  ;;  %v997_v45 = vpop.f32.mrf.mxu0 }
  0xe2   : > { %v996_v1 = vadd.f32 %v995_v41, %v967_v61  ;;  %v948_v20 = vadd.f32 %v947_v44, %v919_v16 }
  0xe3   : > { %v920_v46 = vpop.f32.mrf.mxu1 }
  0xe4   : > { %v921_v42 = vadd.f32 %v920_v46, %v892_v32  ;;  %v993_v46 = vadd.f32 %v2072_v37, %v964_v36 }
  0xe7   : > { %v968_v47 = vpop.f32.mrf.mxu3 }
  0xe8   : > { %v969_v6 = vadd.f32 %v968_v47, %v940_v2 }
  0xe9   : > { %v949_v48 = vpop.f32.mrf.mxu2  ;;  %v1000_v49 = vpop.f32.mrf.mxu0 }
  0xea   : > { %v998_v19 = vadd.f32 %v997_v45, %v969_v6  ;;  %v950_v47 = vadd.f32 %v949_v48, %v921_v42 }
  0xeb   : > { %v1024_v50 = vpop.f32.mrf.mxu1 }
  0xec   : > { %v1025_v3 = vadd.f32 %v1024_v50, %v996_v1 }
  0xef   : > { %v971_v51 = vpop.f32.mrf.mxu3 }
  0xf0   : > { %v972_v29 = vadd.f32 %v971_v51, %v943_v21  ;;  %v945_v51 = vadd.f32 %v2076_v40, %v916_v33 }
  0xf1   : > { %v1048_v52 = vpop.f32.mrf.mxu2  ;;  %v2079_v54 = vpop.f32.mrf.mxu0 }
  0xf2   : > { %v1001_v45 = vadd.f32 %v1000_v49, %v972_v29 }
  0xf3   : > { %v1026_v55 = vpop.f32.mrf.mxu1 }
  0xf4   : > { %v1027_v23 = vadd.f32 %v1026_v55, %v998_v19 }
  0xf7   : > { %v973_v58 = vpop.f32.mrf.mxu3 }
  0xf8   : > { %v974_v38 = vadd.f32 %v973_v58, %v945_v51 }
  0xf9   : > { %v2081_v59 = vpop.f32.mrf.mxu2  ;;  %v1005_v62 = vpop.f32.mrf.mxu0 }
  0xfa   : > { %v1003_v37 = vadd.f32 %v2079_v54, %v974_v38 }
  0xfb   : > { %v1029_v63 = vpop.f32.mrf.mxu1 }
  0xfc   : > { %v1030_v53 = vadd.f32 %v1029_v63, %v1001_v45 }
  0xff   : > { %v976_v4 = vpop.f32.mrf.mxu3 }
 0x100   : > { %v977_v26 = vadd.f32 %v976_v4, %v948_v20 }
 0x101   : > { %v1053_v5 = vpop.f32.mrf.mxu2  ;;  %v1007_v8 = vpop.f32.mrf.mxu0 }
 0x102   : > { %v2085_v7 = vadd.f32 %v1053_v5, %v1025_v3  ;;  %v1006_v44 = vadd.f32 %v1005_v62, %v977_v26 }
 0x103   : > { %v1031_v11 = vpop.f32.mrf.mxu1 }
 0x104   : > { %v1070_v13 = vpack.c.bf16 %v2085_v7, %v2085_v7  ;;  %v1111_v62 = vmul.f32 %v2085_v7, %v2085_v7  ;;  %v1089_v3 = vsel %vm1085_vm2, %v2085_v7, 0.0 }
 0x106   : > { %1079 = vst.msk [vmem:[%s2091_s7 + $0x8] sm:$0xf] %vm1076_vm1, %v1070_v13  ;;  %v1120_v18 = vsel %vm1085_vm2, %v1111_v62, 0.0 }
 0x107   : > { %v978_v25 = vpop.f32.mrf.mxu3 }
 0x108   : > { %v979_v22 = vadd.f32 %v978_v25, %v950_v47 }
 0x109   : > { %v1055_v27 = vpop.f32.mrf.mxu2  ;;  %v1019_v30 = vpop.f32.mrf.mxu0 }
 0x10a   : > { %v1056_v15 = vadd.f32 %v1055_v27, %v1027_v23  ;;  %v1020_v17 = vadd.f32 %v1019_v30, %v991_v28  ;;  %v1008_v61 = vadd.f32 %v1007_v8, %v979_v22 }
 0x10b   : > { %v1034_v35 = vpop.f32.mrf.mxu1 }
 0x10c   : > { %v1071_v41 = vpack.c.bf16 %v1056_v15, %v1056_v15  ;;  %v1049_v43 = vadd.f32 %v1048_v52, %v1020_v17  ;;  %v1035_v31 = vadd.f32 %v1034_v35, %v1006_v44  ;;  %v1112_v6 = vmul.f32 %v1056_v15, %v1056_v15 }
 0x10d   : > { %v1091_v7 = vsel %vm1085_vm2, %v1056_v15, 0.0 }
 0x10e   : > { %1080 = vst.msk [vmem:[%s2091_s7 + $0xc] sm:$0xf] %vm1076_vm1, %v1071_v41  ;;  %v1068_v50 = vpack.c.bf16 %v1049_v43, %v1049_v43  ;;  %v1109_v40 = vmul.f32 %v1049_v43, %v1049_v43  ;;  %v1086_v58 = vsel %vm1085_vm2, %v1049_v43, 0.0  ;;  %v1122_v25 = vsel %vm1085_vm2, %v1112_v6, 0.0 }
 0x10f   : > { %v1063_v10 = vpop.f32.mrf.mxu3 }
 0x110   : > { %1077 = vst.msk [vmem:[%s2091_s7] sm:$0xf] %vm1076_vm1, %v1068_v50  ;;  %v1064_v39 = vadd.f32 %v1063_v10, %v1035_v31  ;;  %v1117_v8 = vsel %vm1085_vm2, %v1109_v40, 0.0 }
 0x111   : > { %v1058_v24 = vpop.f32.mrf.mxu2  ;;  %v1021_v52 = vpop.f32.mrf.mxu0 }
 0x112   : > { %v1059_v49 = vadd.f32 %v1058_v24, %v1030_v53  ;;  %v1074_v55 = vpack.c.bf16 %v1064_v39, %v1064_v39  ;;  %v1022_v48 = vadd.f32 %v1021_v52, %v993_v46  ;;  %v1115_v15 = vmul.f32 %v1064_v39, %v1064_v39 }
 0x113   : > { %v1036_v57 = vpop.f32.mrf.mxu1  ;;  %v1097_v34 = vsel %vm1085_vm2, %v1064_v39, 0.0 }
 0x114   : > { %v1072_v56 = vpack.c.bf16 %v1059_v49, %v1059_v49  ;;  %1083 = vst.msk [vmem:[%s2091_s7 + $0x18] sm:$0xf] %vm1076_vm1, %v1074_v55  ;;  %v1051_v60 = vadd.f32 %v2081_v59, %v1022_v48  ;;  %v1037_v2 = vadd.f32 %v1036_v57, %v1008_v61  ;;  %v1032_v59 = vadd.f32 %v1031_v11, %v1003_v37 }
 0x115   : > { %v1113_v11 = vmul.f32 %v1059_v49, %v1059_v49  ;;  %v1093_v26 = vsel %vm1085_vm2, %v1059_v49, 0.0  ;;  %v1128_v44 = vsel %vm1085_vm2, %v1115_v15, 0.0 }
 0x116   : > { %1081 = vst.msk [vmem:[%s2091_s7 + $0x10] sm:$0xf] %vm1076_vm1, %v1072_v56  ;;  %v1069_v63 = vpack.c.bf16 %v1051_v60, %v1051_v60  ;;  %v1087_v0 = vsel %vm1085_vm2, %v1051_v60, 0.0  ;;  %v1110_v1 = vmul.f32 %v1051_v60, %v1051_v60 }
 0x117   : > { %v1088_v4 = vadd.f32 %v1087_v0, %v1086_v58  ;;  %v1065_v5 = vpop.f32.mrf.mxu3  ;;  %v1124_v30 = vsel %vm1085_vm2, %v1113_v11, 0.0 }
 0x118   : > { %1078 = vst.msk [vmem:[%s2091_s7 + $0x4] sm:$0xf] %vm1076_vm1, %v1069_v63  ;;  %v1118_v54 = vsel %vm1085_vm2, %v1110_v1, 0.0  ;;  %v1066_v12 = vadd.f32 %v1065_v5, %v1037_v2 }
 0x119   : > { %v1060_v9 = vpop.f32.mrf.mxu2  ;;  %v1090_v13 = vadd.f32 %v1089_v3, %v1088_v4  ;;  %v1119_v14 = vadd.f32 %v1118_v54, %v1117_v8 }
 0x11a   : > { %v1061_v16 = vadd.f32 %v1060_v9, %v1032_v59  ;;  %v1075_v19 = vpack.c.bf16 %v1066_v12, %v1066_v12  ;;  %v1116_v36 = vmul.f32 %v1066_v12, %v1066_v12  ;;  %v1099_v33 = vsel %vm1085_vm2, %v1066_v12, 0.0 }
 0x11b   : > { %v1121_v20 = vadd.f32 %v1120_v18, %v1119_v14  ;;  %v1092_v23 = vadd.f32 %v1091_v7, %v1090_v13 }
 0x11c   : > { %v1073_v21 = vpack.c.bf16 %v1061_v16, %v1061_v16  ;;  %v1114_v27 = vmul.f32 %v1061_v16, %v1061_v16  ;;  %1084 = vst.msk [vmem:[%s2091_s7 + $0x1c] sm:$0xf] %vm1076_vm1, %v1075_v19  ;;  %v1095_v32 = vsel %vm1085_vm2, %v1061_v16, 0.0  ;;  %v1130_v50 = vsel %vm1085_vm2, %v1116_v36, 0.0 }
 0x11d   : > { %v1094_v28 = vadd.f32 %v1093_v26, %v1092_v23  ;;  %v1123_v29 = vadd.f32 %v1122_v25, %v1121_v20 }
 0x11e   : > { %1082 = vst.msk [vmem:[%s2091_s7 + $0x14] sm:$0xf] %vm1076_vm1, %v1073_v21  ;;  %v1126_v41 = vsel %vm1085_vm2, %v1114_v27, 0.0 }
 0x11f   : > { %v1096_v17 = vadd.f32 %v1095_v32, %v1094_v28  ;;  %v1125_v35 = vadd.f32 %v1124_v30, %v1123_v29 }
 0x121   : > { %v1127_v42 = vadd.f32 %v1126_v41, %v1125_v35  ;;  %v1098_v43 = vadd.f32 %v1097_v34, %v1096_v17 }
 0x123   : > { %v1100_v45 = vadd.f32 %v1099_v33, %v1098_v43  ;;  %v1129_v47 = vadd.f32 %v1128_v44, %v1127_v42 }
 0x125   : > { %v1101_v31 = vrot.slane %v1100_v45, 4  ;;  %v1131_v51 = vadd.f32 %v1130_v50, %v1129_v47 }
 0x127   : > { %v1102_v53 = vadd.f32 %v1101_v31, %v1100_v45  ;;  %v1132_v10 = vrot.slane %v1131_v51, 4 }
 0x129   : > { %v1103_v22 = vrot.slane %v1102_v53, 2  ;;  %v1133_v24 = vadd.f32 %v1132_v10, %v1131_v51 }
 0x12b   : > { %v1104_v39 = vadd.f32 %v1103_v22, %v1102_v53  ;;  %v1134_v46 = vrot.slane %v1133_v24, 2 }
 0x12d   : > { %v1105_v38 = vrot.slane %v1104_v39, 1  ;;  %v1135_v49 = vadd.f32 %v1134_v46, %v1133_v24 }
 0x12f   : > { %v1106_v52 = vadd.f32 %v1105_v38, %v1104_v39  ;;  %v1136_v55 = vrot.slane %v1135_v49, 1 }
 0x131   : > { %1108 = vst.msk [vmem:[%s242_s10] sm:$0x1] %vm1107_vm3, %v1106_v52  ;;  %v1137_v48 = vadd.f32 %v1136_v55, %v1135_v49 }
 0x133   : > { %1138 = vst.msk [vmem:[%s242_s10 + $0x1] sm:$0x1] %vm1107_vm3, %v1137_v48 }
 0x134 PF: > { %s15_s17 = sadd.s32 1, %s1737_s17   ;;  %s2162_s15 = smov %s1733_s16 }
 0x135   : > { %p12_p6 = scmp.ge.s32.totalorder %s15_s17, 4   ;;  %s2163_s16 = smov %s2165_s18 }
 0x137   :  { %14 = sbr.rel (!%p12_p6) target bundleno = 2 (0x2), region = 74 }

// kernel: net_forward.49
= control target key start
LH: loop header
LB: loop body
LE: loop exit
PB: predicated region body
PF: predicated region fallthrough
CT: control target
= control target key end

     0   :  { %s3435_s15 = smov 0   ;;  %s3437_s16 = smov 0   ;;  %s4222_s0 = inlined_call_operand.vmem [shape: bf16[1024,432], index: 0, kind: input, shape index: {}]   ;;  %s4223_s1 = inlined_call_operand.vmem [shape: bf16[432,8], index: 1, kind: input, shape index: {}]   ;;  %s4224_s2 = inlined_call_operand.vmem [shape: f32[1,8], index: 2, kind: input, shape index: {}]   ;;  %s4225_s3 = inlined_call_operand.vmem [shape: bf16[1024,8], index: 3, kind: output, shape index: {0}]   ;;  %s4226_s4 = inlined_call_operand.vmem [shape: f32[2,2,8], index: 4, kind: output, shape index: {1}]  }
   0x1   :  { %s3439_s17 = smov 0  }
   0x2 LB: > { %s27_s18 = sadd.s32 1, %s3404_s16  ;;  %p2542_p0 = scmp.ge.s32.totalorder %s3408_s17, 1  ;;  %s3408_s17 = sphi %s3439_s17, %s15_s17   ;;  %s3404_s16 = sphi %s3437_s16, %s4228_s16   ;;  %s3400_s15 = sphi %s3435_s15, %s4227_s15  }
   0x3   : > { %p29_p1 = scmp.ge.s32.totalorder %s27_s18, 2  ;;  %p186_p2 = scmp.lt.s32.totalorder %s3408_s17, 3 }
   0x5   : > { %s4230_s18 = smov (%p29_p1, %s27_s18), 0  ;;  %p187_p3 = pnand %p2542_p0, %p186_p2 }
   0x6   : > { %s2543_s25 = sshll.u32 (!%p187_p3), %s3400_s15, 6  ;;  %p239_p5 = scmp.lt.s32.totalorder (!%p187_p3), %s3400_s15, 1 }
   0x7   : > { %190 = sbr.rel (%p187_p3) target bundleno = 704 (0x2c0), region = 32  ;;  %p223_p4 = scmp.lt.s32.totalorder (!%p187_p3), %s2543_s25, 127 }
   0xc   : > { %v3211_v0 = vld [vmem:[%s4223_s1 + $0x38] sm:$0xff]  ;;  %v3210_v3 = vld [vmem:[%s4223_s1 + $0x30] sm:$0xff]  ;;  %s4232_s25 = smov (!%p223_p4, %s2543_s25), 127  ;;  %v3209_v7 = vld [vmem:[%s4223_s1 + $0x28] sm:$0xff]  ;;  %vm1200_vm0 = vcmask 392192   ;;  %vm2037_vm1 = vcmask 60416  }
   0xd   : > { %v3219_v1 = vld [vmem:[%s4223_s1 + $0x78] sm:$0xff]  ;;  %1297 = vmatpush.bf16.msra.mxu0 %v3211_v0  ;;  %v3218_v4 = vld [vmem:[%s4223_s1 + $0x70] sm:$0xff]  ;;  %v3217_v8 = vld [vmem:[%s4223_s1 + $0x68] sm:$0xff]  ;;  %s3203_s12 = sshll.u32 %s4232_s25, 4  ;;  %s2547_s13 = sshll.u32 %s4232_s25, 2  ;;  %vm2102_vm2 = vcmask 64512  }
   0xe   : > { %v3227_v2 = vld [vmem:[%s4223_s1 + $0xb8] sm:$0xff]  ;;  %1466 = vmatpush.bf16.msra.mxu1 %v3219_v1  ;;  %v3226_v5 = vld [vmem:[%s4223_s1 + $0xb0] sm:$0xff]  ;;  %v3225_v9 = vld [vmem:[%s4223_s1 + $0xa8] sm:$0xff]  ;;  %s3495_s23 = scalar_lea.vmem %s4222_s0, %s3203_s12  ;;  %s3640_s20 = scalar_lea.vmem %s4225_s3, %s2547_s13  ;;  %vm2236_vm3 = vcmask 57344  }
   0xf   : > { %1635 = vmatpush.bf16.msra.mxu2 %v3227_v2  ;;  %v3230_v6 = vld [vmem:[%s4223_s1 + $0xd0] sm:$0xff]  ;;  %v3229_v10 = vld [vmem:[%s4223_s1 + $0xc8] sm:$0xff]  ;;  %v3208_v11 = vld [vmem:[%s4223_s1 + $0x20] sm:$0xff]  ;;  %s4234_s15 = smov (!%p239_p5, %s3400_s15), 1 }
  0x10   : > { %1809 = vmatpush.bf16.msra.mxu3 %v3230_v6  ;;  %v3216_v12 = vld [vmem:[%s4223_s1 + $0x60] sm:$0xff]  ;;  %v3232_v15 = vld [vmem:[%s3495_s23 + $0xc] sm:$0xf]  ;;  %v2561_v16 = vld [vmem:[%s3495_s23 + $0x18] sm:$0xf0] }
  0x11   : > { %1298 = vmatpush.bf16.msra.mxu0 %v3210_v3  ;;  %v3224_v13 = vld [vmem:[%s4223_s1 + $0xa0] sm:$0xff]  ;;  %v3207_v17 = vld [vmem:[%s4223_s1 + $0x18] sm:$0xff]  ;;  %v2564_v20 = vor.u32 %v3232_v15, %v2561_v16  ;;  %v3206_v21 = vld [vmem:[%s4223_s1 + $0x10] sm:$0xff] }
  0x12   : > { %1467 = vmatpush.bf16.msra.mxu1 %v3218_v4  ;;  %v3228_v14 = vld [vmem:[%s4223_s1 + $0xc0] sm:$0xff]  ;;  %v3215_v18 = vld [vmem:[%s4223_s1 + $0x58] sm:$0xff]  ;;  %v3214_v22 = vld [vmem:[%s4223_s1 + $0x50] sm:$0xff] }
  0x13   : > { %1636 = vmatpush.bf16.msra.mxu2 %v3226_v5  ;;  %v3223_v19 = vld [vmem:[%s4223_s1 + $0x98] sm:$0xff]  ;;  %v3222_v23 = vld [vmem:[%s4223_s1 + $0x90] sm:$0xff]  ;;  %v3205_v24 = vld [vmem:[%s4223_s1 + $0x8] sm:$0xff] }
  0x14   : > { %1810 = vmatpush.bf16.msra.mxu3 %v3229_v10  ;;  %v3213_v25 = vld [vmem:[%s4223_s1 + $0x48] sm:$0xff]  ;;  %v3204_v27 = vld [vmem:[%s4223_s1] sm:$0xff]  ;;  %v3233_v30 = vld [vmem:[%s3495_s23 + $0xc] sm:$0xf0] }
  0x15   : > { %1299 = vmatpush.bf16.msra.mxu0 %v3209_v7  ;;  %v3221_v26 = vld [vmem:[%s4223_s1 + $0x88] sm:$0xff]  ;;  %v3212_v28 = vld [vmem:[%s4223_s1 + $0x40] sm:$0xff]  ;;  %v2553_v32 = vld [vmem:[%s3495_s23 + $0x10] sm:$0xf0] }
  0x16   : > { %1468 = vmatpush.bf16.msra.mxu1 %v3217_v8  ;;  %v2551_v29 = vld [vmem:[%s3495_s23] sm:$0xf]  ;;  %v3231_v31 = vld [vmem:[%s3495_s23 + $0x4] sm:$0xf]  ;;  %v2559_v34 = vld [vmem:[%s3495_s23 + $0x8] sm:$0xf] }
  0x17   : > { %1637 = vmatpush.bf16.msra.mxu2 %v3225_v9  ;;  %v3220_v33 = vld [vmem:[%s4223_s1 + $0x80] sm:$0xff]  ;;  %v3234_v35 = vld [vmem:[%s3495_s23 + $0x14] sm:$0xf0]  ;;  %v3236_v36 = vld [vmem:[%s3495_s23 + $0x2c] sm:$0xf]  ;;  %v2552_v38 = vor.u32 %v3233_v30, %v2551_v29  ;;  %v2556_v39 = vor.u32 %v3231_v31, %v2553_v32 }
  0x18   : > { %1811 = vmatpush.bf16.msra.mxu3 %v3228_v14  ;;  %v2577_v37 = vld [vmem:[%s3495_s23 + $0x38] sm:$0xf0]  ;;  %v2560_v40 = vor.u32 %v3234_v35, %v2559_v34  ;;  %v2567_v42 = vld [vmem:[%s3495_s23 + $0x20] sm:$0xf]  ;;  %v3237_v43 = vld [vmem:[%s3495_s23 + $0x2c] sm:$0xf0] }
  0x19   : > { %1300 = vmatpush.bf16.msra.mxu0 %v3208_v11  ;;  %v2580_v41 = vor.u32 %v3236_v36, %v2577_v37  ;;  %v3235_v44 = vld [vmem:[%s3495_s23 + $0x24] sm:$0xf]  ;;  %v2569_v45 = vld [vmem:[%s3495_s23 + $0x30] sm:$0xf0]  ;;  %v2575_v46 = vld [vmem:[%s3495_s23 + $0x28] sm:$0xf]  ;;  %v2568_v50 = vor.u32 %v3237_v43, %v2567_v42 }
  0x1a   : > { %1469 = vmatpush.bf16.msra.mxu1 %v3216_v12  ;;  %v3238_v47 = vld [vmem:[%s3495_s23 + $0x34] sm:$0xf0]  ;;  %v3240_v48 = vld [vmem:[%s3495_s23 + $0x4c] sm:$0xf]  ;;  %v2593_v49 = vld [vmem:[%s3495_s23 + $0x58] sm:$0xf0]  ;;  %v2572_v51 = vor.u32 %v3235_v44, %v2569_v45 }
  0x1b   : > { %1638 = vmatpush.bf16.msra.mxu2 %v3224_v13  ;;  %3169 = vmatmul.msk.bf16.vlgmr.msra.gmra.mxu3 %vm1200_vm0, %v2564_v20  ;;  %v2576_v52 = vor.u32 %v3238_v47, %v2575_v46  ;;  %v2596_v53 = vor.u32 %v3240_v48, %v2593_v49  ;;  %v2583_v54 = vld [vmem:[%s3495_s23 + $0x40] sm:$0xf]  ;;  %v3241_v55 = vld [vmem:[%s3495_s23 + $0x4c] sm:$0xf0]  ;;  %v3239_v56 = vld [vmem:[%s3495_s23 + $0x44] sm:$0xf] }
  0x1c   : > { %v2585_v57 = vld [vmem:[%s3495_s23 + $0x50] sm:$0xf0]  ;;  %v2591_v58 = vld [vmem:[%s3495_s23 + $0x48] sm:$0xf]  ;;  %v3242_v59 = vld [vmem:[%s3495_s23 + $0x54] sm:$0xf0]  ;;  %v2584_v62 = vor.u32 %v3241_v55, %v2583_v54 }
  0x1d   : > { %1301 = vmatpush.bf16.msra.mxu0 %v3207_v17  ;;  %v3244_v60 = vld [vmem:[%s3495_s23 + $0x6c] sm:$0xf]  ;;  %v2609_v61 = vld [vmem:[%s3495_s23 + $0x78] sm:$0xf0]  ;;  %v2588_v63 = vor.u32 %v3239_v56, %v2585_v57  ;;  %v2592_v0 = vor.u32 %v3242_v59, %v2591_v58  ;;  %v2599_v2 = vld [vmem:[%s3495_s23 + $0x60] sm:$0xf] }
  0x1e   : > { %1470 = vmatpush.bf16.msra.mxu1 %v3215_v18  ;;  %v2612_v1 = vor.u32 %v3244_v60, %v2609_v61  ;;  %v3245_v3 = vld [vmem:[%s3495_s23 + $0x6c] sm:$0xf0]  ;;  %v3243_v4 = vld [vmem:[%s3495_s23 + $0x64] sm:$0xf]  ;;  %v2601_v5 = vld [vmem:[%s3495_s23 + $0x70] sm:$0xf0] }
  0x1f   : > { %1639 = vmatpush.bf16.msra.mxu2 %v3223_v19  ;;  %v2607_v6 = vld [vmem:[%s3495_s23 + $0x68] sm:$0xf]  ;;  %v3246_v7 = vld [vmem:[%s3495_s23 + $0x74] sm:$0xf0]  ;;  %v3248_v8 = vld [vmem:[%s3495_s23 + $0x8c] sm:$0xf]  ;;  %v2600_v10 = vor.u32 %v3245_v3, %v2599_v2  ;;  %v2604_v11 = vor.u32 %v3243_v4, %v2601_v5 }
  0x20   : > { %v2625_v9 = vld [vmem:[%s3495_s23 + $0x98] sm:$0xf0]  ;;  %v2608_v12 = vor.u32 %v3246_v7, %v2607_v6  ;;  %v2615_v14 = vld [vmem:[%s3495_s23 + $0x80] sm:$0xf]  ;;  %v3249_v15 = vld [vmem:[%s3495_s23 + $0x8c] sm:$0xf0] }
  0x21   : > { %1302 = vmatpush.bf16.msra.mxu0 %v3206_v21  ;;  %v2628_v13 = vor.u32 %v3248_v8, %v2625_v9  ;;  %v3247_v16 = vld [vmem:[%s3495_s23 + $0x84] sm:$0xf]  ;;  %v2617_v17 = vld [vmem:[%s3495_s23 + $0x90] sm:$0xf0]  ;;  %v2623_v18 = vld [vmem:[%s3495_s23 + $0x88] sm:$0xf] }
  0x22   : > { %1471 = vmatpush.bf16.msra.mxu1 %v3214_v22  ;;  %v3250_v19 = vld [vmem:[%s3495_s23 + $0x94] sm:$0xf0]  ;;  %v3252_v20 = vld [vmem:[%s3495_s23 + $0xac] sm:$0xf]  ;;  %v2641_v21 = vld [vmem:[%s3495_s23 + $0xb8] sm:$0xf0]  ;;  %v2616_v22 = vor.u32 %v3249_v15, %v2615_v14 }
  0x23   : > { %1640 = vmatpush.bf16.msra.mxu2 %v3222_v23  ;;  %v2620_v23 = vor.u32 %v3247_v16, %v2617_v17  ;;  %v2633_v29 = vld [vmem:[%s3495_s23 + $0xb0] sm:$0xf0]  ;;  %v2639_v30 = vld [vmem:[%s3495_s23 + $0xa8] sm:$0xf]  ;;  %v3254_v31 = vld [vmem:[%s3495_s23 + $0xb4] sm:$0xf0] }
  0x24   : > { %v3256_v32 = vld [vmem:[%s3495_s23 + $0xcc] sm:$0xf]  ;;  %v2640_v36 = vor.u32 %v3254_v31, %v2639_v30  ;;  %v2655_v42 = vld [vmem:[%s3495_s23 + $0xc8] sm:$0xf]  ;;  %v3258_v43 = vld [vmem:[%s3495_s23 + $0xd4] sm:$0xf0] }
  0x25   : > { %1303 = vmatpush.bf16.msra.mxu0 %v3205_v24  ;;  %v2624_v24 = vor.u32 %v3250_v19, %v2623_v18  ;;  %v3260_v44 = vld [vmem:[%s3495_s23 + $0xec] sm:$0xf]  ;;  %v2673_v45 = vld [vmem:[%s3495_s23 + $0xf8] sm:$0xf0]  ;;  %v2656_v48 = vor.u32 %v3258_v43, %v2655_v42  ;;  %v2671_v54 = vld [vmem:[%s3495_s23 + $0xe8] sm:$0xf] }
  0x26   : > { %1472 = vmatpush.bf16.msra.mxu1 %v3213_v25  ;;  %v2644_v25 = vor.u32 %v3252_v20, %v2641_v21  ;;  %v2676_v49 = vor.u32 %v3260_v44, %v2673_v45  ;;  %v3262_v55 = vld [vmem:[%s3495_s23 + $0xf4] sm:$0xf0]  ;;  %v3264_v56 = vld [vmem:[%s3495_s23 + $0x10c] sm:$0xf]  ;;  %v2689_v57 = vld [vmem:[%s3495_s23 + $0x118] sm:$0xf0] }
  0x27   : > { %1641 = vmatpush.bf16.msra.mxu2 %v3221_v26  ;;  %v2631_v26 = vld [vmem:[%s3495_s23 + $0xa0] sm:$0xf]  ;;  %v2672_v60 = vor.u32 %v3262_v55, %v2671_v54  ;;  %v2692_v61 = vor.u32 %v3264_v56, %v2689_v57  ;;  %v2681_v2 = vld [vmem:[%s3495_s23 + $0x110] sm:$0xf0]  ;;  %v2687_v4 = vld [vmem:[%s3495_s23 + $0x108] sm:$0xf] }
  0x28   : > { %v3627_v3 = vld [vmem:[%s4224_s2] ss:$0 sm:$0xff]  ;;  %v3266_v5 = vld [vmem:[%s3495_s23 + $0x114] sm:$0xf0]  ;;  %v3268_v6 = vld [vmem:[%s3495_s23 + $0x12c] sm:$0xf] }
  0x29   : > { %1304 = vmatpush.bf16.msra.mxu0 %v3204_v27  ;;  %v3253_v27 = vld [vmem:[%s3495_s23 + $0xac] sm:$0xf0]  ;;  %v2705_v7 = vld [vmem:[%s3495_s23 + $0x138] sm:$0xf0]  ;;  %v3270_v30 = vld [vmem:[%s3495_s23 + $0x134] sm:$0xf0] }
  0x2a   : > { %1473 = vmatpush.bf16.msra.mxu1 %v3212_v28  ;;  %v3251_v28 = vld [vmem:[%s3495_s23 + $0xa4] sm:$0xf]  ;;  %v2632_v34 = vor.u32 %v3253_v27, %v2631_v26  ;;  %v2708_v15 = vor.u32 %v3268_v6, %v2705_v7  ;;  %v3269_v26 = vld [vmem:[%s3495_s23 + $0x12c] sm:$0xf0]  ;;  %v2719_v7 = vld [vmem:[%s3495_s23 + $0x148] sm:$0xf] }
  0x2b   : > { %1642 = vmatpush.bf16.msra.mxu2 %v3220_v33  ;;  %3170 = vmatmul.msk.bf16.gmra.mxu3 %vm1200_vm0, %v2580_v41  ;;  %v2657_v33 = vld [vmem:[%s3495_s23 + $0xd8] sm:$0xf0]  ;;  %v2636_v35 = vor.u32 %v3251_v28, %v2633_v29  ;;  %v2649_v41 = vld [vmem:[%s3495_s23 + $0xd0] sm:$0xf0]  ;;  %v3267_v27 = vld [vmem:[%s3495_s23 + $0x124] sm:$0xf] }
  0x2c   : > { %1305 = vmatmul.bf16.vlgmr.msra.gmra.mxu0 %v2552_v38  ;;  %v2660_v37 = vor.u32 %v3256_v32, %v2657_v33  ;;  %v2647_v38 = vld [vmem:[%s3495_s23 + $0xc0] sm:$0xf]  ;;  %v2697_v28 = vld [vmem:[%s3495_s23 + $0x130] sm:$0xf0]  ;;  %v2703_v29 = vld [vmem:[%s3495_s23 + $0x128] sm:$0xf] }
  0x2d   : > { %1474 = vmatmul.bf16.vlgmr.msra.gmra.mxu1 %v2556_v39  ;;  %v3257_v39 = vld [vmem:[%s3495_s23 + $0xcc] sm:$0xf0]  ;;  %v3272_v32 = vld [vmem:[%s3495_s23 + $0x14c] sm:$0xf]  ;;  %v2721_v33 = vld [vmem:[%s3495_s23 + $0x158] sm:$0xf0] }
  0x2e   : > { %1643 = vmatmul.bf16.vlgmr.msra.gmra.mxu2 %v2560_v40  ;;  %v3255_v40 = vld [vmem:[%s3495_s23 + $0xc4] sm:$0xf]  ;;  %v2648_v46 = vor.u32 %v3257_v39, %v2647_v38  ;;  %v2724_v43 = vor.u32 %v3272_v32, %v2721_v33 }
  0x2f   : > { %v2652_v47 = vor.u32 %v3255_v40, %v2649_v41  ;;  %v2704_v40 = vor.u32 %v3270_v30, %v2703_v29 }
  0x3b   : > { %3171 = vmatmul.msk.bf16.gmra.mxu3 %vm1200_vm0, %v2596_v53  ;;  %v2665_v53 = vld [vmem:[%s3495_s23 + $0xf0] sm:$0xf0] }
  0x3c   : > { %1310 = vmatmul.bf16.gmra.mxu0 %v2568_v50  ;;  %v2663_v50 = vld [vmem:[%s3495_s23 + $0xe0] sm:$0xf] }
  0x3d   : > { %1479 = vmatmul.bf16.gmra.mxu1 %v2572_v51  ;;  %v3261_v51 = vld [vmem:[%s3495_s23 + $0xec] sm:$0xf0] }
  0x3e   : > { %1648 = vmatmul.bf16.gmra.mxu2 %v2576_v52  ;;  %v3259_v52 = vld [vmem:[%s3495_s23 + $0xe4] sm:$0xf]  ;;  %v2664_v58 = vor.u32 %v3261_v51, %v2663_v50 }
  0x3f   : > { %v2668_v59 = vor.u32 %v3259_v52, %v2665_v53 }
  0x4b   : > { %3172 = vmatmul.msk.bf16.gmra.mxu3 %vm1200_vm0, %v2612_v1  ;;  %v3263_v1 = vld [vmem:[%s3495_s23 + $0x104] sm:$0xf] }
  0x4c   : > { %1315 = vmatmul.bf16.gmra.mxu0 %v2584_v62  ;;  %v2684_v9 = vor.u32 %v3263_v1, %v2681_v2 }
  0x4d   : > { %1484 = vmatmul.bf16.gmra.mxu1 %v2588_v63  ;;  %v2679_v63 = vld [vmem:[%s3495_s23 + $0x100] sm:$0xf] }
  0x4e   : > { %1653 = vmatmul.bf16.gmra.mxu2 %v2592_v0  ;;  %v3265_v0 = vld [vmem:[%s3495_s23 + $0x10c] sm:$0xf0] }
  0x4f   : > { %v2680_v8 = vor.u32 %v3265_v0, %v2679_v63  ;;  %v3273_v63 = vld [vmem:[%s3495_s23 + $0x14c] sm:$0xf0] }
  0x5b   : > { %3173 = vmatmul.msk.bf16.gmra.mxu3 %vm1200_vm0, %v2628_v13 }
  0x5c   : > { %1320 = vmatmul.bf16.gmra.mxu0 %v2600_v10 }
  0x5d   : > { %1489 = vmatmul.bf16.gmra.mxu1 %v2604_v11 }
  0x5e   : > { %1658 = vmatmul.bf16.gmra.mxu2 %v2608_v12  ;;  %v2688_v12 = vor.u32 %v3266_v5, %v2687_v4  ;;  %v3271_v4 = vld [vmem:[%s3495_s23 + $0x144] sm:$0xf]  ;;  %v2713_v5 = vld [vmem:[%s3495_s23 + $0x150] sm:$0xf0] }
  0x6b   : > { %3174 = vmatmul.msk.bf16.gmra.mxu3 %vm1200_vm0, %v2644_v25 }
  0x6c   : > { %1325 = vmatmul.bf16.gmra.mxu0 %v2616_v22 }
  0x6d   : > { %1494 = vmatmul.bf16.gmra.mxu1 %v2620_v23 }
  0x6e   : > { %1663 = vmatmul.bf16.gmra.mxu2 %v2624_v24  ;;  %v2695_v24 = vld [vmem:[%s3495_s23 + $0x120] sm:$0xf] }
  0x7b   : > { %3175 = vmatmul.msk.bf16.gmra.mxu3 %vm1200_vm0, %v2660_v37 }
  0x7c   : > { %1330 = vmatmul.bf16.gmra.mxu0 %v2632_v34 }
  0x7d   : > { %1499 = vmatmul.bf16.gmra.mxu1 %v2636_v35  ;;  %v2696_v35 = vor.u32 %v3269_v26, %v2695_v24 }
  0x7e   : > { %1668 = vmatmul.bf16.gmra.mxu2 %v2640_v36  ;;  %v2700_v36 = vor.u32 %v3267_v27, %v2697_v28 }
  0x8b   : > { %3176 = vmatmul.msk.bf16.gmra.mxu3 %vm1200_vm0, %v2676_v49 }
  0x8c   : > { %1335 = vmatmul.bf16.gmra.mxu0 %v2648_v46 }
  0x8d   : > { %1504 = vmatmul.bf16.gmra.mxu1 %v2652_v47 }
  0x8e   : > { %1673 = vmatmul.bf16.gmra.mxu2 %v2656_v48 }
  0x9b   : > { %3177 = vmatmul.msk.bf16.gmra.mxu3 %vm1200_vm0, %v2692_v61 }
  0x9c   : > { %1340 = vmatmul.bf16.gmra.mxu0 %v2664_v58 }
  0x9d   : > { %1509 = vmatmul.bf16.gmra.mxu1 %v2668_v59 }
  0x9e   : > { %1678 = vmatmul.bf16.gmra.mxu2 %v2672_v60  ;;  %v1813_v62 = vpop.f32.mrf.mxu3 }
  0xa6   : > { %v1815_v14 = vpop.f32.mrf.mxu3 }
  0xa9   : > { %v1306_v10 = vpop.f32.mrf.mxu0 }
  0xaa   : > { %v1475_v11 = vpop.f32.mrf.mxu1  ;;  %v1307_v13 = vadd.f32 %v3627_v3, %v1306_v10 }
  0xab   : > { %3178 = vmatmul.msk.bf16.gmra.mxu3 %vm1200_vm0, %v2708_v15 }
  0xac   : > { %1345 = vmatmul.bf16.gmra.mxu0 %v2680_v8  ;;  %v1476_v16 = vadd.f32 %v1475_v11, %v1307_v13  ;;  %v3274_v8 = vld [vmem:[%s3495_s23 + $0x154] sm:$0xf0] }
  0xad   : > { %1514 = vmatmul.bf16.gmra.mxu1 %v2684_v9  ;;  %v3276_v9 = vld [vmem:[%s3495_s23 + $0x16c] sm:$0xf] }
  0xae   : > { %1683 = vmatmul.bf16.gmra.mxu2 %v2688_v12  ;;  %v1818_v21 = vpop.f32.mrf.mxu3  ;;  %v2737_v12 = vld [vmem:[%s3495_s23 + $0x178] sm:$0xf0] }
  0xb1   : > { %v1644_v17 = vpop.f32.mrf.mxu2  ;;  %v1308_v19 = vpop.f32.mrf.mxu0 }
  0xb2   : > { %v1645_v18 = vadd.f32 %v1644_v17, %v1476_v16  ;;  %v1477_v20 = vpop.f32.mrf.mxu1  ;;  %v1309_v23 = vadd.f32 %v3627_v3, %v1308_v19  ;;  %v2716_v16 = vor.u32 %v3271_v4, %v2713_v5 }
  0xb4   : > { %v1814_v22 = vadd.f32 %v1813_v62, %v1645_v18  ;;  %v1478_v31 = vadd.f32 %v1477_v20, %v1309_v23  ;;  %v2711_v62 = vld [vmem:[%s3495_s23 + $0x140] sm:$0xf]  ;;  %v2720_v20 = vor.u32 %v3274_v8, %v2719_v7  ;;  %v2740_v23 = vor.u32 %v3276_v9, %v2737_v12 }
  0xb5   : > { %v2712_v15 = vor.u32 %v3273_v63, %v2711_v62 }
  0xb6   : > { %v1973_v25 = vpack.c.bf16 %v1814_v22, %v1814_v22  ;;  %v1820_v42 = vpop.f32.mrf.mxu3  ;;  %v2238_v44 = vmul.f32 %v1814_v22, %v1814_v22  ;;  %v2103_v46 = vsel %vm2102_vm2, %v1814_v22, 0.0 }
  0xb8   : > { %2038 = vst.msk [vmem:[%s3640_s20] sm:$0xf] %vm2037_vm1, %v1973_v25  ;;  %v2302_v52 = vsel %vm2102_vm2, %v2238_v44, 0.0  ;;  %v3275_v44 = vld [vmem:[%s3495_s23 + $0x164] sm:$0xf] }
  0xb9   : > { %v1646_v34 = vpop.f32.mrf.mxu2  ;;  %v1311_v38 = vpop.f32.mrf.mxu0 }
  0xba   : > { %v1647_v37 = vadd.f32 %v1646_v34, %v1478_v31  ;;  %v1480_v39 = vpop.f32.mrf.mxu1  ;;  %v1312_v41 = vadd.f32 %v3627_v3, %v1311_v38 }
  0xbb   : > { %3179 = vmatmul.msk.bf16.gmra.mxu3 %vm1200_vm0, %v2724_v43 }
  0xbc   : > { %v1816_v45 = vadd.f32 %v1815_v14, %v1647_v37  ;;  %1350 = vmatmul.bf16.gmra.mxu0 %v2696_v35  ;;  %v1481_v50 = vadd.f32 %v1480_v39, %v1312_v41  ;;  %v2727_v39 = vld [vmem:[%s3495_s23 + $0x160] sm:$0xf] }
  0xbd   : > { %1519 = vmatmul.bf16.gmra.mxu1 %v2700_v36 }
  0xbe   : > { %v1974_v47 = vpack.c.bf16 %v1816_v45, %v1816_v45  ;;  %v2104_v48 = vsel %vm2102_vm2, %v1816_v45, 0.0  ;;  %v2239_v49 = vmul.f32 %v1816_v45, %v1816_v45  ;;  %1688 = vmatmul.bf16.gmra.mxu2 %v2704_v40  ;;  %v1823_v59 = vpop.f32.mrf.mxu3  ;;  %v3277_v40 = vld [vmem:[%s3495_s23 + $0x16c] sm:$0xf0]  ;;  %v2729_v45 = vld [vmem:[%s3495_s23 + $0x170] sm:$0xf0] }
  0xbf   : > { %v2105_v51 = vadd.f32 %v2104_v48, %v2103_v46  ;;  %v3278_v48 = vld [vmem:[%s3495_s23 + $0x174] sm:$0xf0] }
  0xc0   : > { %2039 = vst.msk [vmem:[%s3640_s20 + $0x4] sm:$0xf] %vm2037_vm1, %v1974_v47  ;;  %v2303_v53 = vsel %vm2102_vm2, %v2239_v49, 0.0  ;;  %v2735_v47 = vld [vmem:[%s3495_s23 + $0x168] sm:$0xf] }
  0xc1   : > { %v2304_v54 = vadd.f32 %v2303_v53, %v2302_v52  ;;  %v1649_v55 = vpop.f32.mrf.mxu2  ;;  %v1313_v57 = vpop.f32.mrf.mxu0  ;;  %v3280_v49 = vld [vmem:[%s3495_s23 + $0x18c] sm:$0xf]  ;;  %v2753_v52 = vld [vmem:[%s3495_s23 + $0x198] sm:$0xf0] }
  0xc2   : > { %v1650_v56 = vadd.f32 %v1649_v55, %v1481_v50  ;;  %v1482_v58 = vpop.f32.mrf.mxu1  ;;  %v1314_v61 = vadd.f32 %v3627_v3, %v1313_v57  ;;  %v2728_v55 = vor.u32 %v3277_v40, %v2727_v39  ;;  %v2756_v63 = vor.u32 %v3280_v49, %v2753_v52 }
  0xc4   : > { %v1819_v60 = vadd.f32 %v1818_v21, %v1650_v56  ;;  %v1483_v11 = vadd.f32 %v1482_v58, %v1314_v61  ;;  %v2732_v56 = vor.u32 %v3275_v44, %v2729_v45 }
  0xc6   : > { %v1975_v0 = vpack.c.bf16 %v1819_v60, %v1819_v60  ;;  %v2106_v1 = vsel %vm2102_vm2, %v1819_v60, 0.0  ;;  %v2240_v2 = vmul.f32 %v1819_v60, %v1819_v60  ;;  %v1825_v22 = vpop.f32.mrf.mxu3  ;;  %v2736_v60 = vor.u32 %v3278_v48, %v2735_v47 }
  0xc7   : > { %v2107_v6 = vadd.f32 %v2106_v1, %v2105_v51 }
  0xc8   : > { %2040 = vst.msk [vmem:[%s3640_s20 + $0x8] sm:$0xf] %vm2037_vm1, %v1975_v0  ;;  %v2305_v10 = vsel %vm2102_vm2, %v2240_v2, 0.0 }
  0xc9   : > { %v2306_v13 = vadd.f32 %v2305_v10, %v2304_v54  ;;  %v1651_v14 = vpop.f32.mrf.mxu2  ;;  %v1316_v18 = vpop.f32.mrf.mxu0 }
  0xca   : > { %v1652_v17 = vadd.f32 %v1651_v14, %v1483_v11  ;;  %v1485_v19 = vpop.f32.mrf.mxu1  ;;  %v1317_v21 = vadd.f32 %v3627_v3, %v1316_v18 }
  0xcb   : > { %3180 = vmatmul.msk.bf16.gmra.mxu3 %vm1200_vm0, %v2740_v23 }
  0xcc   : > { %v1821_v24 = vadd.f32 %v1820_v42, %v1652_v17  ;;  %1355 = vmatmul.bf16.gmra.mxu0 %v2712_v15  ;;  %v1486_v28 = vadd.f32 %v1485_v19, %v1317_v21  ;;  %v3281_v17 = vld [vmem:[%s3495_s23 + $0x18c] sm:$0xf0]  ;;  %v3279_v21 = vld [vmem:[%s3495_s23 + $0x184] sm:$0xf] }
  0xcd   : > { %1524 = vmatmul.bf16.gmra.mxu1 %v2716_v16  ;;  %v2743_v16 = vld [vmem:[%s3495_s23 + $0x180] sm:$0xf] }
  0xce   : > { %v1976_v25 = vpack.c.bf16 %v1821_v24, %v1821_v24  ;;  %v2108_v26 = vsel %vm2102_vm2, %v1821_v24, 0.0  ;;  %v2241_v27 = vmul.f32 %v1821_v24, %v1821_v24  ;;  %1693 = vmatmul.bf16.gmra.mxu2 %v2720_v20  ;;  %v1828_v36 = vpop.f32.mrf.mxu3  ;;  %v2751_v24 = vld [vmem:[%s3495_s23 + $0x188] sm:$0xf] }
  0xcf   : > { %v2109_v29 = vadd.f32 %v2108_v26, %v2107_v6  ;;  %v3284_v26 = vld [vmem:[%s3495_s23 + $0x1ac] sm:$0xf] }
  0xd0   : > { %2041 = vst.msk [vmem:[%s3640_s20 + $0xc] sm:$0xf] %vm2037_vm1, %v1976_v25  ;;  %v2307_v30 = vsel %vm2102_vm2, %v2241_v27, 0.0  ;;  %v3282_v25 = vld [vmem:[%s3495_s23 + $0x194] sm:$0xf0] }
  0xd1   : > { %v2308_v31 = vadd.f32 %v2307_v30, %v2306_v13  ;;  %v1654_v32 = vpop.f32.mrf.mxu2  ;;  %v1318_v34 = vpop.f32.mrf.mxu0 }
  0xd2   : > { %v1655_v33 = vadd.f32 %v1654_v32, %v1486_v28  ;;  %v1487_v35 = vpop.f32.mrf.mxu1  ;;  %v1319_v38 = vadd.f32 %v3627_v3, %v1318_v34  ;;  %v2744_v32 = vor.u32 %v3281_v17, %v2743_v16 }
  0xd4   : > { %v1824_v37 = vadd.f32 %v1823_v59, %v1655_v33  ;;  %v1488_v51 = vadd.f32 %v1487_v35, %v1319_v38 }
  0xd6   : > { %v1977_v41 = vpack.c.bf16 %v1824_v37, %v1824_v37  ;;  %v2110_v42 = vsel %vm2102_vm2, %v1824_v37, 0.0  ;;  %v2242_v43 = vmul.f32 %v1824_v37, %v1824_v37  ;;  %v1830_v62 = vpop.f32.mrf.mxu3  ;;  %v2752_v37 = vor.u32 %v3282_v25, %v2751_v24 }
  0xd7   : > { %v2111_v46 = vadd.f32 %v2110_v42, %v2109_v29  ;;  %v2769_v29 = vld [vmem:[%s3495_s23 + $0x1b8] sm:$0xf0] }
  0xd8   : > { %2042 = vst.msk [vmem:[%s3640_s20 + $0x10] sm:$0xf] %vm2037_vm1, %v1977_v41  ;;  %v2309_v50 = vsel %vm2102_vm2, %v2242_v43, 0.0  ;;  %v2772_v40 = vor.u32 %v3284_v26, %v2769_v29 }
  0xd9   : > { %v2310_v53 = vadd.f32 %v2309_v50, %v2308_v31  ;;  %v1656_v54 = vpop.f32.mrf.mxu2  ;;  %v1321_v58 = vpop.f32.mrf.mxu0 }
  0xda   : > { %v1657_v57 = vadd.f32 %v1656_v54, %v1488_v51  ;;  %v1490_v59 = vpop.f32.mrf.mxu1  ;;  %v1322_v61 = vadd.f32 %v3627_v3, %v1321_v58 }
  0xdb   : > { %3181 = vmatmul.msk.bf16.gmra.mxu3 %vm1200_vm0, %v2756_v63 }
  0xdc   : > { %v1826_v0 = vadd.f32 %v1825_v22, %v1657_v57  ;;  %1360 = vmatmul.bf16.gmra.mxu0 %v2728_v55  ;;  %v1491_v5 = vadd.f32 %v1490_v59, %v1322_v61  ;;  %v2745_v22 = vld [vmem:[%s3495_s23 + $0x190] sm:$0xf0]  ;;  %v3285_v57 = vld [vmem:[%s3495_s23 + $0x1ac] sm:$0xf0]  ;;  %v3283_v61 = vld [vmem:[%s3495_s23 + $0x1a4] sm:$0xf] }
  0xdd   : > { %1529 = vmatmul.bf16.gmra.mxu1 %v2732_v56  ;;  %v2748_v33 = vor.u32 %v3279_v21, %v2745_v22  ;;  %v2759_v56 = vld [vmem:[%s3495_s23 + $0x1a0] sm:$0xf] }
  0xde   : > { %v1978_v1 = vpack.c.bf16 %v1826_v0, %v1826_v0  ;;  %v2112_v2 = vsel %vm2102_vm2, %v1826_v0, 0.0  ;;  %v2243_v4 = vmul.f32 %v1826_v0, %v1826_v0  ;;  %1698 = vmatmul.bf16.gmra.mxu2 %v2736_v60  ;;  %v1833_v13 = vpop.f32.mrf.mxu3  ;;  %v2767_v0 = vld [vmem:[%s3495_s23 + $0x1a8] sm:$0xf] }
  0xdf   : > { %v2113_v6 = vadd.f32 %v2112_v2, %v2111_v46  ;;  %v3288_v2 = vld [vmem:[%s3495_s23 + $0x1cc] sm:$0xf] }
  0xe0   : > { %2043 = vst.msk [vmem:[%s3640_s20 + $0x14] sm:$0xf] %vm2037_vm1, %v1978_v1  ;;  %v2311_v7 = vsel %vm2102_vm2, %v2243_v4, 0.0  ;;  %v3286_v1 = vld [vmem:[%s3495_s23 + $0x1b4] sm:$0xf0] }
  0xe1   : > { %v2312_v8 = vadd.f32 %v2311_v7, %v2310_v53  ;;  %v1659_v9 = vpop.f32.mrf.mxu2  ;;  %v1323_v11 = vpop.f32.mrf.mxu0 }
  0xe2   : > { %v1660_v10 = vadd.f32 %v1659_v9, %v1491_v5  ;;  %v1492_v12 = vpop.f32.mrf.mxu1  ;;  %v1324_v15 = vadd.f32 %v3627_v3, %v1323_v11  ;;  %v2760_v9 = vor.u32 %v3285_v57, %v2759_v56 }
  0xe4   : > { %v1829_v14 = vadd.f32 %v1828_v36, %v1660_v10  ;;  %v1493_v28 = vadd.f32 %v1492_v12, %v1324_v15 }
  0xe6   : > { %v1979_v18 = vpack.c.bf16 %v1829_v14, %v1829_v14  ;;  %v2114_v19 = vsel %vm2102_vm2, %v1829_v14, 0.0  ;;  %v2244_v20 = vmul.f32 %v1829_v14, %v1829_v14  ;;  %v1835_v39 = vpop.f32.mrf.mxu3  ;;  %v2768_v14 = vor.u32 %v3286_v1, %v2767_v0 }
  0xe7   : > { %v2115_v23 = vadd.f32 %v2114_v19, %v2113_v6  ;;  %v2785_v6 = vld [vmem:[%s3495_s23 + $0x1d8] sm:$0xf0] }
  0xe8   : > { %2044 = vst.msk [vmem:[%s3640_s20 + $0x18] sm:$0xf] %vm2037_vm1, %v1979_v18  ;;  %v2313_v27 = vsel %vm2102_vm2, %v2244_v20, 0.0  ;;  %v2788_v17 = vor.u32 %v3288_v2, %v2785_v6 }
  0xe9   : > { %v2314_v30 = vadd.f32 %v2313_v27, %v2312_v8  ;;  %v1661_v31 = vpop.f32.mrf.mxu2  ;;  %v1326_v35 = vpop.f32.mrf.mxu0 }
  0xea   : > { %v1662_v34 = vadd.f32 %v1661_v31, %v1493_v28  ;;  %v1495_v36 = vpop.f32.mrf.mxu1  ;;  %v1327_v38 = vadd.f32 %v3627_v3, %v1326_v35 }
  0xeb   : > { %3182 = vmatmul.msk.bf16.gmra.mxu3 %vm1200_vm0, %v2772_v40 }
  0xec   : > { %v1831_v41 = vadd.f32 %v1830_v62, %v1662_v34  ;;  %1365 = vmatmul.bf16.gmra.mxu0 %v2744_v32  ;;  %v1496_v45 = vadd.f32 %v1495_v36, %v1327_v38  ;;  %v2761_v62 = vld [vmem:[%s3495_s23 + $0x1b0] sm:$0xf0]  ;;  %v3289_v34 = vld [vmem:[%s3495_s23 + $0x1cc] sm:$0xf0]  ;;  %v3287_v38 = vld [vmem:[%s3495_s23 + $0x1c4] sm:$0xf] }
  0xed   : > { %1534 = vmatmul.bf16.gmra.mxu1 %v2748_v33  ;;  %v2764_v10 = vor.u32 %v3283_v61, %v2761_v62  ;;  %v2775_v33 = vld [vmem:[%s3495_s23 + $0x1c0] sm:$0xf] }
  0xee   : > { %v1980_v42 = vpack.c.bf16 %v1831_v41, %v1831_v41  ;;  %v2116_v43 = vsel %vm2102_vm2, %v1831_v41, 0.0  ;;  %v2245_v44 = vmul.f32 %v1831_v41, %v1831_v41  ;;  %1703 = vmatmul.bf16.gmra.mxu2 %v2752_v37  ;;  %v1838_v53 = vpop.f32.mrf.mxu3  ;;  %v2783_v41 = vld [vmem:[%s3495_s23 + $0x1c8] sm:$0xf] }
  0xef   : > { %v2117_v46 = vadd.f32 %v2116_v43, %v2115_v23  ;;  %v3292_v43 = vld [vmem:[%s3495_s23 + $0x1ec] sm:$0xf] }
  0xf0   : > { %2045 = vst.msk [vmem:[%s3640_s20 + $0x1c] sm:$0xf] %vm2037_vm1, %v1980_v42  ;;  %v2315_v47 = vsel %vm2102_vm2, %v2245_v44, 0.0  ;;  %v3290_v42 = vld [vmem:[%s3495_s23 + $0x1d4] sm:$0xf0] }
  0xf1   : > { %v2316_v48 = vadd.f32 %v2315_v47, %v2314_v30  ;;  %v1664_v49 = vpop.f32.mrf.mxu2  ;;  %v1328_v51 = vpop.f32.mrf.mxu0 }
  0xf2   : > { %v1665_v50 = vadd.f32 %v1664_v49, %v1496_v45  ;;  %v1497_v52 = vpop.f32.mrf.mxu1  ;;  %v1329_v55 = vadd.f32 %v3627_v3, %v1328_v51  ;;  %v2776_v49 = vor.u32 %v3289_v34, %v2775_v33 }
  0xf4   : > { %v1834_v54 = vadd.f32 %v1833_v13, %v1665_v50  ;;  %v1498_v5 = vadd.f32 %v1497_v52, %v1329_v55 }
  0xf6   : > { %v1981_v58 = vpack.c.bf16 %v1834_v54, %v1834_v54  ;;  %v2118_v59 = vsel %vm2102_vm2, %v1834_v54, 0.0  ;;  %v2246_v60 = vmul.f32 %v1834_v54, %v1834_v54  ;;  %v1840_v16 = vpop.f32.mrf.mxu3  ;;  %v2784_v54 = vor.u32 %v3290_v42, %v2783_v41 }
  0xf7   : > { %v2119_v63 = vadd.f32 %v2118_v59, %v2117_v46  ;;  %v2801_v46 = vld [vmem:[%s3495_s23 + $0x1f8] sm:$0xf0] }
  0xf8   : > { %2046 = vst.msk [vmem:[%s3640_s20 + $0x20] sm:$0xf] %vm2037_vm1, %v1981_v58  ;;  %v2317_v4 = vsel %vm2102_vm2, %v2246_v60, 0.0  ;;  %v2804_v57 = vor.u32 %v3292_v43, %v2801_v46 }
  0xf9   : > { %v2318_v7 = vadd.f32 %v2317_v4, %v2316_v48  ;;  %v1666_v8 = vpop.f32.mrf.mxu2  ;;  %v1331_v12 = vpop.f32.mrf.mxu0 }
  0xfa   : > { %v1667_v11 = vadd.f32 %v1666_v8, %v1498_v5  ;;  %v1500_v13 = vpop.f32.mrf.mxu1  ;;  %v1332_v15 = vadd.f32 %v3627_v3, %v1331_v12 }
  0xfb   : > { %3183 = vmatmul.msk.bf16.gmra.mxu3 %vm1200_vm0, %v2788_v17 }
  0xfc   : > { %v1836_v18 = vadd.f32 %v1835_v39, %v1667_v11  ;;  %1370 = vmatmul.bf16.gmra.mxu0 %v2760_v9  ;;  %v1501_v22 = vadd.f32 %v1500_v13, %v1332_v15  ;;  %v2777_v39 = vld [vmem:[%s3495_s23 + $0x1d0] sm:$0xf0]  ;;  %v3293_v11 = vld [vmem:[%s3495_s23 + $0x1ec] sm:$0xf0]  ;;  %v3291_v15 = vld [vmem:[%s3495_s23 + $0x1e4] sm:$0xf] }
  0xfd   : > { %1539 = vmatmul.bf16.gmra.mxu1 %v2764_v10  ;;  %v2780_v50 = vor.u32 %v3287_v38, %v2777_v39  ;;  %v2791_v10 = vld [vmem:[%s3495_s23 + $0x1e0] sm:$0xf] }
  0xfe   : > { %v1982_v19 = vpack.c.bf16 %v1836_v18, %v1836_v18  ;;  %v2120_v20 = vsel %vm2102_vm2, %v1836_v18, 0.0  ;;  %v2247_v21 = vmul.f32 %v1836_v18, %v1836_v18  ;;  %1708 = vmatmul.bf16.gmra.mxu2 %v2768_v14  ;;  %v1843_v30 = vpop.f32.mrf.mxu3  ;;  %v2799_v18 = vld [vmem:[%s3495_s23 + $0x1e8] sm:$0xf] }
  0xff   : > { %v2121_v23 = vadd.f32 %v2120_v20, %v2119_v63  ;;  %v3296_v20 = vld [vmem:[%s3495_s23 + $0x20c] sm:$0xf] }
 0x100   : > { %2047 = vst.msk [vmem:[%s3640_s20 + $0x24] sm:$0xf] %vm2037_vm1, %v1982_v19  ;;  %v2319_v24 = vsel %vm2102_vm2, %v2247_v21, 0.0  ;;  %v3294_v19 = vld [vmem:[%s3495_s23 + $0x1f4] sm:$0xf0] }
 0x101   : > { %v2320_v25 = vadd.f32 %v2319_v24, %v2318_v7  ;;  %v1669_v26 = vpop.f32.mrf.mxu2  ;;  %v1333_v28 = vpop.f32.mrf.mxu0 }
 0x102   : > { %v1670_v27 = vadd.f32 %v1669_v26, %v1501_v22  ;;  %v1502_v29 = vpop.f32.mrf.mxu1  ;;  %v1334_v32 = vadd.f32 %v3627_v3, %v1333_v28  ;;  %v2792_v26 = vor.u32 %v3293_v11, %v2791_v10 }
 0x104   : > { %v1839_v31 = vadd.f32 %v1838_v53, %v1670_v27  ;;  %v1503_v45 = vadd.f32 %v1502_v29, %v1334_v32 }
 0x106   : > { %v1983_v35 = vpack.c.bf16 %v1839_v31, %v1839_v31  ;;  %v2122_v36 = vsel %vm2102_vm2, %v1839_v31, 0.0  ;;  %v2248_v37 = vmul.f32 %v1839_v31, %v1839_v31  ;;  %v1845_v56 = vpop.f32.mrf.mxu3  ;;  %v2800_v31 = vor.u32 %v3294_v19, %v2799_v18 }
 0x107   : > { %v2123_v40 = vadd.f32 %v2122_v36, %v2121_v23  ;;  %v2817_v23 = vld [vmem:[%s3495_s23 + $0x218] sm:$0xf0] }
 0x108   : > { %2048 = vst.msk [vmem:[%s3640_s20 + $0x28] sm:$0xf] %vm2037_vm1, %v1983_v35  ;;  %v2321_v44 = vsel %vm2102_vm2, %v2248_v37, 0.0  ;;  %v2820_v34 = vor.u32 %v3296_v20, %v2817_v23 }
 0x109   : > { %v2322_v47 = vadd.f32 %v2321_v44, %v2320_v25  ;;  %v1671_v48 = vpop.f32.mrf.mxu2  ;;  %v1336_v52 = vpop.f32.mrf.mxu0 }
 0x10a   : > { %v1672_v51 = vadd.f32 %v1671_v48, %v1503_v45  ;;  %v1505_v53 = vpop.f32.mrf.mxu1  ;;  %v1337_v55 = vadd.f32 %v3627_v3, %v1336_v52 }
 0x10b   : > { %3184 = vmatmul.msk.bf16.gmra.mxu3 %vm1200_vm0, %v2804_v57 }
 0x10c   : > { %v1841_v58 = vadd.f32 %v1840_v16, %v1672_v51  ;;  %1375 = vmatmul.bf16.gmra.mxu0 %v2776_v49  ;;  %v1506_v62 = vadd.f32 %v1505_v53, %v1337_v55  ;;  %v2793_v16 = vld [vmem:[%s3495_s23 + $0x1f0] sm:$0xf0]  ;;  %v3297_v51 = vld [vmem:[%s3495_s23 + $0x20c] sm:$0xf0]  ;;  %v3295_v55 = vld [vmem:[%s3495_s23 + $0x204] sm:$0xf] }
 0x10d   : > { %1544 = vmatmul.bf16.gmra.mxu1 %v2780_v50  ;;  %v2796_v27 = vor.u32 %v3291_v15, %v2793_v16  ;;  %v2807_v50 = vld [vmem:[%s3495_s23 + $0x200] sm:$0xf] }
 0x10e   : > { %v1984_v59 = vpack.c.bf16 %v1841_v58, %v1841_v58  ;;  %v2124_v60 = vsel %vm2102_vm2, %v1841_v58, 0.0  ;;  %v2249_v61 = vmul.f32 %v1841_v58, %v1841_v58  ;;  %1713 = vmatmul.bf16.gmra.mxu2 %v2784_v54  ;;  %v1848_v7 = vpop.f32.mrf.mxu3  ;;  %v2815_v58 = vld [vmem:[%s3495_s23 + $0x208] sm:$0xf] }
 0x10f   : > { %v2125_v63 = vadd.f32 %v2124_v60, %v2123_v40  ;;  %v3300_v60 = vld [vmem:[%s3495_s23 + $0x22c] sm:$0xf] }
 0x110   : > { %2049 = vst.msk [vmem:[%s3640_s20 + $0x2c] sm:$0xf] %vm2037_vm1, %v1984_v59  ;;  %v2323_v0 = vsel %vm2102_vm2, %v2249_v61, 0.0  ;;  %v3298_v59 = vld [vmem:[%s3495_s23 + $0x214] sm:$0xf0] }
 0x111   : > { %v2324_v1 = vadd.f32 %v2323_v0, %v2322_v47  ;;  %v1674_v2 = vpop.f32.mrf.mxu2  ;;  %v1338_v5 = vpop.f32.mrf.mxu0 }
 0x112   : > { %v1675_v4 = vadd.f32 %v1674_v2, %v1506_v62  ;;  %v1507_v6 = vpop.f32.mrf.mxu1  ;;  %v1339_v9 = vadd.f32 %v3627_v3, %v1338_v5  ;;  %v2808_v2 = vor.u32 %v3297_v51, %v2807_v50 }
 0x114   : > { %v1844_v8 = vadd.f32 %v1843_v30, %v1675_v4  ;;  %v1508_v22 = vadd.f32 %v1507_v6, %v1339_v9 }
 0x116   : > { %v1985_v12 = vpack.c.bf16 %v1844_v8, %v1844_v8  ;;  %v2126_v13 = vsel %vm2102_vm2, %v1844_v8, 0.0  ;;  %v2250_v14 = vmul.f32 %v1844_v8, %v1844_v8  ;;  %v1850_v33 = vpop.f32.mrf.mxu3  ;;  %v2816_v8 = vor.u32 %v3298_v59, %v2815_v58 }
 0x117   : > { %v2127_v17 = vadd.f32 %v2126_v13, %v2125_v63  ;;  %v2833_v63 = vld [vmem:[%s3495_s23 + $0x238] sm:$0xf0] }
 0x118   : > { %2050 = vst.msk [vmem:[%s3640_s20 + $0x30] sm:$0xf] %vm2037_vm1, %v1985_v12  ;;  %v2325_v21 = vsel %vm2102_vm2, %v2250_v14, 0.0  ;;  %v2836_v11 = vor.u32 %v3300_v60, %v2833_v63 }
 0x119   : > { %v2326_v24 = vadd.f32 %v2325_v21, %v2324_v1  ;;  %v1676_v25 = vpop.f32.mrf.mxu2  ;;  %v1341_v29 = vpop.f32.mrf.mxu0 }
 0x11a   : > { %v1677_v28 = vadd.f32 %v1676_v25, %v1508_v22  ;;  %v1510_v30 = vpop.f32.mrf.mxu1  ;;  %v1342_v32 = vadd.f32 %v3627_v3, %v1341_v29 }
 0x11b   : > { %3185 = vmatmul.msk.bf16.gmra.mxu3 %vm1200_vm0, %v2820_v34 }
 0x11c   : > { %v1846_v35 = vadd.f32 %v1845_v56, %v1677_v28  ;;  %1380 = vmatmul.bf16.gmra.mxu0 %v2792_v26  ;;  %v1511_v39 = vadd.f32 %v1510_v30, %v1342_v32  ;;  %v2809_v56 = vld [vmem:[%s3495_s23 + $0x210] sm:$0xf0]  ;;  %v3301_v28 = vld [vmem:[%s3495_s23 + $0x22c] sm:$0xf0]  ;;  %v3299_v32 = vld [vmem:[%s3495_s23 + $0x224] sm:$0xf] }
 0x11d   : > { %1549 = vmatmul.bf16.gmra.mxu1 %v2796_v27  ;;  %v2812_v4 = vor.u32 %v3295_v55, %v2809_v56  ;;  %v2823_v27 = vld [vmem:[%s3495_s23 + $0x220] sm:$0xf] }
 0x11e   : > { %v1986_v36 = vpack.c.bf16 %v1846_v35, %v1846_v35  ;;  %v2128_v37 = vsel %vm2102_vm2, %v1846_v35, 0.0  ;;  %v2251_v38 = vmul.f32 %v1846_v35, %v1846_v35  ;;  %1718 = vmatmul.bf16.gmra.mxu2 %v2800_v31  ;;  %v1853_v47 = vpop.f32.mrf.mxu3  ;;  %v2831_v35 = vld [vmem:[%s3495_s23 + $0x228] sm:$0xf] }
 0x11f   : > { %v2129_v40 = vadd.f32 %v2128_v37, %v2127_v17  ;;  %v3304_v37 = vld [vmem:[%s3495_s23 + $0x24c] sm:$0xf] }
 0x120   : > { %2051 = vst.msk [vmem:[%s3640_s20 + $0x34] sm:$0xf] %vm2037_vm1, %v1986_v36  ;;  %v2327_v41 = vsel %vm2102_vm2, %v2251_v38, 0.0  ;;  %v3302_v36 = vld [vmem:[%s3495_s23 + $0x234] sm:$0xf0] }
 0x121   : > { %v2328_v42 = vadd.f32 %v2327_v41, %v2326_v24  ;;  %v1679_v43 = vpop.f32.mrf.mxu2  ;;  %v1343_v45 = vpop.f32.mrf.mxu0 }
 0x122   : > { %v1680_v44 = vadd.f32 %v1679_v43, %v1511_v39  ;;  %v1512_v46 = vpop.f32.mrf.mxu1  ;;  %v1344_v49 = vadd.f32 %v3627_v3, %v1343_v45  ;;  %v2824_v43 = vor.u32 %v3301_v28, %v2823_v27 }
 0x124   : > { %v1849_v48 = vadd.f32 %v1848_v7, %v1680_v44  ;;  %v1513_v62 = vadd.f32 %v1512_v46, %v1344_v49 }
 0x126   : > { %v1987_v52 = vpack.c.bf16 %v1849_v48, %v1849_v48  ;;  %v2130_v53 = vsel %vm2102_vm2, %v1849_v48, 0.0  ;;  %v2252_v54 = vmul.f32 %v1849_v48, %v1849_v48  ;;  %v1855_v10 = vpop.f32.mrf.mxu3  ;;  %v2832_v48 = vor.u32 %v3302_v36, %v2831_v35 }
 0x127   : > { %v2131_v57 = vadd.f32 %v2130_v53, %v2129_v40  ;;  %v2849_v40 = vld [vmem:[%s3495_s23 + $0x258] sm:$0xf0] }
 0x128   : > { %2052 = vst.msk [vmem:[%s3640_s20 + $0x38] sm:$0xf] %vm2037_vm1, %v1987_v52  ;;  %v2329_v61 = vsel %vm2102_vm2, %v2252_v54, 0.0  ;;  %v2852_v51 = vor.u32 %v3304_v37, %v2849_v40 }
 0x129   : > { %v2330_v0 = vadd.f32 %v2329_v61, %v2328_v42  ;;  %v1681_v1 = vpop.f32.mrf.mxu2  ;;  %v1346_v6 = vpop.f32.mrf.mxu0 }
 0x12a   : > { %v1682_v5 = vadd.f32 %v1681_v1, %v1513_v62  ;;  %v1515_v7 = vpop.f32.mrf.mxu1  ;;  %v1347_v9 = vadd.f32 %v3627_v3, %v1346_v6 }
 0x12b   : > { %3186 = vmatmul.msk.bf16.gmra.mxu3 %vm1200_vm0, %v2836_v11 }
 0x12c   : > { %v1851_v12 = vadd.f32 %v1850_v33, %v1682_v5  ;;  %1385 = vmatmul.bf16.gmra.mxu0 %v2808_v2  ;;  %v1516_v16 = vadd.f32 %v1515_v7, %v1347_v9  ;;  %v2825_v33 = vld [vmem:[%s3495_s23 + $0x230] sm:$0xf0]  ;;  %v3305_v5 = vld [vmem:[%s3495_s23 + $0x24c] sm:$0xf0]  ;;  %v3303_v9 = vld [vmem:[%s3495_s23 + $0x244] sm:$0xf] }
 0x12d   : > { %1554 = vmatmul.bf16.gmra.mxu1 %v2812_v4  ;;  %v2828_v44 = vor.u32 %v3299_v32, %v2825_v33  ;;  %v2839_v4 = vld [vmem:[%s3495_s23 + $0x240] sm:$0xf] }
 0x12e   : > { %v1988_v13 = vpack.c.bf16 %v1851_v12, %v1851_v12  ;;  %v2132_v14 = vsel %vm2102_vm2, %v1851_v12, 0.0  ;;  %v2253_v15 = vmul.f32 %v1851_v12, %v1851_v12  ;;  %1723 = vmatmul.bf16.gmra.mxu2 %v2816_v8  ;;  %v1858_v24 = vpop.f32.mrf.mxu3  ;;  %v2847_v12 = vld [vmem:[%s3495_s23 + $0x248] sm:$0xf] }
 0x12f   : > { %v2133_v17 = vadd.f32 %v2132_v14, %v2131_v57  ;;  %v3308_v14 = vld [vmem:[%s3495_s23 + $0x26c] sm:$0xf] }
 0x130   : > { %2053 = vst.msk [vmem:[%s3640_s20 + $0x3c] sm:$0xf] %vm2037_vm1, %v1988_v13  ;;  %v2331_v18 = vsel %vm2102_vm2, %v2253_v15, 0.0  ;;  %v3306_v13 = vld [vmem:[%s3495_s23 + $0x254] sm:$0xf0] }
 0x131   : > { %v2332_v19 = vadd.f32 %v2331_v18, %v2330_v0  ;;  %v1684_v20 = vpop.f32.mrf.mxu2  ;;  %v1348_v22 = vpop.f32.mrf.mxu0 }
 0x132   : > { %v1685_v21 = vadd.f32 %v1684_v20, %v1516_v16  ;;  %v1517_v23 = vpop.f32.mrf.mxu1  ;;  %v1349_v26 = vadd.f32 %v3627_v3, %v1348_v22  ;;  %v2840_v20 = vor.u32 %v3305_v5, %v2839_v4 }
 0x134   : > { %v1854_v25 = vadd.f32 %v1853_v47, %v1685_v21  ;;  %v1518_v39 = vadd.f32 %v1517_v23, %v1349_v26 }
 0x136   : > { %v1989_v29 = vpack.c.bf16 %v1854_v25, %v1854_v25  ;;  %v2134_v30 = vsel %vm2102_vm2, %v1854_v25, 0.0  ;;  %v2254_v31 = vmul.f32 %v1854_v25, %v1854_v25  ;;  %v1860_v50 = vpop.f32.mrf.mxu3  ;;  %v2848_v25 = vor.u32 %v3306_v13, %v2847_v12 }
 0x137   : > { %v2135_v34 = vadd.f32 %v2134_v30, %v2133_v17  ;;  %v2865_v17 = vld [vmem:[%s3495_s23 + $0x278] sm:$0xf0] }
 0x138   : > { %2054 = vst.msk [vmem:[%s3640_s20 + $0x40] sm:$0xf] %vm2037_vm1, %v1989_v29  ;;  %v2333_v38 = vsel %vm2102_vm2, %v2254_v31, 0.0  ;;  %v2868_v28 = vor.u32 %v3308_v14, %v2865_v17 }
 0x139   : > { %v2334_v41 = vadd.f32 %v2333_v38, %v2332_v19  ;;  %v1686_v42 = vpop.f32.mrf.mxu2  ;;  %v1351_v46 = vpop.f32.mrf.mxu0 }
 0x13a   : > { %v1687_v45 = vadd.f32 %v1686_v42, %v1518_v39  ;;  %v1520_v47 = vpop.f32.mrf.mxu1  ;;  %v1352_v49 = vadd.f32 %v3627_v3, %v1351_v46 }
 0x13b   : > { %3187 = vmatmul.msk.bf16.gmra.mxu3 %vm1200_vm0, %v2852_v51 }
 0x13c   : > { %v1856_v52 = vadd.f32 %v1855_v10, %v1687_v45  ;;  %1390 = vmatmul.bf16.gmra.mxu0 %v2824_v43  ;;  %v1521_v56 = vadd.f32 %v1520_v47, %v1352_v49  ;;  %v2841_v10 = vld [vmem:[%s3495_s23 + $0x250] sm:$0xf0]  ;;  %v3309_v45 = vld [vmem:[%s3495_s23 + $0x26c] sm:$0xf0]  ;;  %v3307_v49 = vld [vmem:[%s3495_s23 + $0x264] sm:$0xf] }
 0x13d   : > { %1559 = vmatmul.bf16.gmra.mxu1 %v2828_v44  ;;  %v2844_v21 = vor.u32 %v3303_v9, %v2841_v10  ;;  %v2855_v44 = vld [vmem:[%s3495_s23 + $0x260] sm:$0xf] }
 0x13e   : > { %v1990_v53 = vpack.c.bf16 %v1856_v52, %v1856_v52  ;;  %v2136_v54 = vsel %vm2102_vm2, %v1856_v52, 0.0  ;;  %v2255_v55 = vmul.f32 %v1856_v52, %v1856_v52  ;;  %1728 = vmatmul.bf16.gmra.mxu2 %v2832_v48  ;;  %v1863_v0 = vpop.f32.mrf.mxu3  ;;  %v2863_v52 = vld [vmem:[%s3495_s23 + $0x268] sm:$0xf] }
 0x13f   : > { %v2137_v57 = vadd.f32 %v2136_v54, %v2135_v34  ;;  %v3312_v54 = vld [vmem:[%s3495_s23 + $0x28c] sm:$0xf] }
 0x140   : > { %2055 = vst.msk [vmem:[%s3640_s20 + $0x44] sm:$0xf] %vm2037_vm1, %v1990_v53  ;;  %v2335_v58 = vsel %vm2102_vm2, %v2255_v55, 0.0  ;;  %v3310_v53 = vld [vmem:[%s3495_s23 + $0x274] sm:$0xf0] }
 0x141   : > { %v2336_v59 = vadd.f32 %v2335_v58, %v2334_v41  ;;  %v1689_v60 = vpop.f32.mrf.mxu2  ;;  %v1353_v62 = vpop.f32.mrf.mxu0 }
 0x142   : > { %v1690_v61 = vadd.f32 %v1689_v60, %v1521_v56  ;;  %v1522_v63 = vpop.f32.mrf.mxu1  ;;  %v1354_v2 = vadd.f32 %v3627_v3, %v1353_v62  ;;  %v2856_v60 = vor.u32 %v3309_v45, %v2855_v44 }
 0x144   : > { %v1859_v1 = vadd.f32 %v1858_v24, %v1690_v61  ;;  %v1523_v16 = vadd.f32 %v1522_v63, %v1354_v2 }
 0x146   : > { %v1991_v6 = vpack.c.bf16 %v1859_v1, %v1859_v1  ;;  %v2138_v7 = vsel %vm2102_vm2, %v1859_v1, 0.0  ;;  %v2256_v8 = vmul.f32 %v1859_v1, %v1859_v1  ;;  %v1865_v27 = vpop.f32.mrf.mxu3  ;;  %v2864_v1 = vor.u32 %v3310_v53, %v2863_v52 }
 0x147   : > { %v2139_v11 = vadd.f32 %v2138_v7, %v2137_v57  ;;  %v2881_v57 = vld [vmem:[%s3495_s23 + $0x298] sm:$0xf0] }
 0x148   : > { %2056 = vst.msk [vmem:[%s3640_s20 + $0x48] sm:$0xf] %vm2037_vm1, %v1991_v6  ;;  %v2337_v15 = vsel %vm2102_vm2, %v2256_v8, 0.0  ;;  %v2884_v5 = vor.u32 %v3312_v54, %v2881_v57 }
 0x149   : > { %v2338_v18 = vadd.f32 %v2337_v15, %v2336_v59  ;;  %v1691_v19 = vpop.f32.mrf.mxu2  ;;  %v1356_v23 = vpop.f32.mrf.mxu0 }
 0x14a   : > { %v1692_v22 = vadd.f32 %v1691_v19, %v1523_v16  ;;  %v1525_v24 = vpop.f32.mrf.mxu1  ;;  %v1357_v26 = vadd.f32 %v3627_v3, %v1356_v23  ;;  %v3853_v19 = vld [vmem:[%s4224_s2] ss:$0 sm:$0xff] }
 0x14b   : > { %3188 = vmatmul.msk.bf16.gmra.mxu3 %vm1200_vm0, %v2868_v28 }
 0x14c   : > { %v1861_v29 = vadd.f32 %v1860_v50, %v1692_v22  ;;  %1395 = vmatmul.bf16.gmra.mxu0 %v2840_v20  ;;  %v1526_v33 = vadd.f32 %v1525_v24, %v1357_v26  ;;  %v2857_v50 = vld [vmem:[%s3495_s23 + $0x270] sm:$0xf0]  ;;  %v3313_v22 = vld [vmem:[%s3495_s23 + $0x28c] sm:$0xf0]  ;;  %v3311_v26 = vld [vmem:[%s3495_s23 + $0x284] sm:$0xf] }
 0x14d   : > { %1564 = vmatmul.bf16.gmra.mxu1 %v2844_v21  ;;  %v2860_v61 = vor.u32 %v3307_v49, %v2857_v50  ;;  %v2871_v21 = vld [vmem:[%s3495_s23 + $0x280] sm:$0xf] }
 0x14e   : > { %v1992_v30 = vpack.c.bf16 %v1861_v29, %v1861_v29  ;;  %v2140_v31 = vsel %vm2102_vm2, %v1861_v29, 0.0  ;;  %v2257_v32 = vmul.f32 %v1861_v29, %v1861_v29  ;;  %1733 = vmatmul.bf16.gmra.mxu2 %v2848_v25  ;;  %v1868_v41 = vpop.f32.mrf.mxu3  ;;  %v2879_v29 = vld [vmem:[%s3495_s23 + $0x288] sm:$0xf] }
 0x14f   : > { %v2141_v34 = vadd.f32 %v2140_v31, %v2139_v11  ;;  %v3316_v31 = vld [vmem:[%s3495_s23 + $0x2ac] sm:$0xf] }
 0x150   : > { %2057 = vst.msk [vmem:[%s3640_s20 + $0x4c] sm:$0xf] %vm2037_vm1, %v1992_v30  ;;  %v2339_v35 = vsel %vm2102_vm2, %v2257_v32, 0.0  ;;  %v3314_v30 = vld [vmem:[%s3495_s23 + $0x294] sm:$0xf0] }
 0x151   : > { %v2340_v36 = vadd.f32 %v2339_v35, %v2338_v18  ;;  %v1694_v37 = vpop.f32.mrf.mxu2  ;;  %v1358_v39 = vpop.f32.mrf.mxu0 }
 0x152   : > { %v1695_v38 = vadd.f32 %v1694_v37, %v1526_v33  ;;  %v1527_v40 = vpop.f32.mrf.mxu1  ;;  %v1359_v43 = vadd.f32 %v3627_v3, %v1358_v39  ;;  %v2872_v37 = vor.u32 %v3313_v22, %v2871_v21 }
 0x154   : > { %v1864_v42 = vadd.f32 %v1863_v0, %v1695_v38  ;;  %v1528_v56 = vadd.f32 %v1527_v40, %v1359_v43 }
 0x156   : > { %v1993_v46 = vpack.c.bf16 %v1864_v42, %v1864_v42  ;;  %v2142_v47 = vsel %vm2102_vm2, %v1864_v42, 0.0  ;;  %v2258_v48 = vmul.f32 %v1864_v42, %v1864_v42  ;;  %v1870_v4 = vpop.f32.mrf.mxu3  ;;  %v2880_v42 = vor.u32 %v3314_v30, %v2879_v29 }
 0x157   : > { %v2143_v51 = vadd.f32 %v2142_v47, %v2141_v34  ;;  %v2897_v34 = vld [vmem:[%s3495_s23 + $0x2b8] sm:$0xf0] }
 0x158   : > { %2058 = vst.msk [vmem:[%s3640_s20 + $0x50] sm:$0xf] %vm2037_vm1, %v1993_v46  ;;  %v2341_v55 = vsel %vm2102_vm2, %v2258_v48, 0.0  ;;  %v2900_v45 = vor.u32 %v3316_v31, %v2897_v34 }
 0x159   : > { %v2342_v58 = vadd.f32 %v2341_v55, %v2340_v36  ;;  %v1696_v59 = vpop.f32.mrf.mxu2  ;;  %v1361_v63 = vpop.f32.mrf.mxu0 }
 0x15a   : > { %v1697_v62 = vadd.f32 %v1696_v59, %v1528_v56  ;;  %v1530_v0 = vpop.f32.mrf.mxu1  ;;  %v1362_v2 = vadd.f32 %v3627_v3, %v1361_v63 }
 0x15b   : > { %3189 = vmatmul.msk.bf16.gmra.mxu3 %vm1200_vm0, %v2884_v5 }
 0x15c   : > { %v1866_v6 = vadd.f32 %v1865_v27, %v1697_v62  ;;  %1400 = vmatmul.bf16.gmra.mxu0 %v2856_v60  ;;  %v1531_v10 = vadd.f32 %v1530_v0, %v1362_v2  ;;  %v2873_v27 = vld [vmem:[%s3495_s23 + $0x290] sm:$0xf0]  ;;  %v3317_v62 = vld [vmem:[%s3495_s23 + $0x2ac] sm:$0xf0]  ;;  %v3315_v2 = vld [vmem:[%s3495_s23 + $0x2a4] sm:$0xf] }
 0x15d   : > { %1569 = vmatmul.bf16.gmra.mxu1 %v2860_v61  ;;  %v2876_v38 = vor.u32 %v3311_v26, %v2873_v27  ;;  %v2887_v61 = vld [vmem:[%s3495_s23 + $0x2a0] sm:$0xf] }
 0x15e   : > { %v1994_v7 = vpack.c.bf16 %v1866_v6, %v1866_v6  ;;  %v2144_v8 = vsel %vm2102_vm2, %v1866_v6, 0.0  ;;  %v2259_v9 = vmul.f32 %v1866_v6, %v1866_v6  ;;  %1738 = vmatmul.bf16.gmra.mxu2 %v2864_v1  ;;  %v1873_v17 = vpop.f32.mrf.mxu3  ;;  %v2895_v6 = vld [vmem:[%s3495_s23 + $0x2a8] sm:$0xf] }
 0x15f   : > { %v2145_v11 = vadd.f32 %v2144_v8, %v2143_v51  ;;  %v3320_v8 = vld [vmem:[%s3495_s23 + $0x2cc] sm:$0xf] }
 0x160   : > { %2059 = vst.msk [vmem:[%s3640_s20 + $0x54] sm:$0xf] %vm2037_vm1, %v1994_v7  ;;  %v2343_v3 = vsel %vm2102_vm2, %v2259_v9, 0.0  ;;  %v3318_v7 = vld [vmem:[%s3495_s23 + $0x2b4] sm:$0xf0] }
 0x161   : > { %v2344_v12 = vadd.f32 %v2343_v3, %v2342_v58  ;;  %v1699_v13 = vpop.f32.mrf.mxu2  ;;  %v1363_v15 = vpop.f32.mrf.mxu0 }
 0x162   : > { %v1700_v14 = vadd.f32 %v1699_v13, %v1531_v10  ;;  %v1532_v16 = vpop.f32.mrf.mxu1  ;;  %v1364_v20 = vadd.f32 %v3853_v19, %v1363_v15  ;;  %v2888_v13 = vor.u32 %v3317_v62, %v2887_v61 }
 0x164   : > { %v1869_v18 = vadd.f32 %v1868_v41, %v1700_v14  ;;  %v1533_v33 = vadd.f32 %v1532_v16, %v1364_v20 }
 0x166   : > { %v1995_v23 = vpack.c.bf16 %v1869_v18, %v1869_v18  ;;  %v2146_v24 = vsel %vm2102_vm2, %v1869_v18, 0.0  ;;  %v2260_v25 = vmul.f32 %v1869_v18, %v1869_v18  ;;  %v1875_v44 = vpop.f32.mrf.mxu3  ;;  %v2896_v18 = vor.u32 %v3318_v7, %v2895_v6 }
 0x167   : > { %v2147_v28 = vadd.f32 %v2146_v24, %v2145_v11  ;;  %v2913_v11 = vld [vmem:[%s3495_s23 + $0x2d8] sm:$0xf0] }
 0x168   : > { %2060 = vst.msk [vmem:[%s3640_s20 + $0x58] sm:$0xf] %vm2037_vm1, %v1995_v23  ;;  %v2345_v32 = vsel %vm2102_vm2, %v2260_v25, 0.0  ;;  %v2916_v22 = vor.u32 %v3320_v8, %v2913_v11 }
 0x169   : > { %v2346_v35 = vadd.f32 %v2345_v32, %v2344_v12  ;;  %v1701_v36 = vpop.f32.mrf.mxu2  ;;  %v1366_v40 = vpop.f32.mrf.mxu0 }
 0x16a   : > { %v1702_v39 = vadd.f32 %v1701_v36, %v1533_v33  ;;  %v1535_v41 = vpop.f32.mrf.mxu1  ;;  %v1367_v43 = vadd.f32 %v3853_v19, %v1366_v40 }
 0x16b   : > { %3190 = vmatmul.msk.bf16.gmra.mxu3 %vm1200_vm0, %v2900_v45 }
 0x16c   : > { %v1871_v46 = vadd.f32 %v1870_v4, %v1702_v39  ;;  %1405 = vmatmul.bf16.gmra.mxu0 %v2872_v37  ;;  %v1536_v50 = vadd.f32 %v1535_v41, %v1367_v43  ;;  %v2889_v4 = vld [vmem:[%s3495_s23 + $0x2b0] sm:$0xf0]  ;;  %v3321_v39 = vld [vmem:[%s3495_s23 + $0x2cc] sm:$0xf0]  ;;  %v3319_v43 = vld [vmem:[%s3495_s23 + $0x2c4] sm:$0xf] }
 0x16d   : > { %1574 = vmatmul.bf16.gmra.mxu1 %v2876_v38  ;;  %v2892_v14 = vor.u32 %v3315_v2, %v2889_v4  ;;  %v2903_v38 = vld [vmem:[%s3495_s23 + $0x2c0] sm:$0xf] }
 0x16e   : > { %v1996_v47 = vpack.c.bf16 %v1871_v46, %v1871_v46  ;;  %v2148_v48 = vsel %vm2102_vm2, %v1871_v46, 0.0  ;;  %v2261_v49 = vmul.f32 %v1871_v46, %v1871_v46  ;;  %1743 = vmatmul.bf16.gmra.mxu2 %v2880_v42  ;;  %v1878_v58 = vpop.f32.mrf.mxu3  ;;  %v2911_v46 = vld [vmem:[%s3495_s23 + $0x2c8] sm:$0xf] }
 0x16f   : > { %v2149_v51 = vadd.f32 %v2148_v48, %v2147_v28  ;;  %v3324_v48 = vld [vmem:[%s3495_s23 + $0x2ec] sm:$0xf] }
 0x170   : > { %2061 = vst.msk [vmem:[%s3640_s20 + $0x5c] sm:$0xf] %vm2037_vm1, %v1996_v47  ;;  %v2347_v52 = vsel %vm2102_vm2, %v2261_v49, 0.0  ;;  %v3322_v47 = vld [vmem:[%s3495_s23 + $0x2d4] sm:$0xf0] }
 0x171   : > { %v2348_v53 = vadd.f32 %v2347_v52, %v2346_v35  ;;  %v1704_v54 = vpop.f32.mrf.mxu2  ;;  %v1368_v56 = vpop.f32.mrf.mxu0 }
 0x172   : > { %v1705_v55 = vadd.f32 %v1704_v54, %v1536_v50  ;;  %v1537_v57 = vpop.f32.mrf.mxu1  ;;  %v1369_v60 = vadd.f32 %v3853_v19, %v1368_v56  ;;  %v2904_v54 = vor.u32 %v3321_v39, %v2903_v38 }
 0x174   : > { %v1874_v59 = vadd.f32 %v1873_v17, %v1705_v55  ;;  %v1538_v10 = vadd.f32 %v1537_v57, %v1369_v60 }
 0x176   : > { %v1997_v63 = vpack.c.bf16 %v1874_v59, %v1874_v59  ;;  %v2150_v0 = vsel %vm2102_vm2, %v1874_v59, 0.0  ;;  %v2262_v1 = vmul.f32 %v1874_v59, %v1874_v59  ;;  %v1880_v21 = vpop.f32.mrf.mxu3  ;;  %v2912_v59 = vor.u32 %v3322_v47, %v2911_v46 }
 0x177   : > { %v2151_v5 = vadd.f32 %v2150_v0, %v2149_v51  ;;  %v2929_v51 = vld [vmem:[%s3495_s23 + $0x2f8] sm:$0xf0] }
 0x178   : > { %2062 = vst.msk [vmem:[%s3640_s20 + $0x60] sm:$0xf] %vm2037_vm1, %v1997_v63  ;;  %v2349_v9 = vsel %vm2102_vm2, %v2262_v1, 0.0  ;;  %v2932_v62 = vor.u32 %v3324_v48, %v2929_v51 }
 0x179   : > { %v2350_v3 = vadd.f32 %v2349_v9, %v2348_v53  ;;  %v1706_v12 = vpop.f32.mrf.mxu2  ;;  %v1371_v16 = vpop.f32.mrf.mxu0 }
 0x17a   : > { %v1707_v15 = vadd.f32 %v1706_v12, %v1538_v10  ;;  %v1540_v17 = vpop.f32.mrf.mxu1  ;;  %v1372_v20 = vadd.f32 %v3853_v19, %v1371_v16 }
 0x17b   : > { %3191 = vmatmul.msk.bf16.gmra.mxu3 %vm1200_vm0, %v2916_v22 }
 0x17c   : > { %v1876_v23 = vadd.f32 %v1875_v44, %v1707_v15  ;;  %1410 = vmatmul.bf16.gmra.mxu0 %v2888_v13  ;;  %v1541_v27 = vadd.f32 %v1540_v17, %v1372_v20  ;;  %v2905_v44 = vld [vmem:[%s3495_s23 + $0x2d0] sm:$0xf0]  ;;  %v3325_v15 = vld [vmem:[%s3495_s23 + $0x2ec] sm:$0xf0]  ;;  %v3323_v20 = vld [vmem:[%s3495_s23 + $0x2e4] sm:$0xf] }
 0x17d   : > { %1579 = vmatmul.bf16.gmra.mxu1 %v2892_v14  ;;  %v2908_v55 = vor.u32 %v3319_v43, %v2905_v44  ;;  %v2919_v14 = vld [vmem:[%s3495_s23 + $0x2e0] sm:$0xf] }
 0x17e   : > { %v1998_v24 = vpack.c.bf16 %v1876_v23, %v1876_v23  ;;  %v2152_v25 = vsel %vm2102_vm2, %v1876_v23, 0.0  ;;  %v2263_v26 = vmul.f32 %v1876_v23, %v1876_v23  ;;  %1748 = vmatmul.bf16.gmra.mxu2 %v2896_v18  ;;  %v1883_v35 = vpop.f32.mrf.mxu3  ;;  %v2927_v23 = vld [vmem:[%s3495_s23 + $0x2e8] sm:$0xf] }
 0x17f   : > { %v2153_v28 = vadd.f32 %v2152_v25, %v2151_v5  ;;  %v3328_v25 = vld [vmem:[%s3495_s23 + $0x30c] sm:$0xf] }
 0x180   : > { %2063 = vst.msk [vmem:[%s3640_s20 + $0x64] sm:$0xf] %vm2037_vm1, %v1998_v24  ;;  %v2351_v29 = vsel %vm2102_vm2, %v2263_v26, 0.0  ;;  %v3326_v24 = vld [vmem:[%s3495_s23 + $0x2f4] sm:$0xf0] }
 0x181   : > { %v2352_v30 = vadd.f32 %v2351_v29, %v2350_v3  ;;  %v1709_v31 = vpop.f32.mrf.mxu2  ;;  %v1373_v33 = vpop.f32.mrf.mxu0 }
 0x182   : > { %v1710_v32 = vadd.f32 %v1709_v31, %v1541_v27  ;;  %v1542_v34 = vpop.f32.mrf.mxu1  ;;  %v1374_v37 = vadd.f32 %v3853_v19, %v1373_v33  ;;  %v2920_v31 = vor.u32 %v3325_v15, %v2919_v14 }
 0x184   : > { %v1879_v36 = vadd.f32 %v1878_v58, %v1710_v32  ;;  %v1543_v50 = vadd.f32 %v1542_v34, %v1374_v37 }
 0x186   : > { %v1999_v40 = vpack.c.bf16 %v1879_v36, %v1879_v36  ;;  %v2154_v41 = vsel %vm2102_vm2, %v1879_v36, 0.0  ;;  %v2264_v42 = vmul.f32 %v1879_v36, %v1879_v36  ;;  %v1885_v61 = vpop.f32.mrf.mxu3  ;;  %v2928_v36 = vor.u32 %v3326_v24, %v2927_v23 }
 0x187   : > { %v2155_v45 = vadd.f32 %v2154_v41, %v2153_v28  ;;  %v2945_v28 = vld [vmem:[%s3495_s23 + $0x318] sm:$0xf0] }
 0x188   : > { %2064 = vst.msk [vmem:[%s3640_s20 + $0x68] sm:$0xf] %vm2037_vm1, %v1999_v40  ;;  %v2353_v49 = vsel %vm2102_vm2, %v2264_v42, 0.0  ;;  %v2948_v39 = vor.u32 %v3328_v25, %v2945_v28 }
 0x189   : > { %v2354_v52 = vadd.f32 %v2353_v49, %v2352_v30  ;;  %v1711_v53 = vpop.f32.mrf.mxu2  ;;  %v1376_v57 = vpop.f32.mrf.mxu0 }
 0x18a   : > { %v1712_v56 = vadd.f32 %v1711_v53, %v1543_v50  ;;  %v1545_v58 = vpop.f32.mrf.mxu1  ;;  %v1377_v60 = vadd.f32 %v3853_v19, %v1376_v57 }
 0x18b   : > { %3192 = vmatmul.msk.bf16.gmra.mxu3 %vm1200_vm0, %v2932_v62 }
 0x18c   : > { %v1881_v63 = vadd.f32 %v1880_v21, %v1712_v56  ;;  %1415 = vmatmul.bf16.gmra.mxu0 %v2904_v54  ;;  %v1546_v4 = vadd.f32 %v1545_v58, %v1377_v60  ;;  %v2921_v21 = vld [vmem:[%s3495_s23 + $0x2f0] sm:$0xf0]  ;;  %v3329_v56 = vld [vmem:[%s3495_s23 + $0x30c] sm:$0xf0]  ;;  %v3327_v60 = vld [vmem:[%s3495_s23 + $0x304] sm:$0xf] }
 0x18d   : > { %1584 = vmatmul.bf16.gmra.mxu1 %v2908_v55  ;;  %v2924_v32 = vor.u32 %v3323_v20, %v2921_v21  ;;  %v2935_v55 = vld [vmem:[%s3495_s23 + $0x300] sm:$0xf] }
 0x18e   : > { %v2000_v0 = vpack.c.bf16 %v1881_v63, %v1881_v63  ;;  %v2156_v1 = vsel %vm2102_vm2, %v1881_v63, 0.0  ;;  %v2265_v2 = vmul.f32 %v1881_v63, %v1881_v63  ;;  %1753 = vmatmul.bf16.gmra.mxu2 %v2912_v59  ;;  %v1888_v3 = vpop.f32.mrf.mxu3  ;;  %v2943_v63 = vld [vmem:[%s3495_s23 + $0x308] sm:$0xf] }
 0x18f   : > { %v2157_v5 = vadd.f32 %v2156_v1, %v2155_v45  ;;  %v3332_v1 = vld [vmem:[%s3495_s23 + $0x32c] sm:$0xf] }
 0x190   : > { %2065 = vst.msk [vmem:[%s3640_s20 + $0x6c] sm:$0xf] %vm2037_vm1, %v2000_v0  ;;  %v2355_v6 = vsel %vm2102_vm2, %v2265_v2, 0.0  ;;  %v3330_v0 = vld [vmem:[%s3495_s23 + $0x314] sm:$0xf0] }
 0x191   : > { %v2356_v7 = vadd.f32 %v2355_v6, %v2354_v52  ;;  %v1714_v8 = vpop.f32.mrf.mxu2  ;;  %v1378_v10 = vpop.f32.mrf.mxu0 }
 0x192   : > { %v1715_v9 = vadd.f32 %v1714_v8, %v1546_v4  ;;  %v1547_v11 = vpop.f32.mrf.mxu1  ;;  %v1379_v13 = vadd.f32 %v3853_v19, %v1378_v10  ;;  %v2936_v8 = vor.u32 %v3329_v56, %v2935_v55 }
 0x194   : > { %v1884_v12 = vadd.f32 %v1883_v35, %v1715_v9  ;;  %v1548_v27 = vadd.f32 %v1547_v11, %v1379_v13 }
 0x196   : > { %v2001_v16 = vpack.c.bf16 %v1884_v12, %v1884_v12  ;;  %v2158_v17 = vsel %vm2102_vm2, %v1884_v12, 0.0  ;;  %v2266_v18 = vmul.f32 %v1884_v12, %v1884_v12  ;;  %v1890_v38 = vpop.f32.mrf.mxu3  ;;  %v2944_v12 = vor.u32 %v3330_v0, %v2943_v63 }
 0x197   : > { %v2159_v22 = vadd.f32 %v2158_v17, %v2157_v5  ;;  %v2961_v5 = vld [vmem:[%s3495_s23 + $0x338] sm:$0xf0] }
 0x198   : > { %2066 = vst.msk [vmem:[%s3640_s20 + $0x70] sm:$0xf] %vm2037_vm1, %v2001_v16  ;;  %v2357_v26 = vsel %vm2102_vm2, %v2266_v18, 0.0  ;;  %v2964_v15 = vor.u32 %v3332_v1, %v2961_v5 }
 0x199   : > { %v2358_v29 = vadd.f32 %v2357_v26, %v2356_v7  ;;  %v1716_v30 = vpop.f32.mrf.mxu2  ;;  %v1381_v34 = vpop.f32.mrf.mxu0 }
 0x19a   : > { %v1717_v33 = vadd.f32 %v1716_v30, %v1548_v27  ;;  %v1550_v35 = vpop.f32.mrf.mxu1  ;;  %v1382_v37 = vadd.f32 %v3853_v19, %v1381_v34 }
 0x19b   : > { %3193 = vmatmul.msk.bf16.gmra.mxu3 %vm1200_vm0, %v2948_v39 }
 0x19c   : > { %v1886_v40 = vadd.f32 %v1885_v61, %v1717_v33  ;;  %1420 = vmatmul.bf16.gmra.mxu0 %v2920_v31  ;;  %v1551_v44 = vadd.f32 %v1550_v35, %v1382_v37  ;;  %v2937_v61 = vld [vmem:[%s3495_s23 + $0x310] sm:$0xf0]  ;;  %v3333_v33 = vld [vmem:[%s3495_s23 + $0x32c] sm:$0xf0]  ;;  %v3331_v37 = vld [vmem:[%s3495_s23 + $0x324] sm:$0xf] }
 0x19d   : > { %1589 = vmatmul.bf16.gmra.mxu1 %v2924_v32  ;;  %v2940_v9 = vor.u32 %v3327_v60, %v2937_v61  ;;  %v2951_v32 = vld [vmem:[%s3495_s23 + $0x320] sm:$0xf] }
 0x19e   : > { %v2002_v41 = vpack.c.bf16 %v1886_v40, %v1886_v40  ;;  %v2160_v42 = vsel %vm2102_vm2, %v1886_v40, 0.0  ;;  %v2267_v43 = vmul.f32 %v1886_v40, %v1886_v40  ;;  %1758 = vmatmul.bf16.gmra.mxu2 %v2928_v36  ;;  %v1893_v52 = vpop.f32.mrf.mxu3  ;;  %v2959_v40 = vld [vmem:[%s3495_s23 + $0x328] sm:$0xf] }
 0x19f   : > { %v2161_v45 = vadd.f32 %v2160_v42, %v2159_v22  ;;  %v3336_v42 = vld [vmem:[%s3495_s23 + $0x34c] sm:$0xf] }
 0x1a0   : > { %2067 = vst.msk [vmem:[%s3640_s20 + $0x74] sm:$0xf] %vm2037_vm1, %v2002_v41  ;;  %v2359_v46 = vsel %vm2102_vm2, %v2267_v43, 0.0  ;;  %v3334_v41 = vld [vmem:[%s3495_s23 + $0x334] sm:$0xf0] }
 0x1a1   : > { %v2360_v47 = vadd.f32 %v2359_v46, %v2358_v29  ;;  %v1719_v48 = vpop.f32.mrf.mxu2  ;;  %v1383_v50 = vpop.f32.mrf.mxu0 }
 0x1a2   : > { %v1720_v49 = vadd.f32 %v1719_v48, %v1551_v44  ;;  %v1552_v51 = vpop.f32.mrf.mxu1  ;;  %v1384_v54 = vadd.f32 %v3853_v19, %v1383_v50  ;;  %v2952_v48 = vor.u32 %v3333_v33, %v2951_v32 }
 0x1a4   : > { %v1889_v53 = vadd.f32 %v1888_v3, %v1720_v49  ;;  %v1553_v4 = vadd.f32 %v1552_v51, %v1384_v54 }
 0x1a6   : > { %v2003_v57 = vpack.c.bf16 %v1889_v53, %v1889_v53  ;;  %v2162_v58 = vsel %vm2102_vm2, %v1889_v53, 0.0  ;;  %v2268_v59 = vmul.f32 %v1889_v53, %v1889_v53  ;;  %v1895_v14 = vpop.f32.mrf.mxu3  ;;  %v2960_v53 = vor.u32 %v3334_v41, %v2959_v40 }
 0x1a7   : > { %v2163_v62 = vadd.f32 %v2162_v58, %v2161_v45  ;;  %v2977_v45 = vld [vmem:[%s3495_s23 + $0x358] sm:$0xf0] }
 0x1a8   : > { %2068 = vst.msk [vmem:[%s3640_s20 + $0x78] sm:$0xf] %vm2037_vm1, %v2003_v57  ;;  %v2361_v2 = vsel %vm2102_vm2, %v2268_v59, 0.0  ;;  %v2980_v56 = vor.u32 %v3336_v42, %v2977_v45 }
 0x1a9   : > { %v2362_v6 = vadd.f32 %v2361_v2, %v2360_v47  ;;  %v1721_v7 = vpop.f32.mrf.mxu2  ;;  %v1386_v11 = vpop.f32.mrf.mxu0 }
 0x1aa   : > { %v1722_v10 = vadd.f32 %v1721_v7, %v1553_v4  ;;  %v1555_v3 = vpop.f32.mrf.mxu1  ;;  %v1387_v13 = vadd.f32 %v3853_v19, %v1386_v11 }
 0x1ab   : > { %3194 = vmatmul.msk.bf16.gmra.mxu3 %vm1200_vm0, %v2964_v15 }
 0x1ac   : > { %v1891_v16 = vadd.f32 %v1890_v38, %v1722_v10  ;;  %1425 = vmatmul.bf16.gmra.mxu0 %v2936_v8  ;;  %v1556_v21 = vadd.f32 %v1555_v3, %v1387_v13  ;;  %v2953_v38 = vld [vmem:[%s3495_s23 + $0x330] sm:$0xf0]  ;;  %v3337_v10 = vld [vmem:[%s3495_s23 + $0x34c] sm:$0xf0]  ;;  %v3335_v13 = vld [vmem:[%s3495_s23 + $0x344] sm:$0xf] }
 0x1ad   : > { %1594 = vmatmul.bf16.gmra.mxu1 %v2940_v9  ;;  %v2956_v49 = vor.u32 %v3331_v37, %v2953_v38  ;;  %v2967_v9 = vld [vmem:[%s3495_s23 + $0x340] sm:$0xf] }
 0x1ae   : > { %v2004_v17 = vpack.c.bf16 %v1891_v16, %v1891_v16  ;;  %v2164_v18 = vsel %vm2102_vm2, %v1891_v16, 0.0  ;;  %v2269_v20 = vmul.f32 %v1891_v16, %v1891_v16  ;;  %1763 = vmatmul.bf16.gmra.mxu2 %v2944_v12  ;;  %v1898_v29 = vpop.f32.mrf.mxu3  ;;  %v2975_v16 = vld [vmem:[%s3495_s23 + $0x348] sm:$0xf] }
 0x1af   : > { %v2165_v22 = vadd.f32 %v2164_v18, %v2163_v62  ;;  %v3340_v18 = vld [vmem:[%s3495_s23 + $0x36c] sm:$0xf] }
 0x1b0   : > { %2069 = vst.msk [vmem:[%s3640_s20 + $0x7c] sm:$0xf] %vm2037_vm1, %v2004_v17  ;;  %v2363_v23 = vsel %vm2102_vm2, %v2269_v20, 0.0  ;;  %v3338_v17 = vld [vmem:[%s3495_s23 + $0x354] sm:$0xf0] }
 0x1b1   : > { %v2364_v24 = vadd.f32 %v2363_v23, %v2362_v6  ;;  %v1724_v25 = vpop.f32.mrf.mxu2  ;;  %v1388_v27 = vpop.f32.mrf.mxu0 }
 0x1b2   : > { %v1725_v26 = vadd.f32 %v1724_v25, %v1556_v21  ;;  %v1557_v28 = vpop.f32.mrf.mxu1  ;;  %v1389_v31 = vadd.f32 %v3853_v19, %v1388_v27  ;;  %v2968_v25 = vor.u32 %v3337_v10, %v2967_v9 }
 0x1b4   : > { %v1894_v30 = vadd.f32 %v1893_v52, %v1725_v26  ;;  %v1558_v44 = vadd.f32 %v1557_v28, %v1389_v31 }
 0x1b6   : > { %v2005_v34 = vpack.c.bf16 %v1894_v30, %v1894_v30  ;;  %v2166_v35 = vsel %vm2102_vm2, %v1894_v30, 0.0  ;;  %v2270_v36 = vmul.f32 %v1894_v30, %v1894_v30  ;;  %v1900_v55 = vpop.f32.mrf.mxu3  ;;  %v2976_v30 = vor.u32 %v3338_v17, %v2975_v16 }
 0x1b7   : > { %v2167_v39 = vadd.f32 %v2166_v35, %v2165_v22  ;;  %v2993_v22 = vld [vmem:[%s3495_s23 + $0x378] sm:$0xf0] }
 0x1b8   : > { %2070 = vst.msk [vmem:[%s3640_s20 + $0x80] sm:$0xf] %vm2037_vm1, %v2005_v34  ;;  %v2365_v43 = vsel %vm2102_vm2, %v2270_v36, 0.0  ;;  %v2996_v33 = vor.u32 %v3340_v18, %v2993_v22 }
 0x1b9   : > { %v2366_v46 = vadd.f32 %v2365_v43, %v2364_v24  ;;  %v1726_v47 = vpop.f32.mrf.mxu2  ;;  %v1391_v51 = vpop.f32.mrf.mxu0 }
 0x1ba   : > { %v1727_v50 = vadd.f32 %v1726_v47, %v1558_v44  ;;  %v1560_v52 = vpop.f32.mrf.mxu1  ;;  %v1392_v54 = vadd.f32 %v3853_v19, %v1391_v51 }
 0x1bb   : > { %3195 = vmatmul.msk.bf16.gmra.mxu3 %vm1200_vm0, %v2980_v56 }
 0x1bc   : > { %v1896_v57 = vadd.f32 %v1895_v14, %v1727_v50  ;;  %1430 = vmatmul.bf16.gmra.mxu0 %v2952_v48  ;;  %v1561_v61 = vadd.f32 %v1560_v52, %v1392_v54  ;;  %v2969_v14 = vld [vmem:[%s3495_s23 + $0x350] sm:$0xf0]  ;;  %v3341_v50 = vld [vmem:[%s3495_s23 + $0x36c] sm:$0xf0]  ;;  %v3339_v54 = vld [vmem:[%s3495_s23 + $0x364] sm:$0xf] }
 0x1bd   : > { %1599 = vmatmul.bf16.gmra.mxu1 %v2956_v49  ;;  %v2972_v26 = vor.u32 %v3335_v13, %v2969_v14  ;;  %v2983_v49 = vld [vmem:[%s3495_s23 + $0x360] sm:$0xf] }
 0x1be   : > { %v2006_v58 = vpack.c.bf16 %v1896_v57, %v1896_v57  ;;  %v2168_v59 = vsel %vm2102_vm2, %v1896_v57, 0.0  ;;  %v2271_v60 = vmul.f32 %v1896_v57, %v1896_v57  ;;  %1768 = vmatmul.bf16.gmra.mxu2 %v2960_v53  ;;  %v1903_v6 = vpop.f32.mrf.mxu3  ;;  %v2991_v57 = vld [vmem:[%s3495_s23 + $0x368] sm:$0xf] }
 0x1bf   : > { %v2169_v62 = vadd.f32 %v2168_v59, %v2167_v39  ;;  %v3344_v59 = vld [vmem:[%s3495_s23 + $0x38c] sm:$0xf] }
 0x1c0   : > { %2071 = vst.msk [vmem:[%s3640_s20 + $0x84] sm:$0xf] %vm2037_vm1, %v2006_v58  ;;  %v2367_v63 = vsel %vm2102_vm2, %v2271_v60, 0.0  ;;  %v3342_v58 = vld [vmem:[%s3495_s23 + $0x374] sm:$0xf0] }
 0x1c1   : > { %v2368_v0 = vadd.f32 %v2367_v63, %v2366_v46  ;;  %v1729_v1 = vpop.f32.mrf.mxu2  ;;  %v1393_v4 = vpop.f32.mrf.mxu0 }
 0x1c2   : > { %v1730_v2 = vadd.f32 %v1729_v1, %v1561_v61  ;;  %v1562_v5 = vpop.f32.mrf.mxu1  ;;  %v1394_v8 = vadd.f32 %v3853_v19, %v1393_v4  ;;  %v2984_v1 = vor.u32 %v3341_v50, %v2983_v49 }
 0x1c4   : > { %v1899_v7 = vadd.f32 %v1898_v29, %v1730_v2  ;;  %v1563_v21 = vadd.f32 %v1562_v5, %v1394_v8 }
 0x1c6   : > { %v2007_v11 = vpack.c.bf16 %v1899_v7, %v1899_v7  ;;  %v2170_v3 = vsel %vm2102_vm2, %v1899_v7, 0.0  ;;  %v2272_v12 = vmul.f32 %v1899_v7, %v1899_v7  ;;  %v1905_v32 = vpop.f32.mrf.mxu3  ;;  %v2992_v7 = vor.u32 %v3342_v58, %v2991_v57 }
 0x1c7   : > { %v2171_v15 = vadd.f32 %v2170_v3, %v2169_v62  ;;  %v3009_v62 = vld [vmem:[%s3495_s23 + $0x398] sm:$0xf0] }
 0x1c8   : > { %2072 = vst.msk [vmem:[%s3640_s20 + $0x88] sm:$0xf] %vm2037_vm1, %v2007_v11  ;;  %v2369_v20 = vsel %vm2102_vm2, %v2272_v12, 0.0  ;;  %v3012_v10 = vor.u32 %v3344_v59, %v3009_v62 }
 0x1c9   : > { %v2370_v23 = vadd.f32 %v2369_v20, %v2368_v0  ;;  %v1731_v24 = vpop.f32.mrf.mxu2  ;;  %v1396_v28 = vpop.f32.mrf.mxu0 }
 0x1ca   : > { %v1732_v27 = vadd.f32 %v1731_v24, %v1563_v21  ;;  %v1565_v29 = vpop.f32.mrf.mxu1  ;;  %v1397_v31 = vadd.f32 %v3853_v19, %v1396_v28 }
 0x1cb   : > { %3196 = vmatmul.msk.bf16.gmra.mxu3 %vm1200_vm0, %v2996_v33 }
 0x1cc   : > { %v1901_v34 = vadd.f32 %v1900_v55, %v1732_v27  ;;  %1435 = vmatmul.bf16.gmra.mxu0 %v2968_v25  ;;  %v1566_v38 = vadd.f32 %v1565_v29, %v1397_v31  ;;  %v2985_v55 = vld [vmem:[%s3495_s23 + $0x370] sm:$0xf0]  ;;  %v3345_v27 = vld [vmem:[%s3495_s23 + $0x38c] sm:$0xf0]  ;;  %v3343_v31 = vld [vmem:[%s3495_s23 + $0x384] sm:$0xf] }
 0x1cd   : > { %1604 = vmatmul.bf16.gmra.mxu1 %v2972_v26  ;;  %v2988_v2 = vor.u32 %v3339_v54, %v2985_v55  ;;  %v2999_v26 = vld [vmem:[%s3495_s23 + $0x380] sm:$0xf] }
 0x1ce   : > { %v2008_v35 = vpack.c.bf16 %v1901_v34, %v1901_v34  ;;  %v2172_v36 = vsel %vm2102_vm2, %v1901_v34, 0.0  ;;  %v2273_v37 = vmul.f32 %v1901_v34, %v1901_v34  ;;  %1773 = vmatmul.bf16.gmra.mxu2 %v2976_v30  ;;  %v1908_v46 = vpop.f32.mrf.mxu3  ;;  %v3007_v34 = vld [vmem:[%s3495_s23 + $0x388] sm:$0xf] }
 0x1cf   : > { %v2173_v39 = vadd.f32 %v2172_v36, %v2171_v15  ;;  %v3348_v36 = vld [vmem:[%s3495_s23 + $0x3ac] sm:$0xf] }
 0x1d0   : > { %2073 = vst.msk [vmem:[%s3640_s20 + $0x8c] sm:$0xf] %vm2037_vm1, %v2008_v35  ;;  %v2371_v40 = vsel %vm2102_vm2, %v2273_v37, 0.0  ;;  %v3346_v35 = vld [vmem:[%s3495_s23 + $0x394] sm:$0xf0] }
 0x1d1   : > { %v2372_v41 = vadd.f32 %v2371_v40, %v2370_v23  ;;  %v1734_v42 = vpop.f32.mrf.mxu2  ;;  %v1398_v44 = vpop.f32.mrf.mxu0 }
 0x1d2   : > { %v1735_v43 = vadd.f32 %v1734_v42, %v1566_v38  ;;  %v1567_v45 = vpop.f32.mrf.mxu1  ;;  %v1399_v48 = vadd.f32 %v3853_v19, %v1398_v44  ;;  %v3000_v42 = vor.u32 %v3345_v27, %v2999_v26 }
 0x1d4   : > { %v1904_v47 = vadd.f32 %v1903_v6, %v1735_v43  ;;  %v1568_v61 = vadd.f32 %v1567_v45, %v1399_v48 }
 0x1d6   : > { %v2009_v51 = vpack.c.bf16 %v1904_v47, %v1904_v47  ;;  %v2174_v52 = vsel %vm2102_vm2, %v1904_v47, 0.0  ;;  %v2274_v53 = vmul.f32 %v1904_v47, %v1904_v47  ;;  %v1910_v9 = vpop.f32.mrf.mxu3  ;;  %v3008_v47 = vor.u32 %v3346_v35, %v3007_v34 }
 0x1d7   : > { %v2175_v56 = vadd.f32 %v2174_v52, %v2173_v39  ;;  %v3025_v39 = vld [vmem:[%s3495_s23 + $0x3b8] sm:$0xf0] }
 0x1d8   : > { %2074 = vst.msk [vmem:[%s3640_s20 + $0x90] sm:$0xf] %vm2037_vm1, %v2009_v51  ;;  %v2373_v60 = vsel %vm2102_vm2, %v2274_v53, 0.0  ;;  %v3028_v50 = vor.u32 %v3348_v36, %v3025_v39 }
 0x1d9   : > { %v2374_v63 = vadd.f32 %v2373_v60, %v2372_v41  ;;  %v1736_v0 = vpop.f32.mrf.mxu2  ;;  %v1401_v5 = vpop.f32.mrf.mxu0 }
 0x1da   : > { %v1737_v4 = vadd.f32 %v1736_v0, %v1568_v61  ;;  %v1570_v6 = vpop.f32.mrf.mxu1  ;;  %v1402_v8 = vadd.f32 %v3853_v19, %v1401_v5 }
 0x1db   : > { %3197 = vmatmul.msk.bf16.gmra.mxu3 %vm1200_vm0, %v3012_v10 }
 0x1dc   : > { %v1906_v11 = vadd.f32 %v1905_v32, %v1737_v4  ;;  %1440 = vmatmul.bf16.gmra.mxu0 %v2984_v1  ;;  %v1571_v14 = vadd.f32 %v1570_v6, %v1402_v8  ;;  %v3001_v32 = vld [vmem:[%s3495_s23 + $0x390] sm:$0xf0]  ;;  %v3349_v4 = vld [vmem:[%s3495_s23 + $0x3ac] sm:$0xf0]  ;;  %v3347_v8 = vld [vmem:[%s3495_s23 + $0x3a4] sm:$0xf] }
 0x1dd   : > { %1609 = vmatmul.bf16.gmra.mxu1 %v2988_v2  ;;  %v3004_v43 = vor.u32 %v3343_v31, %v3001_v32  ;;  %v3015_v2 = vld [vmem:[%s3495_s23 + $0x3a0] sm:$0xf] }
 0x1de   : > { %v2010_v3 = vpack.c.bf16 %v1906_v11, %v1906_v11  ;;  %v2176_v12 = vsel %vm2102_vm2, %v1906_v11, 0.0  ;;  %v2275_v13 = vmul.f32 %v1906_v11, %v1906_v11  ;;  %1778 = vmatmul.bf16.gmra.mxu2 %v2992_v7  ;;  %v1913_v23 = vpop.f32.mrf.mxu3  ;;  %v3023_v11 = vld [vmem:[%s3495_s23 + $0x3a8] sm:$0xf] }
 0x1df   : > { %v2177_v15 = vadd.f32 %v2176_v12, %v2175_v56  ;;  %v3352_v12 = vld [vmem:[%s3495_s23 + $0x3cc] sm:$0xf] }
 0x1e0   : > { %2075 = vst.msk [vmem:[%s3640_s20 + $0x94] sm:$0xf] %vm2037_vm1, %v2010_v3  ;;  %v2375_v16 = vsel %vm2102_vm2, %v2275_v13, 0.0  ;;  %v3350_v3 = vld [vmem:[%s3495_s23 + $0x3b4] sm:$0xf0] }
 0x1e1   : > { %v2376_v17 = vadd.f32 %v2375_v16, %v2374_v63  ;;  %v1739_v18 = vpop.f32.mrf.mxu2  ;;  %v1403_v21 = vpop.f32.mrf.mxu0 }
 0x1e2   : > { %v1740_v20 = vadd.f32 %v1739_v18, %v1571_v14  ;;  %v1572_v22 = vpop.f32.mrf.mxu1  ;;  %v1404_v25 = vadd.f32 %v3853_v19, %v1403_v21  ;;  %v3016_v18 = vor.u32 %v3349_v4, %v3015_v2 }
 0x1e4   : > { %v1909_v24 = vadd.f32 %v1908_v46, %v1740_v20  ;;  %v1573_v38 = vadd.f32 %v1572_v22, %v1404_v25 }
 0x1e6   : > { %v2011_v28 = vpack.c.bf16 %v1909_v24, %v1909_v24  ;;  %v2178_v29 = vsel %vm2102_vm2, %v1909_v24, 0.0  ;;  %v2276_v30 = vmul.f32 %v1909_v24, %v1909_v24  ;;  %v1915_v49 = vpop.f32.mrf.mxu3  ;;  %v3024_v24 = vor.u32 %v3350_v3, %v3023_v11 }
 0x1e7   : > { %v2179_v33 = vadd.f32 %v2178_v29, %v2177_v15  ;;  %v3041_v15 = vld [vmem:[%s3495_s23 + $0x3d8] sm:$0xf0] }
 0x1e8   : > { %2076 = vst.msk [vmem:[%s3640_s20 + $0x98] sm:$0xf] %vm2037_vm1, %v2011_v28  ;;  %v2377_v37 = vsel %vm2102_vm2, %v2276_v30, 0.0  ;;  %v3044_v27 = vor.u32 %v3352_v12, %v3041_v15 }
 0x1e9   : > { %v2378_v40 = vadd.f32 %v2377_v37, %v2376_v17  ;;  %v1741_v41 = vpop.f32.mrf.mxu2  ;;  %v1406_v45 = vpop.f32.mrf.mxu0 }
 0x1ea   : > { %v1742_v44 = vadd.f32 %v1741_v41, %v1573_v38  ;;  %v1575_v46 = vpop.f32.mrf.mxu1  ;;  %v1407_v48 = vadd.f32 %v3853_v19, %v1406_v45 }
 0x1eb   : > { %3198 = vmatmul.msk.bf16.gmra.mxu3 %vm1200_vm0, %v3028_v50 }
 0x1ec   : > { %v1911_v51 = vadd.f32 %v1910_v9, %v1742_v44  ;;  %1445 = vmatmul.bf16.gmra.mxu0 %v3000_v42  ;;  %v1576_v55 = vadd.f32 %v1575_v46, %v1407_v48  ;;  %v3017_v9 = vld [vmem:[%s3495_s23 + $0x3b0] sm:$0xf0]  ;;  %v3353_v44 = vld [vmem:[%s3495_s23 + $0x3cc] sm:$0xf0]  ;;  %v3351_v48 = vld [vmem:[%s3495_s23 + $0x3c4] sm:$0xf] }
 0x1ed   : > { %1614 = vmatmul.bf16.gmra.mxu1 %v3004_v43  ;;  %v3020_v20 = vor.u32 %v3347_v8, %v3017_v9  ;;  %v3031_v43 = vld [vmem:[%s3495_s23 + $0x3c0] sm:$0xf] }
 0x1ee   : > { %v2012_v52 = vpack.c.bf16 %v1911_v51, %v1911_v51  ;;  %v2180_v53 = vsel %vm2102_vm2, %v1911_v51, 0.0  ;;  %v2277_v54 = vmul.f32 %v1911_v51, %v1911_v51  ;;  %1783 = vmatmul.bf16.gmra.mxu2 %v3008_v47  ;;  %v1918_v63 = vpop.f32.mrf.mxu3  ;;  %v3039_v51 = vld [vmem:[%s3495_s23 + $0x3c8] sm:$0xf] }
 0x1ef   : > { %v2181_v56 = vadd.f32 %v2180_v53, %v2179_v33  ;;  %v3356_v53 = vld [vmem:[%s3495_s23 + $0x3ec] sm:$0xf] }
 0x1f0   : > { %2077 = vst.msk [vmem:[%s3640_s20 + $0x9c] sm:$0xf] %vm2037_vm1, %v2012_v52  ;;  %v2379_v57 = vsel %vm2102_vm2, %v2277_v54, 0.0  ;;  %v3354_v52 = vld [vmem:[%s3495_s23 + $0x3d4] sm:$0xf0] }
 0x1f1   : > { %v2380_v58 = vadd.f32 %v2379_v57, %v2378_v40  ;;  %v1744_v59 = vpop.f32.mrf.mxu2  ;;  %v1408_v61 = vpop.f32.mrf.mxu0 }
 0x1f2   : > { %v1745_v60 = vadd.f32 %v1744_v59, %v1576_v55  ;;  %v1577_v62 = vpop.f32.mrf.mxu1  ;;  %v1409_v1 = vadd.f32 %v3853_v19, %v1408_v61  ;;  %v3032_v59 = vor.u32 %v3353_v44, %v3031_v43 }
 0x1f4   : > { %v1914_v0 = vadd.f32 %v1913_v23, %v1745_v60  ;;  %v1578_v14 = vadd.f32 %v1577_v62, %v1409_v1 }
 0x1f6   : > { %v2013_v5 = vpack.c.bf16 %v1914_v0, %v1914_v0  ;;  %v2182_v6 = vsel %vm2102_vm2, %v1914_v0, 0.0  ;;  %v2278_v7 = vmul.f32 %v1914_v0, %v1914_v0  ;;  %v1920_v26 = vpop.f32.mrf.mxu3  ;;  %v3040_v0 = vor.u32 %v3354_v52, %v3039_v51 }
 0x1f7   : > { %v2183_v10 = vadd.f32 %v2182_v6, %v2181_v56  ;;  %v3057_v56 = vld [vmem:[%s3495_s23 + $0x3f8] sm:$0xf0] }
 0x1f8   : > { %2078 = vst.msk [vmem:[%s3640_s20 + $0xa0] sm:$0xf] %vm2037_vm1, %v2013_v5  ;;  %v2381_v13 = vsel %vm2102_vm2, %v2278_v7, 0.0  ;;  %v3060_v4 = vor.u32 %v3356_v53, %v3057_v56 }
 0x1f9   : > { %v2382_v16 = vadd.f32 %v2381_v13, %v2380_v58  ;;  %v1746_v17 = vpop.f32.mrf.mxu2  ;;  %v1411_v22 = vpop.f32.mrf.mxu0 }
 0x1fa   : > { %v1747_v21 = vadd.f32 %v1746_v17, %v1578_v14  ;;  %v1580_v23 = vpop.f32.mrf.mxu1  ;;  %v1412_v25 = vadd.f32 %v3853_v19, %v1411_v22 }
 0x1fb   : > { %3199 = vmatmul.msk.bf16.gmra.mxu3 %vm1200_vm0, %v3044_v27 }
 0x1fc   : > { %v1916_v28 = vadd.f32 %v1915_v49, %v1747_v21  ;;  %1450 = vmatmul.bf16.gmra.mxu0 %v3016_v18  ;;  %v1581_v32 = vadd.f32 %v1580_v23, %v1412_v25  ;;  %v3033_v49 = vld [vmem:[%s3495_s23 + $0x3d0] sm:$0xf0]  ;;  %v3357_v21 = vld [vmem:[%s3495_s23 + $0x3ec] sm:$0xf0]  ;;  %v3355_v25 = vld [vmem:[%s3495_s23 + $0x3e4] sm:$0xf] }
 0x1fd   : > { %1619 = vmatmul.bf16.gmra.mxu1 %v3020_v20  ;;  %v3036_v60 = vor.u32 %v3351_v48, %v3033_v49  ;;  %v3047_v20 = vld [vmem:[%s3495_s23 + $0x3e0] sm:$0xf] }
 0x1fe   : > { %v2014_v29 = vpack.c.bf16 %v1916_v28, %v1916_v28  ;;  %v2184_v30 = vsel %vm2102_vm2, %v1916_v28, 0.0  ;;  %v2279_v31 = vmul.f32 %v1916_v28, %v1916_v28  ;;  %1788 = vmatmul.bf16.gmra.mxu2 %v3024_v24  ;;  %v1923_v40 = vpop.f32.mrf.mxu3  ;;  %v3055_v28 = vld [vmem:[%s3495_s23 + $0x3e8] sm:$0xf] }
 0x1ff   : > { %v2185_v33 = vadd.f32 %v2184_v30, %v2183_v10 }
 0x200   : > { %2079 = vst.msk [vmem:[%s3640_s20 + $0xa4] sm:$0xf] %vm2037_vm1, %v2014_v29  ;;  %v2383_v34 = vsel %vm2102_vm2, %v2279_v31, 0.0  ;;  %v3358_v29 = vld [vmem:[%s3495_s23 + $0x3f4] sm:$0xf0] }
 0x201   : > { %v2384_v35 = vadd.f32 %v2383_v34, %v2382_v16  ;;  %v1749_v36 = vpop.f32.mrf.mxu2  ;;  %v1413_v38 = vpop.f32.mrf.mxu0  ;;  %v3048_v34 = vor.u32 %v3357_v21, %v3047_v20 }
 0x202   : > { %v1750_v37 = vadd.f32 %v1749_v36, %v1581_v32  ;;  %v1582_v39 = vpop.f32.mrf.mxu1  ;;  %v1414_v42 = vadd.f32 %v3853_v19, %v1413_v38  ;;  %v3056_v38 = vor.u32 %v3358_v29, %v3055_v28 }
 0x204   : > { %v1919_v41 = vadd.f32 %v1918_v63, %v1750_v37  ;;  %v1583_v55 = vadd.f32 %v1582_v39, %v1414_v42  ;;  %v4078_v39 = vld [vmem:[%s4224_s2] ss:$0 sm:$0xff] }
 0x206   : > { %v2015_v45 = vpack.c.bf16 %v1919_v41, %v1919_v41  ;;  %v2186_v46 = vsel %vm2102_vm2, %v1919_v41, 0.0  ;;  %v2280_v47 = vmul.f32 %v1919_v41, %v1919_v41  ;;  %v1925_v2 = vpop.f32.mrf.mxu3 }
 0x207   : > { %v2187_v50 = vadd.f32 %v2186_v46, %v2185_v33 }
 0x208   : > { %2080 = vst.msk [vmem:[%s3640_s20 + $0xa8] sm:$0xf] %vm2037_vm1, %v2015_v45  ;;  %v2385_v54 = vsel %vm2102_vm2, %v2280_v47, 0.0 }
 0x209   : > { %v2386_v57 = vadd.f32 %v2385_v54, %v2384_v35  ;;  %v1751_v58 = vpop.f32.mrf.mxu2  ;;  %v1416_v62 = vpop.f32.mrf.mxu0 }
 0x20a   : > { %v1752_v61 = vadd.f32 %v1751_v58, %v1583_v55  ;;  %v1585_v63 = vpop.f32.mrf.mxu1  ;;  %v1417_v1 = vadd.f32 %v3853_v19, %v1416_v62 }
 0x20b   : > { %3200 = vmatmul.msk.bf16.gmra.mxu3 %vm1200_vm0, %v3060_v4 }
 0x20c   : > { %v1921_v5 = vadd.f32 %v1920_v26, %v1752_v61  ;;  %1455 = vmatmul.bf16.gmra.mxu0 %v3032_v59  ;;  %v1586_v9 = vadd.f32 %v1585_v63, %v1417_v1  ;;  %v3049_v26 = vld [vmem:[%s3495_s23 + $0x3f0] sm:$0xf0]  ;;  %s2548_s23 = sshll.u32 %s4234_s15, 1 }
 0x20d   : > { %1624 = vmatmul.bf16.gmra.mxu1 %v3036_v60  ;;  %s242_s28 = scalar_lea.vmem %s4226_s4, %s2548_s23 }
 0x20e   : > { %v2016_v6 = vpack.c.bf16 %v1921_v5, %v1921_v5  ;;  %v2188_v7 = vsel %vm2102_vm2, %v1921_v5, 0.0  ;;  %v2281_v8 = vmul.f32 %v1921_v5, %v1921_v5  ;;  %1793 = vmatmul.bf16.gmra.mxu2 %v3040_v0  ;;  %v1928_v16 = vpop.f32.mrf.mxu3 }
 0x20f   : > { %v2189_v10 = vadd.f32 %v2188_v7, %v2187_v50 }
 0x210   : > { %2081 = vst.msk [vmem:[%s3640_s20 + $0xac] sm:$0xf] %vm2037_vm1, %v2016_v6  ;;  %v2387_v11 = vsel %vm2102_vm2, %v2281_v8, 0.0 }
 0x211   : > { %v2388_v3 = vadd.f32 %v2387_v11, %v2386_v57  ;;  %v1754_v12 = vpop.f32.mrf.mxu2  ;;  %v1418_v14 = vpop.f32.mrf.mxu0 }
 0x212   : > { %v1755_v13 = vadd.f32 %v1754_v12, %v1586_v9  ;;  %v1587_v15 = vpop.f32.mrf.mxu1  ;;  %v1419_v18 = vadd.f32 %v3853_v19, %v1418_v14  ;;  %v3052_v19 = vor.u32 %v3355_v25, %v3049_v26 }
 0x214   : > { %v1924_v17 = vadd.f32 %v1923_v40, %v1755_v13  ;;  %v1588_v31 = vadd.f32 %v1587_v15, %v1419_v18 }
 0x216   : > { %v2017_v22 = vpack.c.bf16 %v1924_v17, %v1924_v17  ;;  %v2190_v23 = vsel %vm2102_vm2, %v1924_v17, 0.0  ;;  %v2282_v24 = vmul.f32 %v1924_v17, %v1924_v17  ;;  %v1930_v41 = vpop.f32.mrf.mxu3 }
 0x217   : > { %v2191_v27 = vadd.f32 %v2190_v23, %v2189_v10 }
 0x218   : > { %2082 = vst.msk [vmem:[%s3640_s20 + $0xb0] sm:$0xf] %vm2037_vm1, %v2017_v22  ;;  %v2389_v30 = vsel %vm2102_vm2, %v2282_v24, 0.0 }
 0x219   : > { %v2390_v32 = vadd.f32 %v2389_v30, %v2388_v3  ;;  %v1756_v33 = vpop.f32.mrf.mxu2  ;;  %v1421_v36 = vpop.f32.mrf.mxu0 }
 0x21a   : > { %v1757_v35 = vadd.f32 %v1756_v33, %v1588_v31  ;;  %v1590_v37 = vpop.f32.mrf.mxu1  ;;  %v1422_v40 = vadd.f32 %v4078_v39, %v1421_v36 }
 0x21c   : > { %v1926_v42 = vadd.f32 %v1925_v2, %v1757_v35  ;;  %1460 = vmatmul.bf16.gmra.mxu0 %v3048_v34  ;;  %v1591_v46 = vadd.f32 %v1590_v37, %v1422_v40 }
 0x21d   : > { %1629 = vmatmul.bf16.gmra.mxu1 %v3052_v19 }
 0x21e   : > { %v2018_v43 = vpack.c.bf16 %v1926_v42, %v1926_v42  ;;  %v2192_v44 = vsel %vm2102_vm2, %v1926_v42, 0.0  ;;  %v2283_v45 = vmul.f32 %v1926_v42, %v1926_v42  ;;  %1798 = vmatmul.bf16.gmra.mxu2 %v3056_v38  ;;  %v1933_v54 = vpop.f32.mrf.mxu3 }
 0x21f   : > { %v2193_v47 = vadd.f32 %v2192_v44, %v2191_v27 }
 0x220   : > { %2083 = vst.msk [vmem:[%s3640_s20 + $0xb4] sm:$0xf] %vm2037_vm1, %v2018_v43  ;;  %v2391_v48 = vsel %vm2102_vm2, %v2283_v45, 0.0 }
 0x221   : > { %v2392_v49 = vadd.f32 %v2391_v48, %v2390_v32  ;;  %v1759_v50 = vpop.f32.mrf.mxu2  ;;  %v1423_v52 = vpop.f32.mrf.mxu0 }
 0x222   : > { %v1760_v51 = vadd.f32 %v1759_v50, %v1591_v46  ;;  %v1592_v53 = vpop.f32.mrf.mxu1  ;;  %v1424_v56 = vadd.f32 %v4078_v39, %v1423_v52 }
 0x224   : > { %v1929_v55 = vadd.f32 %v1928_v16, %v1760_v51  ;;  %v1593_v62 = vadd.f32 %v1592_v53, %v1424_v56 }
 0x226   : > { %v2019_v57 = vpack.c.bf16 %v1929_v55, %v1929_v55  ;;  %v2194_v58 = vsel %vm2102_vm2, %v1929_v55, 0.0  ;;  %v2284_v59 = vmul.f32 %v1929_v55, %v1929_v55  ;;  %v1935_v6 = vpop.f32.mrf.mxu3 }
 0x227   : > { %v2195_v60 = vadd.f32 %v2194_v58, %v2193_v47 }
 0x228   : > { %2084 = vst.msk [vmem:[%s3640_s20 + $0xb8] sm:$0xf] %vm2037_vm1, %v2019_v57  ;;  %v2393_v61 = vsel %vm2102_vm2, %v2284_v59, 0.0 }
 0x229   : > { %v2394_v63 = vadd.f32 %v2393_v61, %v2392_v49  ;;  %v1761_v0 = vpop.f32.mrf.mxu2  ;;  %v1426_v2 = vpop.f32.mrf.mxu0 }
 0x22a   : > { %v1762_v1 = vadd.f32 %v1761_v0, %v1593_v62  ;;  %v1595_v4 = vpop.f32.mrf.mxu1  ;;  %v1427_v5 = vadd.f32 %v4078_v39, %v1426_v2 }
 0x22c   : > { %v1931_v7 = vadd.f32 %v1930_v41, %v1762_v1  ;;  %v1596_v11 = vadd.f32 %v1595_v4, %v1427_v5 }
 0x22e   : > { %v2020_v8 = vpack.c.bf16 %v1931_v7, %v1931_v7  ;;  %v2196_v9 = vsel %vm2102_vm2, %v1931_v7, 0.0  ;;  %v2285_v10 = vmul.f32 %v1931_v7, %v1931_v7  ;;  %v1938_v18 = vpop.f32.mrf.mxu3 }
 0x22f   : > { %v2197_v3 = vadd.f32 %v2196_v9, %v2195_v60 }
 0x230   : > { %2085 = vst.msk [vmem:[%s3640_s20 + $0xbc] sm:$0xf] %vm2037_vm1, %v2020_v8  ;;  %v2395_v12 = vsel %vm2102_vm2, %v2285_v10, 0.0 }
 0x231   : > { %v2396_v13 = vadd.f32 %v2395_v12, %v2394_v63  ;;  %v1764_v14 = vpop.f32.mrf.mxu2  ;;  %v1428_v16 = vpop.f32.mrf.mxu0 }
 0x232   : > { %v1765_v15 = vadd.f32 %v1764_v14, %v1596_v11  ;;  %v1597_v17 = vpop.f32.mrf.mxu1  ;;  %v1429_v21 = vadd.f32 %v4078_v39, %v1428_v16 }
 0x234   : > { %v1934_v20 = vadd.f32 %v1933_v54, %v1765_v15  ;;  %v1598_v27 = vadd.f32 %v1597_v17, %v1429_v21 }
 0x236   : > { %v2021_v22 = vpack.c.bf16 %v1934_v20, %v1934_v20  ;;  %v2198_v23 = vsel %vm2102_vm2, %v1934_v20, 0.0  ;;  %v2286_v24 = vmul.f32 %v1934_v20, %v1934_v20  ;;  %v1940_v34 = vpop.f32.mrf.mxu3 }
 0x237   : > { %v2199_v25 = vadd.f32 %v2198_v23, %v2197_v3 }
 0x238   : > { %2086 = vst.msk [vmem:[%s3640_s20 + $0xc0] sm:$0xf] %vm2037_vm1, %v2021_v22  ;;  %v2397_v26 = vsel %vm2102_vm2, %v2286_v24, 0.0 }
 0x239   : > { %v2398_v28 = vadd.f32 %v2397_v26, %v2396_v13  ;;  %v1766_v29 = vpop.f32.mrf.mxu2  ;;  %v1431_v31 = vpop.f32.mrf.mxu0 }
 0x23a   : > { %v1767_v30 = vadd.f32 %v1766_v29, %v1598_v27  ;;  %v1600_v32 = vpop.f32.mrf.mxu1  ;;  %v1432_v33 = vadd.f32 %v4078_v39, %v1431_v31 }
 0x23c   : > { %v1936_v19 = vadd.f32 %v1935_v6, %v1767_v30  ;;  %v1601_v38 = vadd.f32 %v1600_v32, %v1432_v33 }
 0x23e   : > { %v2022_v35 = vpack.c.bf16 %v1936_v19, %v1936_v19  ;;  %v2200_v36 = vsel %vm2102_vm2, %v1936_v19, 0.0  ;;  %v2287_v37 = vmul.f32 %v1936_v19, %v1936_v19  ;;  %v1943_v47 = vpop.f32.mrf.mxu3 }
 0x23f   : > { %v2201_v40 = vadd.f32 %v2200_v36, %v2199_v25 }
 0x240   : > { %2087 = vst.msk [vmem:[%s3640_s20 + $0xc4] sm:$0xf] %vm2037_vm1, %v2022_v35  ;;  %v2399_v41 = vsel %vm2102_vm2, %v2287_v37, 0.0 }
 0x241   : > { %v2400_v42 = vadd.f32 %v2399_v41, %v2398_v28  ;;  %v1769_v43 = vpop.f32.mrf.mxu2  ;;  %v1433_v45 = vpop.f32.mrf.mxu0 }
 0x242   : > { %v1770_v44 = vadd.f32 %v1769_v43, %v1601_v38  ;;  %v1602_v46 = vpop.f32.mrf.mxu1  ;;  %v1434_v49 = vadd.f32 %v4078_v39, %v1433_v45 }
 0x244   : > { %v1939_v48 = vadd.f32 %v1938_v18, %v1770_v44  ;;  %v1603_v55 = vadd.f32 %v1602_v46, %v1434_v49 }
 0x246   : > { %v2023_v50 = vpack.c.bf16 %v1939_v48, %v1939_v48  ;;  %v2202_v51 = vsel %vm2102_vm2, %v1939_v48, 0.0  ;;  %v2288_v52 = vmul.f32 %v1939_v48, %v1939_v48  ;;  %v1945_v62 = vpop.f32.mrf.mxu3 }
 0x247   : > { %v2203_v53 = vadd.f32 %v2202_v51, %v2201_v40 }
 0x248   : > { %2088 = vst.msk [vmem:[%s3640_s20 + $0xc8] sm:$0xf] %vm2037_vm1, %v2023_v50  ;;  %v2401_v54 = vsel %vm2102_vm2, %v2288_v52, 0.0 }
 0x249   : > { %v2402_v56 = vadd.f32 %v2401_v54, %v2400_v42  ;;  %v1771_v57 = vpop.f32.mrf.mxu2  ;;  %v1436_v59 = vpop.f32.mrf.mxu0 }
 0x24a   : > { %v1772_v58 = vadd.f32 %v1771_v57, %v1603_v55  ;;  %v1605_v60 = vpop.f32.mrf.mxu1  ;;  %v1437_v61 = vadd.f32 %v4078_v39, %v1436_v59 }
 0x24c   : > { %v1941_v63 = vadd.f32 %v1940_v34, %v1772_v58  ;;  %v1606_v4 = vadd.f32 %v1605_v60, %v1437_v61 }
 0x24e   : > { %v2024_v0 = vpack.c.bf16 %v1941_v63, %v1941_v63  ;;  %v2204_v1 = vsel %vm2102_vm2, %v1941_v63, 0.0  ;;  %v2289_v2 = vmul.f32 %v1941_v63, %v1941_v63  ;;  %v1948_v3 = vpop.f32.mrf.mxu3 }
 0x24f   : > { %v2205_v5 = vadd.f32 %v2204_v1, %v2203_v53 }
 0x250   : > { %2089 = vst.msk [vmem:[%s3640_s20 + $0xcc] sm:$0xf] %vm2037_vm1, %v2024_v0  ;;  %v2403_v6 = vsel %vm2102_vm2, %v2289_v2, 0.0 }
 0x251   : > { %v2404_v7 = vadd.f32 %v2403_v6, %v2402_v56  ;;  %v1774_v8 = vpop.f32.mrf.mxu2  ;;  %v1438_v10 = vpop.f32.mrf.mxu0 }
 0x252   : > { %v1775_v9 = vadd.f32 %v1774_v8, %v1606_v4  ;;  %v1607_v11 = vpop.f32.mrf.mxu1  ;;  %v1439_v13 = vadd.f32 %v4078_v39, %v1438_v10 }
 0x254   : > { %v1944_v12 = vadd.f32 %v1943_v47, %v1775_v9  ;;  %v1608_v20 = vadd.f32 %v1607_v11, %v1439_v13 }
 0x256   : > { %v2025_v14 = vpack.c.bf16 %v1944_v12, %v1944_v12  ;;  %v2206_v15 = vsel %vm2102_vm2, %v1944_v12, 0.0  ;;  %v2290_v16 = vmul.f32 %v1944_v12, %v1944_v12  ;;  %v1950_v27 = vpop.f32.mrf.mxu3 }
 0x257   : > { %v4117_v17 = vadd.f32 %v2206_v15, %v2205_v5 }
 0x258   : > { %2090 = vst.msk [vmem:[%s3640_s20 + $0xd0] sm:$0xf] %vm2037_vm1, %v2025_v14  ;;  %v2405_v18 = vsel %vm2102_vm2, %v2290_v16, 0.0 }
 0x259   : > { %v4122_v21 = vadd.f32 %v2405_v18, %v2404_v7  ;;  %v1776_v22 = vpop.f32.mrf.mxu2  ;;  %v1441_v24 = vpop.f32.mrf.mxu0 }
 0x25a   : > { %v1777_v23 = vadd.f32 %v1776_v22, %v1608_v20  ;;  %v1610_v25 = vpop.f32.mrf.mxu1  ;;  %v1442_v26 = vadd.f32 %v4078_v39, %v1441_v24 }
 0x25c   : > { %v4125_v28 = vadd.f32 %v1945_v62, %v1777_v23  ;;  %v1611_v30 = vadd.f32 %v1610_v25, %v1442_v26 }
 0x25e   : > { %v2026_v29 = vpack.c.bf16 %v4125_v28, %v4125_v28  ;;  %v1953_v36 = vpop.f32.mrf.mxu3 }
 0x260   : > { %2091 = vst.msk [vmem:[%s3640_s20 + $0xd4] sm:$0xf] %vm2037_vm1, %v2026_v29 }
 0x261   : > { %v1779_v31 = vpop.f32.mrf.mxu2  ;;  %v1443_v33 = vpop.f32.mrf.mxu0 }
 0x262   : > { %v1780_v32 = vadd.f32 %v1779_v31, %v1611_v30  ;;  %v1612_v34 = vpop.f32.mrf.mxu1  ;;  %v1444_v35 = vadd.f32 %v4078_v39, %v1443_v33  ;;  %v2291_v30 = vmul.f32 %v4125_v28, %v4125_v28  ;;  %v2208_v33 = vsel %vm2102_vm2, %v4125_v28, 0.0 }
 0x264   : > { %v4131_v19 = vadd.f32 %v1948_v3, %v1780_v32  ;;  %v1613_v38 = vadd.f32 %v1612_v34, %v1444_v35 }
 0x266   : > { %v2027_v37 = vpack.c.bf16 %v4131_v19, %v4131_v19  ;;  %v1955_v48 = vpop.f32.mrf.mxu3  ;;  %v2292_v34 = vmul.f32 %v4131_v19, %v4131_v19 }
 0x268   : > { %2092 = vst.msk [vmem:[%s3640_s20 + $0xd8] sm:$0xf] %vm2037_vm1, %v2027_v37 }
 0x269   : > { %v1781_v40 = vpop.f32.mrf.mxu2  ;;  %v1446_v42 = vpop.f32.mrf.mxu0 }
 0x26a   : > { %v1782_v41 = vadd.f32 %v1781_v40, %v1613_v38  ;;  %v1615_v43 = vpop.f32.mrf.mxu1  ;;  %v1447_v44 = vadd.f32 %v4078_v39, %v1446_v42  ;;  %v2407_v38 = vsel %vm2102_vm2, %v2291_v30, 0.0  ;;  %v2210_v40 = vsel %vm2102_vm2, %v4131_v19, 0.0 }
 0x26c   : > { %v4139_v45 = vadd.f32 %v1950_v27, %v1782_v41  ;;  %v1616_v47 = vadd.f32 %v1615_v43, %v1447_v44  ;;  %v2209_v43 = vadd.f32 %v2208_v33, %v4117_v17  ;;  %v2409_v44 = vsel %vm2102_vm2, %v2292_v34, 0.0 }
 0x26e   : > { %v2028_v46 = vpack.c.bf16 %v4139_v45, %v4139_v45  ;;  %v1958_v58 = vpop.f32.mrf.mxu3 }
 0x270   : > { %2093 = vst.msk [vmem:[%s3640_s20 + $0xdc] sm:$0xf] %vm2037_vm1, %v2028_v46  ;;  %v2212_v46 = vsel %vm2102_vm2, %v4139_v45, 0.0 }
 0x271   : > { %v1784_v49 = vpop.f32.mrf.mxu2  ;;  %v1448_v51 = vpop.f32.mrf.mxu0 }
 0x272   : > { %v1785_v50 = vadd.f32 %v1784_v49, %v1616_v47  ;;  %v1617_v52 = vpop.f32.mrf.mxu1  ;;  %v1449_v54 = vadd.f32 %v4078_v39, %v1448_v51  ;;  %v2408_v49 = vadd.f32 %v2407_v38, %v4122_v21 }
 0x274   : > { %v4145_v53 = vadd.f32 %v1953_v36, %v1785_v50  ;;  %v1618_v56 = vadd.f32 %v1617_v52, %v1449_v54  ;;  %v2293_v36 = vmul.f32 %v4139_v45, %v4139_v45  ;;  %v2211_v50 = vadd.f32 %v2210_v40, %v2209_v43 }
 0x276   : > { %v2029_v55 = vpack.c.bf16 %v4145_v53, %v4145_v53  ;;  %v1960_v7 = vpop.f32.mrf.mxu3  ;;  %v2294_v47 = vmul.f32 %v4145_v53, %v4145_v53  ;;  %v2411_v19 = vsel %vm2102_vm2, %v2293_v36, 0.0  ;;  %v2214_v17 = vsel %vm2102_vm2, %v4145_v53, 0.0 }
 0x278   : > { %2094 = vst.msk [vmem:[%s3640_s20 + $0xe0] sm:$0xf] %vm2037_vm1, %v2029_v55 }
 0x279   : > { %v1786_v57 = vpop.f32.mrf.mxu2  ;;  %v1451_v60 = vpop.f32.mrf.mxu0 }
 0x27a   : > { %v1787_v59 = vadd.f32 %v1786_v57, %v1618_v56  ;;  %v1620_v61 = vpop.f32.mrf.mxu1  ;;  %v1452_v62 = vadd.f32 %v4078_v39, %v1451_v60  ;;  %v2410_v56 = vadd.f32 %v2409_v44, %v2408_v49  ;;  %v2213_v57 = vadd.f32 %v2212_v46, %v2211_v50 }
 0x27c   : > { %v1956_v63 = vadd.f32 %v1955_v48, %v1787_v59  ;;  %v1621_v1 = vadd.f32 %v1620_v61, %v1452_v62  ;;  %v2412_v21 = vadd.f32 %v2411_v19, %v2410_v56  ;;  %v2215_v60 = vadd.f32 %v2214_v17, %v2213_v57 }
 0x27e   : > { %v2030_v0 = vpack.c.bf16 %v1956_v63, %v1956_v63  ;;  %v1963_v18 = vpop.f32.mrf.mxu3  ;;  %v2295_v52 = vmul.f32 %v1956_v63, %v1956_v63  ;;  %v2216_v59 = vsel %vm2102_vm2, %v1956_v63, 0.0 }
 0x280   : > { %2095 = vst.msk [vmem:[%s3640_s20 + $0xe4] sm:$0xf] %vm2037_vm1, %v2030_v0  ;;  %v2415_v0 = vsel %vm2102_vm2, %v2295_v52, 0.0 }
 0x281   : > { %v1789_v2 = vpop.f32.mrf.mxu2  ;;  %v1453_v5 = vpop.f32.mrf.mxu0 }
 0x282   : > { %v1790_v4 = vadd.f32 %v1789_v2, %v1621_v1  ;;  %v1622_v6 = vpop.f32.mrf.mxu1  ;;  %v1454_v9 = vadd.f32 %v4078_v39, %v1453_v5 }
 0x284   : > { %v1959_v8 = vadd.f32 %v1958_v58, %v1790_v4  ;;  %v1623_v11 = vadd.f32 %v1622_v6, %v1454_v9  ;;  %v2413_v58 = vsel %vm2102_vm2, %v2294_v47, 0.0  ;;  %v2217_v6 = vadd.f32 %v2216_v59, %v2215_v60 }
 0x285   : > { %v2414_v5 = vadd.f32 %v2413_v58, %v2412_v21 }
 0x286   : > { %v2031_v10 = vpack.c.bf16 %v1959_v8, %v1959_v8  ;;  %v1965_v32 = vpop.f32.mrf.mxu3  ;;  %v2296_v45 = vmul.f32 %v1959_v8, %v1959_v8  ;;  %v2218_v53 = vsel %vm2102_vm2, %v1959_v8, 0.0 }
 0x288   : > { %2096 = vst.msk [vmem:[%s3640_s20 + $0xe8] sm:$0xf] %vm2037_vm1, %v2031_v10 }
 0x289   : > { %v1791_v3 = vpop.f32.mrf.mxu2  ;;  %v1456_v13 = vpop.f32.mrf.mxu0 }
 0x28a   : > { %v1792_v12 = vadd.f32 %v1791_v3, %v1623_v11  ;;  %v1625_v14 = vpop.f32.mrf.mxu1  ;;  %v1457_v15 = vadd.f32 %v4078_v39, %v1456_v13  ;;  %v2416_v3 = vadd.f32 %v2415_v0, %v2414_v5 }
 0x28c   : > { %v1961_v16 = vadd.f32 %v1960_v7, %v1792_v12  ;;  %v1626_v22 = vadd.f32 %v1625_v14, %v1457_v15  ;;  %v2417_v7 = vsel %vm2102_vm2, %v2296_v45, 0.0  ;;  %v2219_v12 = vadd.f32 %v2218_v53, %v2217_v6 }
 0x28e   : > { %v2032_v20 = vpack.c.bf16 %v1961_v16, %v1961_v16  ;;  %v1968_v61 = vpop.f32.mrf.mxu3  ;;  %v2297_v1 = vmul.f32 %v1961_v16, %v1961_v16  ;;  %v2220_v63 = vsel %vm2102_vm2, %v1961_v16, 0.0 }
 0x290   : > { %2097 = vst.msk [vmem:[%s3640_s20 + $0xec] sm:$0xf] %vm2037_vm1, %v2032_v20  ;;  %v2419_v13 = vsel %vm2102_vm2, %v2297_v1, 0.0  ;;  %v2221_v20 = vadd.f32 %v2220_v63, %v2219_v12 }
 0x291   : > { %v1794_v23 = vpop.f32.mrf.mxu2  ;;  %v1458_v25 = vpop.f32.mrf.mxu0 }
 0x292   : > { %v1795_v24 = vadd.f32 %v1794_v23, %v1626_v22  ;;  %v1627_v26 = vpop.f32.mrf.mxu1  ;;  %v1459_v29 = vadd.f32 %v4078_v39, %v1458_v25 }
 0x294   : > { %v1964_v27 = vadd.f32 %v1963_v18, %v1795_v24  ;;  %v1628_v35 = vadd.f32 %v1627_v26, %v1459_v29  ;;  %v2418_v18 = vadd.f32 %v2417_v7, %v2416_v3 }
 0x296   : > { %v2033_v31 = vpack.c.bf16 %v1964_v27, %v1964_v27  ;;  %v2298_v9 = vmul.f32 %v1964_v27, %v1964_v27  ;;  %v2222_v8 = vsel %vm2102_vm2, %v1964_v27, 0.0  ;;  %v1970_v34 = vpop.f32.mrf.mxu3 }
 0x297   : > { %v2223_v26 = vadd.f32 %v2222_v8, %v2221_v20 }
 0x298   : > { %2098 = vst.msk [vmem:[%s3640_s20 + $0xf0] sm:$0xf] %vm2037_vm1, %v2033_v31  ;;  %v2421_v23 = vsel %vm2102_vm2, %v2298_v9, 0.0 }
 0x299   : > { %v1796_v37 = vpop.f32.mrf.mxu2  ;;  %v1461_v42 = vpop.f32.mrf.mxu0 }
 0x29a   : > { %v1797_v41 = vadd.f32 %v1796_v37, %v1628_v35  ;;  %v1462_v28 = vadd.f32 %v4078_v39, %v1461_v42  ;;  %v1630_v51 = vpop.f32.mrf.mxu1 }
 0x29c   : > { %v1966_v48 = vadd.f32 %v1965_v32, %v1797_v41  ;;  %v1631_v55 = vadd.f32 %v1630_v51, %v1462_v28 }
 0x29e   : > { %v2034_v54 = vpack.c.bf16 %v1966_v48, %v1966_v48  ;;  %v2299_v14 = vmul.f32 %v1966_v48, %v1966_v48  ;;  %v2224_v24 = vsel %vm2102_vm2, %v1966_v48, 0.0 }
 0x29f   : > { %v2225_v33 = vadd.f32 %v2224_v24, %v2223_v26 }
 0x2a0   : > { %2099 = vst.msk [vmem:[%s3640_s20 + $0xf4] sm:$0xf] %vm2037_vm1, %v2034_v54  ;;  %v2423_v30 = vsel %vm2102_vm2, %v2299_v14, 0.0 }
 0x2a1   : > { %v1799_v62 = vpop.f32.mrf.mxu2  ;;  %v1463_v4 = vpop.f32.mrf.mxu0 }
 0x2a2   : > { %v1800_v2 = vadd.f32 %v1799_v62, %v1631_v55  ;;  %v1464_v11 = vadd.f32 %v4078_v39, %v1463_v4  ;;  %v1632_v22 = vpop.f32.mrf.mxu1  ;;  %v2420_v39 = vadd.f32 %v2419_v13, %v2418_v18 }
 0x2a4   : > { %v1969_v10 = vadd.f32 %v1968_v61, %v1800_v2  ;;  %v1633_v25 = vadd.f32 %v1632_v22, %v1464_v11  ;;  %v2422_v32 = vadd.f32 %v2421_v23, %v2420_v39 }
 0x2a6   : > { %v2035_v15 = vpack.c.bf16 %v1969_v10, %v1969_v10  ;;  %v2300_v16 = vmul.f32 %v1969_v10, %v1969_v10  ;;  %v2226_v27 = vsel %vm2102_vm2, %v1969_v10, 0.0  ;;  %v2424_v37 = vadd.f32 %v2423_v30, %v2422_v32 }
 0x2a7   : > { %v2227_v38 = vadd.f32 %v2226_v27, %v2225_v33 }
 0x2a8   : > { %2100 = vst.msk [vmem:[%s3640_s20 + $0xf8] sm:$0xf] %vm2037_vm1, %v2035_v15  ;;  %v2425_v35 = vsel %vm2102_vm2, %v2300_v16, 0.0 }
 0x2a9   : > { %v1801_v29 = vpop.f32.mrf.mxu2  ;;  %v2426_v43 = vadd.f32 %v2425_v35, %v2424_v37 }
 0x2aa   : > { %v1802_v31 = vadd.f32 %v1801_v29, %v1633_v25 }
 0x2ac   : > { %v1971_v36 = vadd.f32 %v1970_v34, %v1802_v31 }
 0x2ae   : > { %v2036_v40 = vpack.c.bf16 %v1971_v36, %v1971_v36  ;;  %v2228_v41 = vsel %vm2102_vm2, %v1971_v36, 0.0  ;;  %v2301_v42 = vmul.f32 %v1971_v36, %v1971_v36 }
 0x2af   : > { %v2229_v28 = vadd.f32 %v2228_v41, %v2227_v38 }
 0x2b0   : > { %2101 = vst.msk [vmem:[%s3640_s20 + $0xfc] sm:$0xf] %vm2037_vm1, %v2036_v40  ;;  %v2427_v44 = vsel %vm2102_vm2, %v2301_v42, 0.0 }
 0x2b1   : > { %v2230_v46 = vrot.slane %v2229_v28, 4  ;;  %v2428_v47 = vadd.f32 %v2427_v44, %v2426_v43 }
 0x2b3   : > { %v2231_v48 = vadd.f32 %v2230_v46, %v2229_v28  ;;  %v2429_v49 = vrot.slane %v2428_v47, 4 }
 0x2b5   : > { %v2232_v50 = vrot.slane %v2231_v48, 2  ;;  %v2430_v19 = vadd.f32 %v2429_v49, %v2428_v47 }
 0x2b7   : > { %v2233_v51 = vadd.f32 %v2232_v50, %v2231_v48  ;;  %v2431_v17 = vrot.slane %v2430_v19, 2 }
 0x2b9   : > { %v2234_v52 = vrot.slane %v2233_v51, 1  ;;  %v2432_v54 = vadd.f32 %v2431_v17, %v2430_v19 }
 0x2bb   : > { %v2235_v55 = vadd.f32 %v2234_v52, %v2233_v51  ;;  %v2433_v56 = vrot.slane %v2432_v54, 1 }
 0x2bd   : > { %2237 = vst.msk [vmem:[%s242_s28] sm:$0x1] %vm2236_vm3, %v2235_v55  ;;  %v2434_v57 = vadd.f32 %v2433_v56, %v2432_v54 }
 0x2bf   : > { %2435 = vst.msk [vmem:[%s242_s28 + $0x1] sm:$0x1] %vm2236_vm3, %v2434_v57 }
 0x2c0 PF: > { %s15_s17 = sadd.s32 1, %s3408_s17   ;;  %s4227_s15 = smov %s3404_s16 }
 0x2c1   : > { %p12_p6 = scmp.ge.s32.totalorder %s15_s17, 4   ;;  %s4228_s16 = smov %s4230_s18 }
 0x2c3   :  { %14 = sbr.rel (!%p12_p6) target bundleno = 2 (0x2), region = 74 }

// kernel: net_forward.53
= control target key start
LH: loop header
LB: loop body
LE: loop exit
PB: predicated region body
PF: predicated region fallthrough
CT: control target
= control target key end

     0   :  { %s3122_s0 = inlined_call_operand.vmem [shape: bf16[1024,216], index: 0, kind: input, shape index: {}]   ;;  %s3123_s1 = inlined_call_operand.vmem [shape: bf16[216,1], index: 1, kind: input, shape index: {}]   ;;  %s3124_s2 = inlined_call_operand.<no memory space> [shape: f32[1,1], index: 2, kind: input, shape index: {}]   ;;  %s3125_s3 = inlined_call_operand.vmem [shape: f32[1024,1], index: 3, kind: output, shape index: {0}]   ;;  %s3126_s4 = inlined_call_operand.hbm [shape: f32[2,2,1], index: 4, kind: output, shape index: {1}]  }
   0x1   :  { %v10_v0 = vstv %s3124_s2 }
   0x2   :  { %11 = vst [vmem:[#allocation2] sm:$0x1] %v10_v0 }
   0x3   :  { %12 = vsyncpa [#allocation4], 0 }
   0x4   :  { %14 = vsyncpa [#allocation4 + $0x1], 0  ;;  %s2282_s17 = smov 0   ;;  %s2284_s18 = smov 0  }
   0x5   :  { %s2286_s19 = smov 0   ;;  %s2288_s20 = smov 0  }
   0x6   :  { %s2290_s21 = smov 0   ;;  %s2292_s22 = smov 0  }
   0x7 LB: > { %s1670_s2 = sadd.s32 4294967295, %s2252_s22   ;;  %s1671_s23 = sadd.s32 4294967294, %s2252_s22   ;;  %s2252_s22 = sphi %s2292_s22, %s20_s22   ;;  %s2248_s21 = sphi %s2290_s21, %s3133_s21   ;;  %s2244_s20 = sphi %s2288_s20, %s3132_s20   ;;  %s2240_s19 = sphi %s2286_s19, %s3131_s19   ;;  %s2236_s18 = sphi %s2284_s18, %s3130_s18   ;;  %s2232_s17 = sphi %s2282_s17, %s3129_s17  }
   0x8   : > { %s32_s24 = sadd.s32 1, %s2248_s21  ;;  %s135_s25 = sadd.s32 1, %s2240_s19 }
   0x9   : > { %p34_p0 = scmp.ge.s32.totalorder %s32_s24, 2  ;;  %p145_p1 = scmp.ne.s32.totalorder %s2240_s19, %s2236_s18 }
   0xa   : > { %p146_p2 = scmp.eq.s32.totalorder %s1670_s2, 1  ;;  %p151_p3 = scmp.ne.s32.totalorder %s2236_s18, %s2232_s17 }
   0xb   : > { %s3135_s24 = smov (%p34_p0, %s32_s24), 0  ;;  %p152_p5 = scmp.eq.s32.totalorder %s1671_s23, 1 }
   0xc   : > { %p2322_p4 = por %p146_p2, %p145_p1  ;;  %s132_s27 = ssub.s32 %s2248_s21, %s3135_s24 }
   0xd   : > { %p1674_p6 = scmp.ge.s32.totalorder %s2252_s22, 1  ;;  %p133_p7 = scmp.eq.s32.totalorder %s132_s27, 0 }
   0xe   : > { %p2329_p8 = por %p152_p5, %p151_p3  ;;  %p191_p9 = scmp.lt.s32.totalorder %s2252_s22, 3 }
   0xf   : > { %s2335_s29 = scalar_select %p133_p7, %s2240_s19, %s135_s25  }
  0x10   : > { %p192_p10 = pnand %p1674_p6, %p191_p9 }
  0x11   : > { %s1676_s10 = sshll.u32 (!%p192_p10), %s2244_s20, 6  ;;  %s2022_s8 = sshll.u32 (!%p192_p10), %s2244_s20, 1 }
  0x12   : > { %195 = sbr.rel (%p192_p10) target bundleno = 524 (0x20c), region = 32  ;;  %p229_p11 = scmp.lt.s32.totalorder (!%p192_p10), %s1676_s10, 127 }
  0x13   : > { %s1567_s12 = scalar_lea.hbm (!%p192_p10), %s3126_s4, %s2022_s8  ;;  %s2194_s27 = scalar_lea.hbm (!%p192_p10), %s3126_s4, 4 }
  0x14   : > { %s1571_s15 = sshll.u32 (!%p192_p10), %s1567_s12, 4  ;;  %s1572_s15 = int_to_ptr.hbm [resolvable:$true] %s1571_s15 }
  0x15   : > { %s2188_s16 = sshra.s32 (!%p192_p10), %s1572_s15, 4  ;;  %s2189_s16 = int_to_ptr.hbm [resolvable:$true] %s2188_s16 }
  0x16   : > { %s2190_s2 = scalar_lea.hbm (!%p192_p10), %s2189_s16, 2  ;;  %p2195_p1 = scmp.lt.s32.totalorder (!%p192_p10), %s2189_s16, %s3126_s4 }
  0x17   : > { %v2033_v1 = vld [vmem:[%s3123_s1 + $0x38] sm:$0xff]  ;;  %v272_v2 = vld [vmem:[%s3123_s1 + $0x68] sm:$0xf]  ;;  %vm807_vm0 = vcmask 1043456   ;;  %v2032_v4 = vld [vmem:[%s3123_s1 + $0x30] sm:$0xff]  ;;  %s3137_s10 = smov (!%p229_p11, %s1676_s10), 127  ;;  %p2191_p12 = scmp.ne.s32.totalorder %s2189_s16, %s2190_s2 }
  0x18   : > { %v682_v3 = vunpack.c.l.b16 %v272_v2  ;;  %811 = vmatpush.bf16.msra.mxu0 %v2033_v1  ;;  %2103 = vmatpush.bf16.msra.mxu2 %v2033_v1  ;;  %v2038_v7 = vld [vmem:[%s3123_s1 + $0x60] sm:$0xff]  ;;  %v2031_v8 = vld [vmem:[%s3123_s1 + $0x28] sm:$0xff]  ;;  %v2037_v9 = vld [vmem:[%s3123_s1 + $0x58] sm:$0xff]  ;;  %s2025_s6 = sshll.u32 %s3137_s10, 3  ;;  %vm710_vm1 = vcmask 719872   ;;  %vm1149_vm2 = vcmask 7168   ;;  %p2196_p2 = scmp.lt.s32.totalorder %s2194_s27, %s2190_s2 }
  0x19   : > { %v2030_v10 = vld [vmem:[%s3123_s1 + $0x20] sm:$0xff]  ;;  %v2036_v11 = vld [vmem:[%s3123_s1 + $0x50] sm:$0xff]  ;;  %v2029_v12 = vld [vmem:[%s3123_s1 + $0x18] sm:$0xff]  ;;  %s2379_s14 = scalar_lea.vmem %s3122_s0, %s2025_s6  ;;  %s2475_s7 = scalar_lea.vmem %s3125_s3, %s2025_s6  ;;  %vm1347_vm3 = vcmask 0  }
  0x1a   : > { %v696_v5 = vpack.c.b16 %v682_v3, %v682_v3  ;;  %v2035_v13 = vld [vmem:[%s3123_s1 + $0x48] sm:$0xff]  ;;  %v2028_v14 = vld [vmem:[%s3123_s1 + $0x10] sm:$0xff]  ;;  %v2034_v15 = vld [vmem:[%s3123_s1 + $0x40] sm:$0xff]  ;;  %s224_s10 = sand.u32 1, %s2236_s18   ;;  %p2192_p13 = pnand %p2191_p12, %p2322_p4 }
  0x1b   : > { %v2027_v16 = vld [vmem:[%s3123_s1 + $0x8] sm:$0xff]  ;;  %v2039_v17 = vld [vmem:[%s2379_s14 + $0x4] sm:$0xf]  ;;  %v1683_v21 = vld [vmem:[%s2379_s14] sm:$0xf]  ;;  %s1675_s6 = sshll.u32 %s224_s10, 1  ;;  %p2197_p3 = por %p2196_p2, %p2195_p1 }
  0x1c   : > { %v809_v6 = vsel %vm807_vm0, %v696_v5, 0  ;;  %812 = vmatpush.bf16.msra.mxu0 %v2032_v4  ;;  %2104 = vmatpush.bf16.msra.mxu2 %v2032_v4  ;;  %v1685_v18 = vld [vmem:[%s2379_s14 + $0x8] sm:$0xf0]  ;;  %v2026_v20 = vld [vmem:[%s3123_s1] sm:$0xff]  ;;  %v2040_v22 = vld [vmem:[%s2379_s14 + $0x4] sm:$0xf0]  ;;  %p2193_p0 = pneg %p2192_p13 }
  0x1d   : > { %982 = vmatpush.bf16.msra.mxu1 %v809_v6  ;;  %2111 = vmatpush.bf16.msra.mxu3 %v809_v6  ;;  %v1688_v19 = vor.u32 %v2039_v17, %v1685_v18  ;;  %v1684_v23 = vor.u32 %v2040_v22, %v1683_v21  ;;  %v2041_v24 = vld [vmem:[%s2379_s14 + $0x14] sm:$0xf]  ;;  %v1693_v25 = vld [vmem:[%s2379_s14 + $0x18] sm:$0xf0]  ;;  %v1691_v27 = vld [vmem:[%s2379_s14 + $0x10] sm:$0xf] }
  0x1e   : > { %v1696_v26 = vor.u32 %v2041_v24, %v1693_v25  ;;  %v2042_v28 = vld [vmem:[%s2379_s14 + $0x14] sm:$0xf0]  ;;  %v1811_v30 = vld [vmem:[%s2379_s14 + $0x100] sm:$0xf]  ;;  %v2072_v31 = vld [vmem:[%s2379_s14 + $0x104] sm:$0xf0]  ;;  %p2198_p5 = pnand %p2197_p3, %p2193_p0 }
  0x1f   : > { %v1692_v29 = vor.u32 %v2042_v28, %v1691_v27  ;;  %v1812_v32 = vor.u32 %v2072_v31, %v1811_v30  ;;  %v2043_v33 = vld [vmem:[%s2379_s14 + $0x24] sm:$0xf]  ;;  %v1701_v34 = vld [vmem:[%s2379_s14 + $0x28] sm:$0xf0]  ;;  %v1699_v36 = vld [vmem:[%s2379_s14 + $0x20] sm:$0xf] }
  0x20   : > { %813 = vmatpush.bf16.msra.mxu0 %v2031_v8  ;;  %2105 = vmatpush.bf16.msra.mxu2 %v2031_v8  ;;  %v1704_v35 = vor.u32 %v2043_v33, %v1701_v34  ;;  %v2044_v37 = vld [vmem:[%s2379_s14 + $0x24] sm:$0xf0]  ;;  %v1819_v39 = vld [vmem:[%s2379_s14 + $0x110] sm:$0xf]  ;;  %v2074_v40 = vld [vmem:[%s2379_s14 + $0x114] sm:$0xf0] }
  0x21   : > { %983 = vmatpush.bf16.msra.mxu1 %v2038_v7  ;;  %2112 = vmatpush.bf16.msra.mxu3 %v2038_v7  ;;  %v1700_v38 = vor.u32 %v2044_v37, %v1699_v36  ;;  %v2073_v41 = vld [vmem:[%s2379_s14 + $0x114] sm:$0xf]  ;;  %v1820_v42 = vor.u32 %v2074_v40, %v1819_v39  ;;  %v1821_v43 = vld [vmem:[%s2379_s14 + $0x118] sm:$0xf0]  ;;  %v1707_v48 = vld [vmem:[%s2379_s14 + $0x30] sm:$0xf] }
  0x22   : > { %v1824_v44 = vor.u32 %v2073_v41, %v1821_v43  ;;  %v2045_v45 = vld [vmem:[%s2379_s14 + $0x34] sm:$0xf]  ;;  %v1709_v46 = vld [vmem:[%s2379_s14 + $0x38] sm:$0xf0]  ;;  %v2046_v49 = vld [vmem:[%s2379_s14 + $0x34] sm:$0xf0] }
  0x23   : > { %v1712_v47 = vor.u32 %v2045_v45, %v1709_v46  ;;  %v1708_v50 = vor.u32 %v2046_v49, %v1707_v48  ;;  %v1827_v51 = vld [vmem:[%s2379_s14 + $0x120] sm:$0xf]  ;;  %v2076_v52 = vld [vmem:[%s2379_s14 + $0x124] sm:$0xf0]  ;;  %v2075_v53 = vld [vmem:[%s2379_s14 + $0x124] sm:$0xf] }
  0x24   : > { %814 = vmatpush.bf16.msra.mxu0 %v2030_v10  ;;  %2106 = vmatpush.bf16.msra.mxu2 %v2030_v10  ;;  %v1828_v54 = vor.u32 %v2076_v52, %v1827_v51  ;;  %v1829_v55 = vld [vmem:[%s2379_s14 + $0x128] sm:$0xf0]  ;;  %v2047_v57 = vld [vmem:[%s2379_s14 + $0x44] sm:$0xf]  ;;  %v1715_v60 = vld [vmem:[%s2379_s14 + $0x40] sm:$0xf] }
  0x25   : > { %984 = vmatpush.bf16.msra.mxu1 %v2037_v9  ;;  %2113 = vmatpush.bf16.msra.mxu3 %v2037_v9  ;;  %v1832_v56 = vor.u32 %v2075_v53, %v1829_v55  ;;  %v1717_v58 = vld [vmem:[%s2379_s14 + $0x48] sm:$0xf0]  ;;  %v2048_v61 = vld [vmem:[%s2379_s14 + $0x44] sm:$0xf0]  ;;  %v1835_v63 = vld [vmem:[%s2379_s14 + $0x130] sm:$0xf] }
  0x26   : > { %v1720_v59 = vor.u32 %v2047_v57, %v1717_v58  ;;  %v1716_v62 = vor.u32 %v2048_v61, %v1715_v60  ;;  %v2078_v0 = vld [vmem:[%s2379_s14 + $0x134] sm:$0xf0]  ;;  %v2077_v1 = vld [vmem:[%s2379_s14 + $0x134] sm:$0xf]  ;;  %v1837_v3 = vld [vmem:[%s2379_s14 + $0x138] sm:$0xf0] }
  0x27   : > { %v1836_v2 = vor.u32 %v2078_v0, %v1835_v63  ;;  %v1840_v4 = vor.u32 %v2077_v1, %v1837_v3  ;;  %v2049_v5 = vld [vmem:[%s2379_s14 + $0x54] sm:$0xf]  ;;  %v1725_v6 = vld [vmem:[%s2379_s14 + $0x58] sm:$0xf0]  ;;  %v1723_v8 = vld [vmem:[%s2379_s14 + $0x50] sm:$0xf] }
  0x28   : > { %815 = vmatpush.bf16.msra.mxu0 %v2029_v12  ;;  %2107 = vmatpush.bf16.msra.mxu2 %v2029_v12  ;;  %v1728_v7 = vor.u32 %v2049_v5, %v1725_v6  ;;  %v2050_v9 = vld [vmem:[%s2379_s14 + $0x54] sm:$0xf0]  ;;  %v2080_v12 = vld [vmem:[%s2379_s14 + $0x144] sm:$0xf0]  ;;  %v1845_v17 = vld [vmem:[%s2379_s14 + $0x148] sm:$0xf0] }
  0x29   : > { %985 = vmatpush.bf16.msra.mxu1 %v2036_v11  ;;  %2114 = vmatpush.bf16.msra.mxu3 %v2036_v11  ;;  %v1724_v10 = vor.u32 %v2050_v9, %v1723_v8  ;;  %v1843_v11 = vld [vmem:[%s2379_s14 + $0x140] sm:$0xf]  ;;  %v2052_v21 = vld [vmem:[%s2379_s14 + $0x64] sm:$0xf0]  ;;  %v1741_v24 = vld [vmem:[%s2379_s14 + $0x78] sm:$0xf0] }
  0x2a   : > { %v1851_v25 = vld [vmem:[%s2379_s14 + $0x150] sm:$0xf]  ;;  %v2081_v28 = vld [vmem:[%s2379_s14 + $0x154] sm:$0xf]  ;;  %v2054_v33 = vld [vmem:[%s2379_s14 + $0x74] sm:$0xf0] }
  0x2b   : > { %v1749_v36 = vld [vmem:[%s2379_s14 + $0x88] sm:$0xf0]  ;;  %v1859_v37 = vld [vmem:[%s2379_s14 + $0x160] sm:$0xf]  ;;  %v2083_v40 = vld [vmem:[%s2379_s14 + $0x164] sm:$0xf] }
  0x2c   : > { %816 = vmatpush.bf16.msra.mxu0 %v2028_v14  ;;  %2108 = vmatpush.bf16.msra.mxu2 %v2028_v14  ;;  %v2051_v14 = vld [vmem:[%s2379_s14 + $0x64] sm:$0xf]  ;;  %v1861_v41 = vld [vmem:[%s2379_s14 + $0x168] sm:$0xf0]  ;;  %v1747_v45 = vld [vmem:[%s2379_s14 + $0x80] sm:$0xf] }
  0x2d   : > { %986 = vmatpush.bf16.msra.mxu1 %v2035_v13  ;;  %2115 = vmatpush.bf16.msra.mxu3 %v2035_v13  ;;  %v1844_v13 = vor.u32 %v2080_v12, %v1843_v11  ;;  %v1864_v43 = vor.u32 %v2083_v40, %v1861_v41  ;;  %v2056_v46 = vld [vmem:[%s2379_s14 + $0x84] sm:$0xf0]  ;;  %v2057_v53 = vld [vmem:[%s2379_s14 + $0x94] sm:$0xf]  ;;  %v1757_v55 = vld [vmem:[%s2379_s14 + $0x98] sm:$0xf0] }
  0x2e   : > { %v1748_v48 = vor.u32 %v2056_v46, %v1747_v45  ;;  %v2086_v57 = vld [vmem:[%s2379_s14 + $0x174] sm:$0xf0]  ;;  %v2085_v60 = vld [vmem:[%s2379_s14 + $0x174] sm:$0xf]  ;;  %v1869_v61 = vld [vmem:[%s2379_s14 + $0x178] sm:$0xf0]  ;;  %v1760_v0 = vor.u32 %v2057_v53, %v1757_v55 }
  0x2f   : > { %v1872_v1 = vor.u32 %v2085_v60, %v1869_v61  ;;  %v1755_v3 = vld [vmem:[%s2379_s14 + $0x90] sm:$0xf]  ;;  %s226_s13 = scalar_lea.vmem [#allocation3], %s1675_s6  ;;  %s1553_s20 = scalar_lea.sflag [#allocation4], %s224_s10 }
  0x30   : > { %817 = vmatpush.bf16.msra.mxu0 %v2027_v16  ;;  %2109 = vmatpush.bf16.msra.mxu2 %v2027_v16  ;;  %v2079_v16 = vld [vmem:[%s2379_s14 + $0x144] sm:$0xf] }
  0x31   : > { %987 = vmatpush.bf16.msra.mxu1 %v2034_v15  ;;  %2116 = vmatpush.bf16.msra.mxu3 %v2034_v15  ;;  %v1733_v15 = vld [vmem:[%s2379_s14 + $0x68] sm:$0xf0] }
  0x32   : > { %v1736_v18 = vor.u32 %v2051_v14, %v1733_v15 }
  0x34   : > { %1989 = vmatmul.msk.bf16.vlgmr.msra.gmra.mxu1 %vm710_vm1, %v1688_v19  ;;  %818 = vmatpush.bf16.msra.mxu0 %v2026_v20  ;;  %v1848_v19 = vor.u32 %v2079_v16, %v1845_v17 }
  0x35   : > { %2110 = vmatpush.bf16.msra.mxu2 %v2026_v20  ;;  %2006 = vmatmul.msk.bf16.vlgmr.msra.gmra.mxu3 %vm710_vm1, %v1824_v44  ;;  %v1731_v20 = vld [vmem:[%s2379_s14 + $0x60] sm:$0xf] }
  0x36   : > { %v1732_v22 = vor.u32 %v2052_v21, %v1731_v20  ;;  %v2059_v21 = vld [vmem:[%s2379_s14 + $0xa4] sm:$0xf] }
  0x37   : > { %819 = vmatmul.bf16.vlgmr.msra.gmra.mxu0 %v1684_v23  ;;  %v2053_v23 = vld [vmem:[%s2379_s14 + $0x74] sm:$0xf] }
  0x38   : > { %899 = vmatmul.bf16.vlgmr.msra.gmra.mxu2 %v1812_v32  ;;  %v1744_v30 = vor.u32 %v2053_v23, %v1741_v24  ;;  %v1739_v32 = vld [vmem:[%s2379_s14 + $0x70] sm:$0xf]  ;;  %v1765_v24 = vld [vmem:[%s2379_s14 + $0xa8] sm:$0xf0] }
  0x39   : > { %v1740_v34 = vor.u32 %v2054_v33, %v1739_v32  ;;  %v1768_v32 = vor.u32 %v2059_v21, %v1765_v24 }
  0x44   : > { %1990 = vmatmul.msk.bf16.gmra.mxu1 %vm710_vm1, %v1696_v26  ;;  %v2082_v26 = vld [vmem:[%s2379_s14 + $0x154] sm:$0xf0] }
  0x45   : > { %2007 = vmatmul.msk.bf16.gmra.mxu3 %vm710_vm1, %v1832_v56  ;;  %v1852_v27 = vor.u32 %v2082_v26, %v1851_v25  ;;  %v1867_v56 = vld [vmem:[%s2379_s14 + $0x170] sm:$0xf]  ;;  %v1875_v25 = vld [vmem:[%s2379_s14 + $0x180] sm:$0xf]  ;;  %v2088_v26 = vld [vmem:[%s2379_s14 + $0x184] sm:$0xf0] }
  0x47   : > { %824 = vmatmul.bf16.gmra.mxu0 %v1692_v29  ;;  %v1853_v29 = vld [vmem:[%s2379_s14 + $0x158] sm:$0xf0] }
  0x48   : > { %904 = vmatmul.bf16.gmra.mxu2 %v1820_v42  ;;  %v1856_v31 = vor.u32 %v2081_v28, %v1853_v29  ;;  %v1876_v28 = vor.u32 %v2088_v26, %v1875_v25  ;;  %v2087_v29 = vld [vmem:[%s2379_s14 + $0x184] sm:$0xf] }
  0x49   : > { %v2063_v25 = vld [vmem:[%s2379_s14 + $0xc4] sm:$0xf] }
  0x54   : > { %1991 = vmatmul.msk.bf16.gmra.mxu1 %vm710_vm1, %v1704_v35  ;;  %v2055_v35 = vld [vmem:[%s2379_s14 + $0x84] sm:$0xf] }
  0x55   : > { %2008 = vmatmul.msk.bf16.gmra.mxu3 %vm710_vm1, %v1840_v4  ;;  %v1752_v42 = vor.u32 %v2055_v35, %v1749_v36  ;;  %v2058_v4 = vld [vmem:[%s2379_s14 + $0x94] sm:$0xf0]  ;;  %v1763_v35 = vld [vmem:[%s2379_s14 + $0xa0] sm:$0xf]  ;;  %v2060_v36 = vld [vmem:[%s2379_s14 + $0xa4] sm:$0xf0] }
  0x56   : > { %v1756_v11 = vor.u32 %v2058_v4, %v1755_v3  ;;  %v1771_v4 = vld [vmem:[%s2379_s14 + $0xb0] sm:$0xf] }
  0x57   : > { %829 = vmatmul.bf16.gmra.mxu0 %v1700_v38  ;;  %v2084_v38 = vld [vmem:[%s2379_s14 + $0x164] sm:$0xf0] }
  0x58   : > { %909 = vmatmul.bf16.gmra.mxu2 %v1828_v54  ;;  %v1860_v39 = vor.u32 %v2084_v38, %v1859_v37 }
  0x64   : > { %1992 = vmatmul.msk.bf16.gmra.mxu1 %vm710_vm1, %v1712_v47  ;;  %v2465_v47 = vld [vmem:[#allocation2] ss:$0 sm:$0xff] }
  0x65   : > { %2009 = vmatmul.msk.bf16.gmra.mxu3 %vm710_vm1, %v1848_v19 }
  0x67   : > { %834 = vmatmul.bf16.gmra.mxu0 %v1708_v50 }
  0x68   : > { %914 = vmatmul.bf16.gmra.mxu2 %v1836_v2 }
  0x74   : > { %1993 = vmatmul.msk.bf16.gmra.mxu1 %vm710_vm1, %v1720_v59  ;;  %v1868_v59 = vor.u32 %v2086_v57, %v1867_v56  ;;  %v1773_v57 = vld [vmem:[%s2379_s14 + $0xb8] sm:$0xf0] }
  0x75   : > { %2010 = vmatmul.msk.bf16.gmra.mxu3 %vm710_vm1, %v1856_v31 }
  0x77   : > { %839 = vmatmul.bf16.gmra.mxu0 %v1716_v62 }
  0x78   : > { %919 = vmatmul.bf16.gmra.mxu2 %v1844_v13 }
  0x84   : > { %1994 = vmatmul.msk.bf16.gmra.mxu1 %vm710_vm1, %v1728_v7 }
  0x85   : > { %2011 = vmatmul.msk.bf16.gmra.mxu3 %vm710_vm1, %v1864_v43 }
  0x87   : > { %844 = vmatmul.bf16.gmra.mxu0 %v1724_v10 }
  0x88   : > { %924 = vmatmul.bf16.gmra.mxu2 %v1852_v27 }
  0x94   : > { %1995 = vmatmul.msk.bf16.gmra.mxu1 %vm710_vm1, %v1736_v18 }
  0x95   : > { %2012 = vmatmul.msk.bf16.gmra.mxu3 %vm710_vm1, %v1872_v1 }
  0x97   : > { %849 = vmatmul.bf16.gmra.mxu0 %v1732_v22 }
  0x98   : > { %929 = vmatmul.bf16.gmra.mxu2 %v1860_v39 }
  0xa4   : > { %1996 = vmatmul.msk.bf16.gmra.mxu1 %vm710_vm1, %v1744_v30  ;;  %v1877_v30 = vld [vmem:[%s2379_s14 + $0x188] sm:$0xf0] }
  0xa5   : > { %v1880_v33 = vor.u32 %v2087_v29, %v1877_v30  ;;  %v1781_v29 = vld [vmem:[%s2379_s14 + $0xc8] sm:$0xf0] }
  0xa7   : > { %854 = vmatmul.bf16.gmra.mxu0 %v1740_v34  ;;  %2013 = vmatmul.msk.bf16.gmra.mxu3 %vm710_vm1, %v1880_v33 }
  0xa8   : > { %934 = vmatmul.bf16.gmra.mxu2 %v1868_v59  ;;  %v2090_v59 = vld [vmem:[%s2379_s14 + $0x194] sm:$0xf0] }
  0xb1   : > { %v989_v44 = vpop.f32.mrf.mxu1 }
  0xb4   : > { %1997 = vmatmul.msk.bf16.gmra.mxu1 %vm710_vm1, %v1752_v42  ;;  %v820_v49 = vpop.f32.mrf.mxu0  ;;  %v1764_v42 = vor.u32 %v2060_v36, %v1763_v35  ;;  %v2091_v36 = vld [vmem:[%s2379_s14 + $0x1a4] sm:$0xf] }
  0xb5   : > { %v821_v50 = vadd.f32 %v2465_v47, %v820_v49 }
  0xb7   : > { %v990_v51 = vadd.f32 %v989_v44, %v821_v50  ;;  %859 = vmatmul.bf16.gmra.mxu0 %v1748_v48 }
  0xb8   : > { %939 = vmatmul.bf16.gmra.mxu2 %v1876_v28 }
  0xb9   : > { %v991_v52 = vpop.f32.mrf.mxu1  ;;  %1150 = vst.msk [vmem:[%s2475_s7] sm:$0xff] %vm1149_vm2, %v990_v51  ;;  %v1349_v62 = vmul.f32 %v990_v51, %v990_v51  ;;  %v1214_v5 = vsel %vm1149_vm2, %v990_v51, 0.0 }
  0xbb   : > { %v1413_v9 = vsel %vm1149_vm2, %v1349_v62, 0.0  ;;  %v2514_v40 = vpop.f32.mrf.mxu2  ;;  %v2089_v62 = vld [vmem:[%s2379_s14 + $0x194] sm:$0xf] }
  0xbc   : > { %v822_v54 = vpop.f32.mrf.mxu0 }
  0xbd   : > { %v823_v58 = vadd.f32 %v2465_v47, %v822_v54  ;;  %v2061_v54 = vld [vmem:[%s2379_s14 + $0xb4] sm:$0xf] }
  0xbe   : > { %v1776_v1 = vor.u32 %v2061_v54, %v1773_v57 }
  0xbf   : > { %v992_v63 = vadd.f32 %v991_v52, %v823_v58  ;;  %v1883_v58 = vld [vmem:[%s2379_s14 + $0x190] sm:$0xf] }
  0xc0   : > { %v1884_v61 = vor.u32 %v2090_v59, %v1883_v58 }
  0xc1   : > { %v994_v2 = vpop.f32.mrf.mxu1  ;;  %1151 = vst.msk [vmem:[%s2475_s7 + $0x8] sm:$0xff] %vm1149_vm2, %v992_v63  ;;  %v1215_v6 = vsel %vm1149_vm2, %v992_v63, 0.0  ;;  %v1350_v7 = vmul.f32 %v992_v63, %v992_v63  ;;  %v1885_v63 = vld [vmem:[%s2379_s14 + $0x198] sm:$0xf0] }
  0xc2   : > { %v1216_v8 = vadd.f32 %v1215_v6, %v1214_v5  ;;  %v2062_v5 = vld [vmem:[%s2379_s14 + $0xb4] sm:$0xf0] }
  0xc3   : > { %v1414_v10 = vsel %vm1149_vm2, %v1350_v7, 0.0  ;;  %v2522_v52 = vpop.f32.mrf.mxu2 }
  0xc4   : > { %1998 = vmatmul.msk.bf16.gmra.mxu1 %vm710_vm1, %v1760_v0  ;;  %v1415_v12 = vadd.f32 %v1414_v10, %v1413_v9  ;;  %v825_v13 = vpop.f32.mrf.mxu0 }
  0xc5   : > { %v826_v14 = vadd.f32 %v2465_v47, %v825_v13 }
  0xc7   : > { %v995_v15 = vadd.f32 %v994_v2, %v826_v14  ;;  %864 = vmatmul.bf16.gmra.mxu0 %v1756_v11  ;;  %v1888_v2 = vor.u32 %v2089_v62, %v1885_v63  ;;  %v1772_v11 = vor.u32 %v2062_v5, %v1771_v4 }
  0xc8   : > { %944 = vmatmul.bf16.gmra.mxu2 %v1884_v61 }
  0xc9   : > { %v996_v16 = vpop.f32.mrf.mxu1  ;;  %1152 = vst.msk [vmem:[%s2475_s7 + $0x10] sm:$0xff] %vm1149_vm2, %v995_v15  ;;  %v1217_v17 = vsel %vm1149_vm2, %v995_v15, 0.0  ;;  %v1351_v18 = vmul.f32 %v995_v15, %v995_v15  ;;  %2014 = vmatmul.msk.bf16.gmra.mxu3 %vm710_vm1, %v1888_v2  ;;  %v1074_v15 = vpop.f32.mrf.mxu3  ;;  %v2065_v2 = vld [vmem:[%s2379_s14 + $0xd4] sm:$0xf] }
  0xca   : > { %v1218_v19 = vadd.f32 %v1217_v17, %v1216_v8 }
  0xcb   : > { %v1416_v20 = vsel %vm1149_vm2, %v1351_v18, 0.0  ;;  %v905_v9 = vpop.f32.mrf.mxu2 }
  0xcc   : > { %v1417_v22 = vadd.f32 %v1416_v20, %v1415_v12  ;;  %v827_v23 = vpop.f32.mrf.mxu0  ;;  %v906_v14 = vadd.f32 %v2465_v47, %v905_v9  ;;  %v2094_v9 = vld [vmem:[%s2379_s14 + $0x1b4] sm:$0xf0] }
  0xcd   : > { %v828_v27 = vadd.f32 %v2465_v47, %v827_v23 }
  0xce   : > { %v2542_v17 = vadd.f32 %v1074_v15, %v906_v14  ;;  %v1901_v14 = vld [vmem:[%s2379_s14 + $0x1b8] sm:$0xf0] }
  0xcf   : > { %v997_v31 = vadd.f32 %v996_v16, %v828_v27 }
  0xd0   : > { %1184 = vst.msk [vmem:[%s2475_s7 + $0x110] sm:$0xff] %vm1149_vm2, %v2542_v17 }
  0xd1   : > { %v999_v34 = vpop.f32.mrf.mxu1  ;;  %1153 = vst.msk [vmem:[%s2475_s7 + $0x18] sm:$0xff] %vm1149_vm2, %v997_v31  ;;  %v1219_v37 = vsel %vm1149_vm2, %v997_v31, 0.0  ;;  %v1352_v38 = vmul.f32 %v997_v31, %v997_v31  ;;  %v1076_v30 = vpop.f32.mrf.mxu3  ;;  %v1891_v31 = vld [vmem:[%s2379_s14 + $0x1a0] sm:$0xf] }
  0xd2   : > { %v1220_v39 = vadd.f32 %v1219_v37, %v1218_v19  ;;  %v1893_v37 = vld [vmem:[%s2379_s14 + $0x1a8] sm:$0xf0] }
  0xd3   : > { %v1418_v41 = vsel %vm1149_vm2, %v1352_v38, 0.0  ;;  %v907_v23 = vpop.f32.mrf.mxu2 }
  0xd4   : > { %1999 = vmatmul.msk.bf16.gmra.mxu1 %vm710_vm1, %v1768_v32  ;;  %v1419_v43 = vadd.f32 %v1418_v41, %v1417_v22  ;;  %v830_v44 = vpop.f32.mrf.mxu0  ;;  %v908_v26 = vadd.f32 %v2465_v47, %v907_v23  ;;  %v2092_v32 = vld [vmem:[%s2379_s14 + $0x1a4] sm:$0xf0]  ;;  %v1896_v41 = vor.u32 %v2091_v36, %v1893_v37 }
  0xd5   : > { %v831_v45 = vadd.f32 %v2465_v47, %v830_v44  ;;  %v1892_v35 = vor.u32 %v2092_v32, %v1891_v31  ;;  %v2064_v44 = vld [vmem:[%s2379_s14 + $0xc4] sm:$0xf0] }
  0xd7   : > { %v1000_v46 = vadd.f32 %v999_v34, %v831_v45  ;;  %869 = vmatmul.bf16.gmra.mxu0 %v1764_v42  ;;  %v2557_v34 = vadd.f32 %v1076_v30, %v908_v26 }
  0xd8   : > { %949 = vmatmul.bf16.gmra.mxu2 %v1892_v35 }
  0xd9   : > { %v1001_v48 = vpop.f32.mrf.mxu1  ;;  %1154 = vst.msk [vmem:[%s2475_s7 + $0x20] sm:$0xff] %vm1149_vm2, %v1000_v46  ;;  %v1221_v49 = vsel %vm1149_vm2, %v1000_v46, 0.0  ;;  %v1353_v50 = vmul.f32 %v1000_v46, %v1000_v46  ;;  %2015 = vmatmul.msk.bf16.gmra.mxu3 %vm710_vm1, %v1896_v41 }
  0xda   : > { %v1222_v51 = vadd.f32 %v1221_v49, %v1220_v39  ;;  %v1784_v39 = vor.u32 %v2063_v25, %v1781_v29  ;;  %1185 = vst.msk [vmem:[%s2475_s7 + $0x118] sm:$0xff] %vm1149_vm2, %v2557_v34 }
  0xdb   : > { %v1420_v53 = vsel %vm1149_vm2, %v1353_v50, 0.0  ;;  %v910_v49 = vpop.f32.mrf.mxu2 }
  0xdc   : > { %v1421_v55 = vadd.f32 %v1420_v53, %v1419_v43  ;;  %v832_v56 = vpop.f32.mrf.mxu0  ;;  %v1779_v43 = vld [vmem:[%s2379_s14 + $0xc0] sm:$0xf] }
  0xdd   : > { %v833_v60 = vadd.f32 %v2465_v47, %v832_v56  ;;  %v1079_v56 = vpop.f32.mrf.mxu3 }
  0xdf   : > { %v1002_v0 = vadd.f32 %v1001_v48, %v833_v60 }
  0xe1   : > { %v1004_v3 = vpop.f32.mrf.mxu1  ;;  %1155 = vst.msk [vmem:[%s2475_s7 + $0x28] sm:$0xff] %vm1149_vm2, %v1002_v0  ;;  %v1223_v6 = vsel %vm1149_vm2, %v1002_v0, 0.0  ;;  %v1354_v7 = vmul.f32 %v1002_v0, %v1002_v0 }
  0xe2   : > { %v1224_v8 = vadd.f32 %v1223_v6, %v1222_v51  ;;  %v1780_v51 = vor.u32 %v2064_v44, %v1779_v43  ;;  %v1789_v6 = vld [vmem:[%s2379_s14 + $0xd8] sm:$0xf0]  ;;  %v2067_v43 = vld [vmem:[%s2379_s14 + $0xe4] sm:$0xf] }
  0xe3   : > { %v1422_v10 = vsel %vm1149_vm2, %v1354_v7, 0.0  ;;  %v912_v0 = vpop.f32.mrf.mxu2 }
  0xe4   : > { %2000 = vmatmul.msk.bf16.gmra.mxu1 %vm710_vm1, %v1776_v1  ;;  %v1423_v12 = vadd.f32 %v1422_v10, %v1421_v55  ;;  %v835_v13 = vpop.f32.mrf.mxu0  ;;  %v911_v55 = vadd.f32 %v2465_v47, %v910_v49 }
  0xe5   : > { %v836_v16 = vadd.f32 %v2465_v47, %v835_v13  ;;  %v1081_v7 = vpop.f32.mrf.mxu3  ;;  %v2093_v13 = vld [vmem:[%s2379_s14 + $0x1b4] sm:$0xf] }
  0xe6   : > { %v2574_v58 = vadd.f32 %v1079_v56, %v911_v55  ;;  %v2095_v56 = vld [vmem:[%s2379_s14 + $0x1c4] sm:$0xf] }
  0xe7   : > { %v1005_v18 = vadd.f32 %v1004_v3, %v836_v16  ;;  %874 = vmatmul.bf16.gmra.mxu0 %v1772_v11  ;;  %v913_v3 = vadd.f32 %v2465_v47, %v912_v0  ;;  %v1792_v16 = vor.u32 %v2065_v2, %v1789_v6  ;;  %v2068_v0 = vld [vmem:[%s2379_s14 + $0xe4] sm:$0xf0] }
  0xe8   : > { %1186 = vst.msk [vmem:[%s2475_s7 + $0x120] sm:$0xff] %vm1149_vm2, %v2574_v58 }
  0xe9   : > { %v1006_v19 = vpop.f32.mrf.mxu1  ;;  %1156 = vst.msk [vmem:[%s2475_s7 + $0x30] sm:$0xff] %vm1149_vm2, %v1005_v18  ;;  %v1225_v20 = vsel %vm1149_vm2, %v1005_v18, 0.0  ;;  %v1355_v21 = vmul.f32 %v1005_v18, %v1005_v18  ;;  %v2589_v11 = vadd.f32 %v1081_v7, %v913_v3  ;;  %v1904_v18 = vor.u32 %v2093_v13, %v1901_v14 }
  0xea   : > { %v1226_v22 = vadd.f32 %v1225_v20, %v1224_v8  ;;  %v1899_v8 = vld [vmem:[%s2379_s14 + $0x1b0] sm:$0xf] }
  0xeb   : > { %v1424_v24 = vsel %vm1149_vm2, %v1355_v21, 0.0  ;;  %1187 = vst.msk [vmem:[%s2475_s7 + $0x128] sm:$0xff] %vm1149_vm2, %v2589_v11  ;;  %v1787_v20 = vld [vmem:[%s2379_s14 + $0xd0] sm:$0xf]  ;;  %v2066_v21 = vld [vmem:[%s2379_s14 + $0xd4] sm:$0xf0]  ;;  %2016 = vmatmul.msk.bf16.gmra.mxu3 %vm710_vm1, %v1904_v18  ;;  %v915_v25 = vpop.f32.mrf.mxu2 }
  0xec   : > { %v1425_v27 = vadd.f32 %v1424_v24, %v1423_v12  ;;  %v837_v28 = vpop.f32.mrf.mxu0  ;;  %v1900_v12 = vor.u32 %v2094_v9, %v1899_v8  ;;  %v916_v30 = vadd.f32 %v2465_v47, %v915_v25 }
  0xed   : > { %v838_v33 = vadd.f32 %v2465_v47, %v837_v28  ;;  %v1084_v31 = vpop.f32.mrf.mxu3 }
  0xee   : > { %954 = vmatmul.bf16.gmra.mxu2 %v1900_v12 }
  0xef   : > { %v1007_v38 = vadd.f32 %v1006_v19, %v838_v33  ;;  %v2606_v33 = vadd.f32 %v1084_v31, %v916_v30 }
  0xf1   : > { %v1009_v42 = vpop.f32.mrf.mxu1  ;;  %1157 = vst.msk [vmem:[%s2475_s7 + $0x38] sm:$0xff] %vm1149_vm2, %v1007_v38  ;;  %v1227_v45 = vsel %vm1149_vm2, %v1007_v38, 0.0  ;;  %v1356_v46 = vmul.f32 %v1007_v38, %v1007_v38 }
  0xf2   : > { %v1228_v48 = vadd.f32 %v1227_v45, %v1226_v22  ;;  %1188 = vst.msk [vmem:[%s2475_s7 + $0x130] sm:$0xff] %vm1149_vm2, %v2606_v33 }
  0xf3   : > { %v1426_v50 = vsel %vm1149_vm2, %v1356_v46, 0.0  ;;  %v917_v41 = vpop.f32.mrf.mxu2 }
  0xf4   : > { %2001 = vmatmul.msk.bf16.gmra.mxu1 %vm710_vm1, %v1784_v39  ;;  %v1427_v53 = vadd.f32 %v1426_v50, %v1425_v27  ;;  %v840_v54 = vpop.f32.mrf.mxu0  ;;  %v1788_v27 = vor.u32 %v2066_v21, %v1787_v20  ;;  %v918_v44 = vadd.f32 %v2465_v47, %v917_v41  ;;  %v1907_v50 = vld [vmem:[%s2379_s14 + $0x1c0] sm:$0xf] }
  0xf5   : > { %v841_v57 = vadd.f32 %v2465_v47, %v840_v54  ;;  %v1086_v49 = vpop.f32.mrf.mxu3 }
  0xf6   : > { %v2621_v54 = vadd.f32 %v1086_v49, %v918_v44 }
  0xf7   : > { %v1010_v59 = vadd.f32 %v1009_v42, %v841_v57  ;;  %879 = vmatmul.bf16.gmra.mxu0 %v1780_v51  ;;  %v2096_v51 = vld [vmem:[%s2379_s14 + $0x1c4] sm:$0xf0]  ;;  %v1909_v57 = vld [vmem:[%s2379_s14 + $0x1c8] sm:$0xf0] }
  0xf8   : > { %v1908_v55 = vor.u32 %v2096_v51, %v1907_v50  ;;  %1189 = vst.msk [vmem:[%s2475_s7 + $0x138] sm:$0xff] %vm1149_vm2, %v2621_v54 }
  0xf9   : > { %v1011_v60 = vpop.f32.mrf.mxu1  ;;  %1158 = vst.msk [vmem:[%s2475_s7 + $0x40] sm:$0xff] %vm1149_vm2, %v1010_v59  ;;  %v1229_v61 = vsel %vm1149_vm2, %v1010_v59, 0.0  ;;  %v1357_v62 = vmul.f32 %v1010_v59, %v1010_v59 }
  0xfa   : > { %v1230_v63 = vadd.f32 %v1229_v61, %v1228_v48  ;;  %v1797_v48 = vld [vmem:[%s2379_s14 + $0xe8] sm:$0xf0]  ;;  %v1912_v61 = vor.u32 %v2095_v56, %v1909_v57 }
  0xfb   : > { %v1428_v1 = vsel %vm1149_vm2, %v1357_v62, 0.0 }
  0xfc   : > { %v1429_v4 = vadd.f32 %v1428_v1, %v1427_v53  ;;  %v842_v5 = vpop.f32.mrf.mxu0  ;;  %2017 = vmatmul.msk.bf16.gmra.mxu3 %vm710_vm1, %v1912_v61 }
  0xfd   : > { %v843_v10 = vadd.f32 %v2465_v47, %v842_v5 }
  0xfe   : > { %959 = vmatmul.bf16.gmra.mxu2 %v1908_v55 }
  0xff   : > { %v1012_v15 = vadd.f32 %v1011_v60, %v843_v10  ;;  %v1800_v60 = vor.u32 %v2067_v43, %v1797_v48  ;;  %v1089_v10 = vpop.f32.mrf.mxu3  ;;  %v2070_v43 = vld [vmem:[%s2379_s14 + $0xf4] sm:$0xf0] }
 0x101   : > { %v1014_v19 = vpop.f32.mrf.mxu1  ;;  %1159 = vst.msk [vmem:[%s2475_s7 + $0x48] sm:$0xff] %vm1149_vm2, %v1012_v15  ;;  %v1231_v22 = vsel %vm1149_vm2, %v1012_v15, 0.0  ;;  %v1358_v23 = vmul.f32 %v1012_v15, %v1012_v15 }
 0x102   : > { %v1232_v24 = vadd.f32 %v1231_v22, %v1230_v63  ;;  %v1795_v63 = vld [vmem:[%s2379_s14 + $0xe0] sm:$0xf]  ;;  %v2069_v22 = vld [vmem:[%s2379_s14 + $0xf4] sm:$0xf] }
 0x103   : > { %v1430_v26 = vsel %vm1149_vm2, %v1358_v23, 0.0  ;;  %v1796_v6 = vor.u32 %v2068_v0, %v1795_v63 }
 0x104   : > { %2002 = vmatmul.msk.bf16.gmra.mxu1 %vm710_vm1, %v1792_v16  ;;  %v1431_v28 = vadd.f32 %v1430_v26, %v1429_v4  ;;  %v845_v29 = vpop.f32.mrf.mxu0  ;;  %v920_v4 = vpop.f32.mrf.mxu2  ;;  %v1805_v26 = vld [vmem:[%s2379_s14 + $0xf8] sm:$0xf0] }
 0x105   : > { %v846_v32 = vadd.f32 %v2465_v47, %v845_v29  ;;  %v921_v9 = vadd.f32 %v2465_v47, %v920_v4  ;;  %v2098_v29 = vld [vmem:[%s2379_s14 + $0x1d4] sm:$0xf0] }
 0x107   : > { %v1015_v35 = vadd.f32 %v1014_v19, %v846_v32  ;;  %884 = vmatmul.bf16.gmra.mxu0 %v1788_v27  ;;  %v2638_v13 = vadd.f32 %v1089_v10, %v921_v9  ;;  %v1091_v27 = vpop.f32.mrf.mxu3  ;;  %v1923_v9 = vld [vmem:[%s2379_s14 + $0x1e0] sm:$0xf]  ;;  %v2100_v10 = vld [vmem:[%s2379_s14 + $0x1e4] sm:$0xf0] }
 0x109   : > { %v1016_v36 = vpop.f32.mrf.mxu1  ;;  %1160 = vst.msk [vmem:[%s2475_s7 + $0x50] sm:$0xff] %vm1149_vm2, %v1015_v35  ;;  %v1233_v37 = vsel %vm1149_vm2, %v1015_v35, 0.0  ;;  %v1359_v38 = vmul.f32 %v1015_v35, %v1015_v35  ;;  %v2097_v35 = vld [vmem:[%s2379_s14 + $0x1d4] sm:$0xf] }
 0x10a   : > { %v1234_v39 = vadd.f32 %v1233_v37, %v1232_v24  ;;  %1190 = vst.msk [vmem:[%s2475_s7 + $0x140] sm:$0xff] %vm1149_vm2, %v2638_v13 }
 0x10b   : > { %v1432_v42 = vsel %vm1149_vm2, %v1359_v38, 0.0  ;;  %v1808_v38 = vor.u32 %v2069_v22, %v1805_v26 }
 0x10c   : > { %v1433_v45 = vadd.f32 %v1432_v42, %v1431_v28  ;;  %v847_v46 = vpop.f32.mrf.mxu0  ;;  %v922_v20 = vpop.f32.mrf.mxu2  ;;  %v1915_v28 = vld [vmem:[%s2379_s14 + $0x1d0] sm:$0xf] }
 0x10d   : > { %v848_v53 = vadd.f32 %v2465_v47, %v847_v46  ;;  %v923_v23 = vadd.f32 %v2465_v47, %v922_v20  ;;  %v1916_v32 = vor.u32 %v2098_v29, %v1915_v28  ;;  %v1803_v42 = vld [vmem:[%s2379_s14 + $0xf0] sm:$0xf] }
 0x10e   : > { %v1804_v50 = vor.u32 %v2070_v43, %v1803_v42 }
 0x10f   : > { %v1017_v59 = vadd.f32 %v1016_v36, %v848_v53  ;;  %v2653_v31 = vadd.f32 %v1091_v27, %v923_v23  ;;  %v1917_v36 = vld [vmem:[%s2379_s14 + $0x1d8] sm:$0xf0]  ;;  %964 = vmatmul.bf16.gmra.mxu2 %v1916_v32  ;;  %v1094_v56 = vpop.f32.mrf.mxu3 }
 0x111   : > { %v1019_v62 = vpop.f32.mrf.mxu1  ;;  %1161 = vst.msk [vmem:[%s2475_s7 + $0x58] sm:$0xff] %vm1149_vm2, %v1017_v59  ;;  %v1235_v1 = vsel %vm1149_vm2, %v1017_v59, 0.0  ;;  %v1360_v2 = vmul.f32 %v1017_v59, %v1017_v59 }
 0x112   : > { %v1236_v3 = vadd.f32 %v1235_v1, %v1234_v39  ;;  %1191 = vst.msk [vmem:[%s2475_s7 + $0x148] sm:$0xff] %vm1149_vm2, %v2653_v31  ;;  %v1920_v39 = vor.u32 %v2097_v35, %v1917_v36 }
 0x113   : > { %v1434_v5 = vsel %vm1149_vm2, %v1360_v2, 0.0 }
 0x114   : > { %2003 = vmatmul.msk.bf16.gmra.mxu1 %vm710_vm1, %v1800_v60  ;;  %v1435_v7 = vadd.f32 %v1434_v5, %v1433_v45  ;;  %v850_v8 = vpop.f32.mrf.mxu0  ;;  %2018 = vmatmul.msk.bf16.gmra.mxu3 %vm710_vm1, %v1920_v39  ;;  %v925_v48 = vpop.f32.mrf.mxu2 }
 0x115   : > { %v851_v12 = vadd.f32 %v2465_v47, %v850_v8  ;;  %v926_v55 = vadd.f32 %v2465_v47, %v925_v48 }
 0x117   : > { %v1020_v14 = vadd.f32 %v1019_v62, %v851_v12  ;;  %889 = vmatmul.bf16.gmra.mxu0 %v1796_v6  ;;  %v2670_v59 = vadd.f32 %v1094_v56, %v926_v55  ;;  %v1096_v8 = vpop.f32.mrf.mxu3 }
 0x119   : > { %v1021_v15 = vpop.f32.mrf.mxu1  ;;  %1162 = vst.msk [vmem:[%s2475_s7 + $0x60] sm:$0xff] %vm1149_vm2, %v1020_v14  ;;  %v1237_v16 = vsel %vm1149_vm2, %v1020_v14, 0.0  ;;  %v1361_v18 = vmul.f32 %v1020_v14, %v1020_v14 }
 0x11a   : > { %v1238_v19 = vadd.f32 %v1237_v16, %v1236_v3  ;;  %1192 = vst.msk [vmem:[%s2475_s7 + $0x150] sm:$0xff] %vm1149_vm2, %v2670_v59  ;;  %v2071_v3 = vld [vmem:[%s2379_s14 + $0x104] sm:$0xf] }
 0x11b   : > { %v1436_v21 = vsel %vm1149_vm2, %v1361_v18, 0.0  ;;  %v2099_v16 = vld [vmem:[%s2379_s14 + $0x1e4] sm:$0xf]  ;;  %v1925_v18 = vld [vmem:[%s2379_s14 + $0x1e8] sm:$0xf0] }
 0x11c   : > { %v1437_v24 = vadd.f32 %v1436_v21, %v1435_v7  ;;  %v852_v25 = vpop.f32.mrf.mxu0  ;;  %v927_v1 = vpop.f32.mrf.mxu2  ;;  %v1813_v7 = vld [vmem:[%s2379_s14 + $0x108] sm:$0xf0]  ;;  %v1928_v21 = vor.u32 %v2099_v16, %v1925_v18 }
 0x11d   : > { %v853_v30 = vadd.f32 %v2465_v47, %v852_v25  ;;  %v928_v4 = vadd.f32 %v2465_v47, %v927_v1  ;;  %v1816_v20 = vor.u32 %v2071_v3, %v1813_v7 }
 0x11f   : > { %v1022_v37 = vadd.f32 %v1021_v15, %v853_v30  ;;  %v2685_v14 = vadd.f32 %v1096_v8, %v928_v4  ;;  %v1924_v15 = vor.u32 %v2100_v10, %v1923_v9  ;;  %v1099_v32 = vpop.f32.mrf.mxu3 }
 0x121   : > { %v1024_v41 = vpop.f32.mrf.mxu1  ;;  %1163 = vst.msk [vmem:[%s2475_s7 + $0x68] sm:$0xff] %vm1149_vm2, %v1022_v37  ;;  %v1239_v44 = vsel %vm1149_vm2, %v1022_v37, 0.0  ;;  %v1362_v45 = vmul.f32 %v1022_v37, %v1022_v37  ;;  %969 = vmatmul.bf16.gmra.mxu2 %v1924_v15 }
 0x122   : > { %v1240_v46 = vadd.f32 %v1239_v44, %v1238_v19  ;;  %1193 = vst.msk [vmem:[%s2475_s7 + $0x158] sm:$0xff] %vm1149_vm2, %v2685_v14 }
 0x123   : > { %v1438_v49 = vsel %vm1149_vm2, %v1362_v45, 0.0 }
 0x124   : > { %2004 = vmatmul.msk.bf16.gmra.mxu1 %vm710_vm1, %v1808_v38  ;;  %v1439_v51 = vadd.f32 %v1438_v49, %v1437_v24  ;;  %v855_v53 = vpop.f32.mrf.mxu0  ;;  %2019 = vmatmul.msk.bf16.gmra.mxu3 %vm710_vm1, %v1928_v21  ;;  %v930_v26 = vpop.f32.mrf.mxu2 }
 0x125   : > { %v856_v57 = vadd.f32 %v2465_v47, %v855_v53  ;;  %v931_v30 = vadd.f32 %v2465_v47, %v930_v26 }
 0x127   : > { %v1025_v60 = vadd.f32 %v1024_v41, %v856_v57  ;;  %894 = vmatmul.bf16.gmra.mxu0 %v1804_v50  ;;  %v2700_v36 = vadd.f32 %v1099_v32, %v931_v30  ;;  %v1101_v49 = vpop.f32.mrf.mxu3  ;;  %v1931_v50 = vld [vmem:[%s2379_s14 + $0x1f0] sm:$0xf]  ;;  %v2101_v57 = vld [vmem:[%s2379_s14 + $0x1f4] sm:$0xf] }
 0x129   : > { %v1026_v61 = vpop.f32.mrf.mxu1  ;;  %1164 = vst.msk [vmem:[%s2475_s7 + $0x70] sm:$0xff] %vm1149_vm2, %v1025_v60  ;;  %v1241_v62 = vsel %vm1149_vm2, %v1025_v60, 0.0  ;;  %v1363_v63 = vmul.f32 %v1025_v60, %v1025_v60  ;;  %v1933_v60 = vld [vmem:[%s2379_s14 + $0x1f8] sm:$0xf0] }
 0x12a   : > { %v1242_v0 = vadd.f32 %v1241_v62, %v1240_v46  ;;  %1194 = vst.msk [vmem:[%s2475_s7 + $0x160] sm:$0xff] %vm1149_vm2, %v2700_v36  ;;  %v1936_v62 = vor.u32 %v2101_v57, %v1933_v60 }
 0x12b   : > { %v1440_v2 = vsel %vm1149_vm2, %v1363_v63, 0.0 }
 0x12c   : > { %v1441_v5 = vadd.f32 %v1440_v2, %v1439_v51  ;;  %v857_v6 = vpop.f32.mrf.mxu0  ;;  %v932_v43 = vpop.f32.mrf.mxu2  ;;  %v2102_v51 = vld [vmem:[%s2379_s14 + $0x1f4] sm:$0xf0]  ;;  %s1569_s14 = sshll.u32 %s226_s13, 4  ;;  %s1570_s14 = int_to_ptr.vmem [resolvable:$true] %s1569_s14 }
 0x12d   : > { %v858_v12 = vadd.f32 %v2465_v47, %v857_v6  ;;  %v933_v45 = vadd.f32 %v2465_v47, %v932_v43  ;;  %v1932_v56 = vor.u32 %v2102_v51, %v1931_v50 }
 0x12f   : > { %v1027_v19 = vadd.f32 %v1026_v61, %v858_v12  ;;  %v2713_v55 = vadd.f32 %v1101_v49, %v933_v45  ;;  %v1104_v8 = vpop.f32.mrf.mxu3 }
 0x131   : > { %v1029_v22 = vpop.f32.mrf.mxu1  ;;  %1165 = vst.msk [vmem:[%s2475_s7 + $0x78] sm:$0xff] %vm1149_vm2, %v1027_v19  ;;  %v1243_v23 = vsel %vm1149_vm2, %v1027_v19, 0.0  ;;  %v1364_v24 = vmul.f32 %v1027_v19, %v1027_v19  ;;  %974 = vmatmul.bf16.gmra.mxu2 %v1932_v56 }
 0x132   : > { %v1244_v25 = vadd.f32 %v1243_v23, %v1242_v0  ;;  %1195 = vst.msk [vmem:[%s2475_s7 + $0x168] sm:$0xff] %vm1149_vm2, %v2713_v55 }
 0x133   : > { %v1442_v27 = vsel %vm1149_vm2, %v1364_v24, 0.0 }
 0x134   : > { %2005 = vmatmul.msk.bf16.gmra.mxu1 %vm710_vm1, %v1816_v20  ;;  %v1443_v28 = vadd.f32 %v1442_v27, %v1441_v5  ;;  %v860_v29 = vpop.f32.mrf.mxu0  ;;  %2020 = vmatmul.msk.bf16.gmra.mxu3 %vm710_vm1, %v1936_v62  ;;  %v935_v3 = vpop.f32.mrf.mxu2 }
 0x135   : > { %v861_v35 = vadd.f32 %v2465_v47, %v860_v29  ;;  %v936_v7 = vadd.f32 %v2465_v47, %v935_v3 }
 0x137   : > { %v1030_v37 = vadd.f32 %v1029_v22, %v861_v35  ;;  %v2727_v10 = vadd.f32 %v1104_v8, %v936_v7 }
 0x139   : > { %v1031_v38 = vpop.f32.mrf.mxu1  ;;  %1166 = vst.msk [vmem:[%s2475_s7 + $0x80] sm:$0xff] %vm1149_vm2, %v1030_v37  ;;  %v1245_v39 = vsel %vm1149_vm2, %v1030_v37, 0.0  ;;  %v1365_v41 = vmul.f32 %v1030_v37, %v1030_v37 }
 0x13a   : > { %v1246_v42 = vadd.f32 %v1245_v39, %v1244_v25  ;;  %1196 = vst.msk [vmem:[%s2475_s7 + $0x170] sm:$0xff] %vm1149_vm2, %v2727_v10  ;;  %v1106_v25 = vpop.f32.mrf.mxu3 }
 0x13b   : > { %v1444_v44 = vsel %vm1149_vm2, %v1365_v41, 0.0 }
 0x13c   : > { %v1445_v46 = vadd.f32 %v1444_v44, %v1443_v28  ;;  %v862_v48 = vpop.f32.mrf.mxu0  ;;  %v937_v20 = vpop.f32.mrf.mxu2 }
 0x13d   : > { %v863_v53 = vadd.f32 %v2465_v47, %v862_v48  ;;  %v938_v22 = vadd.f32 %v2465_v47, %v937_v20 }
 0x13f   : > { %v1032_v61 = vadd.f32 %v1031_v38, %v863_v53  ;;  %v2738_v27 = vadd.f32 %v1106_v25, %v938_v22 }
 0x141   : > { %v1034_v63 = vpop.f32.mrf.mxu1  ;;  %1167 = vst.msk [vmem:[%s2475_s7 + $0x88] sm:$0xff] %vm1149_vm2, %v1032_v61  ;;  %v1247_v0 = vsel %vm1149_vm2, %v1032_v61, 0.0  ;;  %v1366_v1 = vmul.f32 %v1032_v61, %v1032_v61 }
 0x142   : > { %v1248_v2 = vadd.f32 %v1247_v0, %v1246_v42  ;;  %1197 = vst.msk [vmem:[%s2475_s7 + $0x178] sm:$0xff] %vm1149_vm2, %v2738_v27  ;;  %v1109_v43 = vpop.f32.mrf.mxu3 }
 0x143   : > { %v1446_v4 = vsel %vm1149_vm2, %v1366_v1, 0.0 }
 0x144   : > { %v1447_v5 = vadd.f32 %v1446_v4, %v1445_v46  ;;  %v865_v6 = vpop.f32.mrf.mxu0  ;;  %v940_v37 = vpop.f32.mrf.mxu2 }
 0x145   : > { %v866_v9 = vadd.f32 %v2465_v47, %v865_v6  ;;  %v941_v42 = vadd.f32 %v2465_v47, %v940_v37 }
 0x147   : > { %v1035_v12 = vadd.f32 %v1034_v63, %v866_v9  ;;  %v2749_v45 = vadd.f32 %v1109_v43, %v941_v42 }
 0x149   : > { %v1036_v15 = vpop.f32.mrf.mxu1  ;;  %1168 = vst.msk [vmem:[%s2475_s7 + $0x90] sm:$0xff] %vm1149_vm2, %v1035_v12  ;;  %v1249_v16 = vsel %vm1149_vm2, %v1035_v12, 0.0  ;;  %v1367_v18 = vmul.f32 %v1035_v12, %v1035_v12 }
 0x14a   : > { %v1250_v19 = vadd.f32 %v1249_v16, %v1248_v2  ;;  %1198 = vst.msk [vmem:[%s2475_s7 + $0x180] sm:$0xff] %vm1149_vm2, %v2749_v45  ;;  %v1111_v62 = vpop.f32.mrf.mxu3 }
 0x14b   : > { %v1448_v21 = vsel %vm1149_vm2, %v1367_v18, 0.0 }
 0x14c   : > { %v1449_v23 = vadd.f32 %v1448_v21, %v1447_v5  ;;  %v867_v24 = vpop.f32.mrf.mxu0  ;;  %v942_v53 = vpop.f32.mrf.mxu2 }
 0x14d   : > { %v868_v26 = vadd.f32 %v2465_v47, %v867_v24  ;;  %v943_v57 = vadd.f32 %v2465_v47, %v942_v53 }
 0x14f   : > { %v1037_v28 = vadd.f32 %v1036_v15, %v868_v26  ;;  %v2760_v0 = vadd.f32 %v1111_v62, %v943_v57 }
 0x151   : > { %v1039_v29 = vpop.f32.mrf.mxu1  ;;  %1169 = vst.msk [vmem:[%s2475_s7 + $0x98] sm:$0xff] %vm1149_vm2, %v1037_v28  ;;  %v1251_v30 = vsel %vm1149_vm2, %v1037_v28, 0.0  ;;  %v1368_v32 = vmul.f32 %v1037_v28, %v1037_v28 }
 0x152   : > { %v1252_v35 = vadd.f32 %v1251_v30, %v1250_v19  ;;  %1199 = vst.msk [vmem:[%s2475_s7 + $0x188] sm:$0xff] %vm1149_vm2, %v2760_v0  ;;  %v1114_v15 = vpop.f32.mrf.mxu3 }
 0x153   : > { %v1450_v38 = vsel %vm1149_vm2, %v1368_v32, 0.0 }
 0x154   : > { %v1451_v39 = vadd.f32 %v1450_v38, %v1449_v23  ;;  %v870_v41 = vpop.f32.mrf.mxu0  ;;  %v945_v6 = vpop.f32.mrf.mxu2 }
 0x155   : > { %v871_v44 = vadd.f32 %v2465_v47, %v870_v41  ;;  %v946_v12 = vadd.f32 %v2465_v47, %v945_v6 }
 0x157   : > { %v1040_v46 = vadd.f32 %v1039_v29, %v871_v44  ;;  %v2775_v18 = vadd.f32 %v1114_v15, %v946_v12 }
 0x159   : > { %v1041_v48 = vpop.f32.mrf.mxu1  ;;  %1170 = vst.msk [vmem:[%s2475_s7 + $0xa0] sm:$0xff] %vm1149_vm2, %v1040_v46  ;;  %v1253_v49 = vsel %vm1149_vm2, %v1040_v46, 0.0  ;;  %v1369_v50 = vmul.f32 %v1040_v46, %v1040_v46 }
 0x15a   : > { %v1254_v51 = vadd.f32 %v1253_v49, %v1252_v35  ;;  %1200 = vst.msk [vmem:[%s2475_s7 + $0x190] sm:$0xff] %vm1149_vm2, %v2775_v18  ;;  %v1116_v24 = vpop.f32.mrf.mxu3 }
 0x15b   : > { %v1452_v56 = vsel %vm1149_vm2, %v1369_v50, 0.0 }
 0x15c   : > { %v1453_v60 = vadd.f32 %v1452_v56, %v1451_v39  ;;  %v872_v61 = vpop.f32.mrf.mxu0  ;;  %v947_v21 = vpop.f32.mrf.mxu2 }
 0x15d   : > { %v873_v63 = vadd.f32 %v2465_v47, %v872_v61  ;;  %v948_v22 = vadd.f32 %v2465_v47, %v947_v21 }
 0x15f   : > { %v1042_v1 = vadd.f32 %v1041_v48, %v873_v63  ;;  %v2787_v26 = vadd.f32 %v1116_v24, %v948_v22 }
 0x161   : > { %v1044_v2 = vpop.f32.mrf.mxu1  ;;  %1171 = vst.msk [vmem:[%s2475_s7 + $0xa8] sm:$0xff] %vm1149_vm2, %v1042_v1  ;;  %v1255_v3 = vsel %vm1149_vm2, %v1042_v1, 0.0  ;;  %v1370_v4 = vmul.f32 %v1042_v1, %v1042_v1 }
 0x162   : > { %v2768_v5 = vadd.f32 %v1255_v3, %v1254_v51  ;;  %1201 = vst.msk [vmem:[%s2475_s7 + $0x198] sm:$0xff] %vm1149_vm2, %v2787_v26  ;;  %v1119_v37 = vpop.f32.mrf.mxu3 }
 0x163   : > { %v1454_v7 = vsel %vm1149_vm2, %v1370_v4, 0.0 }
 0x164   : > { %v2771_v8 = vadd.f32 %v1454_v7, %v1453_v60  ;;  %v875_v9 = vpop.f32.mrf.mxu0  ;;  %v950_v30 = vpop.f32.mrf.mxu2 }
 0x165   : > { %v876_v16 = vadd.f32 %v2465_v47, %v875_v9  ;;  %v951_v35 = vadd.f32 %v2465_v47, %v950_v30 }
 0x167   : > { %v2777_v19 = vadd.f32 %v1044_v2, %v876_v16  ;;  %v2799_v39 = vadd.f32 %v1119_v37, %v951_v35 }
 0x169   : > { %v1046_v20 = vpop.f32.mrf.mxu1  ;;  %1172 = vst.msk [vmem:[%s2475_s7 + $0xb0] sm:$0xff] %vm1149_vm2, %v2777_v19  ;;  %v1371_v35 = vmul.f32 %v2777_v19, %v2777_v19 }
 0x16a   : > { %1202 = vst.msk [vmem:[%s2475_s7 + $0x1a0] sm:$0xff] %vm1149_vm2, %v2799_v39  ;;  %v1121_v48 = vpop.f32.mrf.mxu3 }
 0x16c   : > { %v877_v23 = vpop.f32.mrf.mxu0  ;;  %v952_v43 = vpop.f32.mrf.mxu2 }
 0x16d   : > { %v878_v25 = vadd.f32 %v2465_v47, %v877_v23  ;;  %v953_v44 = vadd.f32 %v2465_v47, %v952_v43  ;;  %v1257_v43 = vsel %vm1149_vm2, %v2777_v19, 0.0 }
 0x16e   : > { %v1258_v19 = vadd.f32 %v1257_v43, %v2768_v5 }
 0x16f   : > { %v2789_v28 = vadd.f32 %v1046_v20, %v878_v25  ;;  %v2808_v50 = vadd.f32 %v1121_v48, %v953_v44 }
 0x171   : > { %v1049_v29 = vpop.f32.mrf.mxu1  ;;  %1173 = vst.msk [vmem:[%s2475_s7 + $0xb8] sm:$0xff] %vm1149_vm2, %v2789_v28  ;;  %v1372_v44 = vmul.f32 %v2789_v28, %v2789_v28 }
 0x172   : > { %1203 = vst.msk [vmem:[%s2475_s7 + $0x1a8] sm:$0xff] %vm1149_vm2, %v2808_v50  ;;  %v1124_v61 = vpop.f32.mrf.mxu3 }
 0x174   : > { %v880_v32 = vpop.f32.mrf.mxu0  ;;  %v955_v56 = vpop.f32.mrf.mxu2 }
 0x175   : > { %v881_v38 = vadd.f32 %v2465_v47, %v880_v32  ;;  %v956_v60 = vadd.f32 %v2465_v47, %v955_v56 }
 0x177   : > { %v1050_v41 = vadd.f32 %v1049_v29, %v881_v38  ;;  %v2817_v63 = vadd.f32 %v1124_v61, %v956_v60  ;;  %v1458_v61 = vsel %vm1149_vm2, %v1372_v44, 0.0 }
 0x179   : > { %v1051_v42 = vpop.f32.mrf.mxu1  ;;  %1174 = vst.msk [vmem:[%s2475_s7 + $0xc0] sm:$0xff] %vm1149_vm2, %v1050_v41  ;;  %v1373_v56 = vmul.f32 %v1050_v41, %v1050_v41 }
 0x17a   : > { %1204 = vst.msk [vmem:[%s2475_s7 + $0x1b0] sm:$0xff] %vm1149_vm2, %v2817_v63  ;;  %v1126_v7 = vpop.f32.mrf.mxu3 }
 0x17c   : > { %v882_v46 = vpop.f32.mrf.mxu0  ;;  %v957_v3 = vpop.f32.mrf.mxu2 }
 0x17d   : > { %v883_v49 = vadd.f32 %v2465_v47, %v882_v46  ;;  %v958_v4 = vadd.f32 %v2465_v47, %v957_v3  ;;  %v2849_v46 = vld [vmem:[#allocation2] ss:$0 sm:$0xff] }
 0x17f   : > { %v1052_v51 = vadd.f32 %v1051_v42, %v883_v49  ;;  %v2826_v12 = vadd.f32 %v1126_v7, %v958_v4 }
 0x181   : > { %v1054_v53 = vpop.f32.mrf.mxu1  ;;  %1175 = vst.msk [vmem:[%s2475_s7 + $0xc8] sm:$0xff] %vm1149_vm2, %v1052_v51  ;;  %v1263_v7 = vsel %vm1149_vm2, %v1052_v51, 0.0 }
 0x182   : > { %1205 = vst.msk [vmem:[%s2475_s7 + $0x1b8] sm:$0xff] %vm1149_vm2, %v2826_v12  ;;  %v1129_v22 = vpop.f32.mrf.mxu3 }
 0x184   : > { %v885_v57 = vpop.f32.mrf.mxu0  ;;  %v960_v20 = vpop.f32.mrf.mxu2 }
 0x185   : > { %v886_v62 = vadd.f32 %v2465_v47, %v885_v57  ;;  %v961_v24 = vadd.f32 %v2465_v47, %v960_v20 }
 0x187   : > { %v1055_v1 = vadd.f32 %v1054_v53, %v886_v62  ;;  %v2835_v30 = vadd.f32 %v1129_v22, %v961_v24  ;;  %v1456_v53 = vsel %vm1149_vm2, %v1371_v35, 0.0  ;;  %v1261_v62 = vsel %vm1149_vm2, %v1050_v41, 0.0 }
 0x188   : > { %v1457_v3 = vadd.f32 %v1456_v53, %v2771_v8 }
 0x189   : > { %v1056_v2 = vpop.f32.mrf.mxu1  ;;  %1176 = vst.msk [vmem:[%s2475_s7 + $0xd0] sm:$0xff] %vm1149_vm2, %v1055_v1  ;;  %v1265_v41 = vsel %vm1149_vm2, %v1055_v1, 0.0 }
 0x18a   : > { %1206 = vst.msk [vmem:[%s2475_s7 + $0x1c0] sm:$0xff] %vm1149_vm2, %v2835_v30  ;;  %v1131_v42 = vpop.f32.mrf.mxu3 }
 0x18c   : > { %v887_v6 = vpop.f32.mrf.mxu0  ;;  %v962_v32 = vpop.f32.mrf.mxu2 }
 0x18d   : > { %v888_v9 = vadd.f32 %v2465_v47, %v887_v6  ;;  %v963_v37 = vadd.f32 %v2465_v47, %v962_v32 }
 0x18f   : > { %v1057_v15 = vadd.f32 %v1056_v2, %v888_v9  ;;  %v2852_v49 = vadd.f32 %v1131_v42, %v963_v37  ;;  %v1374_v2 = vmul.f32 %v1052_v51, %v1052_v51  ;;  %v1375_v9 = vmul.f32 %v1055_v1, %v1055_v1 }
 0x191   : > { %v1059_v16 = vpop.f32.mrf.mxu1  ;;  %1177 = vst.msk [vmem:[%s2475_s7 + $0xd8] sm:$0xff] %vm1149_vm2, %v1057_v15  ;;  %v1462_v22 = vsel %vm1149_vm2, %v1374_v2, 0.0  ;;  %v1464_v35 = vsel %vm1149_vm2, %v1375_v9, 0.0  ;;  %v1267_v51 = vsel %vm1149_vm2, %v1057_v15, 0.0 }
 0x192   : > { %1207 = vst.msk [vmem:[%s2475_s7 + $0x1c8] sm:$0xff] %vm1149_vm2, %v2852_v49 }
 0x194   : > { %v890_v21 = vpop.f32.mrf.mxu0  ;;  %v965_v6 = vpop.f32.mrf.mxu2 }
 0x195   : > { %v891_v23 = vadd.f32 %v2465_v47, %v890_v21  ;;  %v1259_v47 = vsel %vm1149_vm2, %v2789_v28, 0.0  ;;  %v1460_v28 = vsel %vm1149_vm2, %v1373_v56, 0.0 }
 0x196   : > { %v1260_v4 = vadd.f32 %v1259_v47, %v1258_v19 }
 0x197   : > { %v1060_v25 = vadd.f32 %v1059_v16, %v891_v23  ;;  %v1459_v16 = vadd.f32 %v1458_v61, %v1457_v3  ;;  %v1134_v21 = vpop.f32.mrf.mxu3  ;;  %v1376_v23 = vmul.f32 %v1057_v15, %v1057_v15  ;;  %v966_v15 = vadd.f32 %v2849_v46, %v965_v6 }
 0x198   : > { %v1262_v20 = vadd.f32 %v1261_v62, %v1260_v4 }
 0x199   : > { %v1061_v29 = vpop.f32.mrf.mxu1  ;;  %1178 = vst.msk [vmem:[%s2475_s7 + $0xe0] sm:$0xff] %vm1149_vm2, %v1060_v25  ;;  %v1461_v8 = vadd.f32 %v1460_v28, %v1459_v16  ;;  %v1377_v32 = vmul.f32 %v1060_v25, %v1060_v25  ;;  %v1269_v53 = vsel %vm1149_vm2, %v1060_v25, 0.0  ;;  %v2884_v16 = vadd.f32 %v1134_v21, %v966_v15 }
 0x19b   : > { %v1468_v56 = vsel %vm1149_vm2, %v1377_v32, 0.0  ;;  %1208 = vst.msk [vmem:[%s2475_s7 + $0x1d0] sm:$0xff] %vm1149_vm2, %v2884_v16 }
 0x19c   : > { %v892_v38 = vpop.f32.mrf.mxu0  ;;  %v967_v19 = vpop.f32.mrf.mxu2 }
 0x19d   : > { %v893_v48 = vadd.f32 %v2849_v46, %v892_v38  ;;  %v1463_v38 = vadd.f32 %v1462_v22, %v1461_v8 }
 0x19f   : > { %v1062_v57 = vadd.f32 %v1061_v29, %v893_v48  ;;  %v1264_v29 = vadd.f32 %v1263_v7, %v1262_v20  ;;  %v1466_v48 = vsel %vm1149_vm2, %v1376_v23, 0.0  ;;  %v1465_v1 = vadd.f32 %v1464_v35, %v1463_v38  ;;  %v1136_v28 = vpop.f32.mrf.mxu3 }
 0x1a1   : > { %v1064_v60 = vpop.f32.mrf.mxu1  ;;  %1179 = vst.msk [vmem:[%s2475_s7 + $0xe8] sm:$0xff] %vm1149_vm2, %v1062_v57  ;;  %v1266_v42 = vadd.f32 %v1265_v41, %v1264_v29  ;;  %v1378_v43 = vmul.f32 %v1062_v57, %v1062_v57  ;;  %v1271_v61 = vsel %vm1149_vm2, %v1062_v57, 0.0  ;;  %v1467_v2 = vadd.f32 %v1466_v48, %v1465_v1 }
 0x1a3   : > { %v1268_v47 = vadd.f32 %v1267_v51, %v1266_v42  ;;  %v1470_v4 = vsel %vm1149_vm2, %v1378_v43, 0.0  ;;  %v1469_v6 = vadd.f32 %v1468_v56, %v1467_v2 }
 0x1a4   : > { %v895_v5 = vpop.f32.mrf.mxu0  ;;  %v970_v51 = vpop.f32.mrf.mxu2 }
 0x1a5   : > { %v896_v24 = vadd.f32 %v2849_v46, %v895_v5  ;;  %v1270_v3 = vadd.f32 %v1269_v53, %v1268_v47  ;;  %v901_v5 = vadd.f32 %v2849_v46, %v2514_v40  ;;  %v1471_v23 = vadd.f32 %v1470_v4, %v1469_v6 }
 0x1a6   : > { %v903_v47 = vadd.f32 %v2849_v46, %v2522_v52  ;;  %v971_v2 = vadd.f32 %v2849_v46, %v970_v51  ;;  %v1281_v52 = vsel %vm1149_vm2, %v2542_v17, 0.0  ;;  %v1287_v51 = vsel %vm1149_vm2, %v2589_v11, 0.0 }
 0x1a7   : > { %v1065_v37 = vadd.f32 %v1064_v60, %v896_v24  ;;  %v968_v60 = vadd.f32 %v2849_v46, %v967_v19  ;;  %v1272_v20 = vadd.f32 %v1271_v61, %v1270_v3  ;;  %v1139_v48 = vpop.f32.mrf.mxu3  ;;  %v1383_v61 = vmul.f32 %v2542_v17, %v2542_v17 }
 0x1a8   : > { %v1385_v17 = vmul.f32 %v2574_v58, %v2574_v58 }
 0x1a9   : > { %v1066_v44 = vpop.f32.mrf.mxu1  ;;  %1180 = vst.msk [vmem:[%s2475_s7 + $0xf0] sm:$0xff] %vm1149_vm2, %v1065_v37  ;;  %v1379_v62 = vmul.f32 %v1065_v37, %v1065_v37  ;;  %v1273_v7 = vsel %vm1149_vm2, %v1065_v37, 0.0  ;;  %v2886_v57 = vadd.f32 %v1136_v28, %v968_v60  ;;  %v1384_v28 = vmul.f32 %v2557_v34, %v2557_v34 }
 0x1aa   : > { %v1274_v24 = vadd.f32 %v1273_v7, %v1272_v20 }
 0x1ab   : > { %v1472_v22 = vsel %vm1149_vm2, %v1379_v62, 0.0  ;;  %1209 = vst.msk [vmem:[%s2475_s7 + $0x1d8] sm:$0xff] %vm1149_vm2, %v2886_v57 }
 0x1ac   : > { %v897_v25 = vpop.f32.mrf.mxu0  ;;  %v1473_v40 = vadd.f32 %v1472_v22, %v1471_v23  ;;  %v972_v62 = vpop.f32.mrf.mxu2  ;;  %v1480_v22 = vsel %vm1149_vm2, %v1383_v61, 0.0 }
 0x1ad   : > { %v898_v9 = vadd.f32 %v2849_v46, %v897_v25  ;;  %v973_v3 = vadd.f32 %v2849_v46, %v972_v62 }
 0x1af   : > { %v1067_v41 = vadd.f32 %v1066_v44, %v898_v9  ;;  %v1141_v25 = vpop.f32.mrf.mxu3  ;;  %v2919_v9 = vadd.f32 %v1139_v48, %v971_v2  ;;  %v1388_v48 = vmul.f32 %v2621_v54, %v2621_v54 }
 0x1b0   : > { %v2921_v6 = vadd.f32 %v1141_v25, %v973_v3 }
 0x1b1   : > { %v1069_v8 = vpop.f32.mrf.mxu1  ;;  %1181 = vst.msk [vmem:[%s2475_s7 + $0xf8] sm:$0xff] %vm1149_vm2, %v1067_v41  ;;  %v1275_v21 = vsel %vm1149_vm2, %v1067_v41, 0.0  ;;  %v1380_v29 = vmul.f32 %v1067_v41, %v1067_v41  ;;  %v1283_v41 = vsel %vm1149_vm2, %v2557_v34, 0.0 }
 0x1b2   : > { %v1070_v32 = vadd.f32 %v1069_v8, %v901_v5  ;;  %v1276_v35 = vadd.f32 %v1275_v21, %v1274_v24  ;;  %1210 = vst.msk [vmem:[%s2475_s7 + $0x1e0] sm:$0xff] %vm1149_vm2, %v2919_v9  ;;  %v1482_v8 = vsel %vm1149_vm2, %v1384_v28, 0.0  ;;  %v1285_v21 = vsel %vm1149_vm2, %v2574_v58, 0.0 }
 0x1b3   : > { %v1474_v37 = vsel %vm1149_vm2, %v1380_v29, 0.0  ;;  %1211 = vst.msk [vmem:[%s2475_s7 + $0x1e8] sm:$0xff] %vm1149_vm2, %v2921_v6  ;;  %v1386_v29 = vmul.f32 %v2589_v11, %v2589_v11  ;;  %v1289_v58 = vsel %vm1149_vm2, %v2606_v33, 0.0 }
 0x1b4   : > { %1182 = vst.msk [vmem:[%s2475_s7 + $0x100] sm:$0xff] %vm1149_vm2, %v1070_v32  ;;  %v1277_v38 = vsel %vm1149_vm2, %v1070_v32, 0.0  ;;  %v1381_v42 = vmul.f32 %v1070_v32, %v1070_v32  ;;  %v1475_v44 = vadd.f32 %v1474_v37, %v1473_v40  ;;  %v975_v40 = vpop.f32.mrf.mxu2  ;;  %v1387_v37 = vmul.f32 %v2606_v33, %v2606_v33 }
 0x1b5   : > { %v1278_v43 = vadd.f32 %v1277_v38, %v1276_v35  ;;  %v1484_v35 = vsel %vm1149_vm2, %v1385_v17, 0.0  ;;  %v1490_v33 = vsel %vm1149_vm2, %v1388_v48, 0.0  ;;  %v976_v25 = vadd.f32 %v2849_v46, %v975_v40 }
 0x1b6   : > { %v1476_v53 = vsel %vm1149_vm2, %v1381_v42, 0.0  ;;  %v1488_v11 = vsel %vm1149_vm2, %v1387_v37, 0.0  ;;  %v1394_v40 = vmul.f32 %v2713_v55, %v2713_v55  ;;  %v1303_v37 = vsel %vm1149_vm2, %v2713_v55, 0.0 }
 0x1b7   : > { %v1477_v1 = vadd.f32 %v1476_v53, %v1475_v44  ;;  %v1486_v44 = vsel %vm1149_vm2, %v1386_v29, 0.0  ;;  %v1389_v53 = vmul.f32 %v2638_v13, %v2638_v13  ;;  %v1307_v55 = vsel %vm1149_vm2, %v2738_v27, 0.0 }
 0x1b9   : > { %v1071_v56 = vpop.f32.mrf.mxu1 }
 0x1ba   : > { %v1072_v19 = vadd.f32 %v1071_v56, %v903_v47  ;;  %v1291_v56 = vsel %vm1149_vm2, %v2621_v54, 0.0  ;;  %v1391_v54 = vmul.f32 %v2670_v59, %v2670_v59 }
 0x1bc   : > { %1183 = vst.msk [vmem:[%s2475_s7 + $0x108] sm:$0xff] %vm1149_vm2, %v1072_v19  ;;  %v1279_v15 = vsel %vm1149_vm2, %v1072_v19, 0.0  ;;  %v1382_v60 = vmul.f32 %v1072_v19, %v1072_v19  ;;  %v1390_v19 = vmul.f32 %v2653_v31, %v2653_v31 }
 0x1bd   : > { %v1280_v4 = vadd.f32 %v1279_v15, %v1278_v43  ;;  %v1144_v43 = vpop.f32.mrf.mxu3  ;;  %v1293_v15 = vsel %vm1149_vm2, %v2638_v13, 0.0 }
 0x1be   : > { %v1478_v7 = vsel %vm1149_vm2, %v1382_v60, 0.0  ;;  %v1492_v60 = vsel %vm1149_vm2, %v1389_v53, 0.0 }
 0x1bf   : > { %v1282_v20 = vadd.f32 %v1281_v52, %v1280_v4  ;;  %v1479_v5 = vadd.f32 %v1478_v7, %v1477_v1  ;;  %v977_v52 = vpop.f32.mrf.mxu2  ;;  %v1295_v4 = vsel %vm1149_vm2, %v2653_v31, 0.0  ;;  %v1494_v7 = vsel %vm1149_vm2, %v1390_v19, 0.0 }
 0x1c0   : > { %v978_v28 = vadd.f32 %v2849_v46, %v977_v52  ;;  %v1392_v31 = vmul.f32 %v2685_v14, %v2685_v14  ;;  %v1496_v46 = vsel %vm1149_vm2, %v1391_v54, 0.0 }
 0x1c1   : > { %v1284_v23 = vadd.f32 %v1283_v41, %v1282_v20  ;;  %v1481_v24 = vadd.f32 %v1480_v22, %v1479_v5  ;;  %v1297_v22 = vsel %vm1149_vm2, %v2670_v59, 0.0  ;;  %v2971_v41 = vadd.f32 %v1144_v43, %v976_v25 }
 0x1c3   : > { %v1286_v34 = vadd.f32 %v1285_v21, %v1284_v23  ;;  %v1483_v32 = vadd.f32 %v1482_v8, %v1481_v24  ;;  %v1299_v8 = vsel %vm1149_vm2, %v2685_v14, 0.0  ;;  %v1393_v21 = vmul.f32 %v2700_v36, %v2700_v36  ;;  %1212 = vst.msk [vmem:[%s2475_s7 + $0x1f0] sm:$0xff] %vm1149_vm2, %v2971_v41 }
 0x1c5   : > { %v1288_v38 = vadd.f32 %v1287_v51, %v1286_v34  ;;  %v1485_v42 = vadd.f32 %v1484_v35, %v1483_v32  ;;  %v1146_v5 = vpop.f32.mrf.mxu3  ;;  %v1498_v34 = vsel %vm1149_vm2, %v1392_v31, 0.0  ;;  %v1301_v32 = vsel %vm1149_vm2, %v2700_v36, 0.0 }
 0x1c6   : > { %v2973_v17 = vadd.f32 %v1146_v5, %v978_v28  ;;  %v1500_v51 = vsel %vm1149_vm2, %v1393_v21, 0.0  ;;  %v1305_v36 = vsel %vm1149_vm2, %v2727_v10, 0.0 }
 0x1c7   : > { %v1290_v1 = vadd.f32 %v1289_v58, %v1288_v38  ;;  %v1487_v47 = vadd.f32 %v1486_v44, %v1485_v42  ;;  %v1395_v38 = vmul.f32 %v2727_v10, %v2727_v10  ;;  %v1502_v44 = vsel %vm1149_vm2, %v1394_v40, 0.0 }
 0x1c8   : > { %1213 = vst.msk [vmem:[%s2475_s7 + $0x1f8] sm:$0xff] %vm1149_vm2, %v2973_v17  ;;  %v1396_v58 = vmul.f32 %v2738_v27, %v2738_v27  ;;  %v1309_v10 = vsel %vm1149_vm2, %v2749_v45, 0.0  ;;  %v1311_v27 = vsel %vm1149_vm2, %v2760_v0, 0.0 }
 0x1c9   : > { %v1292_v61 = vadd.f32 %v1291_v56, %v1290_v1  ;;  %v1489_v62 = vadd.f32 %v1488_v11, %v1487_v47  ;;  %v1504_v1 = vsel %vm1149_vm2, %v1395_v38, 0.0  ;;  %v1397_v47 = vmul.f32 %v2749_v45, %v2749_v45 }
 0x1ca   : > { %v1506_v19 = vsel %vm1149_vm2, %v1396_v58, 0.0  ;;  %v1313_v45 = vsel %vm1149_vm2, %v2775_v18, 0.0  ;;  %v1406_v38 = vmul.f32 %v2852_v49, %v2852_v49 }
 0x1cb   : > { %v1294_v2 = vadd.f32 %v1293_v15, %v1292_v61  ;;  %v1491_v3 = vadd.f32 %v1490_v33, %v1489_v62  ;;  %v1398_v61 = vmul.f32 %v2760_v0, %v2760_v0  ;;  %v1508_v15 = vsel %vm1149_vm2, %v1397_v47, 0.0 }
 0x1cc   : > { %v1315_v0 = vsel %vm1149_vm2, %v2787_v26, 0.0 }
 0x1cd   : > { %v1296_v13 = vadd.f32 %v1295_v4, %v1294_v2  ;;  %v1493_v20 = vadd.f32 %v1492_v60, %v1491_v3  ;;  %v1399_v60 = vmul.f32 %v2775_v18, %v2775_v18  ;;  %v1510_v52 = vsel %vm1149_vm2, %v1398_v61, 0.0 }
 0x1ce   : > { %v1400_v4 = vmul.f32 %v2787_v26, %v2787_v26  ;;  %v1317_v18 = vsel %vm1149_vm2, %v2799_v39, 0.0  ;;  %v1319_v26 = vsel %vm1149_vm2, %v2808_v50, 0.0 }
 0x1cf   : > { %v1298_v23 = vadd.f32 %v1297_v22, %v1296_v13  ;;  %v1495_v24 = vadd.f32 %v1494_v7, %v1493_v20  ;;  %v1512_v28 = vsel %vm1149_vm2, %v1399_v60, 0.0  ;;  %v1401_v7 = vmul.f32 %v2799_v39, %v2799_v39 }
 0x1d0   : > { %v1514_v5 = vsel %vm1149_vm2, %v1400_v4, 0.0  ;;  %v1402_v22 = vmul.f32 %v2808_v50, %v2808_v50  ;;  %v1321_v39 = vsel %vm1149_vm2, %v2817_v63, 0.0  ;;  %v1323_v50 = vsel %vm1149_vm2, %v2826_v12, 0.0 }
 0x1d1   : > { %v1300_v59 = vadd.f32 %v1299_v8, %v1298_v23  ;;  %v1497_v29 = vadd.f32 %v1496_v46, %v1495_v24  ;;  %v1516_v24 = vsel %vm1149_vm2, %v1401_v7, 0.0  ;;  %v1403_v46 = vmul.f32 %v2817_v63, %v2817_v63 }
 0x1d2   : > { %v1325_v63 = vsel %vm1149_vm2, %v2835_v30, 0.0  ;;  %v1411_v60 = vmul.f32 %v2971_v41, %v2971_v41 }
 0x1d3   : > { %v1302_v14 = vadd.f32 %v1301_v32, %v1300_v59  ;;  %v1499_v35 = vadd.f32 %v1498_v34, %v1497_v29  ;;  %v1518_v59 = vsel %vm1149_vm2, %v1402_v22, 0.0  ;;  %v1404_v29 = vmul.f32 %v2826_v12, %v2826_v12 }
 0x1d4   : > { %v1520_v40 = vsel %vm1149_vm2, %v1403_v46, 0.0  ;;  %v1327_v12 = vsel %vm1149_vm2, %v2852_v49, 0.0  ;;  %v1331_v49 = vsel %vm1149_vm2, %v2886_v57, 0.0 }
 0x1d5   : > { %v1501_v42 = vadd.f32 %v1500_v51, %v1499_v35  ;;  %v1304_v43 = vadd.f32 %v1303_v37, %v1302_v14  ;;  %v1405_v14 = vmul.f32 %v2835_v30, %v2835_v30  ;;  %v1522_v37 = vsel %vm1149_vm2, %v1404_v29, 0.0 }
 0x1d6   : > { %v1329_v30 = vsel %vm1149_vm2, %v2884_v16, 0.0 }
 0x1d7   : > { %v1306_v48 = vadd.f32 %v1305_v36, %v1304_v43  ;;  %v1503_v53 = vadd.f32 %v1502_v44, %v1501_v42  ;;  %v1524_v44 = vsel %vm1149_vm2, %v1405_v14, 0.0  ;;  %v1407_v36 = vmul.f32 %v2884_v16, %v2884_v16 }
 0x1d8   : > { %v1333_v16 = vsel %vm1149_vm2, %v2919_v9, 0.0 }
 0x1d9   : > { %v1308_v11 = vadd.f32 %v1307_v55, %v1306_v48  ;;  %v1505_v56 = vadd.f32 %v1504_v1, %v1503_v53  ;;  %v1526_v53 = vsel %vm1149_vm2, %v1406_v38, 0.0  ;;  %v1408_v1 = vmul.f32 %v2886_v57, %v2886_v57 }
 0x1da   : > { %v1335_v57 = vsel %vm1149_vm2, %v2921_v6, 0.0 }
 0x1db   : > { %v1310_v62 = vadd.f32 %v1309_v10, %v1308_v11  ;;  %v1507_v33 = vadd.f32 %v1506_v19, %v1505_v56  ;;  %v1528_v11 = vsel %vm1149_vm2, %v1407_v36, 0.0  ;;  %v1409_v56 = vmul.f32 %v2919_v9, %v2919_v9 }
 0x1dc   : > { %v1530_v61 = vsel %vm1149_vm2, %v1408_v1, 0.0  ;;  %v1337_v9 = vsel %vm1149_vm2, %v2971_v41, 0.0 }
 0x1dd   : > { %v1312_v2 = vadd.f32 %v1311_v27, %v1310_v62  ;;  %v1509_v3 = vadd.f32 %v1508_v15, %v1507_v33  ;;  %v1410_v62 = vmul.f32 %v2921_v6, %v2921_v6  ;;  %v1532_v27 = vsel %vm1149_vm2, %v1409_v56, 0.0 }
 0x1de   : > { %v1339_v6 = vsel %vm1149_vm2, %v2973_v17, 0.0 }
 0x1df   : > { %v1314_v54 = vadd.f32 %v1313_v45, %v1312_v2  ;;  %v1511_v25 = vadd.f32 %v1510_v52, %v1509_v3  ;;  %v1534_v52 = vsel %vm1149_vm2, %v1410_v62, 0.0  ;;  %v1412_v45 = vmul.f32 %v2973_v17, %v2973_v17 }
 0x1e1   : > { %v1316_v13 = vadd.f32 %v1315_v0, %v1314_v54  ;;  %v1513_v20 = vadd.f32 %v1512_v28, %v1511_v25  ;;  %v1536_v25 = vsel %vm1149_vm2, %v1411_v60, 0.0  ;;  %v1538_v7 = vsel %vm1149_vm2, %v1412_v45, 0.0 }
 0x1e3   : > { %v1318_v31 = vadd.f32 %v1317_v18, %v1316_v13  ;;  %v1515_v23 = vadd.f32 %v1514_v5, %v1513_v20 }
 0x1e5   : > { %v1320_v8 = vadd.f32 %v1319_v26, %v1318_v31  ;;  %v1517_v21 = vadd.f32 %v1516_v24, %v1515_v23 }
 0x1e7   : > { %v1322_v34 = vadd.f32 %v1321_v39, %v1320_v8  ;;  %v1519_v32 = vadd.f32 %v1518_v59, %v1517_v21 }
 0x1e9   : > { %v1324_v35 = vadd.f32 %v1323_v50, %v1322_v34  ;;  %v1521_v51 = vadd.f32 %v1520_v40, %v1519_v32 }
 0x1eb   : > { %v1326_v42 = vadd.f32 %v1325_v63, %v1324_v35  ;;  %v1523_v43 = vadd.f32 %v1522_v37, %v1521_v51 }
 0x1ed   : > { %v1328_v58 = vadd.f32 %v1327_v12, %v1326_v42  ;;  %v1525_v48 = vadd.f32 %v1524_v44, %v1523_v43 }
 0x1ef   : > { %v1527_v55 = vadd.f32 %v1526_v53, %v1525_v48  ;;  %v1330_v47 = vadd.f32 %v1329_v30, %v1328_v58 }
 0x1f1   : > { %v1529_v19 = vadd.f32 %v1528_v11, %v1527_v55  ;;  %v1332_v10 = vadd.f32 %v1331_v49, %v1330_v47 }
 0x1f3   : > { %v1531_v33 = vadd.f32 %v1530_v61, %v1529_v19  ;;  %v1334_v15 = vadd.f32 %v1333_v16, %v1332_v10 }
 0x1f5   : > { %v1533_v2 = vadd.f32 %v1532_v27, %v1531_v33  ;;  %v1336_v3 = vadd.f32 %v1335_v57, %v1334_v15 }
 0x1f7   : > { %v1535_v4 = vadd.f32 %v1534_v52, %v1533_v2  ;;  %v1338_v54 = vadd.f32 %v1337_v9, %v1336_v3 }
 0x1f9   : > { %v1537_v28 = vadd.f32 %v1536_v25, %v1535_v4  ;;  %v1340_v0 = vadd.f32 %v1339_v6, %v1338_v54 }
 0x1fb   : > { %v1341_v13 = vrot.slane %v1340_v0, 4  ;;  %v1539_v20 = vadd.f32 %v1538_v7, %v1537_v28 }
 0x1fd   : > { %v1342_v5 = vadd.f32 %v1341_v13, %v1340_v0  ;;  %v1540_v18 = vrot.slane %v1539_v20, 4 }
 0x1ff   : > { %v1343_v41 = vrot.slane %v1342_v5, 2  ;;  %v1541_v22 = vadd.f32 %v1540_v18, %v1539_v20 }
 0x201   : > { %v1344_v31 = vadd.f32 %v1343_v41, %v1342_v5  ;;  %v1542_v23 = vrot.slane %v1541_v22, 2 }
 0x203   : > { %v1345_v17 = vrot.slane %v1344_v31, 1  ;;  %v1543_v24 = vadd.f32 %v1542_v23, %v1541_v22 }
 0x205   : > { %v1346_v26 = vadd.f32 %v1345_v17, %v1344_v31  ;;  %v1544_v46 = vrot.slane %v1543_v24, 1 }
 0x207   : > { %1348 = vst.msk [vmem:[%s226_s13] sm:$0x1] %vm1347_vm3, %v1346_v26  ;;  %v1545_v8 = vadd.f32 %v1544_v46, %v1543_v24 }
 0x209   : > { %1546 = vst.msk [vmem:[%s226_s13 + $0x1] sm:$0x1] %vm1347_vm3, %v1545_v8 }
 0x20a   : > { %2201 = shalt.err (!%p2198_p5)
}
 0x20b   : > { %2117 = dma.vmem_to_hbm [thread:$0]  (%p2322_p4), %s1570_s14, 32, %s1572_s15, %s1553_s20  }
 0x20c PF: > { %p2123_p6 = scmp.ge.s32.totalorder %s2252_s22, 2  ;;  %s1591_s7 = sand.u32 1, %s2232_s17  }
 0x20d   : > { %s1592_s10 = scalar_lea.sflag [#allocation4], %s1591_s7 }
 0x20e   : > { %p2120_p7 = pnand %p2123_p6, %p2329_p8 }
 0x210   : > { %p2121_p9 = pneg %p2120_p7 }
 0x212   : > { %2227 = dma.done.wait (%p2121_p9), %s1592_s10, 32  }
 0x213   : > { %2229 = vsyncadd (%p2121_p9), %s1592_s10, 4294967264  ;;  %s20_s22 = sadd.s32 1, %s2252_s22   ;;  %s3129_s17 = smov %s2236_s18 }
 0x214   : > { %p17_p10 = scmp.ge.s32.totalorder %s20_s22, 4   ;;  %s3130_s18 = smov %s2240_s19 }
 0x215   : > { %s3131_s19 = smov %s2335_s29  ;;  %s3132_s20 = smov %s2248_s21 }
 0x216   : > { %s3133_s21 = smov %s3135_s24  ;;  %19 = sbr.rel (!%p17_p10) target bundleno = 7 (0x7), region = 79 }
 0x21b   :  { %1598 = vsyncpa [#allocation4], 1 }
 0x21c   :  { %1600 = vsyncpa [#allocation4 + $0x1], 1 }

</bundles_post_ra>
